<compile_context>
chip_gen: v5e
topology: v5e:2x2
jax: 0.10.0
libtpu: 0.0.40
codegen_flags: <defaults>
</compile_context>

<pallas_src>
import jax
import jax.numpy as jnp
from jax.experimental import pallas as pl
from jax.experimental.pallas import tpu as pltpu


def _round_up(x, m):
    return -(-x // m) * m


# ----------------------------------------------------------------------------
# Kernels
# ----------------------------------------------------------------------------
def bilstm_kernel(x_ref, wih_ref, whh_ref, b_ref, h0_ref, c0_ref, y_ref,
                  gpre, h_st, c_st):
    """Fused bidirectional LSTM over one batch block (BB rows).

    x_ref:   [L*BB, D]   bf16, time-major within the block (row t*BB + j)
    wih_ref: [D, 8H]     bf16, gate order (i,f,o,g) per direction, [fwd | bwd]
    whh_ref: [2H, 8H]    bf16, block-diagonal (rows 0:H -> fwd cols, H:2H -> bwd)
    b_ref:   [1, 8H]     f32, combined bias (b_ih + b_hh), reordered
    h0/c0:   [BB, 2H]    f32, [fwd | bwd] initial states
    y_ref:   [L*BB, 2H]  f32, y[t*BB+j] = [h_fwd(t) | h_bwd(t)]  (already
                         time-aligned: un-reversal + concat folded into stores)
    gpre:    [L*BB, 8H]  scratch, hoisted input projection (+bias)
    h_st/c_st:[BB, 2H]   f32 scratch recurrent state
    """
    BB = h0_ref.shape[0]
    H = whh_ref.shape[0] // 2
    G4 = 4 * H
    L = y_ref.shape[0] // BB

    # Hoisted input-to-hidden projection: one bf16 MXU matmul for the whole
    # block and both directions; bias folded in, outside the recurrent loop.
    gpre[...] = (jnp.dot(x_ref[...], wih_ref[...],
                         preferred_element_type=jnp.float32)
                 + b_ref[...]).astype(gpre.dtype)

    h_st[...] = h0_ref[...]
    c_st[...] = c0_ref[...]

    def cell(g, c_prev):
        # Gate columns are (i, f, o, g): sigmoid only on [0:3H], tanh on [3H:4H].
        s = jax.nn.sigmoid(g[:, 0:3 * H])
        gg = jnp.tanh(g[:, 3 * H:4 * H])
        i = s[:, 0:H]
        f = s[:, H:2 * H]
        o = s[:, 2 * H:3 * H]
        c = f * c_prev + i * gg
        h = o * jnp.tanh(c)
        return h, c

    @pl.loop(0, L)
    def _(t):
        rf = pl.multiple_of(t * BB, BB)                # fwd rows, input time t
        rb = pl.multiple_of((L - 1 - t) * BB, BB)      # bwd rows, input time L-1-t
        # ONE fused recurrent matmul for BOTH directions (block-diagonal Whh).
        r = jnp.dot(h_st[...].astype(whh_ref.dtype), whh_ref[...],
                    preferred_element_type=jnp.float32)            # [BB, 8H]
        gf = gpre[pl.ds(rf, BB), pl.ds(0, G4)] + r[:, 0:G4]
        gb = gpre[pl.ds(rb, BB), pl.ds(G4, G4)] + r[:, G4:2 * G4]
        h_f, c_f = cell(gf, c_st[:, 0:H])
        h_b, c_b = cell(gb, c_st[:, H:2 * H])
        c_st[:, 0:H] = c_f
        c_st[:, H:2 * H] = c_b
        h_st[:, 0:H] = h_f
        h_st[:, H:2 * H] = h_b
        # Direct slice stores: forward output at time t, backward output at
        # time L-1-t.  No in-loop concat, no post-hoc reverse in the wrapper.
        y_ref[pl.ds(rf, BB), pl.ds(0, H)] = h_f
        y_ref[pl.ds(rb, BB), pl.ds(H, H)] = h_b


def local_inference_kernel(p_ref, h_ref, mp_ref, mh_ref):
    """One batch row per grid step.  No in-kernel transposes: e and e^T both
    come straight from the MXU; concat pieces are written into output slices."""
    p = p_ref[...]                                   # [Lp, 2H]
    h = h_ref[...]                                   # [Lh, 2H]
    D2 = p.shape[-1]

    e = jnp.einsum('pd,hd->ph', p, h, preferred_element_type=jnp.float32)
    eT = jnp.einsum('hd,pd->hp', h, p, preferred_element_type=jnp.float32)

    def softmax_last(x):
        m = jnp.max(x, axis=-1, keepdims=True)
        ex = jnp.exp(x - m)
        return ex * pl.reciprocal(jnp.sum(ex, axis=-1, keepdims=True), approx=True)

    p_score = softmax_last(e)        # torch softmax dim=2
    h_score = softmax_last(eT)       # torch softmax dim=1 (already transposed)
    p_att = jnp.dot(p_score, h, preferred_element_type=jnp.float32)   # [Lp, 2H]
    h_att = jnp.dot(h_score, p, preferred_element_type=jnp.float32)   # [Lh, 2H]

    mp_ref[:, 0 * D2:1 * D2] = p
    mp_ref[:, 1 * D2:2 * D2] = p_att
    mp_ref[:, 2 * D2:3 * D2] = p - p_att
    mp_ref[:, 3 * D2:4 * D2] = p * p_att
    mh_ref[:, 0 * D2:1 * D2] = h
    mh_ref[:, 1 * D2:2 * D2] = h_att
    mh_ref[:, 2 * D2:3 * D2] = h - h_att
    mh_ref[:, 3 * D2:4 * D2] = h * h_att


def pool_output_kernel(vp_ref, vh_ref, w1_ref, b1_ref, w2_ref, b2_ref, o_ref):
    """Fused: mean+max pooling, concat, 2-layer MLP, log_softmax.

    NB: the torch code passes nn.Tanh as the *bias* argument of nn.Linear, so
    there is no tanh -- the output MLP is two plain affine layers.
    """
    def pool(x):                                      # x: [B, L, 2H]
        L = x.shape[1]
        v_ave = jnp.sum(x, axis=1) * (1.0 / L)
        v_max = jnp.max(x, axis=1)
        return jnp.concatenate([v_ave, v_max], axis=-1)   # [B, 4H]

    v = jnp.concatenate([pool(vp_ref[...]), pool(vh_ref[...])], axis=1)   # [B, 8H]
    hid = jnp.dot(v, w1_ref[...], preferred_element_type=jnp.float32) + b1_ref[...]
    logits = jnp.dot(hid, w2_ref[...], preferred_element_type=jnp.float32) + b2_ref[...]
    m = jnp.max(logits, axis=-1, keepdims=True)
    z = logits - m
    lse = jnp.log(jnp.sum(jnp.exp(z), axis=-1, keepdims=True))
    o_ref[...] = z - lse


# ----------------------------------------------------------------------------
# Pallas call wrappers
# ----------------------------------------------------------------------------
def pallas_bilstm(x_bld, wih, whh_block, b, h0, c0):
    """Bidirectional, single-layer, batch_first LSTM -> [B, L, 2H].

    x_bld: [B, L, D] f32; wih: [D, 8H] (gate-reordered, combined);
    whh_block: [2H, 8H] block-diagonal; b: [1, 8H]; h0/c0: [B, 2H] ([fwd|bwd]).
    """
    B, L, D = x_bld.shape
    H = whh_block.shape[0] // 2

    # Pad the batch (sublane) dim to a multiple of 8 and pick a batch block so
    # the grid can be split across TensorCores (v7x megacore).
    Bp = _round_up(B, 8)
    bb = min(Bp, 32)                 # rows per grid step (multiple of 8)
    nb = -(-Bp // bb)
    Bp = nb * bb

    xp = x_bld if Bp == B else jnp.pad(x_bld, ((0, Bp - B), (0, 0), (0, 0)))
    h0p = h0 if Bp == B else jnp.pad(h0, ((0, Bp - B), (0, 0)))
    c0p = c0 if Bp == B else jnp.pad(c0, ((0, Bp - B), (0, 0)))

    # [Bp, L, D] -> [nb, L*bb, D]: block-major batch, time-major within block.
    x_blocks = (xp.reshape(nb, bb, L, D).transpose(0, 2, 1, 3)
                  .reshape(nb, L * bb, D).astype(jnp.bfloat16))
    wih_bf = wih.astype(jnp.bfloat16)
    whh_bf = whh_block.astype(jnp.bfloat16)
    b_f32 = b.astype(jnp.float32)

    # gpre rows are sliced at multiples of bb; use bf16 (halves VMEM, v7x) only
    # when bb is a full bf16 sublane tile so slices stay tile-aligned.
    gpre_dtype = jnp.bfloat16 if bb % 16 == 0 else jnp.float32
    gpre_isz = 2 if gpre_dtype == jnp.bfloat16 else 4

    # Explicit VMEM budget: above v5e's 16 MiB default scoped limit, below
    # v7x's 64 MiB physical.
    est = (2 * L * bb * D * 2 + 2 * L * bb * 2 * H * 4
           + L * bb * 8 * H * gpre_isz
           + 2 * (D * 8 * H * 2 + 2 * H * 8 * H * 2 + 8 * H * 4)
           + 6 * bb * 2 * H * 4)
    vmem_limit = int(min(max(2 * est, 24 * 1024 * 1024), 48 * 1024 * 1024))

    cost = pl.CostEstimate(
        flops=int(2 * Bp * L * (D + 2 * H) * 8 * H),
        transcendentals=int(Bp * L * 10 * H),
        bytes_accessed=int(Bp * L * (D * 2 + 2 * H * 4)
                           + D * 8 * H * 2 + 2 * H * 8 * H * 2),
    )

    y = pl.pallas_call(
        bilstm_kernel,
        out_shape=jax.ShapeDtypeStruct((nb, L * bb, 2 * H), jnp.float32),
        grid=(nb,),
        in_specs=[
            pl.BlockSpec((None, L * bb, D), lambda i: (i, 0, 0)),
            pl.BlockSpec((D, 8 * H), lambda i: (0, 0)),
            pl.BlockSpec((2 * H, 8 * H), lambda i: (0, 0)),
            pl.BlockSpec((1, 8 * H), lambda i: (0, 0)),
            pl.BlockSpec((bb, 2 * H), lambda i: (i, 0)),
            pl.BlockSpec((bb, 2 * H), lambda i: (i, 0)),
        ],
        out_specs=pl.BlockSpec((None, L * bb, 2 * H), lambda i: (i, 0, 0)),
        scratch_shapes=[
            pltpu.VMEM((L * bb, 8 * H), gpre_dtype),    # hoisted input gates
            pltpu.VMEM((bb, 2 * H), jnp.float32),       # h state [fwd | bwd]
            pltpu.VMEM((bb, 2 * H), jnp.float32),       # c state [fwd | bwd]
        ],
        compiler_params=pltpu.CompilerParams(
            dimension_semantics=("parallel",), vmem_limit_bytes=vmem_limit),
        cost_estimate=cost,
    )(x_blocks, wih_bf, whh_bf, b_f32, h0p, c0p)

    # Only a reshape/transpose back to batch-first remains (no reverse/concat).
    y = (y.reshape(nb, L, bb, 2 * H).transpose(0, 2, 1, 3)
          .reshape(Bp, L, 2 * H))
    return y[:B]


def pallas_local_inference(p_enc, h_enc):
    B, Lp, D2 = p_enc.shape
    Lh = h_enc.shape[1]
    return pl.pallas_call(
        local_inference_kernel,
        out_shape=(jax.ShapeDtypeStruct((B, Lp, 4 * D2), jnp.float32),
                   jax.ShapeDtypeStruct((B, Lh, 4 * D2), jnp.float32)),
        grid=(B,),
        in_specs=[pl.BlockSpec((None, Lp, D2), lambda i: (i, 0, 0)),
                  pl.BlockSpec((None, Lh, D2), lambda i: (i, 0, 0))],
        out_specs=(pl.BlockSpec((None, Lp, 4 * D2), lambda i: (i, 0, 0)),
                   pl.BlockSpec((None, Lh, 4 * D2), lambda i: (i, 0, 0))),
        compiler_params=pltpu.CompilerParams(dimension_semantics=("parallel",)),
    )(p_enc, h_enc)


def pallas_pool_output(vp_seq, vh_seq, w1, b1, w2, b2):
    B, L, H2 = vp_seq.shape
    F, Hh = w1.shape
    C = w2.shape[1]
    return pl.pallas_call(
        pool_output_kernel,
        out_shape=jax.ShapeDtypeStruct((B, C), jnp.float32),
        grid=(1,),
        in_specs=[pl.BlockSpec((B, L, H2), lambda i: (0, 0, 0)),
                  pl.BlockSpec((B, L, H2), lambda i: (0, 0, 0)),
                  pl.BlockSpec((F, Hh), lambda i: (0, 0)),
                  pl.BlockSpec((1, Hh), lambda i: (0, 0)),
                  pl.BlockSpec((Hh, C), lambda i: (0, 0)),
                  pl.BlockSpec((1, C), lambda i: (0, 0))],
        out_specs=pl.BlockSpec((B, C), lambda i: (0, 0)),
        compiler_params=pltpu.CompilerParams(dimension_semantics=("arbitrary",)),
    )(vp_seq, vh_seq, w1, b1, w2, b2)


# ----------------------------------------------------------------------------
# Weight repacking helpers (plain JAX glue)
# ----------------------------------------------------------------------------
def _reorder_gates(w):
    """PyTorch gate order (i,f,g,o) -> kernel order (i,f,o,g) along last axis."""
    H = w.shape[-1] // 4
    return jnp.concatenate([w[..., 0:2 * H], w[..., 3 * H:4 * H],
                            w[..., 2 * H:3 * H]], axis=-1)


def _block_diag_whh(whh_f, whh_b):
    """Two [H,4H] recurrent mats -> one [2H,8H] block-diagonal so a single
    MXU matmul covers both directions per timestep."""
    H = whh_f.shape[0]
    z = jnp.zeros((H, 4 * H), whh_f.dtype)
    top = jnp.concatenate([_reorder_gates(whh_f), z], axis=1)
    bot = jnp.concatenate([z, _reorder_gates(whh_b)], axis=1)
    return jnp.concatenate([top, bot], axis=0)


# ----------------------------------------------------------------------------
# Model (forward pass)
# ----------------------------------------------------------------------------
def esim_forward(params, p_tok, h_tok):
    enc = params["enc_lstm"]
    comp = params["comp_lstm"]
    H = enc["whh_f"].shape[0]
    B = p_tok.shape[0]
    Lp, Lh = p_tok.shape[1], h_tok.shape[1]
    same_len = (Lp == Lh)

    # InputEncoder: embedding gather (XLA glue) + fused bidirectional LSTM.
    emb = params["embedding"]
    p_emb = jnp.take(emb, p_tok, axis=0)     # [B, Lp, E]
    h_emb = jnp.take(emb, h_tok, axis=0)     # [B, Lh, E]

    enc_wih = jnp.concatenate([_reorder_gates(enc["wih_f"]),
                               _reorder_gates(enc["wih_b"])], axis=1)   # [E, 8H]
    enc_b = jnp.concatenate([_reorder_gates(enc["b_f"]),
                             _reorder_gates(enc["b_b"])], axis=1)       # [1, 8H]
    enc_whh = _block_diag_whh(enc["whh_f"], enc["whh_b"])               # [2H, 8H]

    # Reference uses torch.rand initial states per encoder call; here a fixed
    # deterministic draw baked into params is reused for both branches.
    h0 = jnp.concatenate([params["enc_h0"][0], params["enc_h0"][1]], axis=-1)
    c0 = jnp.concatenate([params["enc_c0"][0], params["enc_c0"][1]], axis=-1)

    if same_len:
        # Stack premise + hypothesis on the batch axis -> one encoder call.
        x = jnp.concatenate([p_emb, h_emb], axis=0)            # [2B, L, E]
        h0s = jnp.concatenate([h0, h0], axis=0)                # [2B, 2H]
        c0s = jnp.concatenate([c0, c0], axis=0)
        enc_out = pallas_bilstm(x, enc_wih, enc_whh, enc_b, h0s, c0s)
        p_enc, h_enc = enc_out[:B], enc_out[B:]
    else:
        p_enc = pallas_bilstm(p_emb, enc_wih, enc_whh, enc_b, h0, c0)
        h_enc = pallas_bilstm(h_emb, enc_wih, enc_whh, enc_b, h0, c0)

    # LocalInferenceModel (batch-parallel grid).
    m_p, m_h = pallas_local_inference(p_enc, h_enc)            # [B, L, 8H]

    # InferenceCompositionLayer: the Linear(8H->H) is folded exactly into the
    # composition LSTM input projection:
    #   (m @ Wlin + blin) @ Wih + b  ==  m @ (Wlin @ Wih) + (blin @ Wih + b)
    # TODO(synk): dropout layers are identity here (eval semantics).
    comp_wih = jnp.concatenate([_reorder_gates(comp["wih_f"]),
                                _reorder_gates(comp["wih_b"])], axis=1)  # [H, 8H]
    comp_b = jnp.concatenate([_reorder_gates(comp["b_f"]),
                              _reorder_gates(comp["b_b"])], axis=1)      # [1, 8H]
    wih_eff = jnp.dot(params["comp_lin_w"], comp_wih,
                      preferred_element_type=jnp.float32)                # [8H, 8H]
    b_eff = jnp.dot(params["comp_lin_b"], comp_wih,
                    preferred_element_type=jnp.float32) + comp_b         # [1, 8H]
    comp_whh = _block_diag_whh(comp["whh_f"], comp["whh_b"])

    def compose(m):
        zeros = jnp.zeros((m.shape[0], 2 * H), jnp.float32)   # nn.LSTM default h0/c0
        return pallas_bilstm(m, wih_eff, comp_whh, b_eff, zeros, zeros)

    if same_len:
        m_all = jnp.concatenate([m_p, m_h], axis=0)            # [2B, L, 8H]
        comp_out = compose(m_all)                              # [2B, L, 2H]
        v_p_seq, v_h_seq = comp_out[:B], comp_out[B:]
    else:
        v_p_seq, v_h_seq = compose(m_p), compose(m_h)

    # Pooling + concat + OutputLayer + log_softmax, fused in one kernel.
    return pallas_pool_output(v_p_seq, v_h_seq,
                              params["out_w1"], params["out_b1"],
                              params["out_w2"], params["out_b2"])


# ----------------------------------------------------------------------------
# Deterministic parameter init (PyTorch-style layouts, gate order i|f|g|o)
# ----------------------------------------------------------------------------
def init_params(key, vocab, E, H, C, B):
    keys = jax.random.split(key, 24)

    def nrm(k, shape):
        return (jax.random.normal(k, shape, jnp.float32) * 0.1).astype(jnp.float32)

    emb = nrm(keys[0], (vocab, E)).at[0].set(0.0)   # padding_idx = 0

    def lstm_params(k0, k1, k2, k3, k4, k5, in_dim):
        return dict(
            wih_f=nrm(k0, (in_dim, 4 * H)), whh_f=nrm(k1, (H, 4 * H)),
            b_f=nrm(k2, (1, 4 * H)),
            wih_b=nrm(k3, (in_dim, 4 * H)), whh_b=nrm(k4, (H, 4 * H)),
            b_b=nrm(k5, (1, 4 * H)),
        )

    params = dict(
        embedding=emb,
        enc_lstm=lstm_params(*keys[1:7], in_dim=E),
        enc_h0=jax.random.uniform(keys[7], (2, B, H), jnp.float32),
        enc_c0=jax.random.uniform(keys[8], (2, B, H), jnp.float32),
        comp_lin_w=nrm(keys[9], (8 * H, H)),
        comp_lin_b=nrm(keys[10], (1, H)),
        comp_lstm=lstm_params(*keys[11:17], in_dim=H),
        out_w1=nrm(keys[17], (8 * H, H)),
        out_b1=nrm(keys[18], (1, H)),
        out_w2=nrm(keys[19], (H, C)),
        out_b2=nrm(keys[20], (1, C)),
    )
    return params


# ----------------------------------------------------------------------------
if __name__ == "__main__":
    # H=128 keeps 2H a multiple of 128 (lane-dense stores / aligned gate slices).
    B, Lp, Lh = 2, 8, 8
    E, H, C, VOCAB = 128, 128, 3, 50

    key = jax.random.PRNGKey(0)
    k_params, k_p, k_h = jax.random.split(key, 3)

    params = init_params(k_params, VOCAB, E, H, C, B)
    p_tok = jax.random.randint(k_p, (B, Lp), 1, VOCAB, dtype=jnp.int32)
    h_tok = jax.random.randint(k_h, (B, Lh), 1, VOCAB, dtype=jnp.int32)

    fwd = jax.jit(esim_forward)
    out = fwd(params, p_tok, h_tok)   # [B, C] log-probabilities
    jax.block_until_ready(out)
    assert out.shape == (B, C)
    assert bool(jnp.all(jnp.isfinite(out)))
    print("KERNEL_OK")
</pallas_src>

<mosaic_0001>
module attributes {stable_mosaic.version = 11 : i64} {
  func.func @bilstm_kernel(%arg0: i32, %arg1: memref<1x64x128xbf16, #tpu.memory_space<vmem>>, %arg2: memref<128x1024xbf16, #tpu.memory_space<vmem>>, %arg3: memref<256x1024xbf16, #tpu.memory_space<vmem>>, %arg4: memref<1x1024xf32, #tpu.memory_space<vmem>>, %arg5: memref<8x256xf32, #tpu.memory_space<vmem>>, %arg6: memref<8x256xf32, #tpu.memory_space<vmem>>, %arg7: memref<1x64x256xf32, #tpu.memory_space<vmem>>, %arg8: memref<64x1024xf32, #tpu.memory_space<vmem>>, %arg9: memref<8x256xf32, #tpu.memory_space<vmem>>, %arg10: memref<8x256xf32, #tpu.memory_space<vmem>>) attributes {dimension_semantics = [#tpu.dimension_semantics<parallel>], iteration_bounds = array<i64: 1>, scalar_prefetch = 0 : i64, scratch_operands = 3 : i64, tpu.core_type = #tpu.core_type<tc>, window_params = [{transform_indices = @transform_0, window_bounds = array<i64: 1, 64, 128>}, {pipeline_mode = #tpu.pipeline_mode<synchronous>, transform_indices = @transform_1, window_bounds = array<i64: 128, 1024>}, {pipeline_mode = #tpu.pipeline_mode<synchronous>, transform_indices = @transform_2, window_bounds = array<i64: 256, 1024>}, {pipeline_mode = #tpu.pipeline_mode<synchronous>, transform_indices = @transform_3, window_bounds = array<i64: 1, 1024>}, {transform_indices = @transform_4, window_bounds = array<i64: 8, 256>}, {transform_indices = @transform_5, window_bounds = array<i64: 8, 256>}, {transform_indices = @transform_6, window_bounds = array<i64: 1, 64, 256>}]} {
    %c0 = arith.constant 0 : index
    %c0_0 = arith.constant 0 : index
    %c0_1 = arith.constant 0 : index
    %0 = vector.load %arg1[%c0, %c0_0, %c0_1] : memref<1x64x128xbf16, #tpu.memory_space<vmem>>, vector<1x64x128xbf16>
    %1 = vector.shape_cast %0 : vector<1x64x128xbf16> to vector<64x128xbf16>
    %c0_2 = arith.constant 0 : index
    %c0_3 = arith.constant 0 : index
    %2 = vector.load %arg2[%c0_2, %c0_3] : memref<128x1024xbf16, #tpu.memory_space<vmem>>, vector<128x1024xbf16>
    %cst = arith.constant dense<0.000000e+00> : vector<64x1024xf32>
    %3 = tpu.matmul %1, %2, %cst {dimension_numbers = #tpu.dot_dimension_numbers<[1], [0], [0], [1], [0, 0, 1, 1], [], []>} : vector<64x128xbf16>, vector<128x1024xbf16>, vector<64x1024xf32> -> vector<64x1024xf32>
    %c0_4 = arith.constant 0 : index
    %c0_5 = arith.constant 0 : index
    %4 = vector.load %arg4[%c0_4, %c0_5] : memref<1x1024xf32, #tpu.memory_space<vmem>>, vector<1x1024xf32>
    %5 = vector.broadcast %4 : vector<1x1024xf32> to vector<64x1024xf32>
    %6 = arith.addf %3, %5 : vector<64x1024xf32>
    %c0_6 = arith.constant 0 : index
    %c0_7 = arith.constant 0 : index
    %7 = vector.load %arg8[%c0_6, %c0_7] : memref<64x1024xf32, #tpu.memory_space<vmem>>, vector<64x1024xf32>
    tpu.vector_store %arg8[%c0_6, %c0_7], %6 {strides = array<i32>} : memref<64x1024xf32, #tpu.memory_space<vmem>>, vector<64x1024xf32>,
    %c0_8 = arith.constant 0 : index
    %c0_9 = arith.constant 0 : index
    %8 = vector.load %arg5[%c0_8, %c0_9] : memref<8x256xf32, #tpu.memory_space<vmem>>, vector<8x256xf32>
    %c0_10 = arith.constant 0 : index
    %c0_11 = arith.constant 0 : index
    %9 = vector.load %arg9[%c0_10, %c0_11] : memref<8x256xf32, #tpu.memory_space<vmem>>, vector<8x256xf32>
    tpu.vector_store %arg9[%c0_10, %c0_11], %8 {strides = array<i32>} : memref<8x256xf32, #tpu.memory_space<vmem>>, vector<8x256xf32>,
    %c0_12 = arith.constant 0 : index
    %c0_13 = arith.constant 0 : index
    %10 = vector.load %arg6[%c0_12, %c0_13] : memref<8x256xf32, #tpu.memory_space<vmem>>, vector<8x256xf32>
    %c0_14 = arith.constant 0 : index
    %c0_15 = arith.constant 0 : index
    %11 = vector.load %arg10[%c0_14, %c0_15] : memref<8x256xf32, #tpu.memory_space<vmem>>, vector<8x256xf32>
    tpu.vector_store %arg10[%c0_14, %c0_15], %10 {strides = array<i32>} : memref<8x256xf32, #tpu.memory_space<vmem>>, vector<8x256xf32>,
    %c0_i32 = arith.constant 0 : i32
    %c8_i32 = arith.constant 8 : i32
    %12 = arith.addi %c0_i32, %c8_i32 : i32
    %c1_i32 = arith.constant 1 : i32
    scf.for %arg11 = %c0_i32 to %12 step %c1_i32  : i32 {
      %c1_i32_17 = arith.constant 1 : i32
      %13 = arith.muli %arg11, %c1_i32_17 : i32
      %c0_i32_18 = arith.constant 0 : i32
      %14 = arith.addi %c0_i32_18, %13 : i32
      %c8_i32_19 = arith.constant 8 : i32
      %15 = arith.muli %14, %c8_i32_19 : i32
      %16 = tpu.assume_multiple %15, 8 : i32
      %c7_i32 = arith.constant 7 : i32
      %17 = arith.subi %c7_i32, %14 : i32
      %c8_i32_20 = arith.constant 8 : i32
      %18 = arith.muli %17, %c8_i32_20 : i32
      %19 = tpu.assume_multiple %18, 8 : i32
      %c0_21 = arith.constant 0 : index
      %c0_22 = arith.constant 0 : index
      %20 = vector.load %arg9[%c0_21, %c0_22] : memref<8x256xf32, #tpu.memory_space<vmem>>, vector<8x256xf32>
      %21 = arith.truncf %20 : vector<8x256xf32> to vector<8x256xbf16>
      %c0_23 = arith.constant 0 : index
      %c0_24 = arith.constant 0 : index
      %22 = vector.load %arg3[%c0_23, %c0_24] : memref<256x1024xbf16, #tpu.memory_space<vmem>>, vector<256x1024xbf16>
      %cst_25 = arith.constant dense<0.000000e+00> : vector<8x1024xf32>
      %23 = tpu.matmul %21, %22, %cst_25 {dimension_numbers = #tpu.dot_dimension_numbers<[1], [0], [0], [1], [0, 0, 1, 1], [], []>} : vector<8x256xbf16>, vector<256x1024xbf16>, vector<8x1024xf32> -> vector<8x1024xf32>
      %24 = arith.index_cast %16 : i32 to index
      %c0_26 = arith.constant 0 : index
      %25 = vector.load %arg8[%24, %c0_26] : memref<64x1024xf32, #tpu.memory_space<vmem>>, vector<8x512xf32>
      %26 = vector.extract_strided_slice %23 {offsets = [0, 0], sizes = [8, 512], strides = [1, 1]} : vector<8x1024xf32> to vector<8x512xf32>
      %27 = arith.addf %25, %26 : vector<8x512xf32>
      %28 = arith.index_cast %19 : i32 to index
      %c512 = arith.constant 512 : index
      %29 = vector.load %arg8[%28, %c512] : memref<64x1024xf32, #tpu.memory_space<vmem>>, vector<8x512xf32>
      %30 = vector.extract_strided_slice %23 {offsets = [0, 512], sizes = [8, 512], strides = [1, 1]} : vector<8x1024xf32> to vector<8x512xf32>
      %31 = arith.addf %29, %30 : vector<8x512xf32>
      %c0_27 = arith.constant 0 : index
      %c0_28 = arith.constant 0 : index
      %32 = vector.load %arg10[%c0_27, %c0_28] : memref<8x256xf32, #tpu.memory_space<vmem>>, vector<8x128xf32>
      %33 = vector.extract_strided_slice %27 {offsets = [0, 0], sizes = [8, 384], strides = [1, 1]} : vector<8x512xf32> to vector<8x384xf32>
      %34 = arith.negf %33 : vector<8x384xf32>
      %35 = math.exp %34 : vector<8x384xf32>
      %cst_29 = arith.constant 1.000000e+00 : f32
      %36 = vector.broadcast %cst_29 : f32 to vector<8x384xf32>
      %37 = arith.addf %36, %35 : vector<8x384xf32>
      %38 = arith.divf %36, %37 : vector<8x384xf32>
      %39 = vector.extract_strided_slice %27 {offsets = [0, 384], sizes = [8, 128], strides = [1, 1]} : vector<8x512xf32> to vector<8x128xf32>
      %40 = math.tanh %39 : vector<8x128xf32>
      %41 = vector.extract_strided_slice %38 {offsets = [0, 0], sizes = [8, 128], strides = [1, 1]} : vector<8x384xf32> to vector<8x128xf32>
      %42 = vector.extract_strided_slice %38 {offsets = [0, 128], sizes = [8, 128], strides = [1, 1]} : vector<8x384xf32> to vector<8x128xf32>
      %43 = vector.extract_strided_slice %38 {offsets = [0, 256], sizes = [8, 128], strides = [1, 1]} : vector<8x384xf32> to vector<8x128xf32>
      %44 = arith.mulf %42, %32 : vector<8x128xf32>
      %45 = arith.mulf %41, %40 : vector<8x128xf32>
      %46 = arith.addf %44, %45 : vector<8x128xf32>
      %47 = math.tanh %46 : vector<8x128xf32>
      %48 = arith.mulf %43, %47 : vector<8x128xf32>
      %c0_30 = arith.constant 0 : index
      %c128 = arith.constant 128 : index
      %49 = vector.load %arg10[%c0_30, %c128] : memref<8x256xf32, #tpu.memory_space<vmem>>, vector<8x128xf32>
      %50 = vector.extract_strided_slice %31 {offsets = [0, 0], sizes = [8, 384], strides = [1, 1]} : vector<8x512xf32> to vector<8x384xf32>
      %51 = arith.negf %50 : vector<8x384xf32>
      %52 = math.exp %51 : vector<8x384xf32>
      %cst_31 = arith.constant 1.000000e+00 : f32
      %53 = vector.broadcast %cst_31 : f32 to vector<8x384xf32>
      %54 = arith.addf %53, %52 : vector<8x384xf32>
      %55 = arith.divf %53, %54 : vector<8x384xf32>
      %56 = vector.extract_strided_slice %31 {offsets = [0, 384], sizes = [8, 128], strides = [1, 1]} : vector<8x512xf32> to vector<8x128xf32>
      %57 = math.tanh %56 : vector<8x128xf32>
      %58 = vector.extract_strided_slice %55 {offsets = [0, 0], sizes = [8, 128], strides = [1, 1]} : vector<8x384xf32> to vector<8x128xf32>
      %59 = vector.extract_strided_slice %55 {offsets = [0, 128], sizes = [8, 128], strides = [1, 1]} : vector<8x384xf32> to vector<8x128xf32>
      %60 = vector.extract_strided_slice %55 {offsets = [0, 256], sizes = [8, 128], strides = [1, 1]} : vector<8x384xf32> to vector<8x128xf32>
      %61 = arith.mulf %59, %49 : vector<8x128xf32>
      %62 = arith.mulf %58, %57 : vector<8x128xf32>
      %63 = arith.addf %61, %62 : vector<8x128xf32>
      %64 = math.tanh %63 : vector<8x128xf32>
      %65 = arith.mulf %60, %64 : vector<8x128xf32>
      %c0_32 = arith.constant 0 : index
      %c0_33 = arith.constant 0 : index
      %66 = vector.load %arg10[%c0_32, %c0_33] : memref<8x256xf32, #tpu.memory_space<vmem>>, vector<8x128xf32>
      tpu.vector_store %arg10[%c0_32, %c0_33], %46 {strides = array<i32>} : memref<8x256xf32, #tpu.memory_space<vmem>>, vector<8x128xf32>,
      %c0_34 = arith.constant 0 : index
      %c128_35 = arith.constant 128 : index
      %67 = vector.load %arg10[%c0_34, %c128_35] : memref<8x256xf32, #tpu.memory_space<vmem>>, vector<8x128xf32>
      tpu.vector_store %arg10[%c0_34, %c128_35], %63 {strides = array<i32>} : memref<8x256xf32, #tpu.memory_space<vmem>>, vector<8x128xf32>,
      %c0_36 = arith.constant 0 : index
      %c0_37 = arith.constant 0 : index
      %68 = vector.load %arg9[%c0_36, %c0_37] : memref<8x256xf32, #tpu.memory_space<vmem>>, vector<8x128xf32>
      tpu.vector_store %arg9[%c0_36, %c0_37], %48 {strides = array<i32>} : memref<8x256xf32, #tpu.memory_space<vmem>>, vector<8x128xf32>,
      %c0_38 = arith.constant 0 : index
      %c128_39 = arith.constant 128 : index
      %69 = vector.load %arg9[%c0_38, %c128_39] : memref<8x256xf32, #tpu.memory_space<vmem>>, vector<8x128xf32>
      tpu.vector_store %arg9[%c0_38, %c128_39], %65 {strides = array<i32>} : memref<8x256xf32, #tpu.memory_space<vmem>>, vector<8x128xf32>,
      %c0_40 = arith.constant 0 : index
      %70 = arith.index_cast %16 : i32 to index
      %c0_41 = arith.constant 0 : index
      %71 = vector.load %arg7[%c0_40, %70, %c0_41] : memref<1x64x256xf32, #tpu.memory_space<vmem>>, vector<1x8x128xf32>
      %72 = vector.shape_cast %71 : vector<1x8x128xf32> to vector<8x128xf32>
      %73 = vector.shape_cast %48 : vector<8x128xf32> to vector<1x8x128xf32>
      tpu.vector_store %arg7[%c0_40, %70, %c0_41], %73 {strides = array<i32>} : memref<1x64x256xf32, #tpu.memory_space<vmem>>, vector<1x8x128xf32>,
      %c0_42 = arith.constant 0 : index
      %74 = arith.index_cast %19 : i32 to index
      %c128_43 = arith.constant 128 : index
      %75 = vector.load %arg7[%c0_42, %74, %c128_43] : memref<1x64x256xf32, #tpu.memory_space<vmem>>, vector<1x8x128xf32>
      %76 = vector.shape_cast %75 : vector<1x8x128xf32> to vector<8x128xf32>
      %77 = vector.shape_cast %65 : vector<8x128xf32> to vector<1x8x128xf32>
      tpu.vector_store %arg7[%c0_42, %74, %c128_43], %77 {strides = array<i32>} : memref<1x64x256xf32, #tpu.memory_space<vmem>>, vector<1x8x128xf32>,
    }
    %c8_i32_16 = arith.constant 8 : i32
    return
  }
  func.func @transform_0(%arg0: i32) -> (i32, i32, i32) {
    %c0_i32 = arith.constant 0 : i32
    %c0_i32_0 = arith.constant 0 : i32
    %c0_i32_1 = arith.constant 0 : i32
    return %arg0, %c0_i32, %c0_i32_0 : i32, i32, i32
  }
  func.func @transform_1(%arg0: i32) -> (i32, i32) {
    %c0_i32 = arith.constant 0 : i32
    %c0_i32_0 = arith.constant 0 : i32
    %c0_i32_1 = arith.constant 0 : i32
    return %c0_i32, %c0_i32_0 : i32, i32
  }
  func.func @transform_2(%arg0: i32) -> (i32, i32) {
    %c0_i32 = arith.constant 0 : i32
    %c0_i32_0 = arith.constant 0 : i32
    %c0_i32_1 = arith.constant 0 : i32
    return %c0_i32, %c0_i32_0 : i32, i32
  }
  func.func @transform_3(%arg0: i32) -> (i32, i32) {
    %c0_i32 = arith.constant 0 : i32
    %c0_i32_0 = arith.constant 0 : i32
    %c0_i32_1 = arith.constant 0 : i32
    return %c0_i32, %c0_i32_0 : i32, i32
  }
  func.func @transform_4(%arg0: i32) -> (i32, i32) {
    %c0_i32 = arith.constant 0 : i32
    %c0_i32_0 = arith.constant 0 : i32
    return %arg0, %c0_i32 : i32, i32
  }
  func.func @transform_5(%arg0: i32) -> (i32, i32) {
    %c0_i32 = arith.constant 0 : i32
    %c0_i32_0 = arith.constant 0 : i32
    return %arg0, %c0_i32 : i32, i32
  }
  func.func @transform_6(%arg0: i32) -> (i32, i32, i32) {
    %c0_i32 = arith.constant 0 : i32
    %c0_i32_0 = arith.constant 0 : i32
    %c0_i32_1 = arith.constant 0 : i32
    return %arg0, %c0_i32, %c0_i32_0 : i32, i32, i32
  }
}

module attributes {stable_mosaic.version = 11 : i64} {
  func.func @local_inference_kernel(%arg0: i32, %arg1: memref<1x8x256xf32, #tpu.memory_space<vmem>>, %arg2: memref<1x8x256xf32, #tpu.memory_space<vmem>>, %arg3: memref<1x8x1024xf32, #tpu.memory_space<vmem>>, %arg4: memref<1x8x1024xf32, #tpu.memory_space<vmem>>) attributes {dimension_semantics = [#tpu.dimension_semantics<parallel>], iteration_bounds = array<i64: 2>, scalar_prefetch = 0 : i64, scratch_operands = 0 : i64, tpu.core_type = #tpu.core_type<tc>, window_params = [{transform_indices = @transform_0, window_bounds = array<i64: 1, 8, 256>}, {transform_indices = @transform_1, window_bounds = array<i64: 1, 8, 256>}, {transform_indices = @transform_2, window_bounds = array<i64: 1, 8, 1024>}, {transform_indices = @transform_3, window_bounds = array<i64: 1, 8, 1024>}]} {
    %c0 = arith.constant 0 : index
    %c0_0 = arith.constant 0 : index
    %c0_1 = arith.constant 0 : index
    %0 = vector.load %arg1[%c0, %c0_0, %c0_1] : memref<1x8x256xf32, #tpu.memory_space<vmem>>, vector<1x8x256xf32>
    %1 = vector.shape_cast %0 : vector<1x8x256xf32> to vector<8x256xf32>
    %c0_2 = arith.constant 0 : index
    %c0_3 = arith.constant 0 : index
    %c0_4 = arith.constant 0 : index
    %2 = vector.load %arg2[%c0_2, %c0_3, %c0_4] : memref<1x8x256xf32, #tpu.memory_space<vmem>>, vector<1x8x256xf32>
    %3 = vector.shape_cast %2 : vector<1x8x256xf32> to vector<8x256xf32>
    "tpu.trace_start"() <{level = 10 : i32, message = "pd,hd->ph"}> : () -> ()
    %cst = arith.constant dense<0.000000e+00> : vector<8x8xf32>
    %4 = tpu.matmul %1, %3, %cst {dimension_numbers = #tpu.dot_dimension_numbers<[1], [1], [0], [0], [0, 0, 1, 0], [], []>} : vector<8x256xf32>, vector<8x256xf32>, vector<8x8xf32> -> vector<8x8xf32>
    "tpu.trace_stop"() : () -> ()
    "tpu.trace_start"() <{level = 10 : i32, message = "hd,pd->hp"}> : () -> ()
    %cst_5 = arith.constant dense<0.000000e+00> : vector<8x8xf32>
    %5 = tpu.matmul %3, %1, %cst_5 {dimension_numbers = #tpu.dot_dimension_numbers<[1], [1], [0], [0], [0, 0, 1, 0], [], []>} : vector<8x256xf32>, vector<8x256xf32>, vector<8x8xf32> -> vector<8x8xf32>
    "tpu.trace_stop"() : () -> ()
    %cst_6 = arith.constant dense<0xFF800000> : vector<8xf32>
    %6 = vector.multi_reduction <maximumf>, %4, %cst_6 [1] : vector<8x8xf32> to vector<8xf32>
    %7 = vector.shape_cast %6 : vector<8xf32> to vector<8x1xf32>
    %8 = vector.broadcast %7 : vector<8x1xf32> to vector<8x8xf32>
    %9 = arith.subf %4, %8 : vector<8x8xf32>
    %10 = math.exp %9 : vector<8x8xf32>
    %cst_7 = arith.constant dense<0.000000e+00> : vector<8xf32>
    %11 = vector.multi_reduction <add>, %10, %cst_7 [1] : vector<8x8xf32> to vector<8xf32>
    %12 = vector.shape_cast %11 : vector<8xf32> to vector<8x1xf32>
    %13 = tpu.reciprocal %12 {approx = true} : vector<8x1xf32> -> vector<8x1xf32>
    %14 = vector.broadcast %13 : vector<8x1xf32> to vector<8x8xf32>
    %15 = arith.mulf %10, %14 : vector<8x8xf32>
    %cst_8 = arith.constant dense<0xFF800000> : vector<8xf32>
    %16 = vector.multi_reduction <maximumf>, %5, %cst_8 [1] : vector<8x8xf32> to vector<8xf32>
    %17 = vector.shape_cast %16 : vector<8xf32> to vector<8x1xf32>
    %18 = vector.broadcast %17 : vector<8x1xf32> to vector<8x8xf32>
    %19 = arith.subf %5, %18 : vector<8x8xf32>
    %20 = math.exp %19 : vector<8x8xf32>
    %cst_9 = arith.constant dense<0.000000e+00> : vector<8xf32>
    %21 = vector.multi_reduction <add>, %20, %cst_9 [1] : vector<8x8xf32> to vector<8xf32>
    %22 = vector.shape_cast %21 : vector<8xf32> to vector<8x1xf32>
    %23 = tpu.reciprocal %22 {approx = true} : vector<8x1xf32> -> vector<8x1xf32>
    %24 = vector.broadcast %23 : vector<8x1xf32> to vector<8x8xf32>
    %25 = arith.mulf %20, %24 : vector<8x8xf32>
    %cst_10 = arith.constant dense<0.000000e+00> : vector<8x256xf32>
    %26 = tpu.matmul %15, %3, %cst_10 {dimension_numbers = #tpu.dot_dimension_numbers<[1], [0], [0], [1], [0, 0, 1, 1], [], []>} : vector<8x8xf32>, vector<8x256xf32>, vector<8x256xf32> -> vector<8x256xf32>
    %cst_11 = arith.constant dense<0.000000e+00> : vector<8x256xf32>
    %27 = tpu.matmul %25, %1, %cst_11 {dimension_numbers = #tpu.dot_dimension_numbers<[1], [0], [0], [1], [0, 0, 1, 1], [], []>} : vector<8x8xf32>, vector<8x256xf32>, vector<8x256xf32> -> vector<8x256xf32>
    %c0_12 = arith.constant 0 : index
    %c0_13 = arith.constant 0 : index
    %c0_14 = arith.constant 0 : index
    %28 = vector.load %arg3[%c0_12, %c0_13, %c0_14] : memref<1x8x1024xf32, #tpu.memory_space<vmem>>, vector<1x8x256xf32>
    %29 = vector.shape_cast %28 : vector<1x8x256xf32> to vector<8x256xf32>
    %30 = vector.shape_cast %1 : vector<8x256xf32> to vector<1x8x256xf32>
    tpu.vector_store %arg3[%c0_12, %c0_13, %c0_14], %30 {strides = array<i32>} : memref<1x8x1024xf32, #tpu.memory_space<vmem>>, vector<1x8x256xf32>,
    %c0_15 = arith.constant 0 : index
    %c0_16 = arith.constant 0 : index
    %c256 = arith.constant 256 : index
    %31 = vector.load %arg3[%c0_15, %c0_16, %c256] : memref<1x8x1024xf32, #tpu.memory_space<vmem>>, vector<1x8x256xf32>
    %32 = vector.shape_cast %31 : vector<1x8x256xf32> to vector<8x256xf32>
    %33 = vector.shape_cast %26 : vector<8x256xf32> to vector<1x8x256xf32>
    tpu.vector_store %arg3[%c0_15, %c0_16, %c256], %33 {strides = array<i32>} : memref<1x8x1024xf32, #tpu.memory_space<vmem>>, vector<1x8x256xf32>,
    %34 = arith.subf %1, %26 : vector<8x256xf32>
    %c0_17 = arith.constant 0 : index
    %c0_18 = arith.constant 0 : index
    %c512 = arith.constant 512 : index
    %35 = vector.load %arg3[%c0_17, %c0_18, %c512] : memref<1x8x1024xf32, #tpu.memory_space<vmem>>, vector<1x8x256xf32>
    %36 = vector.shape_cast %35 : vector<1x8x256xf32> to vector<8x256xf32>
    %37 = vector.shape_cast %34 : vector<8x256xf32> to vector<1x8x256xf32>
    tpu.vector_store %arg3[%c0_17, %c0_18, %c512], %37 {strides = array<i32>} : memref<1x8x1024xf32, #tpu.memory_space<vmem>>, vector<1x8x256xf32>,
    %38 = arith.mulf %1, %26 : vector<8x256xf32>
    %c0_19 = arith.constant 0 : index
    %c0_20 = arith.constant 0 : index
    %c768 = arith.constant 768 : index
    %39 = vector.load %arg3[%c0_19, %c0_20, %c768] : memref<1x8x1024xf32, #tpu.memory_space<vmem>>, vector<1x8x256xf32>
    %40 = vector.shape_cast %39 : vector<1x8x256xf32> to vector<8x256xf32>
    %41 = vector.shape_cast %38 : vector<8x256xf32> to vector<1x8x256xf32>
    tpu.vector_store %arg3[%c0_19, %c0_20, %c768], %41 {strides = array<i32>} : memref<1x8x1024xf32, #tpu.memory_space<vmem>>, vector<1x8x256xf32>,
    %c0_21 = arith.constant 0 : index
    %c0_22 = arith.constant 0 : index
    %c0_23 = arith.constant 0 : index
    %42 = vector.load %arg4[%c0_21, %c0_22, %c0_23] : memref<1x8x1024xf32, #tpu.memory_space<vmem>>, vector<1x8x256xf32>
    %43 = vector.shape_cast %42 : vector<1x8x256xf32> to vector<8x256xf32>
    %44 = vector.shape_cast %3 : vector<8x256xf32> to vector<1x8x256xf32>
    tpu.vector_store %arg4[%c0_21, %c0_22, %c0_23], %44 {strides = array<i32>} : memref<1x8x1024xf32, #tpu.memory_space<vmem>>, vector<1x8x256xf32>,
    %c0_24 = arith.constant 0 : index
    %c0_25 = arith.constant 0 : index
    %c256_26 = arith.constant 256 : index
    %45 = vector.load %arg4[%c0_24, %c0_25, %c256_26] : memref<1x8x1024xf32, #tpu.memory_space<vmem>>, vector<1x8x256xf32>
    %46 = vector.shape_cast %45 : vector<1x8x256xf32> to vector<8x256xf32>
    %47 = vector.shape_cast %27 : vector<8x256xf32> to vector<1x8x256xf32>
    tpu.vector_store %arg4[%c0_24, %c0_25, %c256_26], %47 {strides = array<i32>} : memref<1x8x1024xf32, #tpu.memory_space<vmem>>, vector<1x8x256xf32>,
    %48 = arith.subf %3, %27 : vector<8x256xf32>
    %c0_27 = arith.constant 0 : index
    %c0_28 = arith.constant 0 : index
    %c512_29 = arith.constant 512 : index
    %49 = vector.load %arg4[%c0_27, %c0_28, %c512_29] : memref<1x8x1024xf32, #tpu.memory_space<vmem>>, vector<1x8x256xf32>
    %50 = vector.shape_cast %49 : vector<1x8x256xf32> to vector<8x256xf32>
    %51 = vector.shape_cast %48 : vector<8x256xf32> to vector<1x8x256xf32>
    tpu.vector_store %arg4[%c0_27, %c0_28, %c512_29], %51 {strides = array<i32>} : memref<1x8x1024xf32, #tpu.memory_space<vmem>>, vector<1x8x256xf32>,
    %52 = arith.mulf %3, %27 : vector<8x256xf32>
    %c0_30 = arith.constant 0 : index
    %c0_31 = arith.constant 0 : index
    %c768_32 = arith.constant 768 : index
    %53 = vector.load %arg4[%c0_30, %c0_31, %c768_32] : memref<1x8x1024xf32, #tpu.memory_space<vmem>>, vector<1x8x256xf32>
    %54 = vector.shape_cast %53 : vector<1x8x256xf32> to vector<8x256xf32>
    %55 = vector.shape_cast %52 : vector<8x256xf32> to vector<1x8x256xf32>
    tpu.vector_store %arg4[%c0_30, %c0_31, %c768_32], %55 {strides = array<i32>} : memref<1x8x1024xf32, #tpu.memory_space<vmem>>, vector<1x8x256xf32>,
    return
  }
  func.func @transform_0(%arg0: i32) -> (i32, i32, i32) {
    %c0_i32 = arith.constant 0 : i32
    %c0_i32_0 = arith.constant 0 : i32
    %c0_i32_1 = arith.constant 0 : i32
    return %arg0, %c0_i32, %c0_i32_0 : i32, i32, i32
  }
  func.func @transform_1(%arg0: i32) -> (i32, i32, i32) {
    %c0_i32 = arith.constant 0 : i32
    %c0_i32_0 = arith.constant 0 : i32
    %c0_i32_1 = arith.constant 0 : i32
    return %arg0, %c0_i32, %c0_i32_0 : i32, i32, i32
  }
  func.func @transform_2(%arg0: i32) -> (i32, i32, i32) {
    %c0_i32 = arith.constant 0 : i32
    %c0_i32_0 = arith.constant 0 : i32
    %c0_i32_1 = arith.constant 0 : i32
    return %arg0, %c0_i32, %c0_i32_0 : i32, i32, i32
  }
  func.func @transform_3(%arg0: i32) -> (i32, i32, i32) {
    %c0_i32 = arith.constant 0 : i32
    %c0_i32_0 = arith.constant 0 : i32
    %c0_i32_1 = arith.constant 0 : i32
    return %arg0, %c0_i32, %c0_i32_0 : i32, i32, i32
  }
}

module attributes {stable_mosaic.version = 11 : i64} {
  func.func @bilstm_kernel(%arg0: i32, %arg1: memref<1x64x1024xbf16, #tpu.memory_space<vmem>>, %arg2: memref<1024x1024xbf16, #tpu.memory_space<vmem>>, %arg3: memref<256x1024xbf16, #tpu.memory_space<vmem>>, %arg4: memref<1x1024xf32, #tpu.memory_space<vmem>>, %arg5: memref<8x256xf32, #tpu.memory_space<vmem>>, %arg6: memref<8x256xf32, #tpu.memory_space<vmem>>, %arg7: memref<1x64x256xf32, #tpu.memory_space<vmem>>, %arg8: memref<64x1024xf32, #tpu.memory_space<vmem>>, %arg9: memref<8x256xf32, #tpu.memory_space<vmem>>, %arg10: memref<8x256xf32, #tpu.memory_space<vmem>>) attributes {dimension_semantics = [#tpu.dimension_semantics<parallel>], iteration_bounds = array<i64: 1>, scalar_prefetch = 0 : i64, scratch_operands = 3 : i64, tpu.core_type = #tpu.core_type<tc>, window_params = [{transform_indices = @transform_0, window_bounds = array<i64: 1, 64, 1024>}, {pipeline_mode = #tpu.pipeline_mode<synchronous>, transform_indices = @transform_1, window_bounds = array<i64: 1024, 1024>}, {pipeline_mode = #tpu.pipeline_mode<synchronous>, transform_indices = @transform_2, window_bounds = array<i64: 256, 1024>}, {pipeline_mode = #tpu.pipeline_mode<synchronous>, transform_indices = @transform_3, window_bounds = array<i64: 1, 1024>}, {transform_indices = @transform_4, window_bounds = array<i64: 8, 256>}, {transform_indices = @transform_5, window_bounds = array<i64: 8, 256>}, {transform_indices = @transform_6, window_bounds = array<i64: 1, 64, 256>}]} {
    %c0 = arith.constant 0 : index
    %c0_0 = arith.constant 0 : index
    %c0_1 = arith.constant 0 : index
    %0 = vector.load %arg1[%c0, %c0_0, %c0_1] : memref<1x64x1024xbf16, #tpu.memory_space<vmem>>, vector<1x64x1024xbf16>
    %1 = vector.shape_cast %0 : vector<1x64x1024xbf16> to vector<64x1024xbf16>
    %c0_2 = arith.constant 0 : index
    %c0_3 = arith.constant 0 : index
    %2 = vector.load %arg2[%c0_2, %c0_3] : memref<1024x1024xbf16, #tpu.memory_space<vmem>>, vector<1024x1024xbf16>
    %cst = arith.constant dense<0.000000e+00> : vector<64x1024xf32>
    %3 = tpu.matmul %1, %2, %cst {dimension_numbers = #tpu.dot_dimension_numbers<[1], [0], [0], [1], [0, 0, 1, 1], [], []>} : vector<64x1024xbf16>, vector<1024x1024xbf16>, vector<64x1024xf32> -> vector<64x1024xf32>
    %c0_4 = arith.constant 0 : index
    %c0_5 = arith.constant 0 : index
    %4 = vector.load %arg4[%c0_4, %c0_5] : memref<1x1024xf32, #tpu.memory_space<vmem>>, vector<1x1024xf32>
    %5 = vector.broadcast %4 : vector<1x1024xf32> to vector<64x1024xf32>
    %6 = arith.addf %3, %5 : vector<64x1024xf32>
    %c0_6 = arith.constant 0 : index
    %c0_7 = arith.constant 0 : index
    %7 = vector.load %arg8[%c0_6, %c0_7] : memref<64x1024xf32, #tpu.memory_space<vmem>>, vector<64x1024xf32>
    tpu.vector_store %arg8[%c0_6, %c0_7], %6 {strides = array<i32>} : memref<64x1024xf32, #tpu.memory_space<vmem>>, vector<64x1024xf32>,
    %c0_8 = arith.constant 0 : index
    %c0_9 = arith.constant 0 : index
    %8 = vector.load %arg5[%c0_8, %c0_9] : memref<8x256xf32, #tpu.memory_space<vmem>>, vector<8x256xf32>
    %c0_10 = arith.constant 0 : index
    %c0_11 = arith.constant 0 : index
    %9 = vector.load %arg9[%c0_10, %c0_11] : memref<8x256xf32, #tpu.memory_space<vmem>>, vector<8x256xf32>
    tpu.vector_store %arg9[%c0_10, %c0_11], %8 {strides = array<i32>} : memref<8x256xf32, #tpu.memory_space<vmem>>, vector<8x256xf32>,
    %c0_12 = arith.constant 0 : index
    %c0_13 = arith.constant 0 : index
    %10 = vector.load %arg6[%c0_12, %c0_13] : memref<8x256xf32, #tpu.memory_space<vmem>>, vector<8x256xf32>
    %c0_14 = arith.constant 0 : index
    %c0_15 = arith.constant 0 : index
    %11 = vector.load %arg10[%c0_14, %c0_15] : memref<8x256xf32, #tpu.memory_space<vmem>>, vector<8x256xf32>
    tpu.vector_store %arg10[%c0_14, %c0_15], %10 {strides = array<i32>} : memref<8x256xf32, #tpu.memory_space<vmem>>, vector<8x256xf32>,
    %c0_i32 = arith.constant 0 : i32
    %c8_i32 = arith.constant 8 : i32
    %12 = arith.addi %c0_i32, %c8_i32 : i32
    %c1_i32 = arith.constant 1 : i32
    scf.for %arg11 = %c0_i32 to %12 step %c1_i32  : i32 {
      %c1_i32_17 = arith.constant 1 : i32
      %13 = arith.muli %arg11, %c1_i32_17 : i32
      %c0_i32_18 = arith.constant 0 : i32
      %14 = arith.addi %c0_i32_18, %13 : i32
      %c8_i32_19 = arith.constant 8 : i32
      %15 = arith.muli %14, %c8_i32_19 : i32
      %16 = tpu.assume_multiple %15, 8 : i32
      %c7_i32 = arith.constant 7 : i32
      %17 = arith.subi %c7_i32, %14 : i32
      %c8_i32_20 = arith.constant 8 : i32
      %18 = arith.muli %17, %c8_i32_20 : i32
      %19 = tpu.assume_multiple %18, 8 : i32
      %c0_21 = arith.constant 0 : index
      %c0_22 = arith.constant 0 : index
      %20 = vector.load %arg9[%c0_21, %c0_22] : memref<8x256xf32, #tpu.memory_space<vmem>>, vector<8x256xf32>
      %21 = arith.truncf %20 : vector<8x256xf32> to vector<8x256xbf16>
      %c0_23 = arith.constant 0 : index
      %c0_24 = arith.constant 0 : index
      %22 = vector.load %arg3[%c0_23, %c0_24] : memref<256x1024xbf16, #tpu.memory_space<vmem>>, vector<256x1024xbf16>
      %cst_25 = arith.constant dense<0.000000e+00> : vector<8x1024xf32>
      %23 = tpu.matmul %21, %22, %cst_25 {dimension_numbers = #tpu.dot_dimension_numbers<[1], [0], [0], [1], [0, 0, 1, 1], [], []>} : vector<8x256xbf16>, vector<256x1024xbf16>, vector<8x1024xf32> -> vector<8x1024xf32>
      %24 = arith.index_cast %16 : i32 to index
      %c0_26 = arith.constant 0 : index
      %25 = vector.load %arg8[%24, %c0_26] : memref<64x1024xf32, #tpu.memory_space<vmem>>, vector<8x512xf32>
      %26 = vector.extract_strided_slice %23 {offsets = [0, 0], sizes = [8, 512], strides = [1, 1]} : vector<8x1024xf32> to vector<8x512xf32>
      %27 = arith.addf %25, %26 : vector<8x512xf32>
      %28 = arith.index_cast %19 : i32 to index
      %c512 = arith.constant 512 : index
      %29 = vector.load %arg8[%28, %c512] : memref<64x1024xf32, #tpu.memory_space<vmem>>, vector<8x512xf32>
      %30 = vector.extract_strided_slice %23 {offsets = [0, 512], sizes = [8, 512], strides = [1, 1]} : vector<8x1024xf32> to vector<8x512xf32>
      %31 = arith.addf %29, %30 : vector<8x512xf32>
      %c0_27 = arith.constant 0 : index
      %c0_28 = arith.constant 0 : index
      %32 = vector.load %arg10[%c0_27, %c0_28] : memref<8x256xf32, #tpu.memory_space<vmem>>, vector<8x128xf32>
      %33 = vector.extract_strided_slice %27 {offsets = [0, 0], sizes = [8, 384], strides = [1, 1]} : vector<8x512xf32> to vector<8x384xf32>
      %34 = arith.negf %33 : vector<8x384xf32>
      %35 = math.exp %34 : vector<8x384xf32>
      %cst_29 = arith.constant 1.000000e+00 : f32
      %36 = vector.broadcast %cst_29 : f32 to vector<8x384xf32>
      %37 = arith.addf %36, %35 : vector<8x384xf32>
      %38 = arith.divf %36, %37 : vector<8x384xf32>
      %39 = vector.extract_strided_slice %27 {offsets = [0, 384], sizes = [8, 128], strides = [1, 1]} : vector<8x512xf32> to vector<8x128xf32>
      %40 = math.tanh %39 : vector<8x128xf32>
      %41 = vector.extract_strided_slice %38 {offsets = [0, 0], sizes = [8, 128], strides = [1, 1]} : vector<8x384xf32> to vector<8x128xf32>
      %42 = vector.extract_strided_slice %38 {offsets = [0, 128], sizes = [8, 128], strides = [1, 1]} : vector<8x384xf32> to vector<8x128xf32>
      %43 = vector.extract_strided_slice %38 {offsets = [0, 256], sizes = [8, 128], strides = [1, 1]} : vector<8x384xf32> to vector<8x128xf32>
      %44 = arith.mulf %42, %32 : vector<8x128xf32>
      %45 = arith.mulf %41, %40 : vector<8x128xf32>
      %46 = arith.addf %44, %45 : vector<8x128xf32>
      %47 = math.tanh %46 : vector<8x128xf32>
      %48 = arith.mulf %43, %47 : vector<8x128xf32>
      %c0_30 = arith.constant 0 : index
      %c128 = arith.constant 128 : index
      %49 = vector.load %arg10[%c0_30, %c128] : memref<8x256xf32, #tpu.memory_space<vmem>>, vector<8x128xf32>
      %50 = vector.extract_strided_slice %31 {offsets = [0, 0], sizes = [8, 384], strides = [1, 1]} : vector<8x512xf32> to vector<8x384xf32>
      %51 = arith.negf %50 : vector<8x384xf32>
      %52 = math.exp %51 : vector<8x384xf32>
      %cst_31 = arith.constant 1.000000e+00 : f32
      %53 = vector.broadcast %cst_31 : f32 to vector<8x384xf32>
      %54 = arith.addf %53, %52 : vector<8x384xf32>
      %55 = arith.divf %53, %54 : vector<8x384xf32>
      %56 = vector.extract_strided_slice %31 {offsets = [0, 384], sizes = [8, 128], strides = [1, 1]} : vector<8x512xf32> to vector<8x128xf32>
      %57 = math.tanh %56 : vector<8x128xf32>
      %58 = vector.extract_strided_slice %55 {offsets = [0, 0], sizes = [8, 128], strides = [1, 1]} : vector<8x384xf32> to vector<8x128xf32>
      %59 = vector.extract_strided_slice %55 {offsets = [0, 128], sizes = [8, 128], strides = [1, 1]} : vector<8x384xf32> to vector<8x128xf32>
      %60 = vector.extract_strided_slice %55 {offsets = [0, 256], sizes = [8, 128], strides = [1, 1]} : vector<8x384xf32> to vector<8x128xf32>
      %61 = arith.mulf %59, %49 : vector<8x128xf32>
      %62 = arith.mulf %58, %57 : vector<8x128xf32>
      %63 = arith.addf %61, %62 : vector<8x128xf32>
      %64 = math.tanh %63 : vector<8x128xf32>
      %65 = arith.mulf %60, %64 : vector<8x128xf32>
      %c0_32 = arith.constant 0 : index
      %c0_33 = arith.constant 0 : index
      %66 = vector.load %arg10[%c0_32, %c0_33] : memref<8x256xf32, #tpu.memory_space<vmem>>, vector<8x128xf32>
      tpu.vector_store %arg10[%c0_32, %c0_33], %46 {strides = array<i32>} : memref<8x256xf32, #tpu.memory_space<vmem>>, vector<8x128xf32>,
      %c0_34 = arith.constant 0 : index
      %c128_35 = arith.constant 128 : index
      %67 = vector.load %arg10[%c0_34, %c128_35] : memref<8x256xf32, #tpu.memory_space<vmem>>, vector<8x128xf32>
      tpu.vector_store %arg10[%c0_34, %c128_35], %63 {strides = array<i32>} : memref<8x256xf32, #tpu.memory_space<vmem>>, vector<8x128xf32>,
      %c0_36 = arith.constant 0 : index
      %c0_37 = arith.constant 0 : index
      %68 = vector.load %arg9[%c0_36, %c0_37] : memref<8x256xf32, #tpu.memory_space<vmem>>, vector<8x128xf32>
      tpu.vector_store %arg9[%c0_36, %c0_37], %48 {strides = array<i32>} : memref<8x256xf32, #tpu.memory_space<vmem>>, vector<8x128xf32>,
      %c0_38 = arith.constant 0 : index
      %c128_39 = arith.constant 128 : index
      %69 = vector.load %arg9[%c0_38, %c128_39] : memref<8x256xf32, #tpu.memory_space<vmem>>, vector<8x128xf32>
      tpu.vector_store %arg9[%c0_38, %c128_39], %65 {strides = array<i32>} : memref<8x256xf32, #tpu.memory_space<vmem>>, vector<8x128xf32>,
      %c0_40 = arith.constant 0 : index
      %70 = arith.index_cast %16 : i32 to index
      %c0_41 = arith.constant 0 : index
      %71 = vector.load %arg7[%c0_40, %70, %c0_41] : memref<1x64x256xf32, #tpu.memory_space<vmem>>, vector<1x8x128xf32>
      %72 = vector.shape_cast %71 : vector<1x8x128xf32> to vector<8x128xf32>
      %73 = vector.shape_cast %48 : vector<8x128xf32> to vector<1x8x128xf32>
      tpu.vector_store %arg7[%c0_40, %70, %c0_41], %73 {strides = array<i32>} : memref<1x64x256xf32, #tpu.memory_space<vmem>>, vector<1x8x128xf32>,
      %c0_42 = arith.constant 0 : index
      %74 = arith.index_cast %19 : i32 to index
      %c128_43 = arith.constant 128 : index
      %75 = vector.load %arg7[%c0_42, %74, %c128_43] : memref<1x64x256xf32, #tpu.memory_space<vmem>>, vector<1x8x128xf32>
      %76 = vector.shape_cast %75 : vector<1x8x128xf32> to vector<8x128xf32>
      %77 = vector.shape_cast %65 : vector<8x128xf32> to vector<1x8x128xf32>
      tpu.vector_store %arg7[%c0_42, %74, %c128_43], %77 {strides = array<i32>} : memref<1x64x256xf32, #tpu.memory_space<vmem>>, vector<1x8x128xf32>,
    }
    %c8_i32_16 = arith.constant 8 : i32
    return
  }
  func.func @transform_0(%arg0: i32) -> (i32, i32, i32) {
    %c0_i32 = arith.constant 0 : i32
    %c0_i32_0 = arith.constant 0 : i32
    %c0_i32_1 = arith.constant 0 : i32
    return %arg0, %c0_i32, %c0_i32_0 : i32, i32, i32
  }
  func.func @transform_1(%arg0: i32) -> (i32, i32) {
    %c0_i32 = arith.constant 0 : i32
    %c0_i32_0 = arith.constant 0 : i32
    %c0_i32_1 = arith.constant 0 : i32
    return %c0_i32, %c0_i32_0 : i32, i32
  }
  func.func @transform_2(%arg0: i32) -> (i32, i32) {
    %c0_i32 = arith.constant 0 : i32
    %c0_i32_0 = arith.constant 0 : i32
    %c0_i32_1 = arith.constant 0 : i32
    return %c0_i32, %c0_i32_0 : i32, i32
  }
  func.func @transform_3(%arg0: i32) -> (i32, i32) {
    %c0_i32 = arith.constant 0 : i32
    %c0_i32_0 = arith.constant 0 : i32
    %c0_i32_1 = arith.constant 0 : i32
    return %c0_i32, %c0_i32_0 : i32, i32
  }
  func.func @transform_4(%arg0: i32) -> (i32, i32) {
    %c0_i32 = arith.constant 0 : i32
    %c0_i32_0 = arith.constant 0 : i32
    return %arg0, %c0_i32 : i32, i32
  }
  func.func @transform_5(%arg0: i32) -> (i32, i32) {
    %c0_i32 = arith.constant 0 : i32
    %c0_i32_0 = arith.constant 0 : i32
    return %arg0, %c0_i32 : i32, i32
  }
  func.func @transform_6(%arg0: i32) -> (i32, i32, i32) {
    %c0_i32 = arith.constant 0 : i32
    %c0_i32_0 = arith.constant 0 : i32
    %c0_i32_1 = arith.constant 0 : i32
    return %arg0, %c0_i32, %c0_i32_0 : i32, i32, i32
  }
}

module attributes {stable_mosaic.version = 11 : i64} {
  func.func @pool_output_kernel(%arg0: i32, %arg1: memref<2x8x256xf32, #tpu.memory_space<vmem>>, %arg2: memref<2x8x256xf32, #tpu.memory_space<vmem>>, %arg3: memref<1024x128xf32, #tpu.memory_space<vmem>>, %arg4: memref<1x128xf32, #tpu.memory_space<vmem>>, %arg5: memref<128x3xf32, #tpu.memory_space<vmem>>, %arg6: memref<1x3xf32, #tpu.memory_space<vmem>>, %arg7: memref<2x3xf32, #tpu.memory_space<vmem>>) attributes {dimension_semantics = [#tpu.dimension_semantics<arbitrary>], iteration_bounds = array<i64: 1>, scalar_prefetch = 0 : i64, scratch_operands = 0 : i64, tpu.core_type = #tpu.core_type<tc>, window_params = [{pipeline_mode = #tpu.pipeline_mode<synchronous>, transform_indices = @transform_0, window_bounds = array<i64: 2, 8, 256>}, {pipeline_mode = #tpu.pipeline_mode<synchronous>, transform_indices = @transform_1, window_bounds = array<i64: 2, 8, 256>}, {pipeline_mode = #tpu.pipeline_mode<synchronous>, transform_indices = @transform_2, window_bounds = array<i64: 1024, 128>}, {pipeline_mode = #tpu.pipeline_mode<synchronous>, transform_indices = @transform_3, window_bounds = array<i64: 1, 128>}, {pipeline_mode = #tpu.pipeline_mode<synchronous>, transform_indices = @transform_4, window_bounds = array<i64: 128, 3>}, {pipeline_mode = #tpu.pipeline_mode<synchronous>, transform_indices = @transform_5, window_bounds = array<i64: 1, 3>}, {pipeline_mode = #tpu.pipeline_mode<synchronous>, transform_indices = @transform_6, window_bounds = array<i64: 2, 3>}]} {
    %c0 = arith.constant 0 : index
    %c0_0 = arith.constant 0 : index
    %c0_1 = arith.constant 0 : index
    %0 = vector.load %arg1[%c0, %c0_0, %c0_1] : memref<2x8x256xf32, #tpu.memory_space<vmem>>, vector<2x8x256xf32>
    %cst = arith.constant dense<0.000000e+00> : vector<2x256xf32>
    %1 = vector.multi_reduction <add>, %0, %cst [1] : vector<2x8x256xf32> to vector<2x256xf32>
    %cst_2 = arith.constant 1.250000e-01 : f32
    %2 = vector.broadcast %cst_2 : f32 to vector<2x256xf32>
    %3 = arith.mulf %1, %2 : vector<2x256xf32>
    %cst_3 = arith.constant dense<0xFF800000> : vector<2x256xf32>
    %4 = vector.multi_reduction <maximumf>, %0, %cst_3 [1] : vector<2x8x256xf32> to vector<2x256xf32>
    %5 = tpu.concatenate %3, %4 in 1 : vector<2x256xf32>, vector<2x256xf32> -> vector<2x512xf32>
    %c0_4 = arith.constant 0 : index
    %c0_5 = arith.constant 0 : index
    %c0_6 = arith.constant 0 : index
    %6 = vector.load %arg2[%c0_4, %c0_5, %c0_6] : memref<2x8x256xf32, #tpu.memory_space<vmem>>, vector<2x8x256xf32>
    %cst_7 = arith.constant dense<0.000000e+00> : vector<2x256xf32>
    %7 = vector.multi_reduction <add>, %6, %cst_7 [1] : vector<2x8x256xf32> to vector<2x256xf32>
    %cst_8 = arith.constant 1.250000e-01 : f32
    %8 = vector.broadcast %cst_8 : f32 to vector<2x256xf32>
    %9 = arith.mulf %7, %8 : vector<2x256xf32>
    %cst_9 = arith.constant dense<0xFF800000> : vector<2x256xf32>
    %10 = vector.multi_reduction <maximumf>, %6, %cst_9 [1] : vector<2x8x256xf32> to vector<2x256xf32>
    %11 = tpu.concatenate %9, %10 in 1 : vector<2x256xf32>, vector<2x256xf32> -> vector<2x512xf32>
    %12 = tpu.concatenate %5, %11 in 1 : vector<2x512xf32>, vector<2x512xf32> -> vector<2x1024xf32>
    %c0_10 = arith.constant 0 : index
    %c0_11 = arith.constant 0 : index
    %13 = vector.load %arg3[%c0_10, %c0_11] : memref<1024x128xf32, #tpu.memory_space<vmem>>, vector<1024x128xf32>
    %cst_12 = arith.constant dense<0.000000e+00> : vector<2x128xf32>
    %14 = tpu.matmul %12, %13, %cst_12 {dimension_numbers = #tpu.dot_dimension_numbers<[1], [0], [0], [1], [0, 0, 1, 1], [], []>} : vector<2x1024xf32>, vector<1024x128xf32>, vector<2x128xf32> -> vector<2x128xf32>
    %c0_13 = arith.constant 0 : index
    %c0_14 = arith.constant 0 : index
    %15 = vector.load %arg4[%c0_13, %c0_14] : memref<1x128xf32, #tpu.memory_space<vmem>>, vector<1x128xf32>
    %16 = vector.broadcast %15 : vector<1x128xf32> to vector<2x128xf32>
    %17 = arith.addf %14, %16 : vector<2x128xf32>
    %c0_15 = arith.constant 0 : index
    %c0_16 = arith.constant 0 : index
    %18 = vector.load %arg5[%c0_15, %c0_16] : memref<128x3xf32, #tpu.memory_space<vmem>>, vector<128x3xf32>
    %cst_17 = arith.constant dense<0.000000e+00> : vector<2x3xf32>
    %19 = tpu.matmul %17, %18, %cst_17 {dimension_numbers = #tpu.dot_dimension_numbers<[1], [0], [0], [1], [0, 0, 1, 1], [], []>} : vector<2x128xf32>, vector<128x3xf32>, vector<2x3xf32> -> vector<2x3xf32>
    %c0_18 = arith.constant 0 : index
    %c0_19 = arith.constant 0 : index
    %20 = vector.load %arg6[%c0_18, %c0_19] : memref<1x3xf32, #tpu.memory_space<vmem>>, vector<1x3xf32>
    %21 = vector.broadcast %20 : vector<1x3xf32> to vector<2x3xf32>
    %22 = arith.addf %19, %21 : vector<2x3xf32>
    %cst_20 = arith.constant dense<0xFF800000> : vector<2xf32>
    %23 = vector.multi_reduction <maximumf>, %22, %cst_20 [1] : vector<2x3xf32> to vector<2xf32>
    %24 = vector.shape_cast %23 : vector<2xf32> to vector<2x1xf32>
    %25 = vector.broadcast %24 : vector<2x1xf32> to vector<2x3xf32>
    %26 = arith.subf %22, %25 : vector<2x3xf32>
    %27 = math.exp %26 : vector<2x3xf32>
    %cst_21 = arith.constant dense<0.000000e+00> : vector<2xf32>
    %28 = vector.multi_reduction <add>, %27, %cst_21 [1] : vector<2x3xf32> to vector<2xf32>
    %29 = vector.shape_cast %28 : vector<2xf32> to vector<2x1xf32>
    %30 = math.log %29 : vector<2x1xf32>
    %31 = vector.broadcast %30 : vector<2x1xf32> to vector<2x3xf32>
    %32 = arith.subf %26, %31 : vector<2x3xf32>
    %c0_22 = arith.constant 0 : index
    %c0_23 = arith.constant 0 : index
    %33 = vector.load %arg7[%c0_22, %c0_23] : memref<2x3xf32, #tpu.memory_space<vmem>>, vector<2x3xf32>
    tpu.vector_store %arg7[%c0_22, %c0_23], %32 {strides = array<i32>} : memref<2x3xf32, #tpu.memory_space<vmem>>, vector<2x3xf32>,
    return
  }
  func.func @transform_0(%arg0: i32) -> (i32, i32, i32) {
    %c0_i32 = arith.constant 0 : i32
    %c0_i32_0 = arith.constant 0 : i32
    %c0_i32_1 = arith.constant 0 : i32
    %c0_i32_2 = arith.constant 0 : i32
    return %c0_i32, %c0_i32_0, %c0_i32_1 : i32, i32, i32
  }
  func.func @transform_1(%arg0: i32) -> (i32, i32, i32) {
    %c0_i32 = arith.constant 0 : i32
    %c0_i32_0 = arith.constant 0 : i32
    %c0_i32_1 = arith.constant 0 : i32
    %c0_i32_2 = arith.constant 0 : i32
    return %c0_i32, %c0_i32_0, %c0_i32_1 : i32, i32, i32
  }
  func.func @transform_2(%arg0: i32) -> (i32, i32) {
    %c0_i32 = arith.constant 0 : i32
    %c0_i32_0 = arith.constant 0 : i32
    %c0_i32_1 = arith.constant 0 : i32
    return %c0_i32, %c0_i32_0 : i32, i32
  }
  func.func @transform_3(%arg0: i32) -> (i32, i32) {
    %c0_i32 = arith.constant 0 : i32
    %c0_i32_0 = arith.constant 0 : i32
    %c0_i32_1 = arith.constant 0 : i32
    return %c0_i32, %c0_i32_0 : i32, i32
  }
  func.func @transform_4(%arg0: i32) -> (i32, i32) {
    %c0_i32 = arith.constant 0 : i32
    %c0_i32_0 = arith.constant 0 : i32
    %c0_i32_1 = arith.constant 0 : i32
    return %c0_i32, %c0_i32_0 : i32, i32
  }
  func.func @transform_5(%arg0: i32) -> (i32, i32) {
    %c0_i32 = arith.constant 0 : i32
    %c0_i32_0 = arith.constant 0 : i32
    %c0_i32_1 = arith.constant 0 : i32
    return %c0_i32, %c0_i32_0 : i32, i32
  }
  func.func @transform_6(%arg0: i32) -> (i32, i32) {
    %c0_i32 = arith.constant 0 : i32
    %c0_i32_0 = arith.constant 0 : i32
    %c0_i32_1 = arith.constant 0 : i32
    return %c0_i32, %c0_i32_0 : i32, i32
  }
}

</mosaic_0001>

<bundles_post_ra>
// kernel: esim_forward.5
= control target key start
LH: loop header
LB: loop body
LE: loop exit
PB: predicated region body
PF: predicated region fallthrough
CT: control target
= control target key end

     0   :  { %s588_s12 = smov 0   ;;  %s663_s0 = inlined_call_operand.vmem [shape: f32[2,8,256], index: 0, kind: input, shape index: {}]   ;;  %s664_s1 = inlined_call_operand.vmem [shape: f32[2,8,256], index: 1, kind: input, shape index: {}]   ;;  %s665_s2 = inlined_call_operand.vmem [shape: f32[2,8,1024], index: 2, kind: output, shape index: {0}]   ;;  %s666_s3 = inlined_call_operand.vmem [shape: f32[2,8,1024], index: 3, kind: output, shape index: {1}]  }
   0x1 LB: > { %s521_s13 = sadd.s32 4294967295, %s566_s12   ;;  %p525_p0 = scmp.ge.s32.totalorder %s566_s12, 1  ;;  %s566_s12 = sphi %s588_s12, %s14_s12  }
   0x2   : > { %p150_p1 = scmp.lt.s32.totalorder %s566_s12, 3 }
   0x4   : > { %p151_p2 = pnand %p525_p0, %p150_p1 }
   0x5   : > { %p184_p3 = scmp.lt.s32.totalorder (!%p151_p2), %s521_s13, 1 }
   0x6   : > { %154 = sbr.rel (%p151_p2) target bundleno = 550 (0x226), region = 28 }
   0xb   : > { %s668_s13 = smov (!%p184_p3, %s521_s13), 1  ;;  %vm288_vm0 = vcmask 64512  }
   0xc   : > { %s540_s14 = sshll.u32 %s668_s13, 4  ;;  %s542_s18 = sshll.u32 %s668_s13, 6 }
   0xd   : > { %s188_s17 = scalar_lea.vmem %s663_s0, %s540_s14  ;;  %s602_s21 = scalar_lea.vmem %s665_s2, %s542_s18 }
   0xe   : > { %v604_v0 = vld [vmem:[%s188_s17] sm:$0xff]  ;;  %v606_v1 = vld [vmem:[%s188_s17 + $0x8] sm:$0xff]  ;;  %s193_s24 = scalar_lea.vmem %s664_s1, %s540_s14  ;;  %s620_s27 = scalar_lea.vmem %s666_s3, %s542_s18 }
   0xf   : > { %263 = vmatpush.xpose.msra.mxu2 %v604_v0  ;;  %397 = vst [vmem:[%s602_s21] sm:$0xff] %v604_v0  ;;  %283 = vmatpush.xpose.msra.mxu3 %v606_v1  ;;  %v206_v2 = vld [vmem:[%s193_s24] sm:$0xff]  ;;  %v615_v3 = vld [vmem:[%s193_s24 + $0x8] sm:$0xff] }
  0x10   : > { %398 = vst [vmem:[%s602_s21 + $0x8] sm:$0xff] %v606_v1  ;;  %223 = vmatpush.xpose.msra.mxu0 %v206_v2  ;;  %243 = vmatpush.xpose.msra.mxu1 %v615_v3 }
  0x11   : > { %409 = vst [vmem:[%s620_s27] sm:$0xff] %v206_v2 }
  0x12   : > { %264 = vmatmul.f32.vlgmr.msra.gmra.mxu2 %v206_v2  ;;  %284 = vmatmul.f32.vlgmr.msra.gmra.mxu3 %v615_v3  ;;  %410 = vst [vmem:[%s620_s27 + $0x8] sm:$0xff] %v615_v3 }
  0x13   : > { %372 = vmatpush.msrb.mxu2 %v604_v0  ;;  %392 = vmatpush.msrb.mxu3 %v606_v1 }
  0x14   : > { %224 = vmatmul.f32.vlgmr.msra.gmra.mxu0 %v604_v0  ;;  %244 = vmatmul.f32.vlgmr.msra.gmra.mxu1 %v606_v1 }
  0x15   : > { %329 = vmatpush.msrb.mxu0 %v206_v2  ;;  %349 = vmatpush.msrb.mxu1 %v615_v3 }
  0x91   : > { %v225_v7 = vpop.f32.mrf.mxu0  ;;  %v245_v8 = vpop.f32.mrf.mxu1 }
  0x92   : > { %v246_v10 = vadd.f32 %v245_v8, %v225_v7 }
  0x94   : > { %v289_v11 = vsel %vm288_vm0, %v246_v10, -inf }
  0x95   : > { %v265_v4 = vpop.f32.mrf.mxu2  ;;  %v285_v5 = vpop.f32.mrf.mxu3 }
  0x96   : > { %v286_v6 = vadd.f32 %v285_v5, %v265_v4 }
  0x98   : > { %v300_v9 = vsel %vm288_vm0, %v286_v6, -inf }
  0x99   : > { %301 = vmax.xlane.f32.xlu0 %v300_v9 }
  0xa1   : > { %290 = vmax.xlane.f32.xlu0 %v289_v11 }
 0x10c   : > { %v302_v12 = vpop.xlane.xlu0 %301 }
 0x10d   : > { %v303_v13 = vsub.f32 %v286_v6, %v302_v12 }
 0x10f   : > { %v304_v14 = vmul.f32 1.442695, %v303_v13 }
 0x111   : > { %552 = vpow2.f32 %v304_v14 }
 0x114   : > { %v291_v15 = vpop.xlane.xlu0 %290 }
 0x115   : > { %v292_v16 = vsub.f32 %v246_v10, %v291_v15 }
 0x117   : > { %v553_v17 = vpop.eup %552  ;;  %v293_v18 = vmul.f32 1.442695, %v292_v16 }
 0x118   : > { %v306_v19 = vsel %vm288_vm0, %v553_v17, 0.0 }
 0x119   : > { %554 = vpow2.f32 %v293_v18  ;;  %307 = vadd.xlane.f32.xlu1 %v306_v19 }
 0x11f   : > { %v555_v20 = vpop.eup %554 }
 0x120   : > { %v295_v21 = vsel %vm288_vm0, %v555_v20, 0.0 }
 0x121   : > { %296 = vadd.xlane.f32.xlu1 %v295_v21 }
 0x18c   : > { %v308_v22 = vpop.xlane.xlu1 %307 }
 0x18d   : > { %556 = vrcp.f32 %v308_v22 }
 0x193   : > { %v557_v23 = vpop.eup %556 }
 0x194   : > { %v297_v24 = vpop.xlane.xlu1 %296  ;;  %v310_v25 = vmul.f32 %v557_v23, %v553_v17 }
 0x195   : > { %558 = vrcp.f32 %v297_v24 }
 0x196   : > { %536 = vmatmul.msk.f32.vlgmr.msrb.gmra.mxu2 %vm288_vm0, %v310_v25  ;;  %537 = vmatmul.msk.f32.vlgmr.msrb.gmra.mxu3 %vm288_vm0, %v310_v25 }
 0x19b   : > { %v559_v26 = vpop.eup %558 }
 0x19c   : > { %v299_v27 = vmul.f32 %v559_v26, %v555_v20 }
 0x19e   : > { %534 = vmatmul.msk.f32.vlgmr.msrb.gmra.mxu0 %vm288_vm0, %v299_v27  ;;  %535 = vmatmul.msk.f32.vlgmr.msrb.gmra.mxu1 %vm288_vm0, %v299_v27 }
 0x219   : > { %v374_v28 = vpop.f32.mrf.mxu2  ;;  %v394_v29 = vpop.f32.mrf.mxu3 }
 0x21a   : > { %411 = vst [vmem:[%s620_s27 + $0x10] sm:$0xff] %v374_v28  ;;  %v413_v30 = vsub.f32 %v206_v2, %v374_v28  ;;  %v417_v31 = vmul.f32 %v374_v28, %v206_v2  ;;  %v414_v32 = vsub.f32 %v615_v3, %v394_v29  ;;  %v418_v33 = vmul.f32 %v394_v29, %v615_v3 }
 0x21b   : > { %412 = vst [vmem:[%s620_s27 + $0x18] sm:$0xff] %v394_v29  ;;  %v331_v34 = vpop.f32.mrf.mxu0  ;;  %v351_v36 = vpop.f32.mrf.mxu1 }
 0x21c   : > { %415 = vst [vmem:[%s620_s27 + $0x20] sm:$0xff] %v413_v30  ;;  %v401_v35 = vsub.f32 %v604_v0, %v331_v34  ;;  %v405_v37 = vmul.f32 %v331_v34, %v604_v0  ;;  %v402_v38 = vsub.f32 %v606_v1, %v351_v36  ;;  %v406_v39 = vmul.f32 %v351_v36, %v606_v1 }
 0x21d   : > { %419 = vst [vmem:[%s620_s27 + $0x30] sm:$0xff] %v417_v31 }
 0x21e   : > { %416 = vst [vmem:[%s620_s27 + $0x28] sm:$0xff] %v414_v32 }
 0x21f   : > { %420 = vst [vmem:[%s620_s27 + $0x38] sm:$0xff] %v418_v33 }
 0x220   : > { %399 = vst [vmem:[%s602_s21 + $0x10] sm:$0xff] %v331_v34 }
 0x221   : > { %403 = vst [vmem:[%s602_s21 + $0x20] sm:$0xff] %v401_v35 }
 0x222   : > { %407 = vst [vmem:[%s602_s21 + $0x30] sm:$0xff] %v405_v37 }
 0x223   : > { %400 = vst [vmem:[%s602_s21 + $0x18] sm:$0xff] %v351_v36 }
 0x224   : > { %404 = vst [vmem:[%s602_s21 + $0x28] sm:$0xff] %v402_v38 }
 0x225   : > { %408 = vst [vmem:[%s602_s21 + $0x38] sm:$0xff] %v406_v39 }
 0x226 PF: > { %s14_s12 = sadd.s32 1, %s566_s12  }
 0x227   : > { %p11_p4 = scmp.ge.s32.totalorder %s14_s12, 4  }
 0x229   :  { %13 = sbr.rel (!%p11_p4) target bundleno = 1 (0x1), region = 73 }

// kernel: esim_forward.4
= control target key start
LH: loop header
LB: loop body
LE: loop exit
PB: predicated region body
PF: predicated region fallthrough
CT: control target
= control target key end

     0   :  { %s4389_s1 = inlined_call_operand.vmem [shape: bf16[128,1024], index: 1, kind: input, shape index: {}]   ;;  %s4390_s2 = inlined_call_operand.vmem [shape: bf16[256,1024], index: 2, kind: input, shape index: {}]   ;;  %s4391_s6 = inlined_call_operand.vmem [shape: f32[1,64,256], index: 6, kind: output, shape index: {}]   ;;  %s4392_s0 = inlined_call_operand.vmem [shape: bf16[1,64,128], index: 0, kind: input, shape index: {}]   ;;  %s4393_s3 = inlined_call_operand.vmem [shape: f32[1,1024], index: 3, kind: input, shape index: {}]   ;;  %s4394_s4 = inlined_call_operand.vmem [shape: f32[8,256], index: 4, kind: input, shape index: {}]   ;;  %s4395_s5 = inlined_call_operand.vmem [shape: f32[8,256], index: 5, kind: input, shape index: {}]  }
   0x1   :  { %v2175_v0 = vld [vmem:[%s4389_s1 + $0x1c0] sm:$0xf]  ;;  %v2793_v2 = vld [vmem:[%s4389_s1 + $0x1c4] sm:$0xf]  ;;  %v2183_v5 = vld [vmem:[%s4389_s1 + $0x1c8] sm:$0xf] }
   0x2   :  { %v2797_v1 = vld [vmem:[%s4389_s1 + $0x1dc] sm:$0xf0]  ;;  %v2177_v4 = vld [vmem:[%s4389_s1 + $0x1e0] sm:$0xf0]  ;;  %v2798_v6 = vld [vmem:[%s4389_s1 + $0x1e4] sm:$0xf0] }
   0x3   :  { %v2176_v3 = vor.u32 %v2797_v1, %v2175_v0  ;;  %v2180_v7 = vor.u32 %v2793_v2, %v2177_v4  ;;  %v2184_v8 = vor.u32 %v2798_v6, %v2183_v5  ;;  %v2794_v9 = vld [vmem:[%s4389_s1 + $0x1cc] sm:$0xf]  ;;  %v2143_v11 = vld [vmem:[%s4389_s1 + $0x180] sm:$0xf]  ;;  %v2785_v14 = vld [vmem:[%s4389_s1 + $0x184] sm:$0xf] }
   0x4   :  { %v2185_v10 = vld [vmem:[%s4389_s1 + $0x1e8] sm:$0xf0]  ;;  %v2789_v13 = vld [vmem:[%s4389_s1 + $0x19c] sm:$0xf0]  ;;  %v2145_v15 = vld [vmem:[%s4389_s1 + $0x1a0] sm:$0xf0] }
   0x5   :  { %457 = vmatpush.bf16.msra.mxu0 %v2176_v3  ;;  %v2188_v12 = vor.u32 %v2794_v9, %v2185_v10  ;;  %486 = vmatpush.bf16.msra.mxu1 %v2180_v7  ;;  %v2144_v16 = vor.u32 %v2789_v13, %v2143_v11  ;;  %v2148_v17 = vor.u32 %v2785_v14, %v2145_v15  ;;  %v2151_v18 = vld [vmem:[%s4389_s1 + $0x188] sm:$0xf]  ;;  %v2786_v20 = vld [vmem:[%s4389_s1 + $0x18c] sm:$0xf]  ;;  %v2111_v23 = vld [vmem:[%s4389_s1 + $0x140] sm:$0xf] }
   0x6   :  { %515 = vmatpush.bf16.msra.mxu2 %v2184_v8  ;;  %v2790_v19 = vld [vmem:[%s4389_s1 + $0x1a4] sm:$0xf0]  ;;  %v2153_v22 = vld [vmem:[%s4389_s1 + $0x1a8] sm:$0xf0]  ;;  %v2781_v24 = vld [vmem:[%s4389_s1 + $0x15c] sm:$0xf0] }
   0x7   :  { %544 = vmatpush.bf16.msra.mxu3 %v2188_v12  ;;  %v2152_v21 = vor.u32 %v2790_v19, %v2151_v18  ;;  %v2156_v25 = vor.u32 %v2786_v20, %v2153_v22  ;;  %v2777_v26 = vld [vmem:[%s4389_s1 + $0x144] sm:$0xf]  ;;  %v2119_v28 = vld [vmem:[%s4389_s1 + $0x148] sm:$0xf]  ;;  %v2112_v29 = vor.u32 %v2781_v24, %v2111_v23  ;;  %v2778_v31 = vld [vmem:[%s4389_s1 + $0x14c] sm:$0xf] }
   0x8   :  { %v2113_v27 = vld [vmem:[%s4389_s1 + $0x160] sm:$0xf0]  ;;  %v2782_v30 = vld [vmem:[%s4389_s1 + $0x164] sm:$0xf0]  ;;  %v2121_v32 = vld [vmem:[%s4389_s1 + $0x168] sm:$0xf0] }
   0x9   :  { %458 = vmatpush.bf16.msra.mxu0 %v2144_v16  ;;  %487 = vmatpush.bf16.msra.mxu1 %v2148_v17  ;;  %v2116_v33 = vor.u32 %v2777_v26, %v2113_v27  ;;  %v2120_v34 = vor.u32 %v2782_v30, %v2119_v28  ;;  %v2079_v35 = vld [vmem:[%s4389_s1 + $0x100] sm:$0xf]  ;;  %v2769_v37 = vld [vmem:[%s4389_s1 + $0x104] sm:$0xf]  ;;  %v2124_v38 = vor.u32 %v2778_v31, %v2121_v32  ;;  %v2087_v40 = vld [vmem:[%s4389_s1 + $0x108] sm:$0xf] }
   0xa   :  { %516 = vmatpush.bf16.msra.mxu2 %v2152_v21  ;;  %v2773_v36 = vld [vmem:[%s4389_s1 + $0x11c] sm:$0xf0]  ;;  %v2081_v39 = vld [vmem:[%s4389_s1 + $0x120] sm:$0xf0]  ;;  %v2774_v41 = vld [vmem:[%s4389_s1 + $0x124] sm:$0xf0] }
   0xb   :  { %545 = vmatpush.bf16.msra.mxu3 %v2156_v25  ;;  %v2770_v42 = vld [vmem:[%s4389_s1 + $0x10c] sm:$0xf]  ;;  %v2080_v44 = vor.u32 %v2773_v36, %v2079_v35  ;;  %v2084_v45 = vor.u32 %v2769_v37, %v2081_v39  ;;  %v2088_v46 = vor.u32 %v2774_v41, %v2087_v40  ;;  %v2047_v47 = vld [vmem:[%s4389_s1 + $0xc0] sm:$0xf]  ;;  %v2761_v49 = vld [vmem:[%s4389_s1 + $0xc4] sm:$0xf] }
   0xc   :  { %v2089_v43 = vld [vmem:[%s4389_s1 + $0x128] sm:$0xf0]  ;;  %v2765_v48 = vld [vmem:[%s4389_s1 + $0xdc] sm:$0xf0]  ;;  %v2049_v51 = vld [vmem:[%s4389_s1 + $0xe0] sm:$0xf0] }
   0xd   :  { %459 = vmatpush.bf16.msra.mxu0 %v2112_v29  ;;  %488 = vmatpush.bf16.msra.mxu1 %v2116_v33  ;;  %v2092_v50 = vor.u32 %v2770_v42, %v2089_v43  ;;  %v2055_v52 = vld [vmem:[%s4389_s1 + $0xc8] sm:$0xf]  ;;  %v2762_v54 = vld [vmem:[%s4389_s1 + $0xcc] sm:$0xf]  ;;  %v2048_v56 = vor.u32 %v2765_v48, %v2047_v47  ;;  %v2052_v57 = vor.u32 %v2761_v49, %v2049_v51  ;;  %v2015_v59 = vld [vmem:[%s4389_s1 + $0x80] sm:$0xf] }
   0xe   :  { %517 = vmatpush.bf16.msra.mxu2 %v2120_v34  ;;  %v2766_v53 = vld [vmem:[%s4389_s1 + $0xe4] sm:$0xf0]  ;;  %v2057_v55 = vld [vmem:[%s4389_s1 + $0xe8] sm:$0xf0]  ;;  %v2757_v60 = vld [vmem:[%s4389_s1 + $0x9c] sm:$0xf0] }
   0xf   :  { %546 = vmatpush.bf16.msra.mxu3 %v2124_v38  ;;  %v2056_v58 = vor.u32 %v2766_v53, %v2055_v52  ;;  %v2753_v61 = vld [vmem:[%s4389_s1 + $0x84] sm:$0xf]  ;;  %v2060_v62 = vor.u32 %v2762_v54, %v2057_v55  ;;  %v2023_v0 = vld [vmem:[%s4389_s1 + $0x88] sm:$0xf]  ;;  %v2754_v2 = vld [vmem:[%s4389_s1 + $0x8c] sm:$0xf]  ;;  %v2016_v4 = vor.u32 %v2757_v60, %v2015_v59 }
  0x10   :  { %v2017_v63 = vld [vmem:[%s4389_s1 + $0xa0] sm:$0xf0]  ;;  %v2758_v1 = vld [vmem:[%s4389_s1 + $0xa4] sm:$0xf0]  ;;  %v2025_v3 = vld [vmem:[%s4389_s1 + $0xa8] sm:$0xf0] }
  0x11   :  { %460 = vmatpush.bf16.msra.mxu0 %v2080_v44  ;;  %489 = vmatpush.bf16.msra.mxu1 %v2084_v45  ;;  %v2020_v5 = vor.u32 %v2753_v61, %v2017_v63  ;;  %v2024_v6 = vor.u32 %v2758_v1, %v2023_v0  ;;  %v1983_v7 = vld [vmem:[%s4389_s1 + $0x40] sm:$0xf]  ;;  %v2745_v9 = vld [vmem:[%s4389_s1 + $0x44] sm:$0xf]  ;;  %v2028_v10 = vor.u32 %v2754_v2, %v2025_v3  ;;  %v1991_v12 = vld [vmem:[%s4389_s1 + $0x48] sm:$0xf] }
  0x12   :  { %518 = vmatpush.bf16.msra.mxu2 %v2088_v46  ;;  %v2749_v8 = vld [vmem:[%s4389_s1 + $0x5c] sm:$0xf0]  ;;  %v1985_v11 = vld [vmem:[%s4389_s1 + $0x60] sm:$0xf0]  ;;  %v2750_v13 = vld [vmem:[%s4389_s1 + $0x64] sm:$0xf0] }
  0x13   :  { %547 = vmatpush.bf16.msra.mxu3 %v2092_v50  ;;  %v2746_v14 = vld [vmem:[%s4389_s1 + $0x4c] sm:$0xf]  ;;  %v1984_v16 = vor.u32 %v2749_v8, %v1983_v7  ;;  %v1951_v17 = vld [vmem:[%s4389_s1] sm:$0xf]  ;;  %v1988_v18 = vor.u32 %v2745_v9, %v1985_v11  ;;  %v1992_v19 = vor.u32 %v2750_v13, %v1991_v12  ;;  %v2737_v21 = vld [vmem:[%s4389_s1 + $0x4] sm:$0xf] }
  0x14   :  { %v1993_v15 = vld [vmem:[%s4389_s1 + $0x68] sm:$0xf0]  ;;  %v2741_v20 = vld [vmem:[%s4389_s1 + $0x1c] sm:$0xf0]  ;;  %v1953_v22 = vld [vmem:[%s4389_s1 + $0x20] sm:$0xf0] }
  0x15   :  { %461 = vmatpush.bf16.msra.mxu0 %v2048_v56  ;;  %490 = vmatpush.bf16.msra.mxu1 %v2052_v57  ;;  %v1996_v23 = vor.u32 %v2746_v14, %v1993_v15  ;;  %v1959_v24 = vld [vmem:[%s4389_s1 + $0x8] sm:$0xf]  ;;  %v2738_v26 = vld [vmem:[%s4389_s1 + $0xc] sm:$0xf]  ;;  %v2199_v28 = vld [vmem:[%s4389_s1 + $0x1d8] sm:$0xf]  ;;  %v1952_v30 = vor.u32 %v2741_v20, %v1951_v17  ;;  %v1956_v33 = vor.u32 %v2737_v21, %v1953_v22 }
  0x16   :  { %519 = vmatpush.bf16.msra.mxu2 %v2056_v58  ;;  %v2742_v25 = vld [vmem:[%s4389_s1 + $0x24] sm:$0xf0]  ;;  %v1961_v27 = vld [vmem:[%s4389_s1 + $0x28] sm:$0xf0]  ;;  %v2800_v29 = vld [vmem:[%s4389_s1 + $0x1f4] sm:$0xf0] }
  0x17   :  { %548 = vmatpush.bf16.msra.mxu3 %v2060_v62  ;;  %v2796_v31 = vld [vmem:[%s4389_s1 + $0x1dc] sm:$0xf]  ;;  %v1960_v34 = vor.u32 %v2742_v25, %v1959_v24  ;;  %v3223_v35 = vld [vmem:[%s4392_s0] sm:$0xff]  ;;  %v1964_v36 = vor.u32 %v2738_v26, %v1961_v27  ;;  %v2200_v37 = vor.u32 %v2800_v29, %v2199_v28  ;;  %v2191_v38 = vld [vmem:[%s4389_s1 + $0x1d0] sm:$0xf] }
  0x18   :  { %v2201_v32 = vld [vmem:[%s4389_s1 + $0x1f8] sm:$0xf0]  ;;  %v2799_v39 = vld [vmem:[%s4389_s1 + $0x1ec] sm:$0xf0]  ;;  %v2795_v40 = vld [vmem:[%s4389_s1 + $0x1d4] sm:$0xf] }
  0x19   :  { %462 = vmatpush.bf16.msra.mxu0 %v2016_v4  ;;  %491 = vmatpush.bf16.msra.mxu1 %v2020_v5  ;;  %v2204_v41 = vor.u32 %v2796_v31, %v2201_v32  ;;  %v2193_v42 = vld [vmem:[%s4389_s1 + $0x1f0] sm:$0xf0]  ;;  %v2167_v43 = vld [vmem:[%s4389_s1 + $0x198] sm:$0xf]  ;;  %v2788_v45 = vld [vmem:[%s4389_s1 + $0x19c] sm:$0xf]  ;;  %v2192_v47 = vor.u32 %v2799_v39, %v2191_v38 }
  0x1a   :  { %520 = vmatpush.bf16.msra.mxu2 %v2024_v6  ;;  %v2792_v44 = vld [vmem:[%s4389_s1 + $0x1b4] sm:$0xf0]  ;;  %v2169_v46 = vld [vmem:[%s4389_s1 + $0x1b8] sm:$0xf0]  ;;  %v2196_v48 = vor.u32 %v2795_v40, %v2193_v42  ;;  %v2159_v50 = vld [vmem:[%s4389_s1 + $0x190] sm:$0xf] }
  0x1b   :  { %549 = vmatpush.bf16.msra.mxu3 %v2028_v10  ;;  %v2168_v49 = vor.u32 %v2792_v44, %v2167_v43  ;;  %v2791_v51 = vld [vmem:[%s4389_s1 + $0x1ac] sm:$0xf0]  ;;  %v2787_v52 = vld [vmem:[%s4389_s1 + $0x194] sm:$0xf]  ;;  %v2172_v53 = vor.u32 %v2788_v45, %v2169_v46  ;;  %v2135_v55 = vld [vmem:[%s4389_s1 + $0x158] sm:$0xf] }
  0x1c   :  { %v2161_v54 = vld [vmem:[%s4389_s1 + $0x1b0] sm:$0xf0]  ;;  %v2784_v56 = vld [vmem:[%s4389_s1 + $0x174] sm:$0xf0]  ;;  %v2780_v57 = vld [vmem:[%s4389_s1 + $0x15c] sm:$0xf]  ;;  %v2160_v59 = vor.u32 %v2791_v51, %v2159_v50 }
  0x1d   :  { %463 = vmatpush.bf16.msra.mxu0 %v1984_v16  ;;  %492 = vmatpush.bf16.msra.mxu1 %v1988_v18  ;;  %v2137_v58 = vld [vmem:[%s4389_s1 + $0x178] sm:$0xf0]  ;;  %v2164_v60 = vor.u32 %v2787_v52, %v2161_v54  ;;  %v2136_v61 = vor.u32 %v2784_v56, %v2135_v55  ;;  %v2127_v62 = vld [vmem:[%s4389_s1 + $0x150] sm:$0xf]  ;;  %v2779_v0 = vld [vmem:[%s4389_s1 + $0x154] sm:$0xf] }
  0x1e   :  { %521 = vmatpush.bf16.msra.mxu2 %v1992_v19  ;;  %v2783_v63 = vld [vmem:[%s4389_s1 + $0x16c] sm:$0xf0]  ;;  %v2140_v1 = vor.u32 %v2780_v57, %v2137_v58  ;;  %v2129_v2 = vld [vmem:[%s4389_s1 + $0x170] sm:$0xf0]  ;;  %v2103_v3 = vld [vmem:[%s4389_s1 + $0x118] sm:$0xf] }
  0x1f   :  { %550 = vmatpush.bf16.msra.mxu3 %v1996_v23  ;;  %v2776_v4 = vld [vmem:[%s4389_s1 + $0x134] sm:$0xf0]  ;;  %v2772_v5 = vld [vmem:[%s4389_s1 + $0x11c] sm:$0xf]  ;;  %v2128_v7 = vor.u32 %v2783_v63, %v2127_v62  ;;  %v2132_v8 = vor.u32 %v2779_v0, %v2129_v2  ;;  %v2095_v10 = vld [vmem:[%s4389_s1 + $0x110] sm:$0xf] }
  0x20   :  { %v2105_v6 = vld [vmem:[%s4389_s1 + $0x138] sm:$0xf0]  ;;  %v2104_v9 = vor.u32 %v2776_v4, %v2103_v3  ;;  %v2775_v11 = vld [vmem:[%s4389_s1 + $0x12c] sm:$0xf0]  ;;  %v2771_v12 = vld [vmem:[%s4389_s1 + $0x114] sm:$0xf] }
  0x21   :  { %464 = vmatpush.bf16.msra.mxu0 %v1952_v30  ;;  %493 = vmatpush.bf16.msra.mxu1 %v1956_v33  ;;  %v2108_v13 = vor.u32 %v2772_v5, %v2105_v6  ;;  %v2097_v14 = vld [vmem:[%s4389_s1 + $0x130] sm:$0xf0]  ;;  %v2071_v15 = vld [vmem:[%s4389_s1 + $0xd8] sm:$0xf]  ;;  %v2764_v17 = vld [vmem:[%s4389_s1 + $0xdc] sm:$0xf]  ;;  %v2096_v20 = vor.u32 %v2775_v11, %v2095_v10 }
  0x22   :  { %522 = vmatpush.bf16.msra.mxu2 %v1960_v34  ;;  %v2768_v16 = vld [vmem:[%s4389_s1 + $0xf4] sm:$0xf0]  ;;  %v2073_v18 = vld [vmem:[%s4389_s1 + $0xf8] sm:$0xf0]  ;;  %v3328_v19 = vld [vmem:[%s4392_s0 + $0x8] sm:$0xff]  ;;  %v2100_v21 = vor.u32 %v2771_v12, %v2097_v14 }
  0x23   :  { %551 = vmatpush.bf16.msra.mxu3 %v1964_v36  ;;  %v2072_v22 = vor.u32 %v2768_v16, %v2071_v15  ;;  %v2063_v23 = vld [vmem:[%s4389_s1 + $0xd0] sm:$0xf]  ;;  %v2763_v25 = vld [vmem:[%s4389_s1 + $0xd4] sm:$0xf]  ;;  %v2076_v26 = vor.u32 %v2764_v17, %v2073_v18  ;;  %v2039_v28 = vld [vmem:[%s4389_s1 + $0x98] sm:$0xf] }
  0x24   :  { %465 = vmatmul.bf16.vlgmr.msra.gmra.mxu0 %v3223_v35  ;;  %494 = vmatmul.bf16.vlgmr.msra.gmra.mxu1 %v3223_v35  ;;  %v2767_v24 = vld [vmem:[%s4389_s1 + $0xec] sm:$0xf0]  ;;  %v2065_v27 = vld [vmem:[%s4389_s1 + $0xf0] sm:$0xf0]  ;;  %v2760_v29 = vld [vmem:[%s4389_s1 + $0xb4] sm:$0xf0] }
  0x25   :  { %523 = vmatmul.bf16.vlgmr.msra.gmra.mxu2 %v3223_v35  ;;  %573 = vmatpush.bf16.msrb.mxu0 %v2192_v47  ;;  %v2756_v30 = vld [vmem:[%s4389_s1 + $0x9c] sm:$0xf]  ;;  %v2064_v32 = vor.u32 %v2767_v24, %v2063_v23  ;;  %v2068_v33 = vor.u32 %v2763_v25, %v2065_v27  ;;  %v2040_v34 = vor.u32 %v2760_v29, %v2039_v28  ;;  %v2031_v36 = vld [vmem:[%s4389_s1 + $0x90] sm:$0xf]  ;;  %v2755_v39 = vld [vmem:[%s4389_s1 + $0x94] sm:$0xf] }
  0x26   :  { %631 = vmatpush.bf16.msrb.mxu2 %v2200_v37  ;;  %552 = vmatmul.bf16.vlgmr.msra.gmra.mxu3 %v3223_v35  ;;  %v2041_v31 = vld [vmem:[%s4389_s1 + $0xb8] sm:$0xf0]  ;;  %v2759_v37 = vld [vmem:[%s4389_s1 + $0xac] sm:$0xf0]  ;;  %v2033_v40 = vld [vmem:[%s4389_s1 + $0xb0] sm:$0xf0] }
  0x27   :  { %660 = vmatpush.bf16.msrb.mxu3 %v2204_v41  ;;  %602 = vmatpush.bf16.msrb.mxu1 %v2196_v48  ;;  %v2044_v38 = vor.u32 %v2756_v30, %v2041_v31  ;;  %v2032_v41 = vor.u32 %v2759_v37, %v2031_v36  ;;  %v2007_v42 = vld [vmem:[%s4389_s1 + $0x58] sm:$0xf]  ;;  %v2748_v44 = vld [vmem:[%s4389_s1 + $0x5c] sm:$0xf]  ;;  %v2036_v45 = vor.u32 %v2755_v39, %v2033_v40  ;;  %v1999_v48 = vld [vmem:[%s4389_s1 + $0x50] sm:$0xf] }
  0x28   :  { %v2752_v43 = vld [vmem:[%s4389_s1 + $0x74] sm:$0xf0]  ;;  %v2009_v47 = vld [vmem:[%s4389_s1 + $0x78] sm:$0xf0]  ;;  %v2747_v51 = vld [vmem:[%s4389_s1 + $0x54] sm:$0xf] }
  0x29   :  { %574 = vmatpush.bf16.msrb.mxu0 %v2160_v59  ;;  %v2008_v46 = vor.u32 %v2752_v43, %v2007_v42  ;;  %v2012_v50 = vor.u32 %v2748_v44, %v2009_v47  ;;  %v2001_v52 = vld [vmem:[%s4389_s1 + $0x70] sm:$0xf0]  ;;  %v2744_v54 = vld [vmem:[%s4389_s1 + $0x34] sm:$0xf0]  ;;  %v2740_v55 = vld [vmem:[%s4389_s1 + $0x1c] sm:$0xf] }
  0x2a   :  { %632 = vmatpush.bf16.msrb.mxu2 %v2168_v49  ;;  %v2751_v49 = vld [vmem:[%s4389_s1 + $0x6c] sm:$0xf0]  ;;  %v1977_v56 = vld [vmem:[%s4389_s1 + $0x38] sm:$0xf0]  ;;  %v2004_v58 = vor.u32 %v2747_v51, %v2001_v52  ;;  %v2739_v63 = vld [vmem:[%s4389_s1 + $0x14] sm:$0xf] }
  0x2b   :  { %661 = vmatpush.bf16.msrb.mxu3 %v2172_v53  ;;  %603 = vmatpush.bf16.msrb.mxu1 %v2164_v60  ;;  %v1975_v53 = vld [vmem:[%s4389_s1 + $0x18] sm:$0xf]  ;;  %v2000_v57 = vor.u32 %v2751_v49, %v1999_v48  ;;  %v1967_v60 = vld [vmem:[%s4389_s1 + $0x10] sm:$0xf]  ;;  %v1980_v62 = vor.u32 %v2740_v55, %v1977_v56  ;;  %v1969_v0 = vld [vmem:[%s4389_s1 + $0x30] sm:$0xf0] }
  0x2c   :  { %v1976_v59 = vor.u32 %v2744_v54, %v1975_v53  ;;  %v1972_v2 = vor.u32 %v2739_v63, %v1969_v0  ;;  %v2735_v3 = vld [vmem:[%s4392_s0 + $0x10] sm:$0xff]  ;;  %v2736_v4 = vld [vmem:[%s4392_s0 + $0x18] sm:$0xff] }
  0x2d   :  { %575 = vmatpush.bf16.msrb.mxu0 %v2128_v7 }
  0x2e   :  { %633 = vmatpush.bf16.msrb.mxu2 %v2136_v61  ;;  %v2743_v61 = vld [vmem:[%s4389_s1 + $0x2c] sm:$0xf0] }
  0x2f   :  { %662 = vmatpush.bf16.msrb.mxu3 %v2140_v1  ;;  %604 = vmatpush.bf16.msrb.mxu1 %v2132_v8  ;;  %v1968_v1 = vor.u32 %v2743_v61, %v1967_v60 }
  0x31   :  { %576 = vmatpush.bf16.msrb.mxu0 %v2096_v20 }
  0x32   :  { %634 = vmatpush.bf16.msrb.mxu2 %v2104_v9 }
  0x33   :  { %663 = vmatpush.bf16.msrb.mxu3 %v2108_v13  ;;  %605 = vmatpush.bf16.msrb.mxu1 %v2100_v21 }
  0x34   :  { %470 = vmatmul.bf16.gmra.mxu0 %v3328_v19  ;;  %499 = vmatmul.bf16.gmra.mxu1 %v3328_v19 }
  0x35   :  { %528 = vmatmul.bf16.gmra.mxu2 %v3328_v19  ;;  %577 = vmatpush.bf16.msrb.mxu0 %v2064_v32 }
  0x36   :  { %635 = vmatpush.bf16.msrb.mxu2 %v2072_v22  ;;  %557 = vmatmul.bf16.gmra.mxu3 %v3328_v19 }
  0x37   :  { %664 = vmatpush.bf16.msrb.mxu3 %v2076_v26  ;;  %606 = vmatpush.bf16.msrb.mxu1 %v2068_v33 }
  0x39   :  { %578 = vmatpush.bf16.msrb.mxu0 %v2032_v41 }
  0x3a   :  { %636 = vmatpush.bf16.msrb.mxu2 %v2040_v34 }
  0x3b   :  { %665 = vmatpush.bf16.msrb.mxu3 %v2044_v38  ;;  %607 = vmatpush.bf16.msrb.mxu1 %v2036_v45 }
  0x3d   :  { %579 = vmatpush.bf16.msrb.mxu0 %v2000_v57 }
  0x3e   :  { %637 = vmatpush.bf16.msrb.mxu2 %v2008_v46 }
  0x3f   :  { %666 = vmatpush.bf16.msrb.mxu3 %v2012_v50  ;;  %608 = vmatpush.bf16.msrb.mxu1 %v2004_v58 }
  0x41   :  { %580 = vmatpush.bf16.msrb.mxu0 %v1968_v1 }
  0x42   :  { %638 = vmatpush.bf16.msrb.mxu2 %v1976_v59 }
  0x43   :  { %667 = vmatpush.bf16.msrb.mxu3 %v1980_v62  ;;  %609 = vmatpush.bf16.msrb.mxu1 %v1972_v2 }
  0x44   :  { %475 = vmatmul.bf16.gmra.mxu0 %v2735_v3  ;;  %504 = vmatmul.bf16.gmra.mxu1 %v2735_v3 }
  0x45   :  { %533 = vmatmul.bf16.gmra.mxu2 %v2735_v3 }
  0x46   :  { %562 = vmatmul.bf16.gmra.mxu3 %v2735_v3 }
  0x54   :  { %480 = vmatmul.bf16.gmra.mxu0 %v2736_v4  ;;  %509 = vmatmul.bf16.gmra.mxu1 %v2736_v4 }
  0x55   :  { %538 = vmatmul.bf16.gmra.mxu2 %v2736_v4 }
  0x56   :  { %567 = vmatmul.bf16.gmra.mxu3 %v2736_v4 }
  0x64   :  { %581 = vmatmul.bf16.vlgmr.msrb.gmra.mxu0 %v3223_v35  ;;  %610 = vmatmul.bf16.vlgmr.msrb.gmra.mxu1 %v3223_v35 }
  0x65   :  { %639 = vmatmul.bf16.vlgmr.msrb.gmra.mxu2 %v3223_v35 }
  0x66   :  { %668 = vmatmul.bf16.vlgmr.msrb.gmra.mxu3 %v3223_v35  ;;  %v3435_v35 = vld [vmem:[%s4393_s3] sm:$0xff] }
  0x67   :  { %v3438_v5 = vperm.slane %v3435_v35, 0  ;;  %v3441_v6 = vperm.slane %v3435_v35, 1  ;;  %v3446_v11 = vperm.slane %v3435_v35, 2  ;;  %v3449_v12 = vperm.slane %v3435_v35, 3 }
  0x74   :  { %586 = vmatmul.bf16.gmra.mxu0 %v3328_v19  ;;  %615 = vmatmul.bf16.gmra.mxu1 %v3328_v19 }
  0x75   :  { %644 = vmatmul.bf16.gmra.mxu2 %v3328_v19 }
  0x76   :  { %673 = vmatmul.bf16.gmra.mxu3 %v3328_v19 }
  0x84   :  { %591 = vmatmul.bf16.gmra.mxu0 %v2735_v3  ;;  %620 = vmatmul.bf16.gmra.mxu1 %v2735_v3 }
  0x85   :  { %649 = vmatmul.bf16.gmra.mxu2 %v2735_v3 }
  0x86   :  { %678 = vmatmul.bf16.gmra.mxu3 %v2735_v3 }
  0x94   :  { %596 = vmatmul.bf16.gmra.mxu0 %v2736_v4  ;;  %625 = vmatmul.bf16.gmra.mxu1 %v2736_v4 }
  0x95   :  { %654 = vmatmul.bf16.gmra.mxu2 %v2736_v4 }
  0x96   :  { %683 = vmatmul.bf16.gmra.mxu3 %v2736_v4 }
  0xa1   :  { %v466_v7 = vpop.f32.mrf.mxu0  ;;  %v495_v9 = vpop.f32.mrf.mxu1 }
  0xa2   :  { %v467_v8 = vadd.f32 %v466_v7, %v3438_v5  ;;  %v496_v10 = vadd.f32 %v495_v9, %v3441_v6  ;;  %v3483_v9 = vperm.slane %v3435_v35, 5 }
  0xa4   :  { %689 = vst [vmem:[#allocation2] sm:$0xff] %v467_v8  ;;  %v3480_v8 = vperm.slane %v3435_v35, 4 }
  0xa5   :  { %690 = vst [vmem:[#allocation2 + $0x8] sm:$0xff] %v496_v10 }
  0xa8   :  { %v524_v13 = vpop.f32.mrf.mxu2 }
  0xa9   :  { %v525_v14 = vadd.f32 %v524_v13, %v3446_v11  ;;  %v553_v15 = vpop.f32.mrf.mxu3  ;;  %v468_v16 = vpop.f32.mrf.mxu0 }
  0xaa   :  { %v554_v17 = vadd.f32 %v553_v15, %v3449_v12  ;;  %v469_v18 = vadd.f32 %v468_v16, %v3438_v5  ;;  %v497_v19 = vpop.f32.mrf.mxu1 }
  0xab   :  { %691 = vst [vmem:[#allocation2 + $0x10] sm:$0xff] %v525_v14  ;;  %v498_v20 = vadd.f32 %v497_v19, %v3441_v6  ;;  %v3493_v19 = vperm.slane %v3435_v35, 7 }
  0xac   :  { %692 = vst [vmem:[#allocation2 + $0x18] sm:$0xff] %v554_v17 }
  0xad   :  { %697 = vst [vmem:[#allocation2 + $0x40] sm:$0xff] %v469_v18  ;;  %v3490_v18 = vperm.slane %v3435_v35, 6 }
  0xae   :  { %698 = vst [vmem:[#allocation2 + $0x48] sm:$0xff] %v498_v20 }
  0xb0   :  { %v526_v21 = vpop.f32.mrf.mxu2 }
  0xb1   :  { %v527_v22 = vadd.f32 %v526_v21, %v3446_v11  ;;  %v555_v23 = vpop.f32.mrf.mxu3  ;;  %v471_v24 = vpop.f32.mrf.mxu0 }
  0xb2   :  { %v556_v25 = vadd.f32 %v555_v23, %v3449_v12  ;;  %v472_v26 = vadd.f32 %v471_v24, %v3438_v5  ;;  %v500_v27 = vpop.f32.mrf.mxu1 }
  0xb3   :  { %699 = vst [vmem:[#allocation2 + $0x50] sm:$0xff] %v527_v22  ;;  %v501_v28 = vadd.f32 %v500_v27, %v3441_v6 }
  0xb4   :  { %700 = vst [vmem:[#allocation2 + $0x58] sm:$0xff] %v556_v25 }
  0xb5   :  { %705 = vst [vmem:[#allocation2 + $0x80] sm:$0xff] %v472_v26 }
  0xb6   :  { %706 = vst [vmem:[#allocation2 + $0x88] sm:$0xff] %v501_v28 }
  0xb8   :  { %v529_v29 = vpop.f32.mrf.mxu2 }
  0xb9   :  { %v530_v30 = vadd.f32 %v529_v29, %v3446_v11  ;;  %v558_v31 = vpop.f32.mrf.mxu3  ;;  %v473_v32 = vpop.f32.mrf.mxu0 }
  0xba   :  { %v559_v33 = vadd.f32 %v558_v31, %v3449_v12  ;;  %v474_v34 = vadd.f32 %v473_v32, %v3438_v5  ;;  %v502_v36 = vpop.f32.mrf.mxu1 }
  0xbb   :  { %707 = vst [vmem:[#allocation2 + $0x90] sm:$0xff] %v530_v30  ;;  %v503_v37 = vadd.f32 %v502_v36, %v3441_v6 }
  0xbc   :  { %708 = vst [vmem:[#allocation2 + $0x98] sm:$0xff] %v559_v33 }
  0xbd   :  { %713 = vst [vmem:[#allocation2 + $0xc0] sm:$0xff] %v474_v34 }
  0xbe   :  { %714 = vst [vmem:[#allocation2 + $0xc8] sm:$0xff] %v503_v37 }
  0xc0   :  { %v531_v38 = vpop.f32.mrf.mxu2 }
  0xc1   :  { %v532_v39 = vadd.f32 %v531_v38, %v3446_v11  ;;  %v560_v40 = vpop.f32.mrf.mxu3  ;;  %v476_v41 = vpop.f32.mrf.mxu0 }
  0xc2   :  { %v561_v42 = vadd.f32 %v560_v40, %v3449_v12  ;;  %v477_v43 = vadd.f32 %v476_v41, %v3438_v5  ;;  %v505_v44 = vpop.f32.mrf.mxu1 }
  0xc3   :  { %715 = vst [vmem:[#allocation2 + $0xd0] sm:$0xff] %v532_v39  ;;  %v506_v45 = vadd.f32 %v505_v44, %v3441_v6 }
  0xc4   :  { %716 = vst [vmem:[#allocation2 + $0xd8] sm:$0xff] %v561_v42 }
  0xc5   :  { %721 = vst [vmem:[#allocation2 + $0x100] sm:$0xff] %v477_v43 }
  0xc6   :  { %722 = vst [vmem:[#allocation2 + $0x108] sm:$0xff] %v506_v45 }
  0xc8   :  { %v534_v46 = vpop.f32.mrf.mxu2 }
  0xc9   :  { %v535_v47 = vadd.f32 %v534_v46, %v3446_v11  ;;  %v563_v48 = vpop.f32.mrf.mxu3  ;;  %v478_v49 = vpop.f32.mrf.mxu0 }
  0xca   :  { %v564_v50 = vadd.f32 %v563_v48, %v3449_v12  ;;  %v479_v51 = vadd.f32 %v478_v49, %v3438_v5  ;;  %v507_v52 = vpop.f32.mrf.mxu1 }
  0xcb   :  { %723 = vst [vmem:[#allocation2 + $0x110] sm:$0xff] %v535_v47  ;;  %v508_v53 = vadd.f32 %v507_v52, %v3441_v6  ;;  %v757_v52 = vld [vmem:[%s4395_s5] sm:$0xff] }
  0xcc   :  { %724 = vst [vmem:[#allocation2 + $0x118] sm:$0xff] %v564_v50  ;;  %v753_v50 = vld [vmem:[%s4394_s4] sm:$0xff] }
  0xcd   :  { %729 = vst [vmem:[#allocation2 + $0x140] sm:$0xff] %v479_v51  ;;  %v754_v51 = vld [vmem:[%s4394_s4 + $0x8] sm:$0xff]  ;;  %s3537_s4 = smov 0  }
  0xce   :  { %730 = vst [vmem:[#allocation2 + $0x148] sm:$0xff] %v508_v53  ;;  %v758_v53 = vld [vmem:[%s4395_s5 + $0x8] sm:$0xff] }
  0xcf   :  { %755 = vst [vmem:[#allocation3] sm:$0xff] %v753_v50 }
  0xd0   :  { %v536_v54 = vpop.f32.mrf.mxu2  ;;  %756 = vst [vmem:[#allocation3 + $0x8] sm:$0xff] %v754_v51 }
  0xd1   :  { %v537_v55 = vadd.f32 %v536_v54, %v3446_v11  ;;  %v565_v56 = vpop.f32.mrf.mxu3  ;;  %v481_v57 = vpop.f32.mrf.mxu0  ;;  %759 = vst [vmem:[#allocation4 + $0x8] sm:$0xff] %v757_v52 }
  0xd2   :  { %v566_v58 = vadd.f32 %v565_v56, %v3449_v12  ;;  %v482_v59 = vadd.f32 %v481_v57, %v3438_v5  ;;  %v510_v60 = vpop.f32.mrf.mxu1  ;;  %760 = vst [vmem:[#allocation4] sm:$0xff] %v758_v53 }
  0xd3   :  { %731 = vst [vmem:[#allocation2 + $0x150] sm:$0xff] %v537_v55  ;;  %v511_v61 = vadd.f32 %v510_v60, %v3441_v6 }
  0xd4   :  { %732 = vst [vmem:[#allocation2 + $0x158] sm:$0xff] %v566_v58 }
  0xd5   :  { %737 = vst [vmem:[#allocation2 + $0x180] sm:$0xff] %v482_v59 }
  0xd6   :  { %738 = vst [vmem:[#allocation2 + $0x188] sm:$0xff] %v511_v61 }
  0xd8   :  { %v539_v62 = vpop.f32.mrf.mxu2 }
  0xd9   :  { %v540_v63 = vadd.f32 %v539_v62, %v3446_v11  ;;  %v568_v0 = vpop.f32.mrf.mxu3  ;;  %v483_v1 = vpop.f32.mrf.mxu0 }
  0xda   :  { %v569_v2 = vadd.f32 %v568_v0, %v3449_v12  ;;  %v484_v3 = vadd.f32 %v483_v1, %v3438_v5  ;;  %v512_v4 = vpop.f32.mrf.mxu1 }
  0xdb   :  { %739 = vst [vmem:[#allocation2 + $0x190] sm:$0xff] %v540_v63  ;;  %v513_v7 = vadd.f32 %v512_v4, %v3441_v6 }
  0xdc   :  { %740 = vst [vmem:[#allocation2 + $0x198] sm:$0xff] %v569_v2 }
  0xdd   :  { %745 = vst [vmem:[#allocation2 + $0x1c0] sm:$0xff] %v484_v3 }
  0xde   :  { %746 = vst [vmem:[#allocation2 + $0x1c8] sm:$0xff] %v513_v7 }
  0xe0   :  { %v541_v10 = vpop.f32.mrf.mxu2 }
  0xe1   :  { %v542_v13 = vadd.f32 %v541_v10, %v3446_v11  ;;  %v570_v14 = vpop.f32.mrf.mxu3  ;;  %v582_v15 = vpop.f32.mrf.mxu0 }
  0xe2   :  { %v571_v5 = vadd.f32 %v570_v14, %v3449_v12  ;;  %v583_v16 = vadd.f32 %v582_v15, %v3480_v8  ;;  %v611_v17 = vpop.f32.mrf.mxu1 }
  0xe3   :  { %747 = vst [vmem:[#allocation2 + $0x1d0] sm:$0xff] %v542_v13  ;;  %v612_v6 = vadd.f32 %v611_v17, %v3483_v9 }
  0xe4   :  { %748 = vst [vmem:[#allocation2 + $0x1d8] sm:$0xff] %v571_v5 }
  0xe5   :  { %693 = vst [vmem:[#allocation2 + $0x20] sm:$0xff] %v583_v16 }
  0xe6   :  { %694 = vst [vmem:[#allocation2 + $0x28] sm:$0xff] %v612_v6 }
  0xe8   :  { %v640_v11 = vpop.f32.mrf.mxu2 }
  0xe9   :  { %v641_v20 = vadd.f32 %v640_v11, %v3490_v18  ;;  %v669_v21 = vpop.f32.mrf.mxu3  ;;  %v584_v12 = vpop.f32.mrf.mxu0 }
  0xea   :  { %v670_v22 = vadd.f32 %v669_v21, %v3493_v19  ;;  %v585_v23 = vadd.f32 %v584_v12, %v3480_v8  ;;  %v613_v24 = vpop.f32.mrf.mxu1 }
  0xeb   :  { %695 = vst [vmem:[#allocation2 + $0x30] sm:$0xff] %v641_v20  ;;  %v614_v25 = vadd.f32 %v613_v24, %v3483_v9 }
  0xec   :  { %696 = vst [vmem:[#allocation2 + $0x38] sm:$0xff] %v670_v22 }
  0xed   :  { %701 = vst [vmem:[#allocation2 + $0x60] sm:$0xff] %v585_v23 }
  0xee   :  { %702 = vst [vmem:[#allocation2 + $0x68] sm:$0xff] %v614_v25 }
  0xf0   :  { %v642_v26 = vpop.f32.mrf.mxu2 }
  0xf1   :  { %v643_v35 = vadd.f32 %v642_v26, %v3490_v18  ;;  %v671_v27 = vpop.f32.mrf.mxu3  ;;  %v587_v28 = vpop.f32.mrf.mxu0 }
  0xf2   :  { %v672_v29 = vadd.f32 %v671_v27, %v3493_v19  ;;  %v588_v30 = vadd.f32 %v587_v28, %v3480_v8  ;;  %v616_v31 = vpop.f32.mrf.mxu1 }
  0xf3   :  { %703 = vst [vmem:[#allocation2 + $0x70] sm:$0xff] %v643_v35  ;;  %v617_v32 = vadd.f32 %v616_v31, %v3483_v9 }
  0xf4   :  { %704 = vst [vmem:[#allocation2 + $0x78] sm:$0xff] %v672_v29 }
  0xf5   :  { %709 = vst [vmem:[#allocation2 + $0xa0] sm:$0xff] %v588_v30 }
  0xf6   :  { %710 = vst [vmem:[#allocation2 + $0xa8] sm:$0xff] %v617_v32 }
  0xf8   :  { %v645_v33 = vpop.f32.mrf.mxu2 }
  0xf9   :  { %v646_v34 = vadd.f32 %v645_v33, %v3490_v18  ;;  %v674_v36 = vpop.f32.mrf.mxu3  ;;  %v589_v37 = vpop.f32.mrf.mxu0 }
  0xfa   :  { %v675_v38 = vadd.f32 %v674_v36, %v3493_v19  ;;  %v590_v39 = vadd.f32 %v589_v37, %v3480_v8  ;;  %v618_v40 = vpop.f32.mrf.mxu1 }
  0xfb   :  { %711 = vst [vmem:[#allocation2 + $0xb0] sm:$0xff] %v646_v34  ;;  %v619_v41 = vadd.f32 %v618_v40, %v3483_v9 }
  0xfc   :  { %712 = vst [vmem:[#allocation2 + $0xb8] sm:$0xff] %v675_v38 }
  0xfd   :  { %717 = vst [vmem:[#allocation2 + $0xe0] sm:$0xff] %v590_v39 }
  0xfe   :  { %718 = vst [vmem:[#allocation2 + $0xe8] sm:$0xff] %v619_v41 }
 0x100   :  { %v647_v42 = vpop.f32.mrf.mxu2 }
 0x101   :  { %v648_v43 = vadd.f32 %v647_v42, %v3490_v18  ;;  %v676_v44 = vpop.f32.mrf.mxu3  ;;  %v592_v45 = vpop.f32.mrf.mxu0 }
 0x102   :  { %v677_v46 = vadd.f32 %v676_v44, %v3493_v19  ;;  %v593_v47 = vadd.f32 %v592_v45, %v3480_v8  ;;  %v621_v48 = vpop.f32.mrf.mxu1 }
 0x103   :  { %719 = vst [vmem:[#allocation2 + $0xf0] sm:$0xff] %v648_v43  ;;  %v622_v49 = vadd.f32 %v621_v48, %v3483_v9 }
 0x104   :  { %720 = vst [vmem:[#allocation2 + $0xf8] sm:$0xff] %v677_v46 }
 0x105   :  { %725 = vst [vmem:[#allocation2 + $0x120] sm:$0xff] %v593_v47 }
 0x106   :  { %726 = vst [vmem:[#allocation2 + $0x128] sm:$0xff] %v622_v49 }
 0x108   :  { %v650_v54 = vpop.f32.mrf.mxu2 }
 0x109   :  { %v651_v55 = vadd.f32 %v650_v54, %v3490_v18  ;;  %v679_v56 = vpop.f32.mrf.mxu3  ;;  %v594_v57 = vpop.f32.mrf.mxu0 }
 0x10a   :  { %v680_v58 = vadd.f32 %v679_v56, %v3493_v19  ;;  %v595_v59 = vadd.f32 %v594_v57, %v3480_v8  ;;  %v623_v60 = vpop.f32.mrf.mxu1 }
 0x10b   :  { %727 = vst [vmem:[#allocation2 + $0x130] sm:$0xff] %v651_v55  ;;  %v624_v61 = vadd.f32 %v623_v60, %v3483_v9 }
 0x10c   :  { %728 = vst [vmem:[#allocation2 + $0x138] sm:$0xff] %v680_v58 }
 0x10d   :  { %733 = vst [vmem:[#allocation2 + $0x160] sm:$0xff] %v595_v59 }
 0x10e   :  { %734 = vst [vmem:[#allocation2 + $0x168] sm:$0xff] %v624_v61 }
 0x110   :  { %v652_v62 = vpop.f32.mrf.mxu2 }
 0x111   :  { %v653_v63 = vadd.f32 %v652_v62, %v3490_v18  ;;  %v681_v0 = vpop.f32.mrf.mxu3  ;;  %v597_v1 = vpop.f32.mrf.mxu0 }
 0x112   :  { %v682_v2 = vadd.f32 %v681_v0, %v3493_v19  ;;  %v598_v3 = vadd.f32 %v597_v1, %v3480_v8  ;;  %v626_v4 = vpop.f32.mrf.mxu1 }
 0x113   :  { %735 = vst [vmem:[#allocation2 + $0x170] sm:$0xff] %v653_v63  ;;  %v627_v7 = vadd.f32 %v626_v4, %v3483_v9 }
 0x114   :  { %736 = vst [vmem:[#allocation2 + $0x178] sm:$0xff] %v682_v2 }
 0x115   :  { %741 = vst [vmem:[#allocation2 + $0x1a0] sm:$0xff] %v598_v3 }
 0x116   :  { %742 = vst [vmem:[#allocation2 + $0x1a8] sm:$0xff] %v627_v7 }
 0x118   :  { %v655_v10 = vpop.f32.mrf.mxu2 }
 0x119   :  { %v656_v13 = vadd.f32 %v655_v10, %v3490_v18  ;;  %v684_v14 = vpop.f32.mrf.mxu3  ;;  %v599_v15 = vpop.f32.mrf.mxu0 }
 0x11a   :  { %v685_v5 = vadd.f32 %v684_v14, %v3493_v19  ;;  %v600_v16 = vadd.f32 %v599_v15, %v3480_v8  ;;  %v628_v17 = vpop.f32.mrf.mxu1 }
 0x11b   :  { %743 = vst [vmem:[#allocation2 + $0x1b0] sm:$0xff] %v656_v13  ;;  %v629_v6 = vadd.f32 %v628_v17, %v3483_v9 }
 0x11c   :  { %744 = vst [vmem:[#allocation2 + $0x1b8] sm:$0xff] %v685_v5 }
 0x11d   :  { %749 = vst [vmem:[#allocation2 + $0x1e0] sm:$0xff] %v600_v16 }
 0x11e   :  { %750 = vst [vmem:[#allocation2 + $0x1e8] sm:$0xff] %v629_v6 }
 0x120   :  { %v657_v11 = vpop.f32.mrf.mxu2 }
 0x121   :  { %v658_v20 = vadd.f32 %v657_v11, %v3490_v18  ;;  %v686_v21 = vpop.f32.mrf.mxu3 }
 0x122   :  { %v687_v12 = vadd.f32 %v686_v21, %v3493_v19 }
 0x123   :  { %751 = vst [vmem:[#allocation2 + $0x1f0] sm:$0xff] %v658_v20 }
 0x124   :  { %752 = vst [vmem:[#allocation2 + $0x1f8] sm:$0xff] %v687_v12 }
 0x125 LB: > { %v2433_v8 = vld [vmem:[%s4390_s2 + $0x1c0] sm:$0xf]  ;;  %v2857_v23 = vld [vmem:[%s4390_s2 + $0x1c4] sm:$0xf]  ;;  %s2205_s11 = sshll.u32 %s2979_s4, 3  ;;  %s768_s15 = ssub.s32 7, %s2979_s4  ;;  %s2979_s4 = sphi %s3537_s4, %s766_s4  }
 0x126   : > { %v2861_v9 = vld [vmem:[%s4390_s2 + $0x1dc] sm:$0xf0]  ;;  %v2435_v24 = vld [vmem:[%s4390_s2 + $0x1e0] sm:$0xf0]  ;;  %s4331_s12 = sshra.s32 %s2205_s11, 3  ;;  %s4354_s16 = sshll.u32 %s768_s15, 3 }
 0x127   : > { %v2689_v18 = vld [vmem:[%s4390_s2 + $0x3c0] sm:$0xf]  ;;  %v2434_v19 = vor.u32 %v2861_v9, %v2433_v8  ;;  %v2438_v26 = vor.u32 %v2857_v23, %v2435_v24  ;;  %v2921_v35 = vld [vmem:[%s4390_s2 + $0x3c4] sm:$0xf]  ;;  %s2929_s13 = sshll.u32 %s4331_s12, 6  ;;  %s1763_s17 = sshra.s32 %s4354_s16, 3 }
 0x128   : > { %v2925_v22 = vld [vmem:[%s4390_s2 + $0x3dc] sm:$0xf0]  ;;  %v2691_v27 = vld [vmem:[%s4390_s2 + $0x3e0] sm:$0xf0]  ;;  %s4334_s14 = scalar_lea.vmem [#allocation2], %s2929_s13  ;;  %s2930_s18 = sshll.u32 %s1763_s17, 6 }
 0x129   : > { %v2690_v25 = vor.u32 %v2925_v22, %v2689_v18  ;;  %v2401_v28 = vld [vmem:[%s4390_s2 + $0x180] sm:$0xf]  ;;  %1542 = vmatpush.bf16.msra.mxu0 %v2434_v19  ;;  %v2694_v29 = vor.u32 %v2921_v35, %v2691_v27  ;;  %1568 = vmatpush.bf16.msra.mxu2 %v2438_v26  ;;  %v2849_v36 = vld [vmem:[%s4390_s2 + $0x184] sm:$0xf]  ;;  %s2931_s19 = sshll.u32 %s4331_s12, 4  ;;  %s4360_s20 = scalar_lea.vmem [#allocation2], %s2930_s18 }
 0x12a   : > { %v2853_v30 = vld [vmem:[%s4390_s2 + $0x19c] sm:$0xf0]  ;;  %v2403_v37 = vld [vmem:[%s4390_s2 + $0x1a0] sm:$0xf0]  ;;  %s1910_s3 = scalar_lea.vmem %s4391_s6, %s2931_s19  ;;  %s2932_s21 = sshll.u32 %s1763_s17, 4 }
 0x12b   : > { %v2657_v31 = vld [vmem:[%s4390_s2 + $0x380] sm:$0xf]  ;;  %1555 = vmatpush.bf16.msra.mxu1 %v2690_v25  ;;  %v2402_v33 = vor.u32 %v2853_v30, %v2401_v28  ;;  %v2913_v38 = vld [vmem:[%s4390_s2 + $0x384] sm:$0xf]  ;;  %1581 = vmatpush.bf16.msra.mxu3 %v2694_v29  ;;  %v2406_v39 = vor.u32 %v2849_v36, %v2403_v37  ;;  %s1914_s24 = scalar_lea.vmem %s4391_s6, %s2932_s21  ;;  %s766_s4 = sadd.s32 1, %s2979_s4  }
 0x12c   : > { %v2917_v32 = vld [vmem:[%s4390_s2 + $0x39c] sm:$0xf0]  ;;  %v2659_v40 = vld [vmem:[%s4390_s2 + $0x3a0] sm:$0xf0]  ;;  %p763_p0 = scmp.ge.s32.totalorder %s766_s4, 8  }
 0x12d   : > { %v2658_v34 = vor.u32 %v2917_v32, %v2657_v31  ;;  %v2369_v41 = vld [vmem:[%s4390_s2 + $0x140] sm:$0xf]  ;;  %v2662_v43 = vor.u32 %v2913_v38, %v2659_v40  ;;  %v2841_v46 = vld [vmem:[%s4390_s2 + $0x144] sm:$0xf]  ;;  %1543 = vmatpush.bf16.msra.mxu0 %v2402_v33  ;;  %1569 = vmatpush.bf16.msra.mxu2 %v2406_v39 }
 0x12e   : > { %v2845_v42 = vld [vmem:[%s4390_s2 + $0x15c] sm:$0xf0]  ;;  %v2371_v48 = vld [vmem:[%s4390_s2 + $0x160] sm:$0xf0] }
 0x12f   : > { %v2625_v44 = vld [vmem:[%s4390_s2 + $0x340] sm:$0xf]  ;;  %v2370_v47 = vor.u32 %v2845_v42, %v2369_v41  ;;  %v2905_v49 = vld [vmem:[%s4390_s2 + $0x344] sm:$0xf]  ;;  %1556 = vmatpush.bf16.msra.mxu1 %v2658_v34  ;;  %v2374_v52 = vor.u32 %v2841_v46, %v2371_v48  ;;  %1582 = vmatpush.bf16.msra.mxu3 %v2662_v43  ;;  %v2441_v46 = vld [vmem:[%s4390_s2 + $0x1c8] sm:$0xf] }
 0x130   : > { %v2909_v45 = vld [vmem:[%s4390_s2 + $0x35c] sm:$0xf0]  ;;  %v2627_v50 = vld [vmem:[%s4390_s2 + $0x360] sm:$0xf0]  ;;  %v2697_v48 = vld [vmem:[%s4390_s2 + $0x3c8] sm:$0xf] }
 0x131   : > { %v2626_v51 = vor.u32 %v2909_v45, %v2625_v44  ;;  %v2337_v53 = vld [vmem:[%s4390_s2 + $0x100] sm:$0xf]  ;;  %v2630_v56 = vor.u32 %v2905_v49, %v2627_v50  ;;  %v2833_v58 = vld [vmem:[%s4390_s2 + $0x104] sm:$0xf]  ;;  %1544 = vmatpush.bf16.msra.mxu0 %v2370_v47  ;;  %1570 = vmatpush.bf16.msra.mxu2 %v2374_v52  ;;  %v2862_v47 = vld [vmem:[%s4390_s2 + $0x1e4] sm:$0xf0] }
 0x132   : > { %v2837_v54 = vld [vmem:[%s4390_s2 + $0x11c] sm:$0xf0]  ;;  %v2339_v59 = vld [vmem:[%s4390_s2 + $0x120] sm:$0xf0]  ;;  %v2926_v50 = vld [vmem:[%s4390_s2 + $0x3e4] sm:$0xf0] }
 0x133   : > { %v2593_v55 = vld [vmem:[%s4390_s2 + $0x300] sm:$0xf]  ;;  %v2897_v60 = vld [vmem:[%s4390_s2 + $0x304] sm:$0xf]  ;;  %v2338_v62 = vor.u32 %v2837_v54, %v2337_v53  ;;  %1557 = vmatpush.bf16.msra.mxu1 %v2626_v51  ;;  %v2342_v0 = vor.u32 %v2833_v58, %v2339_v59  ;;  %1583 = vmatpush.bf16.msra.mxu3 %v2630_v56  ;;  %v2858_v51 = vld [vmem:[%s4390_s2 + $0x1cc] sm:$0xf]  ;;  %v2442_v58 = vor.u32 %v2862_v47, %v2441_v46 }
 0x134   : > { %v2901_v57 = vld [vmem:[%s4390_s2 + $0x31c] sm:$0xf0]  ;;  %v2595_v61 = vld [vmem:[%s4390_s2 + $0x320] sm:$0xf0]  ;;  %v2443_v52 = vld [vmem:[%s4390_s2 + $0x1e8] sm:$0xf0] }
 0x135   : > { %v2594_v63 = vor.u32 %v2901_v57, %v2593_v55  ;;  %v2305_v1 = vld [vmem:[%s4390_s2 + $0xc0] sm:$0xf]  ;;  %v2598_v4 = vor.u32 %v2897_v60, %v2595_v61  ;;  %v2825_v10 = vld [vmem:[%s4390_s2 + $0xc4] sm:$0xf]  ;;  %1545 = vmatpush.bf16.msra.mxu0 %v2338_v62  ;;  %1571 = vmatpush.bf16.msra.mxu2 %v2342_v0  ;;  %v2922_v55 = vld [vmem:[%s4390_s2 + $0x3cc] sm:$0xf]  ;;  %v2698_v61 = vor.u32 %v2926_v50, %v2697_v48 }
 0x136   : > { %v2829_v2 = vld [vmem:[%s4390_s2 + $0xdc] sm:$0xf0]  ;;  %v2307_v13 = vld [vmem:[%s4390_s2 + $0xe0] sm:$0xf0]  ;;  %v2699_v56 = vld [vmem:[%s4390_s2 + $0x3e8] sm:$0xf0]  ;;  %v2446_v62 = vor.u32 %v2858_v51, %v2443_v52 }
 0x137   : > { %v2561_v3 = vld [vmem:[%s4390_s2 + $0x2c0] sm:$0xf]  ;;  %v2889_v14 = vld [vmem:[%s4390_s2 + $0x2c4] sm:$0xf]  ;;  %v2306_v5 = vor.u32 %v2829_v2, %v2305_v1  ;;  %1558 = vmatpush.bf16.msra.mxu1 %v2594_v63  ;;  %v2310_v17 = vor.u32 %v2825_v10, %v2307_v13  ;;  %1584 = vmatpush.bf16.msra.mxu3 %v2598_v4  ;;  %v771_v60 = vld [vmem:[#allocation3 + $0x8] sm:$0xff]  ;;  %v2702_v2 = vor.u32 %v2922_v55, %v2699_v56 }
 0x138   : > { %v2893_v7 = vld [vmem:[%s4390_s2 + $0x2dc] sm:$0xf0]  ;;  %v2563_v15 = vld [vmem:[%s4390_s2 + $0x2e0] sm:$0xf0]  ;;  %v2409_v63 = vld [vmem:[%s4390_s2 + $0x188] sm:$0xf] }
 0x139   : > { %v2562_v16 = vor.u32 %v2893_v7, %v2561_v3  ;;  %v2273_v6 = vld [vmem:[%s4390_s2 + $0x80] sm:$0xf]  ;;  %v2566_v21 = vor.u32 %v2889_v14, %v2563_v15  ;;  %v2817_v8 = vld [vmem:[%s4390_s2 + $0x84] sm:$0xf]  ;;  %1546 = vmatpush.bf16.msra.mxu0 %v2306_v5  ;;  %1572 = vmatpush.bf16.msra.mxu2 %v2310_v17  ;;  %v2854_v0 = vld [vmem:[%s4390_s2 + $0x1a4] sm:$0xf0]  ;;  %v3784_v15 = vpack.c.bf16 %v771_v60, %v771_v60 }
 0x13a   : > { %v2821_v11 = vld [vmem:[%s4390_s2 + $0x9c] sm:$0xf0]  ;;  %v2275_v9 = vld [vmem:[%s4390_s2 + $0xa0] sm:$0xf0]  ;;  %v2665_v1 = vld [vmem:[%s4390_s2 + $0x388] sm:$0xf]  ;;  %v2410_v5 = vor.u32 %v2854_v0, %v2409_v63 }
 0x13b   : > { %v2529_v20 = vld [vmem:[%s4390_s2 + $0x280] sm:$0xf]  ;;  %v2881_v18 = vld [vmem:[%s4390_s2 + $0x284] sm:$0xf]  ;;  %v2274_v22 = vor.u32 %v2821_v11, %v2273_v6  ;;  %1559 = vmatpush.bf16.msra.mxu1 %v2562_v16  ;;  %v2278_v24 = vor.u32 %v2817_v8, %v2275_v9  ;;  %1585 = vmatpush.bf16.msra.mxu3 %v2566_v21  ;;  %v2918_v3 = vld [vmem:[%s4390_s2 + $0x3a4] sm:$0xf0] }
 0x13c   : > { %v2885_v12 = vld [vmem:[%s4390_s2 + $0x29c] sm:$0xf0]  ;;  %v2531_v19 = vld [vmem:[%s4390_s2 + $0x2a0] sm:$0xf0]  ;;  %v2850_v4 = vld [vmem:[%s4390_s2 + $0x18c] sm:$0xf]  ;;  %v2666_v16 = vor.u32 %v2918_v3, %v2665_v1 }
 0x13d   : > { %v2530_v23 = vor.u32 %v2885_v12, %v2529_v20  ;;  %v2241_v25 = vld [vmem:[%s4390_s2 + $0x40] sm:$0xf]  ;;  %v2534_v27 = vor.u32 %v2881_v18, %v2531_v19  ;;  %v2809_v29 = vld [vmem:[%s4390_s2 + $0x44] sm:$0xf]  ;;  %1547 = vmatpush.bf16.msra.mxu0 %v2274_v22  ;;  %1573 = vmatpush.bf16.msra.mxu2 %v2278_v24  ;;  %v2411_v7 = vld [vmem:[%s4390_s2 + $0x1a8] sm:$0xf0] }
 0x13e   : > { %v2813_v26 = vld [vmem:[%s4390_s2 + $0x5c] sm:$0xf0]  ;;  %v2243_v30 = vld [vmem:[%s4390_s2 + $0x60] sm:$0xf0]  ;;  %v2914_v13 = vld [vmem:[%s4390_s2 + $0x38c] sm:$0xf]  ;;  %v2414_v17 = vor.u32 %v2850_v4, %v2411_v7 }
 0x13f   : > { %v2497_v35 = vld [vmem:[%s4390_s2 + $0x240] sm:$0xf]  ;;  %v2873_v31 = vld [vmem:[%s4390_s2 + $0x244] sm:$0xf]  ;;  %v2242_v33 = vor.u32 %v2813_v26, %v2241_v25  ;;  %1560 = vmatpush.bf16.msra.mxu1 %v2530_v23  ;;  %v2246_v38 = vor.u32 %v2809_v29, %v2243_v30  ;;  %1586 = vmatpush.bf16.msra.mxu3 %v2534_v27  ;;  %v2667_v14 = vld [vmem:[%s4390_s2 + $0x3a8] sm:$0xf0] }
 0x140   : > { %v2877_v28 = vld [vmem:[%s4390_s2 + $0x25c] sm:$0xf0]  ;;  %v2499_v32 = vld [vmem:[%s4390_s2 + $0x260] sm:$0xf0]  ;;  %v2377_v6 = vld [vmem:[%s4390_s2 + $0x148] sm:$0xf]  ;;  %v2670_v21 = vor.u32 %v2914_v13, %v2667_v14 }
 0x141   : > { %v2209_v34 = vld [vmem:[%s4390_s2] sm:$0xf]  ;;  %v2498_v37 = vor.u32 %v2877_v28, %v2497_v35  ;;  %v2801_v41 = vld [vmem:[%s4390_s2 + $0x4] sm:$0xf]  ;;  %v2502_v42 = vor.u32 %v2873_v31, %v2499_v32  ;;  %1548 = vmatpush.bf16.msra.mxu0 %v2242_v33  ;;  %1574 = vmatpush.bf16.msra.mxu2 %v2246_v38  ;;  %v2846_v11 = vld [vmem:[%s4390_s2 + $0x164] sm:$0xf0] }
 0x142   : > { %v2805_v36 = vld [vmem:[%s4390_s2 + $0x1c] sm:$0xf0]  ;;  %v2211_v43 = vld [vmem:[%s4390_s2 + $0x20] sm:$0xf0]  ;;  %v2633_v20 = vld [vmem:[%s4390_s2 + $0x348] sm:$0xf]  ;;  %v2378_v22 = vor.u32 %v2846_v11, %v2377_v6 }
 0x143   : > { %v2465_v39 = vld [vmem:[%s4390_s2 + $0x200] sm:$0xf]  ;;  %v2865_v44 = vld [vmem:[%s4390_s2 + $0x204] sm:$0xf]  ;;  %v2210_v49 = vor.u32 %v2805_v36, %v2209_v34  ;;  %1561 = vmatpush.bf16.msra.mxu1 %v2498_v37  ;;  %v2214_v54 = vor.u32 %v2801_v41, %v2211_v43  ;;  %1587 = vmatpush.bf16.msra.mxu3 %v2502_v42  ;;  %v2910_v12 = vld [vmem:[%s4390_s2 + $0x364] sm:$0xf0] }
 0x144   : > { %v2869_v40 = vld [vmem:[%s4390_s2 + $0x21c] sm:$0xf0]  ;;  %v2467_v45 = vld [vmem:[%s4390_s2 + $0x220] sm:$0xf0]  ;;  %v2842_v8 = vld [vmem:[%s4390_s2 + $0x14c] sm:$0xf]  ;;  %v2634_v23 = vor.u32 %v2910_v12, %v2633_v20 }
 0x145   : > { %v2466_v53 = vor.u32 %v2869_v40, %v2465_v39  ;;  %v2470_v57 = vor.u32 %v2865_v44, %v2467_v45  ;;  %v770_v59 = vld [vmem:[#allocation3] sm:$0xff]  ;;  %1549 = vmatpush.bf16.msra.mxu0 %v2210_v49  ;;  %1575 = vmatpush.bf16.msra.mxu2 %v2214_v54  ;;  %v2379_v9 = vld [vmem:[%s4390_s2 + $0x168] sm:$0xf0]  ;;  %v2345_v25 = vld [vmem:[%s4390_s2 + $0x108] sm:$0xf] }
 0x146   : > { %v3776_v10 = vpack.c.bf16 %v770_v59, %v770_v59  ;;  %v2906_v18 = vld [vmem:[%s4390_s2 + $0x34c] sm:$0xf]  ;;  %v2382_v24 = vor.u32 %v2842_v8, %v2379_v9  ;;  %v2838_v26 = vld [vmem:[%s4390_s2 + $0x124] sm:$0xf0] }
 0x147   : > { %1562 = vmatpush.bf16.msra.mxu1 %v2466_v53  ;;  %1588 = vmatpush.bf16.msra.mxu3 %v2470_v57  ;;  %v2635_v19 = vld [vmem:[%s4390_s2 + $0x368] sm:$0xf0]  ;;  %v2601_v35 = vld [vmem:[%s4390_s2 + $0x308] sm:$0xf]  ;;  %v2346_v33 = vor.u32 %v2838_v26, %v2345_v25  ;;  %v2859_v25 = vld [vmem:[%s4390_s2 + $0x1d4] sm:$0xf] }
 0x148   : > { %1576 = vmatmul.bf16.vlgmr.msra.gmra.mxu2 %v3776_v10  ;;  %1550 = vmatmul.bf16.vlgmr.msra.gmra.mxu0 %v3776_v10  ;;  %v2638_v27 = vor.u32 %v2906_v18, %v2635_v19  ;;  %v2902_v28 = vld [vmem:[%s4390_s2 + $0x324] sm:$0xf0]  ;;  %v2834_v29 = vld [vmem:[%s4390_s2 + $0x10c] sm:$0xf]  ;;  %v2449_v18 = vld [vmem:[%s4390_s2 + $0x1d0] sm:$0xf] }
 0x149   : > { %1594 = vmatpush.bf16.msrb.mxu0 %v2442_v58  ;;  %1620 = vmatpush.bf16.msrb.mxu2 %v2446_v62  ;;  %v2347_v30 = vld [vmem:[%s4390_s2 + $0x128] sm:$0xf0]  ;;  %v2602_v34 = vor.u32 %v2902_v28, %v2601_v35  ;;  %v2313_v37 = vld [vmem:[%s4390_s2 + $0xc8] sm:$0xf]  ;;  %v2863_v19 = vld [vmem:[%s4390_s2 + $0x1ec] sm:$0xf0] }
 0x14a   : > { %1589 = vmatmul.bf16.vlgmr.msra.gmra.mxu3 %v3784_v15  ;;  %1563 = vmatmul.bf16.vlgmr.msra.gmra.mxu1 %v3784_v15  ;;  %v2898_v31 = vld [vmem:[%s4390_s2 + $0x30c] sm:$0xf]  ;;  %v2350_v36 = vor.u32 %v2834_v29, %v2347_v30  ;;  %v2830_v38 = vld [vmem:[%s4390_s2 + $0xe4] sm:$0xf0]  ;;  %v2451_v26 = vld [vmem:[%s4390_s2 + $0x1f0] sm:$0xf0] }
 0x14b   : > { %1607 = vmatpush.bf16.msrb.mxu1 %v2698_v61  ;;  %1633 = vmatpush.bf16.msrb.mxu3 %v2702_v2  ;;  %v2603_v32 = vld [vmem:[%s4390_s2 + $0x328] sm:$0xf0]  ;;  %v2569_v39 = vld [vmem:[%s4390_s2 + $0x2c8] sm:$0xf]  ;;  %v2314_v46 = vor.u32 %v2830_v38, %v2313_v37  ;;  %v2923_v28 = vld [vmem:[%s4390_s2 + $0x3d4] sm:$0xf] }
 0x14c   : > { %v2606_v40 = vor.u32 %v2898_v31, %v2603_v32  ;;  %v2894_v41 = vld [vmem:[%s4390_s2 + $0x2e4] sm:$0xf0]  ;;  %v2826_v42 = vld [vmem:[%s4390_s2 + $0xcc] sm:$0xf]  ;;  %v2707_v29 = vld [vmem:[%s4390_s2 + $0x3f0] sm:$0xf0]  ;;  %v2450_v31 = vor.u32 %v2863_v19, %v2449_v18 }
 0x14d   : > { %1595 = vmatpush.bf16.msrb.mxu0 %v2410_v5  ;;  %1621 = vmatpush.bf16.msrb.mxu2 %v2414_v17  ;;  %v2315_v43 = vld [vmem:[%s4390_s2 + $0xe8] sm:$0xf0]  ;;  %v2570_v47 = vor.u32 %v2894_v41, %v2569_v39  ;;  %v2281_v49 = vld [vmem:[%s4390_s2 + $0x88] sm:$0xf]  ;;  %v2673_v37 = vld [vmem:[%s4390_s2 + $0x390] sm:$0xf]  ;;  %v2710_v38 = vor.u32 %v2923_v28, %v2707_v29 }
 0x14e   : > { %v2890_v44 = vld [vmem:[%s4390_s2 + $0x2cc] sm:$0xf]  ;;  %v2318_v48 = vor.u32 %v2826_v42, %v2315_v43  ;;  %v2822_v50 = vld [vmem:[%s4390_s2 + $0xa4] sm:$0xf0]  ;;  %v2919_v39 = vld [vmem:[%s4390_s2 + $0x3ac] sm:$0xf0] }
 0x14f   : > { %1608 = vmatpush.bf16.msrb.mxu1 %v2666_v16  ;;  %1634 = vmatpush.bf16.msrb.mxu3 %v2670_v21  ;;  %v2571_v45 = vld [vmem:[%s4390_s2 + $0x2e8] sm:$0xf0]  ;;  %v2537_v51 = vld [vmem:[%s4390_s2 + $0x288] sm:$0xf]  ;;  %v2282_v58 = vor.u32 %v2822_v50, %v2281_v49  ;;  %v2419_v41 = vld [vmem:[%s4390_s2 + $0x1b0] sm:$0xf0] }
 0x150   : > { %v2574_v52 = vor.u32 %v2890_v44, %v2571_v45  ;;  %v2886_v53 = vld [vmem:[%s4390_s2 + $0x2a4] sm:$0xf0]  ;;  %v2818_v54 = vld [vmem:[%s4390_s2 + $0x8c] sm:$0xf]  ;;  %v2915_v42 = vld [vmem:[%s4390_s2 + $0x394] sm:$0xf]  ;;  %v2674_v45 = vor.u32 %v2919_v39, %v2673_v37 }
 0x151   : > { %1596 = vmatpush.bf16.msrb.mxu0 %v2378_v22  ;;  %1622 = vmatpush.bf16.msrb.mxu2 %v2382_v24  ;;  %v2283_v55 = vld [vmem:[%s4390_s2 + $0xa8] sm:$0xf0]  ;;  %v2538_v59 = vor.u32 %v2886_v53, %v2537_v51  ;;  %v2249_v61 = vld [vmem:[%s4390_s2 + $0x48] sm:$0xf]  ;;  %v2705_v22 = vld [vmem:[%s4390_s2 + $0x3d0] sm:$0xf] }
 0x152   : > { %v2882_v56 = vld [vmem:[%s4390_s2 + $0x28c] sm:$0xf]  ;;  %v2286_v60 = vor.u32 %v2818_v54, %v2283_v55  ;;  %v2814_v62 = vld [vmem:[%s4390_s2 + $0x64] sm:$0xf0]  ;;  %v2927_v24 = vld [vmem:[%s4390_s2 + $0x3ec] sm:$0xf0] }
 0x153   : > { %1609 = vmatpush.bf16.msrb.mxu1 %v2634_v23  ;;  %1635 = vmatpush.bf16.msrb.mxu3 %v2638_v27  ;;  %v2539_v57 = vld [vmem:[%s4390_s2 + $0x2a8] sm:$0xf0]  ;;  %v2505_v63 = vld [vmem:[%s4390_s2 + $0x248] sm:$0xf]  ;;  %v2250_v13 = vor.u32 %v2814_v62, %v2249_v61  ;;  %v2706_v32 = vor.u32 %v2927_v24, %v2705_v22  ;;  %v2675_v43 = vld [vmem:[%s4390_s2 + $0x3b0] sm:$0xf0] }
 0x154   : > { %v2542_v0 = vor.u32 %v2882_v56, %v2539_v57  ;;  %v2878_v1 = vld [vmem:[%s4390_s2 + $0x264] sm:$0xf0]  ;;  %v2810_v2 = vld [vmem:[%s4390_s2 + $0x4c] sm:$0xf]  ;;  %v2641_v49 = vld [vmem:[%s4390_s2 + $0x350] sm:$0xf]  ;;  %v2678_v50 = vor.u32 %v2915_v42, %v2675_v43 }
 0x155   : > { %1597 = vmatpush.bf16.msrb.mxu0 %v2346_v33  ;;  %1623 = vmatpush.bf16.msrb.mxu2 %v2350_v36  ;;  %v2251_v3 = vld [vmem:[%s4390_s2 + $0x68] sm:$0xf0]  ;;  %v2217_v14 = vld [vmem:[%s4390_s2 + $0x8] sm:$0xf]  ;;  %v2506_v16 = vor.u32 %v2878_v1, %v2505_v63  ;;  %v2454_v33 = vor.u32 %v2859_v25, %v2451_v26  ;;  %v2855_v36 = vld [vmem:[%s4390_s2 + $0x1ac] sm:$0xf0] }
 0x156   : > { %v2874_v4 = vld [vmem:[%s4390_s2 + $0x24c] sm:$0xf]  ;;  %v2806_v5 = vld [vmem:[%s4390_s2 + $0x24] sm:$0xf0]  ;;  %v2254_v17 = vor.u32 %v2810_v2, %v2251_v3  ;;  %v2911_v51 = vld [vmem:[%s4390_s2 + $0x36c] sm:$0xf0] }
 0x157   : > { %1610 = vmatpush.bf16.msrb.mxu1 %v2602_v34  ;;  %1636 = vmatpush.bf16.msrb.mxu3 %v2606_v40  ;;  %v2507_v7 = vld [vmem:[%s4390_s2 + $0x268] sm:$0xf0]  ;;  %v2473_v6 = vld [vmem:[%s4390_s2 + $0x208] sm:$0xf]  ;;  %v2218_v23 = vor.u32 %v2806_v5, %v2217_v14  ;;  %v2417_v34 = vld [vmem:[%s4390_s2 + $0x190] sm:$0xf]  ;;  %v2642_v57 = vor.u32 %v2911_v51, %v2641_v49 }
 0x158   : > { %v2870_v11 = vld [vmem:[%s4390_s2 + $0x224] sm:$0xf0]  ;;  %v2802_v20 = vld [vmem:[%s4390_s2 + $0xc] sm:$0xf]  ;;  %v2510_v21 = vor.u32 %v2874_v4, %v2507_v7  ;;  %v2851_v40 = vld [vmem:[%s4390_s2 + $0x194] sm:$0xf]  ;;  %v2418_v44 = vor.u32 %v2855_v36, %v2417_v34 }
 0x159   : > { %1598 = vmatpush.bf16.msrb.mxu0 %v2314_v46  ;;  %1624 = vmatpush.bf16.msrb.mxu2 %v2318_v48  ;;  %v2219_v12 = vld [vmem:[%s4390_s2 + $0x28] sm:$0xf0]  ;;  %v2474_v35 = vor.u32 %v2870_v11, %v2473_v6  ;;  %v2422_v46 = vor.u32 %v2851_v40, %v2419_v41  ;;  %v2847_v48 = vld [vmem:[%s4390_s2 + $0x16c] sm:$0xf0]  ;;  %v2387_v53 = vld [vmem:[%s4390_s2 + $0x170] sm:$0xf0] }
 0x15a   : > { %v2866_v8 = vld [vmem:[%s4390_s2 + $0x20c] sm:$0xf]  ;;  %v2222_v27 = vor.u32 %v2802_v20, %v2219_v12  ;;  %v2907_v54 = vld [vmem:[%s4390_s2 + $0x354] sm:$0xf]  ;;  %v2609_v61 = vld [vmem:[%s4390_s2 + $0x310] sm:$0xf] }
 0x15b   : > { %1611 = vmatpush.bf16.msrb.mxu1 %v2570_v47  ;;  %1637 = vmatpush.bf16.msrb.mxu3 %v2574_v52  ;;  %v2475_v9 = vld [vmem:[%s4390_s2 + $0x228] sm:$0xf0]  ;;  %v2385_v47 = vld [vmem:[%s4390_s2 + $0x150] sm:$0xf]  ;;  %v2843_v52 = vld [vmem:[%s4390_s2 + $0x154] sm:$0xf] }
 0x15c   : > { %v2478_v30 = vor.u32 %v2866_v8, %v2475_v9  ;;  %v2643_v55 = vld [vmem:[%s4390_s2 + $0x370] sm:$0xf0]  ;;  %v2386_v56 = vor.u32 %v2847_v48, %v2385_v47  ;;  %v2903_v63 = vld [vmem:[%s4390_s2 + $0x32c] sm:$0xf0] }
 0x15d   : > { %1599 = vmatpush.bf16.msrb.mxu0 %v2282_v58  ;;  %1625 = vmatpush.bf16.msrb.mxu2 %v2286_v60  ;;  %v2390_v58 = vor.u32 %v2843_v52, %v2387_v53  ;;  %v2839_v60 = vld [vmem:[%s4390_s2 + $0x12c] sm:$0xf0]  ;;  %v2646_v62 = vor.u32 %v2907_v54, %v2643_v55  ;;  %v2355_v1 = vld [vmem:[%s4390_s2 + $0x130] sm:$0xf0]  ;;  %v2610_v7 = vor.u32 %v2903_v63, %v2609_v61  ;;  %v2457_v54 = vld [vmem:[%s4390_s2 + $0x1d8] sm:$0xf] }
 0x15e   : > { %v2899_v2 = vld [vmem:[%s4390_s2 + $0x314] sm:$0xf]  ;;  %v2321_v14 = vld [vmem:[%s4390_s2 + $0xd0] sm:$0xf]  ;;  %v2864_v55 = vld [vmem:[%s4390_s2 + $0x1f4] sm:$0xf0] }
 0x15f   : > { %1612 = vmatpush.bf16.msrb.mxu1 %v2538_v59  ;;  %1638 = vmatpush.bf16.msrb.mxu3 %v2542_v0  ;;  %v2353_v59 = vld [vmem:[%s4390_s2 + $0x110] sm:$0xf]  ;;  %v2835_v0 = vld [vmem:[%s4390_s2 + $0x114] sm:$0xf]  ;;  %v2924_v63 = vld [vmem:[%s4390_s2 + $0x3dc] sm:$0xf] }
 0x160   : > { %v2611_v3 = vld [vmem:[%s4390_s2 + $0x330] sm:$0xf0]  ;;  %v2354_v4 = vor.u32 %v2839_v60, %v2353_v59  ;;  %v2831_v5 = vld [vmem:[%s4390_s2 + $0xec] sm:$0xf0]  ;;  %v2860_v59 = vld [vmem:[%s4390_s2 + $0x1dc] sm:$0xf] }
 0x161   : > { %1600 = vmatpush.bf16.msrb.mxu0 %v2250_v13  ;;  %1626 = vmatpush.bf16.msrb.mxu2 %v2254_v17  ;;  %v2358_v13 = vor.u32 %v2835_v0, %v2355_v1  ;;  %v2614_v17 = vor.u32 %v2899_v2, %v2611_v3  ;;  %v2895_v6 = vld [vmem:[%s4390_s2 + $0x2ec] sm:$0xf0]  ;;  %v2827_v11 = vld [vmem:[%s4390_s2 + $0xd4] sm:$0xf]  ;;  %v2322_v8 = vor.u32 %v2831_v5, %v2321_v14  ;;  %v2459_v60 = vld [vmem:[%s4390_s2 + $0x1f8] sm:$0xf0] }
 0x162   : > { %v2323_v20 = vld [vmem:[%s4390_s2 + $0xf0] sm:$0xf0]  ;;  %v2289_v19 = vld [vmem:[%s4390_s2 + $0x90] sm:$0xf]  ;;  %v2715_v0 = vld [vmem:[%s4390_s2 + $0x3f8] sm:$0xf0]  ;;  %v2458_v2 = vor.u32 %v2864_v55, %v2457_v54 }
 0x163   : > { %1613 = vmatpush.bf16.msrb.mxu1 %v2506_v16  ;;  %1639 = vmatpush.bf16.msrb.mxu3 %v2510_v21  ;;  %v2577_v16 = vld [vmem:[%s4390_s2 + $0x2d0] sm:$0xf]  ;;  %v2891_v21 = vld [vmem:[%s4390_s2 + $0x2d4] sm:$0xf]  ;;  %v2326_v18 = vor.u32 %v2827_v11, %v2323_v20  ;;  %v2681_v14 = vld [vmem:[%s4390_s2 + $0x398] sm:$0xf]  ;;  %v2718_v5 = vor.u32 %v2924_v63, %v2715_v0 }
 0x164   : > { %v2579_v12 = vld [vmem:[%s4390_s2 + $0x2f0] sm:$0xf0]  ;;  %v2578_v9 = vor.u32 %v2895_v6, %v2577_v16  ;;  %v2823_v22 = vld [vmem:[%s4390_s2 + $0xac] sm:$0xf0]  ;;  %v2920_v16 = vld [vmem:[%s4390_s2 + $0x3b4] sm:$0xf0] }
 0x165   : > { %1601 = vmatpush.bf16.msrb.mxu0 %v2218_v23  ;;  %1627 = vmatpush.bf16.msrb.mxu2 %v2222_v27  ;;  %v2545_v23 = vld [vmem:[%s4390_s2 + $0x290] sm:$0xf]  ;;  %v2582_v24 = vor.u32 %v2891_v21, %v2579_v12  ;;  %v2819_v26 = vld [vmem:[%s4390_s2 + $0x94] sm:$0xf]  ;;  %v2290_v29 = vor.u32 %v2823_v22, %v2289_v19  ;;  %v2427_v6 = vld [vmem:[%s4390_s2 + $0x1b8] sm:$0xf0]  ;;  %v2682_v12 = vor.u32 %v2920_v16, %v2681_v14 }
 0x166   : > { %v2887_v25 = vld [vmem:[%s4390_s2 + $0x2ac] sm:$0xf0]  ;;  %v2883_v27 = vld [vmem:[%s4390_s2 + $0x294] sm:$0xf]  ;;  %v2916_v11 = vld [vmem:[%s4390_s2 + $0x39c] sm:$0xf] }
 0x167   : > { %1614 = vmatpush.bf16.msrb.mxu1 %v2474_v35  ;;  %1640 = vmatpush.bf16.msrb.mxu3 %v2478_v30  ;;  %v2291_v35 = vld [vmem:[%s4390_s2 + $0xb0] sm:$0xf0]  ;;  %v2546_v30 = vor.u32 %v2887_v25, %v2545_v23  ;;  %v2513_v34 = vld [vmem:[%s4390_s2 + $0x250] sm:$0xf]  ;;  %v2683_v20 = vld [vmem:[%s4390_s2 + $0x3b8] sm:$0xf0] }
 0x168   : > { %1602 = vmatmul.bf16.vlgmr.msrb.gmra.mxu0 %v3776_v10  ;;  %1628 = vmatmul.bf16.vlgmr.msrb.gmra.mxu2 %v3776_v10  ;;  %v2547_v28 = vld [vmem:[%s4390_s2 + $0x2b0] sm:$0xf0]  ;;  %v2879_v37 = vld [vmem:[%s4390_s2 + $0x26c] sm:$0xf0]  ;;  %v2649_v19 = vld [vmem:[%s4390_s2 + $0x358] sm:$0xf]  ;;  %v2686_v22 = vor.u32 %v2916_v11, %v2683_v20 }
 0x169   : > { %1646 = vmatpush.bf16.msra.mxu0 %v2450_v31  ;;  %1672 = vmatpush.bf16.msra.mxu2 %v2454_v33  ;;  %v2294_v31 = vor.u32 %v2819_v26, %v2291_v35  ;;  %v2815_v33 = vld [vmem:[%s4390_s2 + $0x6c] sm:$0xf0]  ;;  %v2550_v36 = vor.u32 %v2883_v27, %v2547_v28  ;;  %v2259_v39 = vld [vmem:[%s4390_s2 + $0x70] sm:$0xf0]  ;;  %v2912_v23 = vld [vmem:[%s4390_s2 + $0x374] sm:$0xf0] }
 0x16a   : > { %1615 = vmatmul.bf16.vlgmr.msrb.gmra.mxu1 %v3784_v15  ;;  %1641 = vmatmul.bf16.vlgmr.msrb.gmra.mxu3 %v3784_v15  ;;  %v2875_v40 = vld [vmem:[%s4390_s2 + $0x254] sm:$0xf]  ;;  %v2225_v43 = vld [vmem:[%s4390_s2 + $0x10] sm:$0xf]  ;;  %v2395_v25 = vld [vmem:[%s4390_s2 + $0x178] sm:$0xf0]  ;;  %v2650_v28 = vor.u32 %v2912_v23, %v2649_v19 }
 0x16b   : > { %1659 = vmatpush.bf16.msra.mxu1 %v2706_v32  ;;  %1685 = vmatpush.bf16.msra.mxu3 %v2710_v38  ;;  %v2257_v32 = vld [vmem:[%s4390_s2 + $0x50] sm:$0xf]  ;;  %v2811_v38 = vld [vmem:[%s4390_s2 + $0x54] sm:$0xf]  ;;  %v2908_v26 = vld [vmem:[%s4390_s2 + $0x35c] sm:$0xf] }
 0x16c   : > { %v2515_v41 = vld [vmem:[%s4390_s2 + $0x270] sm:$0xf0]  ;;  %v2258_v42 = vor.u32 %v2815_v33, %v2257_v32  ;;  %v2481_v47 = vld [vmem:[%s4390_s2 + $0x210] sm:$0xf]  ;;  %v2651_v35 = vld [vmem:[%s4390_s2 + $0x378] sm:$0xf0] }
 0x16d   : > { %1647 = vmatpush.bf16.msra.mxu0 %v2418_v44  ;;  %1673 = vmatpush.bf16.msra.mxu2 %v2422_v46  ;;  %v2807_v44 = vld [vmem:[%s4390_s2 + $0x2c] sm:$0xf0]  ;;  %v2262_v46 = vor.u32 %v2811_v38, %v2259_v39  ;;  %v2803_v49 = vld [vmem:[%s4390_s2 + $0x14] sm:$0xf]  ;;  %v2617_v32 = vld [vmem:[%s4390_s2 + $0x318] sm:$0xf]  ;;  %v2654_v33 = vor.u32 %v2908_v26, %v2651_v35 }
 0x16e   : > { %v2871_v48 = vld [vmem:[%s4390_s2 + $0x22c] sm:$0xf0]  ;;  %v2227_v51 = vld [vmem:[%s4390_s2 + $0x30] sm:$0xf0]  ;;  %v2900_v38 = vld [vmem:[%s4390_s2 + $0x31c] sm:$0xf] }
 0x16f   : > { %1660 = vmatpush.bf16.msra.mxu1 %v2674_v45  ;;  %1686 = vmatpush.bf16.msra.mxu3 %v2678_v50  ;;  %v2514_v45 = vor.u32 %v2879_v37, %v2513_v34  ;;  %v2518_v50 = vor.u32 %v2875_v40, %v2515_v41  ;;  %v2867_v52 = vld [vmem:[%s4390_s2 + $0x214] sm:$0xf]  ;;  %v2482_v61 = vor.u32 %v2871_v48, %v2481_v47  ;;  %v2904_v34 = vld [vmem:[%s4390_s2 + $0x334] sm:$0xf0]  ;;  %v2363_v37 = vld [vmem:[%s4390_s2 + $0x138] sm:$0xf0] }
 0x170   : > { %v2483_v53 = vld [vmem:[%s4390_s2 + $0x230] sm:$0xf0]  ;;  %v2619_v39 = vld [vmem:[%s4390_s2 + $0x338] sm:$0xf0]  ;;  %v2618_v41 = vor.u32 %v2904_v34, %v2617_v32  ;;  %v2896_v47 = vld [vmem:[%s4390_s2 + $0x2f4] sm:$0xf0] }
 0x171   : > { %1648 = vmatpush.bf16.msra.mxu0 %v2386_v56  ;;  %1674 = vmatpush.bf16.msra.mxu2 %v2390_v58  ;;  %v2713_v56 = vld [vmem:[%s4390_s2 + $0x3d8] sm:$0xf]  ;;  %v2486_v1 = vor.u32 %v2867_v52, %v2483_v53  ;;  %v2828_v48 = vld [vmem:[%s4390_s2 + $0xdc] sm:$0xf] }
 0x172   : > { %v2928_v58 = vld [vmem:[%s4390_s2 + $0x3f4] sm:$0xf0]  ;;  %v2555_v63 = vld [vmem:[%s4390_s2 + $0x2b8] sm:$0xf0] }
 0x173   : > { %1661 = vmatpush.bf16.msra.mxu1 %v2642_v57  ;;  %1687 = vmatpush.bf16.msra.mxu3 %v2646_v62  ;;  %v2226_v57 = vor.u32 %v2807_v44, %v2225_v43  ;;  %v2230_v62 = vor.u32 %v2803_v49, %v2227_v51  ;;  %v2714_v3 = vor.u32 %v2928_v58, %v2713_v56  ;;  %v2329_v43 = vld [vmem:[%s4390_s2 + $0xd8] sm:$0xf]  ;;  %v2331_v49 = vld [vmem:[%s4390_s2 + $0xf8] sm:$0xf0] }
 0x174   : > { %v2832_v44 = vld [vmem:[%s4390_s2 + $0xf4] sm:$0xf0]  ;;  %v2587_v51 = vld [vmem:[%s4390_s2 + $0x2f8] sm:$0xf0]  ;;  %v2334_v54 = vor.u32 %v2828_v48, %v2331_v49 }
 0x175   : > { %1649 = vmatpush.bf16.msra.mxu0 %v2354_v4  ;;  %1675 = vmatpush.bf16.msra.mxu2 %v2358_v13  ;;  %v2462_v4 = vor.u32 %v2860_v59, %v2459_v60  ;;  %v2856_v13 = vld [vmem:[%s4390_s2 + $0x1b4] sm:$0xf0]  ;;  %v2330_v52 = vor.u32 %v2832_v44, %v2329_v43  ;;  %v2820_v60 = vld [vmem:[%s4390_s2 + $0x9c] sm:$0xf] }
 0x176   : > { %v2297_v55 = vld [vmem:[%s4390_s2 + $0x98] sm:$0xf]  ;;  %v2267_v16 = vld [vmem:[%s4390_s2 + $0x78] sm:$0xf0] }
 0x177   : > { %1662 = vmatpush.bf16.msra.mxu1 %v2610_v7  ;;  %1688 = vmatpush.bf16.msra.mxu3 %v2614_v17  ;;  %v2425_v7 = vld [vmem:[%s4390_s2 + $0x198] sm:$0xf]  ;;  %v2852_v17 = vld [vmem:[%s4390_s2 + $0x19c] sm:$0xf] }
 0x178   : > { %v2426_v21 = vor.u32 %v2856_v13, %v2425_v7  ;;  %v2824_v56 = vld [vmem:[%s4390_s2 + $0xb4] sm:$0xf0]  ;;  %v2235_v23 = vld [vmem:[%s4390_s2 + $0x38] sm:$0xf0] }
 0x179   : > { %1650 = vmatpush.bf16.msra.mxu0 %v2322_v8  ;;  %1676 = vmatpush.bf16.msra.mxu2 %v2326_v18  ;;  %v2430_v8 = vor.u32 %v2852_v17, %v2427_v6  ;;  %v2848_v18 = vld [vmem:[%s4390_s2 + $0x174] sm:$0xf0]  ;;  %v2298_v0 = vor.u32 %v2824_v56, %v2297_v55  ;;  %v2876_v17 = vld [vmem:[%s4390_s2 + $0x25c] sm:$0xf] }
 0x17a   : > { %v2888_v59 = vld [vmem:[%s4390_s2 + $0x2b4] sm:$0xf0]  ;;  %v2523_v6 = vld [vmem:[%s4390_s2 + $0x278] sm:$0xf0] }
 0x17b   : > { %1663 = vmatpush.bf16.msra.mxu1 %v2578_v9  ;;  %1689 = vmatpush.bf16.msra.mxu3 %v2582_v24  ;;  %v2393_v9 = vld [vmem:[%s4390_s2 + $0x158] sm:$0xf]  ;;  %v2844_v24 = vld [vmem:[%s4390_s2 + $0x15c] sm:$0xf] }
 0x17c   : > { %v2394_v27 = vor.u32 %v2848_v18, %v2393_v9  ;;  %v2521_v7 = vld [vmem:[%s4390_s2 + $0x258] sm:$0xf]  ;;  %v2526_v18 = vor.u32 %v2876_v17, %v2523_v6 }
 0x17d   : > { %1651 = vmatpush.bf16.msra.mxu0 %v2290_v29  ;;  %1677 = vmatpush.bf16.msra.mxu2 %v2294_v31  ;;  %v2398_v29 = vor.u32 %v2844_v24, %v2395_v25  ;;  %v2840_v31 = vld [vmem:[%s4390_s2 + $0x134] sm:$0xf0]  ;;  %v2868_v24 = vld [vmem:[%s4390_s2 + $0x21c] sm:$0xf] }
 0x17e   : > { %v2880_v14 = vld [vmem:[%s4390_s2 + $0x274] sm:$0xf0]  ;;  %v2491_v25 = vld [vmem:[%s4390_s2 + $0x238] sm:$0xf0] }
 0x17f   : > { %1664 = vmatpush.bf16.msra.mxu1 %v2546_v30  ;;  %1690 = vmatpush.bf16.msra.mxu3 %v2550_v36  ;;  %v2361_v30 = vld [vmem:[%s4390_s2 + $0x118] sm:$0xf]  ;;  %v2836_v36 = vld [vmem:[%s4390_s2 + $0x11c] sm:$0xf]  ;;  %v2522_v20 = vor.u32 %v2880_v14, %v2521_v7 }
 0x180   : > { %v2362_v40 = vor.u32 %v2840_v31, %v2361_v30  ;;  %v2489_v9 = vld [vmem:[%s4390_s2 + $0x218] sm:$0xf]  ;;  %v1755_v31 = vld [vmem:[%s4334_s14] sm:$0xff] }
 0x181   : > { %1652 = vmatpush.bf16.msra.mxu0 %v2258_v42  ;;  %1678 = vmatpush.bf16.msra.mxu2 %v2262_v46  ;;  %v2366_v42 = vor.u32 %v2836_v36, %v2363_v37  ;;  %v2622_v46 = vor.u32 %v2900_v38, %v2619_v39  ;;  %v2872_v19 = vld [vmem:[%s4390_s2 + $0x234] sm:$0xf0] }
 0x182   : > { %v2490_v35 = vor.u32 %v2872_v19, %v2489_v9  ;;  %v1776_v19 = vld [vmem:[#allocation4 + $0x8] sm:$0xff] }
 0x183   : > { %1665 = vmatpush.bf16.msra.mxu1 %v2514_v45  ;;  %1691 = vmatpush.bf16.msra.mxu3 %v2518_v50  ;;  %v2585_v45 = vld [vmem:[%s4390_s2 + $0x2d8] sm:$0xf]  ;;  %v2892_v50 = vld [vmem:[%s4390_s2 + $0x2dc] sm:$0xf] }
 0x184   : > { %v2586_v53 = vor.u32 %v2896_v47, %v2585_v45  ;;  %v2590_v58 = vor.u32 %v2892_v50, %v2587_v51 }
 0x185   : > { %1653 = vmatpush.bf16.msra.mxu0 %v2226_v57  ;;  %1679 = vmatpush.bf16.msra.mxu2 %v2230_v62  ;;  %v2553_v57 = vld [vmem:[%s4390_s2 + $0x298] sm:$0xf]  ;;  %v2884_v62 = vld [vmem:[%s4390_s2 + $0x29c] sm:$0xf] }
 0x186   : > { %v2558_v13 = vor.u32 %v2884_v62, %v2555_v63 }
 0x187   : > { %1666 = vmatpush.bf16.msra.mxu1 %v2482_v61  ;;  %1692 = vmatpush.bf16.msra.mxu3 %v2486_v1  ;;  %v2299_v61 = vld [vmem:[%s4390_s2 + $0xb8] sm:$0xf0]  ;;  %v2554_v1 = vor.u32 %v2888_v59, %v2553_v57 }
 0x188   : > { %1654 = vmatmul.bf16.vlgmr.msra.gmra.mxu0 %v3776_v10  ;;  %1680 = vmatmul.bf16.vlgmr.msra.gmra.mxu2 %v3776_v10 }
 0x189   : > { %1698 = vmatpush.bf16.msrb.mxu0 %v2458_v2  ;;  %1724 = vmatpush.bf16.msrb.mxu2 %v2462_v4  ;;  %v2302_v2 = vor.u32 %v2820_v60, %v2299_v61  ;;  %v2816_v4 = vld [vmem:[%s4390_s2 + $0x74] sm:$0xf0] }
 0x18a   : > { %1667 = vmatmul.bf16.vlgmr.msra.gmra.mxu1 %v3784_v15  ;;  %1693 = vmatmul.bf16.vlgmr.msra.gmra.mxu3 %v3784_v15 }
 0x18b   : > { %1711 = vmatpush.bf16.msrb.mxu1 %v2714_v3  ;;  %1737 = vmatpush.bf16.msrb.mxu3 %v2718_v5  ;;  %v2265_v3 = vld [vmem:[%s4390_s2 + $0x58] sm:$0xf]  ;;  %v2812_v5 = vld [vmem:[%s4390_s2 + $0x5c] sm:$0xf] }
 0x18c   : > { %v2266_v11 = vor.u32 %v2816_v4, %v2265_v3 }
 0x18d   : > { %1699 = vmatpush.bf16.msrb.mxu0 %v2426_v21  ;;  %1725 = vmatpush.bf16.msrb.mxu2 %v2430_v8  ;;  %v2270_v21 = vor.u32 %v2812_v5, %v2267_v16  ;;  %v2808_v8 = vld [vmem:[%s4390_s2 + $0x34] sm:$0xf0] }
 0x18f   : > { %1712 = vmatpush.bf16.msrb.mxu1 %v2682_v12  ;;  %1738 = vmatpush.bf16.msrb.mxu3 %v2686_v22  ;;  %v2233_v12 = vld [vmem:[%s4390_s2 + $0x18] sm:$0xf]  ;;  %v2804_v22 = vld [vmem:[%s4390_s2 + $0x1c] sm:$0xf] }
 0x190   : > { %v2234_v26 = vor.u32 %v2808_v8, %v2233_v12 }
 0x191   : > { %1700 = vmatpush.bf16.msrb.mxu0 %v2394_v27  ;;  %1726 = vmatpush.bf16.msrb.mxu2 %v2398_v29  ;;  %v2238_v27 = vor.u32 %v2804_v22, %v2235_v23 }
 0x193   : > { %1713 = vmatpush.bf16.msrb.mxu1 %v2650_v28  ;;  %1739 = vmatpush.bf16.msrb.mxu3 %v2654_v33  ;;  %v2494_v28 = vor.u32 %v2868_v24, %v2491_v25 }
 0x195   : > { %1701 = vmatpush.bf16.msrb.mxu0 %v2362_v40  ;;  %1727 = vmatpush.bf16.msrb.mxu2 %v2366_v42 }
 0x197   : > { %1714 = vmatpush.bf16.msrb.mxu1 %v2618_v41  ;;  %1740 = vmatpush.bf16.msrb.mxu3 %v2622_v46 }
 0x199   : > { %1702 = vmatpush.bf16.msrb.mxu0 %v2330_v52  ;;  %1728 = vmatpush.bf16.msrb.mxu2 %v2334_v54  ;;  %v1757_v54 = vld [vmem:[%s4334_s14 + $0x10] sm:$0xff] }
 0x19b   : > { %1715 = vmatpush.bf16.msrb.mxu1 %v2586_v53  ;;  %1741 = vmatpush.bf16.msrb.mxu3 %v2590_v58 }
 0x19d   : > { %1703 = vmatpush.bf16.msrb.mxu0 %v2298_v0  ;;  %1729 = vmatpush.bf16.msrb.mxu2 %v2302_v2 }
 0x19f   : > { %1716 = vmatpush.bf16.msrb.mxu1 %v2554_v1  ;;  %1742 = vmatpush.bf16.msrb.mxu3 %v2558_v13  ;;  %v1758_v1 = vld [vmem:[%s4334_s14 + $0x18] sm:$0xff] }
 0x1a1   : > { %1704 = vmatpush.bf16.msrb.mxu0 %v2266_v11  ;;  %1730 = vmatpush.bf16.msrb.mxu2 %v2270_v21 }
 0x1a3   : > { %1717 = vmatpush.bf16.msrb.mxu1 %v2522_v20  ;;  %1743 = vmatpush.bf16.msrb.mxu3 %v2526_v18 }
 0x1a5   : > { %1705 = vmatpush.bf16.msrb.mxu0 %v2234_v26  ;;  %1731 = vmatpush.bf16.msrb.mxu2 %v2238_v27 }
 0x1a7   : > { %1718 = vmatpush.bf16.msrb.mxu1 %v2490_v35  ;;  %1744 = vmatpush.bf16.msrb.mxu3 %v2494_v28 }
 0x1a8   : > { %1706 = vmatmul.bf16.vlgmr.msrb.gmra.mxu0 %v3776_v10  ;;  %1732 = vmatmul.bf16.vlgmr.msrb.gmra.mxu2 %v3776_v10  ;;  %v1756_v10 = vld [vmem:[%s4334_s14 + $0x8] sm:$0xff] }
 0x1aa   : > { %1719 = vmatmul.bf16.vlgmr.msrb.gmra.mxu1 %v3784_v15  ;;  %1745 = vmatmul.bf16.vlgmr.msrb.gmra.mxu3 %v3784_v15 }
 0x1c5   : > { %v1551_v29 = vpop.f32.mrf.mxu0 }
 0x1c7   : > { %v1564_v30 = vpop.f32.mrf.mxu1 }
 0x1c8   : > { %v1565_v32 = vadd.f32 %v1564_v30, %v1551_v29 }
 0x1ca   : > { %v1759_v33 = vadd.f32 %v1755_v31, %v1565_v32 }
 0x1cb   : > { %v1577_v34 = vpop.f32.mrf.mxu2 }
 0x1cc   : > { %v2723_v36 = vmul.f32 -1.442695, %v1759_v33 }
 0x1cd   : > { %v1590_v37 = vpop.f32.mrf.mxu3  ;;  %v1553_v15 = vpop.f32.mrf.mxu0 }
 0x1ce   : > { %v1591_v38 = vadd.f32 %v1590_v37, %v1577_v34  ;;  %2941 = vpow2.f32 %v2723_v36  ;;  %v1768_v15 = vld [vmem:[%s4360_s20 + $0x20] sm:$0xff] }
 0x1cf   : > { %v1566_v40 = vpop.f32.mrf.mxu1 }
 0x1d0   : > { %v1760_v39 = vadd.f32 %v1756_v10, %v1591_v38 }
 0x1d2   : > { %v2724_v41 = vmul.f32 -1.442695, %v1760_v39 }
 0x1d3   : > { %v1579_v42 = vpop.f32.mrf.mxu2 }
 0x1d4   : > { %2943 = vpow2.f32 %v2724_v41  ;;  %v2942_v43 = vpop.eup %2941 }
 0x1d5   : > { %v1592_v44 = vpop.f32.mrf.mxu3  ;;  %v1786_v45 = vadd.f32 1.0, %v2942_v43 }
 0x1d7   : > { %2945 = vrcp.f32 %v1786_v45  ;;  %vm1794_vm2 = vweird.f32 %v1786_v45  ;;  %v1800_v14 = vand.u32 2147483648, %v1786_v45  ;;  %v1798_v17 = vand.u32 2147483647, %v1786_v45 }
 0x1d9   : > { %v1801_v12 = vor.u32 1.1754944e-38, %v1800_v14  ;;  %vm1799_vm7 = vcmp.eq.f32.partialorder %v1798_v17, 8.507059e+37 }
 0x1da   : > { %v2944_v46 = vpop.eup %2943 }
 0x1db   : > { %v1787_v47 = vadd.f32 1.0, %v2944_v46 }
 0x1dd   : > { %2947 = vrcp.f32 %v1787_v47  ;;  %v2946_v48 = vpop.eup %2945  ;;  %vm1809_vm0 = vweird.f32 %v1787_v47  ;;  %v1815_v62 = vand.u32 2147483648, %v1787_v47  ;;  %v1813_v3 = vand.u32 2147483647, %v1787_v47 }
 0x1de   : > { %v1790_v49 = vmul.f32 %v2946_v48, %v1786_v45  ;;  %vm1795_vm3 = vweird.f32 %v2946_v48 }
 0x1df   : > { %v1816_v6 = vor.u32 1.1754944e-38, %v1815_v62  ;;  %vm4345_vm5 = vmor %vm1794_vm2, %vm1795_vm3  ;;  %vm1814_vm6 = vcmp.eq.f32.partialorder %v1813_v3, 8.507059e+37 }
 0x1e0   : > { %v1791_v55 = vsub.f32 1.0, %v1790_v49 }
 0x1e2   : > { %v1792_v61 = vmul.f32 %v2946_v48, %v1791_v55 }
 0x1e3   : > { %v2948_v50 = vpop.eup %2947 }
 0x1e4   : > { %v1805_v51 = vmul.f32 %v2948_v50, %v1787_v47  ;;  %vm1810_vm1 = vweird.f32 %v2948_v50  ;;  %v1793_v16 = vadd.f32 %v2946_v48, %v1792_v61 }
 0x1e5   : > { %v1603_v52 = vpop.f32.mrf.mxu0  ;;  %vm4340_vm4 = vmor %vm1809_vm0, %vm1810_vm1 }
 0x1e6   : > { %v1806_v56 = vsub.f32 1.0, %v1805_v51  ;;  %v1797_v9 = vsel %vm4345_vm5, %v2946_v48, %v1793_v16  ;;  %v1769_v48 = vld [vmem:[%s4360_s20 + $0x28] sm:$0xff] }
 0x1e7   : > { %v1616_v53 = vpop.f32.mrf.mxu1  ;;  %v1802_v25 = vsel %vm1799_vm7, %v1801_v12, %v1797_v9 }
 0x1e8   : > { %v1617_v57 = vadd.f32 %v1616_v53, %v1603_v52  ;;  %v1807_v58 = vmul.f32 %v2948_v50, %v1806_v56 }
 0x1ea   : > { %v1761_v59 = vadd.f32 %v1757_v54, %v1617_v57  ;;  %v1808_v2 = vadd.f32 %v2948_v50, %v1807_v58 }
 0x1eb   : > { %v1629_v63 = vpop.f32.mrf.mxu2 }
 0x1ec   : > { %v2725_v60 = vmul.f32 -1.442695, %v1761_v59  ;;  %v1812_v21 = vsel %vm4340_vm4, %v2948_v50, %v1808_v2 }
 0x1ed   : > { %v1642_v0 = vpop.f32.mrf.mxu3  ;;  %v1605_v4 = vpop.f32.mrf.mxu0  ;;  %v1817_v22 = vsel %vm1814_vm6, %v1816_v6, %v1812_v21  ;;  %v1771_v6 = vld [vmem:[%s4360_s20 + $0x38] sm:$0xff] }
 0x1ee   : > { %2949 = vpow2.f32 %v2725_v60  ;;  %v1643_v13 = vadd.f32 %v1642_v0, %v1629_v63  ;;  %v1835_v26 = vmul.f32 %v1817_v22, %v1776_v19 }
 0x1ef   : > { %v1618_v5 = vpop.f32.mrf.mxu1 }
 0x1f0   : > { %v1762_v11 = vadd.f32 %v1758_v1, %v1643_v13  ;;  %v1770_v1 = vld [vmem:[%s4360_s20 + $0x30] sm:$0xff] }
 0x1f2   : > { %2951 = vtanh.f32 %v1762_v11 }
 0x1f3   : > { %v1631_v23 = vpop.f32.mrf.mxu2 }
 0x1f4   : > { %v2950_v8 = vpop.eup %2949 }
 0x1f5   : > { %v1788_v18 = vadd.f32 1.0, %v2950_v8  ;;  %v1644_v24 = vpop.f32.mrf.mxu3 }
 0x1f7   : > { %2953 = vrcp.f32 %v1788_v18  ;;  %v1830_v31 = vand.u32 2147483648, %v1788_v18  ;;  %vm1824_vm8 = vweird.f32 %v1788_v18  ;;  %v1828_v33 = vand.u32 2147483647, %v1788_v18 }
 0x1f8   : > { %v2952_v35 = vpop.eup %2951 }
 0x1f9   : > { %v1836_v27 = vmul.f32 %v2952_v35, %v1802_v25  ;;  %v1831_v36 = vor.u32 1.1754944e-38, %v1830_v31  ;;  %vm1829_vm11 = vcmp.eq.f32.partialorder %v1828_v33, 8.507059e+37 }
 0x1fb   : > { %v1837_v28 = vadd.f32 %v1836_v27, %v1835_v26 }
 0x1fd   : > { %v2954_v29 = vpop.eup %2953  ;;  %1904 = vst [vmem:[#allocation4 + $0x8] sm:$0xff] %v1837_v28  ;;  %2955 = vtanh.f32 %v1837_v28 }
 0x1fe   : > { %v1820_v30 = vmul.f32 %v2954_v29, %v1788_v18  ;;  %vm1825_vm9 = vweird.f32 %v2954_v29 }
 0x1ff   : > { %vm1826_vm10 = vmor %vm1824_vm8, %vm1825_vm9 }
 0x200   : > { %v1821_v32 = vsub.f32 1.0, %v1820_v30 }
 0x202   : > { %v1822_v34 = vmul.f32 %v2954_v29, %v1821_v32 }
 0x203   : > { %v2956_v41 = vpop.eup %2955 }
 0x204   : > { %v1823_v37 = vadd.f32 %v2954_v29, %v1822_v34  ;;  %v1840_v34 = vld [vmem:[#allocation4] sm:$0xff] }
 0x205   : > { %v1655_v10 = vpop.f32.mrf.mxu0 }
 0x206   : > { %v1827_v39 = vsel %vm1826_vm10, %v2954_v29, %v1823_v37 }
 0x207   : > { %v1668_v38 = vpop.f32.mrf.mxu1  ;;  %v1832_v42 = vsel %vm1829_vm11, %v1831_v36, %v1827_v39 }
 0x208   : > { %v1669_v40 = vadd.f32 %v1668_v38, %v1655_v10  ;;  %v1839_v43 = vmul.f32 %v2956_v41, %v1832_v42 }
 0x20a   : > { %v1772_v44 = vadd.f32 %v1768_v15, %v1669_v40  ;;  %1906 = vst [vmem:[#allocation3] sm:$0xff] %v1839_v43 }
 0x20b   : > { %1911 = vst [vmem:[%s1910_s3] sm:$0xff] %v1839_v43  ;;  %v1681_v46 = vpop.f32.mrf.mxu2 }
 0x20c   : > { %v2726_v45 = vmul.f32 -1.442695, %v1772_v44 }
 0x20d   : > { %v1694_v47 = vpop.f32.mrf.mxu3  ;;  %v1657_v49 = vpop.f32.mrf.mxu0 }
 0x20e   : > { %2957 = vpow2.f32 %v2726_v45  ;;  %v1695_v50 = vadd.f32 %v1694_v47, %v1681_v46 }
 0x20f   : > { %v1670_v51 = vpop.f32.mrf.mxu1 }
 0x210   : > { %v1773_v52 = vadd.f32 %v1769_v48, %v1695_v50 }
 0x212   : > { %v2727_v53 = vmul.f32 -1.442695, %v1773_v52 }
 0x213   : > { %v1683_v55 = vpop.f32.mrf.mxu2 }
 0x214   : > { %v2958_v54 = vpop.eup %2957  ;;  %2959 = vpow2.f32 %v2727_v53 }
 0x215   : > { %v1850_v56 = vadd.f32 1.0, %v2958_v54  ;;  %v1696_v57 = vpop.f32.mrf.mxu3 }
 0x217   : > { %2961 = vrcp.f32 %v1850_v56  ;;  %vm1858_vm14 = vweird.f32 %v1850_v56  ;;  %v1864_v23 = vand.u32 2147483648, %v1850_v56  ;;  %v1862_v25 = vand.u32 2147483647, %v1850_v56 }
 0x219   : > { %v1865_v30 = vor.u32 1.1754944e-38, %v1864_v23  ;;  %vm1863_vm3 = vcmp.eq.f32.partialorder %v1862_v25, 8.507059e+37 }
 0x21a   : > { %v2960_v58 = vpop.eup %2959 }
 0x21b   : > { %v1851_v59 = vadd.f32 1.0, %v2960_v58 }
 0x21d   : > { %2963 = vrcp.f32 %v1851_v59  ;;  %v2962_v60 = vpop.eup %2961  ;;  %vm1873_vm12 = vweird.f32 %v1851_v59  ;;  %v1879_v21 = vand.u32 2147483648, %v1851_v59  ;;  %v1877_v18 = vand.u32 2147483647, %v1851_v59 }
 0x21e   : > { %v1854_v61 = vmul.f32 %v2962_v60, %v1850_v56  ;;  %vm1859_vm15 = vweird.f32 %v2962_v60 }
 0x21f   : > { %v1880_v26 = vor.u32 1.1754944e-38, %v1879_v21  ;;  %vm4373_vm1 = vmor %vm1858_vm14, %vm1859_vm15  ;;  %vm1878_vm2 = vcmp.eq.f32.partialorder %v1877_v18, 8.507059e+37 }
 0x220   : > { %v1855_v4 = vsub.f32 1.0, %v1854_v61 }
 0x222   : > { %v1856_v11 = vmul.f32 %v2962_v60, %v1855_v4 }
 0x223   : > { %v2964_v63 = vpop.eup %2963 }
 0x224   : > { %v1869_v2 = vmul.f32 %v2964_v63, %v1851_v59  ;;  %vm1874_vm13 = vweird.f32 %v2964_v63  ;;  %v1857_v24 = vadd.f32 %v2962_v60, %v1856_v11 }
 0x225   : > { %v1707_v62 = vpop.f32.mrf.mxu0  ;;  %vm4369_vm0 = vmor %vm1873_vm12, %vm1874_vm13 }
 0x226   : > { %v1870_v7 = vsub.f32 1.0, %v1869_v2  ;;  %v1861_v32 = vsel %vm4373_vm1, %v2962_v60, %v1857_v24 }
 0x227   : > { %v1720_v0 = vpop.f32.mrf.mxu1  ;;  %v1866_v10 = vsel %vm1863_vm3, %v1865_v30, %v1861_v32 }
 0x228   : > { %v1721_v3 = vadd.f32 %v1720_v0, %v1707_v62  ;;  %v1871_v14 = vmul.f32 %v2964_v63, %v1870_v7 }
 0x22a   : > { %v1774_v13 = vadd.f32 %v1770_v1, %v1721_v3  ;;  %v1872_v9 = vadd.f32 %v2964_v63, %v1871_v14 }
 0x22b   : > { %v1733_v16 = vpop.f32.mrf.mxu2 }
 0x22c   : > { %v2728_v5 = vmul.f32 -1.442695, %v1774_v13  ;;  %v1876_v28 = vsel %vm4369_vm0, %v2964_v63, %v1872_v9 }
 0x22d   : > { %v1746_v17 = vpop.f32.mrf.mxu3  ;;  %v1709_v20 = vpop.f32.mrf.mxu0  ;;  %v1881_v36 = vsel %vm1878_vm2, %v1880_v26, %v1876_v28 }
 0x22e   : > { %2965 = vpow2.f32 %v2728_v5  ;;  %v1747_v12 = vadd.f32 %v1746_v17, %v1733_v16  ;;  %v1899_v38 = vmul.f32 %v1881_v36, %v1840_v34 }
 0x22f   : > { %v1722_v8 = vpop.f32.mrf.mxu1 }
 0x230   : > { %v1775_v22 = vadd.f32 %v1771_v6, %v1747_v12 }
 0x232   : > { %2967 = vtanh.f32 %v1775_v22 }
 0x233   : > { %v1735_v31 = vpop.f32.mrf.mxu2 }
 0x234   : > { %v2966_v27 = vpop.eup %2965 }
 0x235   : > { %v1852_v29 = vadd.f32 1.0, %v2966_v27  ;;  %v1748_v33 = vpop.f32.mrf.mxu3 }
 0x237   : > { %2969 = vrcp.f32 %v1852_v29  ;;  %v1894_v43 = vand.u32 2147483648, %v1852_v29  ;;  %v1892_v45 = vand.u32 2147483647, %v1852_v29  ;;  %vm1888_vm5 = vweird.f32 %v1852_v29 }
 0x238   : > { %v2968_v37 = vpop.eup %2967 }
 0x239   : > { %v1900_v15 = vmul.f32 %v2968_v37, %v1866_v10  ;;  %v1895_v47 = vor.u32 1.1754944e-38, %v1894_v43  ;;  %vm1893_vm7 = vcmp.eq.f32.partialorder %v1892_v45, 8.507059e+37 }
 0x23b   : > { %v1901_v39 = vadd.f32 %v1900_v15, %v1899_v38 }
 0x23d   : > { %v2970_v40 = vpop.eup %2969  ;;  %1905 = vst [vmem:[#allocation4] sm:$0xff] %v1901_v39  ;;  %2971 = vtanh.f32 %v1901_v39 }
 0x23e   : > { %v1884_v41 = vmul.f32 %v2970_v40, %v1852_v29  ;;  %vm1889_vm4 = vweird.f32 %v2970_v40 }
 0x23f   : > { %vm1890_vm6 = vmor %vm1888_vm5, %vm1889_vm4 }
 0x240   : > { %v1885_v42 = vsub.f32 1.0, %v1884_v41 }
 0x242   : > { %v1886_v44 = vmul.f32 %v2970_v40, %v1885_v42 }
 0x243   : > { %v2972_v49 = vpop.eup %2971 }
 0x244   : > { %v1887_v46 = vadd.f32 %v2970_v40, %v1886_v44 }
 0x246   : > { %v1891_v48 = vsel %vm1890_vm6, %v2970_v40, %v1887_v46 }
 0x247   : > { %v1896_v50 = vsel %vm1893_vm7, %v1895_v47, %v1891_v48  ;;  %765 = sbr.rel (!%p763_p0) target bundleno = 293 (0x125), region = 55 }
 0x248   : > { %v1903_v51 = vmul.f32 %v2972_v49, %v1896_v50 }
 0x24a   : > { %1907 = vst [vmem:[#allocation3 + $0x8] sm:$0xff] %v1903_v51 }
 0x24b   : > { %1915 = vst [vmem:[%s1914_s24 + $0x8] sm:$0xff] %v1903_v51 }

// kernel: esim_forward.7
= control target key start
LH: loop header
LB: loop body
LE: loop exit
PB: predicated region body
PF: predicated region fallthrough
CT: control target
= control target key end

     0   :  { %vm84_vm0 = vcmask 1041409   ;;  %s1076_s0 = inlined_call_operand.vmem [shape: f32[2,8,256], index: 0, kind: input, shape index: {}]   ;;  %s1077_s1 = inlined_call_operand.vmem [shape: f32[2,8,256], index: 1, kind: input, shape index: {}]   ;;  %s1078_s2 = inlined_call_operand.vmem [shape: f32[1024,128], index: 2, kind: input, shape index: {}]   ;;  %s1079_s3 = inlined_call_operand.vmem [shape: f32[1,128], index: 3, kind: input, shape index: {}]   ;;  %s1080_s4 = inlined_call_operand.vmem [shape: f32[128,3], index: 4, kind: input, shape index: {}]   ;;  %s1081_s5 = inlined_call_operand.vmem [shape: f32[1,3], index: 5, kind: input, shape index: {}]   ;;  %s1082_s6 = inlined_call_operand.hbm [shape: f32[2,3], index: 6, kind: output, shape index: {}]  }
   0x1   :  { %v216_v0 = vld [vmem:[%s1078_s2 + $0x178] sm:$0xff]  ;;  %v215_v2 = vld [vmem:[%s1078_s2 + $0x170] sm:$0xff]  ;;  %v214_v6 = vld [vmem:[%s1078_s2 + $0x168] sm:$0xff] }
   0x2   :  { %v184_v1 = vld [vmem:[%s1078_s2 + $0x78] sm:$0xff]  ;;  %341 = vmatpush.msra.mxu2 %v216_v0  ;;  %v183_v4 = vld [vmem:[%s1078_s2 + $0x70] sm:$0xff]  ;;  %v182_v8 = vld [vmem:[%s1078_s2 + $0x68] sm:$0xff] }
   0x3   :  { %301 = vmatpush.msra.mxu0 %v184_v1  ;;  %v232_v3 = vld [vmem:[%s1078_s2 + $0x1f8] sm:$0xff]  ;;  %v231_v7 = vld [vmem:[%s1078_s2 + $0x1f0] sm:$0xff]  ;;  %v230_v10 = vld [vmem:[%s1078_s2 + $0x1e8] sm:$0xff] }
   0x4   :  { %v200_v5 = vld [vmem:[%s1078_s2 + $0xf8] sm:$0xff]  ;;  %361 = vmatpush.msra.mxu3 %v232_v3  ;;  %342 = vmatpush.msra.mxu2 %v215_v2  ;;  %v199_v9 = vld [vmem:[%s1078_s2 + $0xf0] sm:$0xff]  ;;  %v213_v11 = vld [vmem:[%s1078_s2 + $0x160] sm:$0xff] }
   0x5   :  { %321 = vmatpush.msra.mxu1 %v200_v5  ;;  %302 = vmatpush.msra.mxu0 %v183_v4  ;;  %v181_v12 = vld [vmem:[%s1078_s2 + $0x60] sm:$0xff]  ;;  %v198_v13 = vld [vmem:[%s1078_s2 + $0xe8] sm:$0xff]  ;;  %v212_v16 = vld [vmem:[%s1078_s2 + $0x158] sm:$0xff] }
   0x6   :  { %362 = vmatpush.msra.mxu3 %v231_v7  ;;  %343 = vmatpush.msra.mxu2 %v214_v6  ;;  %v229_v14 = vld [vmem:[%s1078_s2 + $0x1e0] sm:$0xff]  ;;  %v180_v17 = vld [vmem:[%s1078_s2 + $0x58] sm:$0xff]  ;;  %v211_v20 = vld [vmem:[%s1078_s2 + $0x150] sm:$0xff] }
   0x7   :  { %322 = vmatpush.msra.mxu1 %v199_v9  ;;  %303 = vmatpush.msra.mxu0 %v182_v8  ;;  %v197_v15 = vld [vmem:[%s1078_s2 + $0xe0] sm:$0xff]  ;;  %v228_v18 = vld [vmem:[%s1078_s2 + $0x1d8] sm:$0xff]  ;;  %v179_v21 = vld [vmem:[%s1078_s2 + $0x50] sm:$0xff] }
   0x8   :  { %363 = vmatpush.msra.mxu3 %v230_v10  ;;  %344 = vmatpush.msra.mxu2 %v213_v11  ;;  %v196_v19 = vld [vmem:[%s1078_s2 + $0xd8] sm:$0xff]  ;;  %v227_v22 = vld [vmem:[%s1078_s2 + $0x1d0] sm:$0xff]  ;;  %v210_v24 = vld [vmem:[%s1078_s2 + $0x148] sm:$0xff] }
   0x9   :  { %323 = vmatpush.msra.mxu1 %v198_v13  ;;  %304 = vmatpush.msra.mxu0 %v181_v12  ;;  %v195_v23 = vld [vmem:[%s1078_s2 + $0xd0] sm:$0xff]  ;;  %v178_v25 = vld [vmem:[%s1078_s2 + $0x48] sm:$0xff]  ;;  %v209_v28 = vld [vmem:[%s1078_s2 + $0x140] sm:$0xff] }
   0xa   :  { %364 = vmatpush.msra.mxu3 %v229_v14  ;;  %345 = vmatpush.msra.mxu2 %v212_v16  ;;  %v226_v26 = vld [vmem:[%s1078_s2 + $0x1c8] sm:$0xff]  ;;  %v177_v29 = vld [vmem:[%s1078_s2 + $0x40] sm:$0xff]  ;;  %v208_v32 = vld [vmem:[%s1078_s2 + $0x138] sm:$0xff] }
   0xb   :  { %324 = vmatpush.msra.mxu1 %v197_v15  ;;  %305 = vmatpush.msra.mxu0 %v180_v17  ;;  %v194_v27 = vld [vmem:[%s1078_s2 + $0xc8] sm:$0xff]  ;;  %v225_v30 = vld [vmem:[%s1078_s2 + $0x1c0] sm:$0xff]  ;;  %v176_v33 = vld [vmem:[%s1078_s2 + $0x38] sm:$0xff] }
   0xc   :  { %365 = vmatpush.msra.mxu3 %v228_v18  ;;  %346 = vmatpush.msra.mxu2 %v211_v20  ;;  %v193_v31 = vld [vmem:[%s1078_s2 + $0xc0] sm:$0xff]  ;;  %v224_v34 = vld [vmem:[%s1078_s2 + $0x1b8] sm:$0xff]  ;;  %v207_v36 = vld [vmem:[%s1078_s2 + $0x130] sm:$0xff] }
   0xd   :  { %325 = vmatpush.msra.mxu1 %v196_v19  ;;  %306 = vmatpush.msra.mxu0 %v179_v21  ;;  %v192_v35 = vld [vmem:[%s1078_s2 + $0xb8] sm:$0xff]  ;;  %v175_v37 = vld [vmem:[%s1078_s2 + $0x30] sm:$0xff]  ;;  %v206_v40 = vld [vmem:[%s1078_s2 + $0x128] sm:$0xff] }
   0xe   :  { %366 = vmatpush.msra.mxu3 %v227_v22  ;;  %347 = vmatpush.msra.mxu2 %v210_v24  ;;  %v223_v38 = vld [vmem:[%s1078_s2 + $0x1b0] sm:$0xff]  ;;  %v174_v41 = vld [vmem:[%s1078_s2 + $0x28] sm:$0xff]  ;;  %v205_v44 = vld [vmem:[%s1078_s2 + $0x120] sm:$0xff] }
   0xf   :  { %326 = vmatpush.msra.mxu1 %v195_v23  ;;  %307 = vmatpush.msra.mxu0 %v178_v25  ;;  %v191_v39 = vld [vmem:[%s1078_s2 + $0xb0] sm:$0xff]  ;;  %v222_v42 = vld [vmem:[%s1078_s2 + $0x1a8] sm:$0xff]  ;;  %v173_v45 = vld [vmem:[%s1078_s2 + $0x20] sm:$0xff] }
  0x10   :  { %367 = vmatpush.msra.mxu3 %v226_v26  ;;  %348 = vmatpush.msra.mxu2 %v209_v28  ;;  %v190_v43 = vld [vmem:[%s1078_s2 + $0xa8] sm:$0xff]  ;;  %v221_v46 = vld [vmem:[%s1078_s2 + $0x1a0] sm:$0xff]  ;;  %v204_v48 = vld [vmem:[%s1078_s2 + $0x118] sm:$0xff] }
  0x11   :  { %327 = vmatpush.msra.mxu1 %v194_v27  ;;  %308 = vmatpush.msra.mxu0 %v177_v29  ;;  %v189_v47 = vld [vmem:[%s1078_s2 + $0xa0] sm:$0xff]  ;;  %v172_v49 = vld [vmem:[%s1078_s2 + $0x18] sm:$0xff]  ;;  %v203_v52 = vld [vmem:[%s1078_s2 + $0x110] sm:$0xff] }
  0x12   :  { %368 = vmatpush.msra.mxu3 %v225_v30  ;;  %349 = vmatpush.msra.mxu2 %v208_v32  ;;  %v220_v50 = vld [vmem:[%s1078_s2 + $0x198] sm:$0xff]  ;;  %v171_v53 = vld [vmem:[%s1078_s2 + $0x10] sm:$0xff]  ;;  %v202_v56 = vld [vmem:[%s1078_s2 + $0x108] sm:$0xff] }
  0x13   :  { %328 = vmatpush.msra.mxu1 %v193_v31  ;;  %309 = vmatpush.msra.mxu0 %v176_v33  ;;  %v188_v51 = vld [vmem:[%s1078_s2 + $0x98] sm:$0xff]  ;;  %v219_v54 = vld [vmem:[%s1078_s2 + $0x190] sm:$0xff]  ;;  %v170_v57 = vld [vmem:[%s1078_s2 + $0x8] sm:$0xff] }
  0x14   :  { %369 = vmatpush.msra.mxu3 %v224_v34  ;;  %350 = vmatpush.msra.mxu2 %v207_v36  ;;  %v187_v55 = vld [vmem:[%s1078_s2 + $0x90] sm:$0xff]  ;;  %v218_v58 = vld [vmem:[%s1078_s2 + $0x188] sm:$0xff]  ;;  %v201_v60 = vld [vmem:[%s1078_s2 + $0x100] sm:$0xff] }
  0x15   :  { %329 = vmatpush.msra.mxu1 %v192_v35  ;;  %310 = vmatpush.msra.mxu0 %v175_v37  ;;  %v186_v59 = vld [vmem:[%s1078_s2 + $0x88] sm:$0xff]  ;;  %v169_v61 = vld [vmem:[%s1078_s2] sm:$0xff]  ;;  %v280_v62 = vld [vmem:[%s1078_s2 + $0x378] sm:$0xff] }
  0x16   :  { %370 = vmatpush.msra.mxu3 %v223_v38  ;;  %351 = vmatpush.msra.mxu2 %v206_v40  ;;  %v217_v63 = vld [vmem:[%s1078_s2 + $0x180] sm:$0xff]  ;;  %v248_v0 = vld [vmem:[%s1078_s2 + $0x278] sm:$0xff]  ;;  %v279_v2 = vld [vmem:[%s1078_s2 + $0x370] sm:$0xff] }
  0x17   :  { %330 = vmatpush.msra.mxu1 %v191_v39  ;;  %311 = vmatpush.msra.mxu0 %v174_v41  ;;  %v296_v1 = vld [vmem:[%s1078_s2 + $0x3f8] sm:$0xff]  ;;  %v185_v3 = vld [vmem:[%s1078_s2 + $0x80] sm:$0xff]  ;;  %v247_v4 = vld [vmem:[%s1078_s2 + $0x270] sm:$0xff] }
  0x18   :  { %371 = vmatpush.msra.mxu3 %v222_v42  ;;  %352 = vmatpush.msra.mxu2 %v205_v44  ;;  %v264_v5 = vld [vmem:[%s1078_s2 + $0x2f8] sm:$0xff]  ;;  %v278_v6 = vld [vmem:[%s1078_s2 + $0x368] sm:$0xff]  ;;  %v295_v7 = vld [vmem:[%s1078_s2 + $0x3f0] sm:$0xff] }
  0x19   :  { %331 = vmatpush.msra.mxu1 %v190_v43  ;;  %312 = vmatpush.msra.mxu0 %v173_v45  ;;  %v246_v8 = vld [vmem:[%s1078_s2 + $0x268] sm:$0xff]  ;;  %v263_v9 = vld [vmem:[%s1078_s2 + $0x2f0] sm:$0xff]  ;;  %v277_v10 = vld [vmem:[%s1078_s2 + $0x360] sm:$0xff] }
  0x1a   :  { %372 = vmatpush.msra.mxu3 %v221_v46  ;;  %353 = vmatpush.msra.mxu2 %v204_v48  ;;  %v294_v11 = vld [vmem:[%s1078_s2 + $0x3e8] sm:$0xff]  ;;  %v245_v12 = vld [vmem:[%s1078_s2 + $0x260] sm:$0xff]  ;;  %v26_v15 = vld [vmem:[%s1076_s0 + $0x10] sm:$0xff] }
  0x1b   :  { %332 = vmatpush.msra.mxu1 %v189_v47  ;;  %313 = vmatpush.msra.mxu0 %v172_v49  ;;  %v262_v13 = vld [vmem:[%s1078_s2 + $0x2e8] sm:$0xff]  ;;  %v24_v14 = vld [vmem:[%s1076_s0] sm:$0xff]  ;;  %v276_v16 = vld [vmem:[%s1078_s2 + $0x358] sm:$0xff]  ;;  %v40_v20 = vrot.slane %v26_v15, 4 }
  0x1c   :  { %373 = vmatpush.msra.mxu3 %v220_v50  ;;  %354 = vmatpush.msra.mxu2 %v203_v52  ;;  %v293_v17 = vld [vmem:[%s1078_s2 + $0x3e0] sm:$0xff]  ;;  %v244_v18 = vld [vmem:[%s1078_s2 + $0x258] sm:$0xff]  ;;  %v28_v19 = vrot.slane %v24_v14, 4  ;;  %v25_v22 = vld [vmem:[%s1076_s0 + $0x8] sm:$0xff] }
  0x1d   :  { %333 = vmatpush.msra.mxu1 %v188_v51  ;;  %314 = vmatpush.msra.mxu0 %v171_v53  ;;  %v261_v21 = vld [vmem:[%s1078_s2 + $0x2e0] sm:$0xff]  ;;  %v27_v23 = vld [vmem:[%s1076_s0 + $0x18] sm:$0xff]  ;;  %v275_v24 = vld [vmem:[%s1078_s2 + $0x350] sm:$0xff]  ;;  %v69_v27 = vmax.f32 %v26_v15, %v40_v20  ;;  %v34_v29 = vrot.slane %v25_v22, 4  ;;  %v41_v32 = vadd.f32 %v40_v20, %v26_v15 }
  0x1e   :  { %374 = vmatpush.msra.mxu3 %v219_v54  ;;  %355 = vmatpush.msra.mxu2 %v202_v56  ;;  %v292_v25 = vld [vmem:[%s1078_s2 + $0x3d8] sm:$0xff]  ;;  %v57_v26 = vmax.f32 %v24_v14, %v28_v19  ;;  %v29_v28 = vadd.f32 %v28_v19, %v24_v14  ;;  %v243_v30 = vld [vmem:[%s1078_s2 + $0x250] sm:$0xff]  ;;  %v46_v33 = vrot.slane %v27_v23, 4  ;;  %v274_v34 = vld [vmem:[%s1078_s2 + $0x348] sm:$0xff] }
  0x1f   :  { %334 = vmatpush.msra.mxu1 %v187_v55  ;;  %315 = vmatpush.msra.mxu0 %v170_v57  ;;  %v260_v31 = vld [vmem:[%s1078_s2 + $0x2d8] sm:$0xff]  ;;  %v291_v35 = vld [vmem:[%s1078_s2 + $0x3d0] sm:$0xff]  ;;  %v70_v37 = vrot.slane %v69_v27, 2  ;;  %v63_v39 = vmax.f32 %v25_v22, %v34_v29  ;;  %v242_v40 = vld [vmem:[%s1078_s2 + $0x248] sm:$0xff]  ;;  %v42_v42 = vrot.slane %v41_v32, 2  ;;  %v35_v44 = vadd.f32 %v34_v29, %v25_v22 }
  0x20   :  { %375 = vmatpush.msra.mxu3 %v218_v58  ;;  %356 = vmatpush.msra.mxu2 %v201_v60  ;;  %v58_v36 = vrot.slane %v57_v26, 2  ;;  %v30_v38 = vrot.slane %v29_v28, 2  ;;  %v259_v41 = vld [vmem:[%s1078_s2 + $0x2d0] sm:$0xff]  ;;  %v75_v43 = vmax.f32 %v27_v23, %v46_v33  ;;  %v47_v45 = vadd.f32 %v46_v33, %v27_v23  ;;  %v273_v46 = vld [vmem:[%s1078_s2 + $0x340] sm:$0xff]  ;;  %v290_v47 = vld [vmem:[%s1078_s2 + $0x3c8] sm:$0xff] }
  0x21   :  { %335 = vmatpush.msra.mxu1 %v186_v59  ;;  %316 = vmatpush.msra.mxu0 %v169_v61  ;;  %v241_v48 = vld [vmem:[%s1078_s2 + $0x240] sm:$0xff]  ;;  %v71_v50 = vmax.f32 %v69_v27, %v70_v37  ;;  %v64_v52 = vrot.slane %v63_v39, 2  ;;  %v258_v53 = vld [vmem:[%s1078_s2 + $0x2c8] sm:$0xff]  ;;  %v272_v54 = vld [vmem:[%s1078_s2 + $0x338] sm:$0xff]  ;;  %v43_v56 = vadd.f32 %v42_v42, %v41_v32  ;;  %v36_v58 = vrot.slane %v35_v44, 2 }
  0x22   :  { %421 = vmatpush.msrb.mxu2 %v280_v62  ;;  %376 = vmatpush.msra.mxu3 %v217_v63  ;;  %v59_v49 = vmax.f32 %v57_v26, %v58_v36  ;;  %v31_v51 = vadd.f32 %v30_v38, %v29_v28  ;;  %v289_v55 = vld [vmem:[%s1078_s2 + $0x3c0] sm:$0xff]  ;;  %v76_v57 = vrot.slane %v75_v43, 2  ;;  %v48_v59 = vrot.slane %v47_v45, 2  ;;  %v240_v60 = vld [vmem:[%s1078_s2 + $0x238] sm:$0xff]  ;;  %v271_v62 = vld [vmem:[%s1078_s2 + $0x330] sm:$0xff] }
  0x23   :  { %381 = vmatpush.msrb.mxu0 %v248_v0  ;;  %336 = vmatpush.msra.mxu1 %v185_v3  ;;  %v257_v61 = vld [vmem:[%s1078_s2 + $0x2c0] sm:$0xff]  ;;  %v72_v0 = vrot.slane %v71_v50, 1  ;;  %v288_v3 = vld [vmem:[%s1078_s2 + $0x3b8] sm:$0xff]  ;;  %v98_v22 = vld [vmem:[%s1077_s1 + $0x8] sm:$0xff] }
  0x24   :  { %441 = vmatpush.msrb.mxu3 %v296_v1  ;;  %422 = vmatpush.msrb.mxu2 %v279_v2  ;;  %v60_v63 = vrot.slane %v59_v49, 1  ;;  %v32_v1 = vrot.slane %v31_v51, 1  ;;  %v65_v2 = vmax.f32 %v63_v39, %v64_v52 }
  0x25   :  { %382 = vmatpush.msrb.mxu0 %v247_v4  ;;  %401 = vmatpush.msrb.mxu1 %v264_v5  ;;  %v239_v4 = vld [vmem:[%s1078_s2 + $0x230] sm:$0xff]  ;;  %v44_v5 = vrot.slane %v43_v56, 1 }
  0x26   :  { %423 = vmatpush.msrb.mxu2 %v278_v6  ;;  %442 = vmatpush.msrb.mxu3 %v295_v7  ;;  %v77_v6 = vmax.f32 %v75_v43, %v76_v57  ;;  %v37_v7 = vadd.f32 %v36_v58, %v35_v44  ;;  %v33_v14 = vadd.f32 %v32_v1, %v31_v51  ;;  %v66_v15 = vrot.slane %v65_v2, 1 }
  0x27   :  { %383 = vmatpush.msrb.mxu0 %v246_v8  ;;  %402 = vmatpush.msrb.mxu1 %v263_v9  ;;  %v49_v8 = vadd.f32 %v48_v59, %v47_v45  ;;  %v97_v9 = vld [vmem:[%s1077_s1] sm:$0xff] }
  0x28   :  { %424 = vmatpush.msrb.mxu2 %v277_v10  ;;  %443 = vmatpush.msrb.mxu3 %v294_v11  ;;  %v256_v10 = vld [vmem:[%s1078_s2 + $0x2b8] sm:$0xff]  ;;  %v270_v11 = vld [vmem:[%s1078_s2 + $0x328] sm:$0xff]  ;;  %v38_v19 = vrot.slane %v37_v7, 1  ;;  %v101_v26 = vrot.slane %v97_v9, 4 }
  0x29   :  { %384 = vmatpush.msrb.mxu0 %v245_v12  ;;  %403 = vmatpush.msrb.mxu1 %v262_v13  ;;  %v61_v12 = vmax.f32 %v59_v49, %v60_v63  ;;  %v73_v13 = vmax.f32 %v71_v50, %v72_v0  ;;  %v50_v20 = vrot.slane %v49_v8, 1 }
  0x2a   :  { %425 = vmatpush.msrb.mxu2 %v276_v16  ;;  %444 = vmatpush.msrb.mxu3 %v293_v17  ;;  %v287_v16 = vld [vmem:[%s1078_s2 + $0x3b0] sm:$0xff]  ;;  %v45_v17 = vadd.f32 %v44_v5, %v43_v56 }
  0x2b   :  { %385 = vmatpush.msrb.mxu0 %v244_v18  ;;  %404 = vmatpush.msrb.mxu1 %v261_v21  ;;  %v78_v18 = vrot.slane %v77_v6, 1  ;;  %v99_v21 = vld [vmem:[%s1077_s1 + $0x10] sm:$0xff]  ;;  %v93_v23 = vsel %vm84_vm0, %v73_v13, %v61_v12 }
  0x2c   :  { %426 = vmatpush.msrb.mxu2 %v275_v24  ;;  %445 = vmatpush.msrb.mxu3 %v292_v25  ;;  %v52_v24 = vmul.f32 0.125, %v33_v14  ;;  %v67_v25 = vmax.f32 %v65_v2, %v66_v15 }
  0x2d   :  { %386 = vmatpush.msrb.mxu0 %v243_v30  ;;  %405 = vmatpush.msrb.mxu1 %v260_v31 }
  0x2e   :  { %427 = vmatpush.msrb.mxu2 %v274_v34  ;;  %446 = vmatpush.msrb.mxu3 %v291_v35 }
  0x2f   :  { %387 = vmatpush.msrb.mxu0 %v242_v40  ;;  %406 = vmatpush.msrb.mxu1 %v259_v41 }
  0x30   :  { %428 = vmatpush.msrb.mxu2 %v273_v46  ;;  %447 = vmatpush.msrb.mxu3 %v290_v47 }
  0x31   :  { %388 = vmatpush.msrb.mxu0 %v241_v48  ;;  %407 = vmatpush.msrb.mxu1 %v258_v53 }
  0x32   :  { %429 = vmatpush.msrb.mxu2 %v272_v54  ;;  %448 = vmatpush.msrb.mxu3 %v289_v55 }
  0x33   :  { %389 = vmatpush.msrb.mxu0 %v240_v60  ;;  %408 = vmatpush.msrb.mxu1 %v257_v61 }
  0x34   :  { %11 = vsyncpa [#allocation3], 0  ;;  %430 = vmatpush.msrb.mxu2 %v271_v62  ;;  %449 = vmatpush.msrb.mxu3 %v288_v3  ;;  %v238_v27 = vld [vmem:[%s1078_s2 + $0x228] sm:$0xff]  ;;  %v255_v28 = vld [vmem:[%s1078_s2 + $0x2b0] sm:$0xff]  ;;  %v54_v29 = vmul.f32 0.125, %v45_v17  ;;  %v79_v30 = vmax.f32 %v77_v6, %v78_v18  ;;  %v39_v31 = vadd.f32 %v38_v19, %v37_v7  ;;  %v51_v32 = vadd.f32 %v50_v20, %v49_v8  ;;  %s522_s7 = sshll.u32 %s1082_s6, 4  ;;  %s523_s7 = int_to_ptr.hbm [resolvable:$true] %s522_s7 }
  0x35   :  { %390 = vmatpush.msrb.mxu0 %v239_v4  ;;  %409 = vmatpush.msrb.mxu1 %v256_v10  ;;  %v269_v33 = vld [vmem:[%s1078_s2 + $0x320] sm:$0xff]  ;;  %v286_v34 = vld [vmem:[%s1078_s2 + $0x3a8] sm:$0xff]  ;;  %v113_v35 = vrot.slane %v99_v21, 4  ;;  %v130_v36 = vmax.f32 %v97_v9, %v101_v26  ;;  %v102_v37 = vadd.f32 %v101_v26, %v97_v9  ;;  %v100_v38 = vld [vmem:[%s1077_s1 + $0x18] sm:$0xff]  ;;  %v107_v39 = vrot.slane %v98_v22, 4 }
  0x36   :  { %431 = vmatpush.msrb.mxu2 %v270_v11  ;;  %450 = vmatpush.msrb.mxu3 %v287_v16  ;;  %v237_v40 = vld [vmem:[%s1078_s2 + $0x220] sm:$0xff]  ;;  %v85_v41 = vsel %vm84_vm0, %v54_v29, %v52_v24  ;;  %v94_v42 = vsel %vm84_vm0, %v79_v30, %v67_v25  ;;  %v53_v43 = vmul.f32 0.125, %v39_v31  ;;  %v55_v44 = vmul.f32 0.125, %v51_v32  ;;  %v254_v45 = vld [vmem:[%s1078_s2 + $0x2a8] sm:$0xff]  ;;  %v268_v46 = vld [vmem:[%s1078_s2 + $0x318] sm:$0xff] }
  0x37   :  { %391 = vmatpush.msrb.mxu0 %v238_v27  ;;  %410 = vmatpush.msrb.mxu1 %v255_v28  ;;  %v131_v47 = vrot.slane %v130_v36, 2  ;;  %v142_v48 = vmax.f32 %v99_v21, %v113_v35  ;;  %v103_v49 = vrot.slane %v102_v37, 2  ;;  %v114_v50 = vadd.f32 %v113_v35, %v99_v21  ;;  %v285_v51 = vld [vmem:[%s1078_s2 + $0x3a0] sm:$0xff]  ;;  %v236_v56 = vld [vmem:[%s1078_s2 + $0x218] sm:$0xff]  ;;  %v267_v62 = vld [vmem:[%s1078_s2 + $0x310] sm:$0xff] }
  0x38   :  { %432 = vmatpush.msrb.mxu2 %v269_v33  ;;  %451 = vmatpush.msrb.mxu3 %v286_v34  ;;  %v86_v52 = vsel %vm84_vm0, %v55_v44, %v53_v43  ;;  %v119_v53 = vrot.slane %v100_v38, 4  ;;  %v136_v54 = vmax.f32 %v98_v22, %v107_v39  ;;  %v108_v55 = vadd.f32 %v107_v39, %v98_v22  ;;  %v253_v61 = vld [vmem:[%s1078_s2 + $0x2a0] sm:$0xff]  ;;  %v284_v3 = vld [vmem:[%s1078_s2 + $0x398] sm:$0xff]  ;;  %v235_v8 = vld [vmem:[%s1078_s2 + $0x210] sm:$0xff] }
  0x39   :  { %357 = vmatmul.f32.vlgmr.msra.gmra.mxu2 %v93_v23  ;;  %392 = vmatpush.msrb.mxu0 %v237_v40  ;;  %v132_v57 = vmax.f32 %v130_v36, %v131_v47  ;;  %v143_v58 = vrot.slane %v142_v48, 2  ;;  %v104_v59 = vadd.f32 %v103_v49, %v102_v37  ;;  %v115_v60 = vrot.slane %v114_v50, 2  ;;  %v252_v9 = vld [vmem:[%s1078_s2 + $0x298] sm:$0xff]  ;;  %v266_v14 = vld [vmem:[%s1078_s2 + $0x308] sm:$0xff]  ;;  %v283_v15 = vld [vmem:[%s1078_s2 + $0x390] sm:$0xff] }
  0x3a   :  { %411 = vmatpush.msrb.mxu1 %v254_v45  ;;  %433 = vmatpush.msrb.mxu2 %v268_v46  ;;  %v137_v63 = vrot.slane %v136_v54, 2  ;;  %v148_v0 = vmax.f32 %v100_v38, %v119_v53  ;;  %v109_v1 = vrot.slane %v108_v55, 2  ;;  %v120_v2 = vadd.f32 %v119_v53, %v100_v38  ;;  %v234_v20 = vld [vmem:[%s1078_s2 + $0x208] sm:$0xff]  ;;  %v251_v21 = vld [vmem:[%s1078_s2 + $0x290] sm:$0xff]  ;;  %v265_v26 = vld [vmem:[%s1078_s2 + $0x300] sm:$0xff] }
  0x3b   :  { %452 = vmatpush.msrb.mxu3 %v285_v51  ;;  %317 = vmatmul.f32.vlgmr.msra.gmra.mxu0 %v85_v41  ;;  %v133_v4 = vrot.slane %v132_v57, 1  ;;  %v144_v5 = vmax.f32 %v142_v48, %v143_v58  ;;  %v105_v6 = vrot.slane %v104_v59, 1  ;;  %v116_v7 = vadd.f32 %v115_v60, %v114_v50  ;;  %v282_v27 = vld [vmem:[%s1078_s2 + $0x388] sm:$0xff]  ;;  %v233_v31 = vld [vmem:[%s1078_s2 + $0x200] sm:$0xff]  ;;  %v476_v45 = vld [vmem:[%s1080_s4 + $0x78] sm:$0xff] }
  0x3c   :  { %377 = vmatmul.f32.vlgmr.msra.gmra.mxu3 %v94_v42  ;;  %393 = vmatpush.msrb.mxu0 %v236_v56  ;;  %v138_v10 = vmax.f32 %v136_v54, %v137_v63  ;;  %v149_v11 = vrot.slane %v148_v0, 2  ;;  %v110_v12 = vadd.f32 %v109_v1, %v108_v55  ;;  %v121_v13 = vrot.slane %v120_v2, 2  ;;  %v250_v37 = vld [vmem:[%s1078_s2 + $0x288] sm:$0xff]  ;;  %v281_v38 = vld [vmem:[%s1078_s2 + $0x380] sm:$0xff]  ;;  %v475_v48 = vld [vmem:[%s1080_s4 + $0x70] sm:$0xff] }
  0x3d   :  { %412 = vmatpush.msrb.mxu1 %v253_v61  ;;  %434 = vmatpush.msrb.mxu2 %v267_v62  ;;  %v134_v16 = vmax.f32 %v132_v57, %v133_v4  ;;  %v145_v17 = vrot.slane %v144_v5, 1  ;;  %v106_v18 = vadd.f32 %v105_v6, %v104_v59  ;;  %v117_v19 = vrot.slane %v116_v7, 1  ;;  %v249_v44 = vld [vmem:[%s1078_s2 + $0x280] sm:$0xff]  ;;  %v474_v50 = vld [vmem:[%s1080_s4 + $0x68] sm:$0xff]  ;;  %v471_v53 = vld [vmem:[%s1080_s4 + $0x50] sm:$0xff] }
  0x3e   :  { %453 = vmatpush.msrb.mxu3 %v284_v3  ;;  %337 = vmatmul.f32.vlgmr.msra.gmra.mxu1 %v86_v52  ;;  %v139_v22 = vrot.slane %v138_v10, 1  ;;  %v150_v23 = vmax.f32 %v148_v0, %v149_v11  ;;  %v111_v24 = vrot.slane %v110_v12, 1  ;;  %v122_v25 = vadd.f32 %v121_v13, %v120_v2  ;;  %v473_v51 = vld [vmem:[%s1080_s4 + $0x60] sm:$0xff]  ;;  %v472_v52 = vld [vmem:[%s1080_s4 + $0x58] sm:$0xff]  ;;  %v470_v54 = vld [vmem:[%s1080_s4 + $0x48] sm:$0xff] }
  0x3f   :  { %394 = vmatpush.msrb.mxu0 %v235_v8  ;;  %413 = vmatpush.msrb.mxu1 %v252_v9  ;;  %v146_v28 = vmax.f32 %v144_v5, %v145_v17  ;;  %v118_v29 = vadd.f32 %v117_v19, %v116_v7  ;;  %v125_v30 = vmul.f32 0.125, %v106_v18  ;;  %v469_v55 = vld [vmem:[%s1080_s4 + $0x40] sm:$0xff]  ;;  %v468_v56 = vld [vmem:[%s1080_s4 + $0x38] sm:$0xff]  ;;  %v467_v57 = vld [vmem:[%s1080_s4 + $0x30] sm:$0xff]  ;;  %vm501_vm1 = vcmask 17408  }
  0x40   :  { %435 = vmatpush.msrb.mxu2 %v266_v14  ;;  %454 = vmatpush.msrb.mxu3 %v283_v15  ;;  %v140_v32 = vmax.f32 %v138_v10, %v139_v22  ;;  %v151_v33 = vrot.slane %v150_v23, 1  ;;  %v112_v34 = vadd.f32 %v111_v24, %v110_v12  ;;  %v123_v35 = vrot.slane %v122_v25, 1  ;;  %v466_v58 = vld [vmem:[%s1080_s4 + $0x28] sm:$0xff]  ;;  %v465_v59 = vld [vmem:[%s1080_s4 + $0x20] sm:$0xff]  ;;  %v464_v60 = vld [vmem:[%s1080_s4 + $0x18] sm:$0xff] }
  0x41   :  { %395 = vmatpush.msrb.mxu0 %v234_v20  ;;  %414 = vmatpush.msrb.mxu1 %v251_v21  ;;  %v165_v36 = vsel %vm84_vm0, %v146_v28, %v134_v16  ;;  %v127_v39 = vmul.f32 0.125, %v118_v29  ;;  %v463_v61 = vld [vmem:[%s1080_s4 + $0x10] sm:$0xff]  ;;  %v462_v62 = vld [vmem:[%s1080_s4 + $0x8] sm:$0xff]  ;;  %v461_v63 = vld [vmem:[%s1080_s4] sm:$0xff] }
  0x42   :  { %436 = vmatpush.msrb.mxu2 %v265_v26  ;;  %455 = vmatpush.msrb.mxu3 %v282_v27  ;;  %v152_v40 = vmax.f32 %v150_v23, %v151_v33  ;;  %v124_v41 = vadd.f32 %v123_v35, %v122_v25  ;;  %v126_v42 = vmul.f32 0.125, %v112_v34  ;;  %v532_v0 = vld [vmem:[%s1079_s3] ss:$0 sm:$0xff]  ;;  %s564_s3 = smov [#allocation2]  }
  0x43   :  { %437 = vmatmul.f32.vlgmr.msrb.gmra.mxu2 %v165_v36  ;;  %396 = vmatpush.msrb.mxu0 %v233_v31  ;;  %v157_v43 = vsel %vm84_vm0, %v127_v39, %v125_v30  ;;  %v533_v17 = vld [vmem:[%s1081_s5] ss:$0 sm:$0xff]  ;;  %s520_s30 = sshll.u32 %s564_s3, 4  ;;  %s521_s30 = int_to_ptr.vmem [resolvable:$true] %s520_s30 }
  0x44   :  { %415 = vmatpush.msrb.mxu1 %v250_v37  ;;  %456 = vmatpush.msrb.mxu3 %v281_v38  ;;  %v166_v46 = vsel %vm84_vm0, %v152_v40, %v140_v32  ;;  %v128_v47 = vmul.f32 0.125, %v124_v41 }
  0x45   :  { %397 = vmatmul.f32.vlgmr.msrb.gmra.mxu0 %v157_v43  ;;  %457 = vmatmul.f32.vlgmr.msrb.gmra.mxu3 %v166_v46 }
  0x46   :  { %416 = vmatpush.msrb.mxu1 %v249_v44  ;;  %v158_v49 = vsel %vm84_vm0, %v128_v47, %v126_v42  ;;  %481 = vmatpush.msra.mxu0 %v476_v45 }
  0x47   :  { %417 = vmatmul.f32.vlgmr.msrb.gmra.mxu1 %v158_v49 }
  0x48   :  { %482 = vmatpush.msra.mxu0 %v475_v48 }
  0x4a   :  { %483 = vmatpush.msra.mxu0 %v474_v50 }
  0x4c   :  { %484 = vmatpush.msra.mxu0 %v473_v51 }
  0x4e   :  { %485 = vmatpush.msra.mxu0 %v472_v52 }
  0x50   :  { %486 = vmatpush.msra.mxu0 %v471_v53 }
  0x52   :  { %487 = vmatpush.msra.mxu0 %v470_v54 }
  0x54   :  { %488 = vmatpush.msra.mxu0 %v469_v55 }
  0x56   :  { %489 = vmatpush.msra.mxu0 %v468_v56 }
  0x58   :  { %490 = vmatpush.msra.mxu0 %v467_v57 }
  0x5a   :  { %491 = vmatpush.msra.mxu0 %v466_v58 }
  0x5c   :  { %492 = vmatpush.msra.mxu0 %v465_v59 }
  0x5e   :  { %493 = vmatpush.msra.mxu0 %v464_v60 }
  0x60   :  { %494 = vmatpush.msra.mxu0 %v463_v61 }
  0x62   :  { %495 = vmatpush.msra.mxu0 %v462_v62 }
  0x64   :  { %496 = vmatpush.msra.mxu0 %v461_v63 }
  0xb8   :  { %v318_v1 = vpop.f32.mrf.mxu0 }
  0xb9   :  { %v319_v2 = vadd.f32 %v532_v0, %v318_v1 }
  0xbb   :  { %v338_v3 = vpop.f32.mrf.mxu1 }
  0xbc   :  { %v339_v4 = vadd.f32 %v338_v3, %v319_v2  ;;  %v358_v5 = vpop.f32.mrf.mxu2 }
  0xbe   :  { %v359_v6 = vadd.f32 %v358_v5, %v339_v4 }
  0xbf   :  { %v378_v7 = vpop.f32.mrf.mxu3 }
  0xc0   :  { %v379_v8 = vadd.f32 %v378_v7, %v359_v6 }
  0xc2   :  { %v398_v9 = vpop.f32.mrf.mxu0 }
  0xc3   :  { %v399_v10 = vadd.f32 %v398_v9, %v379_v8 }
  0xc4   :  { %v418_v11 = vpop.f32.mrf.mxu1 }
  0xc5   :  { %v419_v12 = vadd.f32 %v418_v11, %v399_v10 }
  0xc6   :  { %v438_v13 = vpop.f32.mrf.mxu2 }
  0xc7   :  { %v439_v14 = vadd.f32 %v438_v13, %v419_v12 }
  0xc8   :  { %v458_v15 = vpop.f32.mrf.mxu3 }
  0xc9   :  { %v459_v16 = vadd.f32 %v458_v15, %v439_v14 }
  0xcb   :  { %497 = vmatmul.f32.vlgmr.msra.gmra.mxu0 %v459_v16 }
 0x148   :  { %v498_v18 = vpop.f32.mrf.mxu0 }
 0x149   :  { %v499_v19 = vadd.f32 %v533_v17, %v498_v18 }
 0x14b   :  { %v502_v20 = vsel %vm501_vm1, %v499_v19, -inf }
 0x14c   :  { %503 = vmax.xlane.f32.xlu0 %v502_v20 }
 0x1bf   :  { %v504_v21 = vpop.xlane.xlu0 %503 }
 0x1c0   :  { %v505_v22 = vsub.f32 %v499_v19, %v504_v21 }
 0x1c2   :  { %v506_v23 = vmul.f32 1.442695, %v505_v22 }
 0x1c4   :  { %534 = vpow2.f32 %v506_v23 }
 0x1ca   :  { %v535_v24 = vpop.eup %534 }
 0x1cb   :  { %v508_v25 = vsel %vm501_vm1, %v535_v24, 0.0 }
 0x1cc   :  { %509 = vadd.xlane.f32.xlu0 %v508_v25 }
 0x23f   :  { %v510_v26 = vpop.xlane.xlu0 %509 }
 0x240   :  { %536 = vlog2.f32 %v510_v26 }
 0x246   :  { %v537_v27 = vpop.eup %536 }
 0x247   :  { %v512_v28 = vmul.f32 0.6931472, %v537_v27 }
 0x249   :  { %v513_v29 = vsub.f32 %v505_v22, %v512_v28 }
 0x24b   :  { %514 = vst.msk [vmem:[#allocation2] sm:$0x3] %vm501_vm1, %v513_v29 }
 0x24c   :  { %525 = dma.vmem_to_hbm [thread:$0]  %s521_s30, 32, %s523_s7, [#allocation3]  }
 0x24d   :  { %562 = dma.done.wait [#allocation3], 32  }
 0x24e   :  { %563 = vsyncadd [#allocation3], 4294967264 }
 0x24f   :  { %530 = vsyncpa [#allocation3], 1 }

// kernel: esim_forward.6
= control target key start
LH: loop header
LB: loop body
LE: loop exit
PB: predicated region body
PF: predicated region fallthrough
CT: control target
= control target key end

     0   :  { %s15135_s1 = inlined_call_operand.vmem [shape: bf16[1024,1024], index: 1, kind: input, shape index: {}]   ;;  %s15136_s2 = inlined_call_operand.vmem [shape: bf16[256,1024], index: 2, kind: input, shape index: {}]   ;;  %s15137_s6 = inlined_call_operand.vmem [shape: f32[1,64,256], index: 6, kind: output, shape index: {}]   ;;  %s15138_s0 = inlined_call_operand.vmem [shape: bf16[1,64,1024], index: 0, kind: input, shape index: {}]   ;;  %s15139_s3 = inlined_call_operand.vmem [shape: f32[1,1024], index: 3, kind: input, shape index: {}]   ;;  %s15140_s4 = inlined_call_operand.vmem [shape: f32[8,256], index: 4, kind: input, shape index: {}, may-alias: {4,5}]   ;;  %s15141_s5 = inlined_call_operand.vmem [shape: f32[8,256], index: 5, kind: input, shape index: {}, may-alias: {4,5}]  }
   0x1   :  { %v6759_v0 = vld [vmem:[%s15135_s1 + $0x1c0] sm:$0xf] }
   0x2   :  { %v9201_v1 = vld [vmem:[%s15135_s1 + $0x1dc] sm:$0xf0] }
   0x3   :  { %v7015_v2 = vld [vmem:[%s15135_s1 + $0x3c0] sm:$0xf]  ;;  %v6760_v3 = vor.u32 %v9201_v1, %v6759_v0 }
   0x4   :  { %v9265_v4 = vld [vmem:[%s15135_s1 + $0x3dc] sm:$0xf0] }
   0x5   :  { %v7271_v5 = vld [vmem:[%s15135_s1 + $0x5c0] sm:$0xf]  ;;  %v7016_v7 = vor.u32 %v9265_v4, %v7015_v2  ;;  %3305 = vmatpush.bf16.msra.mxu0 %v6760_v3 }
   0x6   :  { %v9329_v6 = vld [vmem:[%s15135_s1 + $0x5dc] sm:$0xf0] }
   0x7   :  { %v7272_v8 = vor.u32 %v9329_v6, %v7271_v5  ;;  %v7527_v9 = vld [vmem:[%s15135_s1 + $0x7c0] sm:$0xf]  ;;  %3334 = vmatpush.bf16.msra.mxu1 %v7016_v7 }
   0x8   :  { %v9393_v10 = vld [vmem:[%s15135_s1 + $0x7dc] sm:$0xf0] }
   0x9   :  { %v6727_v11 = vld [vmem:[%s15135_s1 + $0x180] sm:$0xf]  ;;  %v7528_v12 = vor.u32 %v9393_v10, %v7527_v9  ;;  %3363 = vmatpush.bf16.msra.mxu2 %v7272_v8 }
   0xa   :  { %v9193_v13 = vld [vmem:[%s15135_s1 + $0x19c] sm:$0xf0] }
   0xb   :  { %v6983_v14 = vld [vmem:[%s15135_s1 + $0x380] sm:$0xf]  ;;  %v6728_v16 = vor.u32 %v9193_v13, %v6727_v11  ;;  %3392 = vmatpush.bf16.msra.mxu3 %v7528_v12 }
   0xc   :  { %v9257_v15 = vld [vmem:[%s15135_s1 + $0x39c] sm:$0xf0] }
   0xd   :  { %v6984_v17 = vor.u32 %v9257_v15, %v6983_v14  ;;  %v7239_v18 = vld [vmem:[%s15135_s1 + $0x580] sm:$0xf]  ;;  %3306 = vmatpush.bf16.msra.mxu0 %v6728_v16 }
   0xe   :  { %v9321_v19 = vld [vmem:[%s15135_s1 + $0x59c] sm:$0xf0] }
   0xf   :  { %v7495_v20 = vld [vmem:[%s15135_s1 + $0x780] sm:$0xf]  ;;  %v7240_v21 = vor.u32 %v9321_v19, %v7239_v18  ;;  %3335 = vmatpush.bf16.msra.mxu1 %v6984_v17 }
  0x10   :  { %v9385_v22 = vld [vmem:[%s15135_s1 + $0x79c] sm:$0xf0] }
  0x11   :  { %v6695_v23 = vld [vmem:[%s15135_s1 + $0x140] sm:$0xf]  ;;  %v7496_v25 = vor.u32 %v9385_v22, %v7495_v20  ;;  %3364 = vmatpush.bf16.msra.mxu2 %v7240_v21 }
  0x12   :  { %v9185_v24 = vld [vmem:[%s15135_s1 + $0x15c] sm:$0xf0] }
  0x13   :  { %v6951_v26 = vld [vmem:[%s15135_s1 + $0x340] sm:$0xf]  ;;  %v6696_v29 = vor.u32 %v9185_v24, %v6695_v23  ;;  %3393 = vmatpush.bf16.msra.mxu3 %v7496_v25 }
  0x14   :  { %v9249_v27 = vld [vmem:[%s15135_s1 + $0x35c] sm:$0xf0] }
  0x15   :  { %v7207_v28 = vld [vmem:[%s15135_s1 + $0x540] sm:$0xf]  ;;  %v6952_v33 = vor.u32 %v9249_v27, %v6951_v26  ;;  %3307 = vmatpush.bf16.msra.mxu0 %v6696_v29 }
  0x16   :  { %v9313_v30 = vld [vmem:[%s15135_s1 + $0x55c] sm:$0xf0] }
  0x17   :  { %v7463_v31 = vld [vmem:[%s15135_s1 + $0x740] sm:$0xf]  ;;  %v7208_v34 = vor.u32 %v9313_v30, %v7207_v28  ;;  %3336 = vmatpush.bf16.msra.mxu1 %v6952_v33  ;;  %v9109_v30 = vld [vmem:[%s15138_s0 + $0x4] sm:$0xf] }
  0x18   :  { %v9377_v32 = vld [vmem:[%s15135_s1 + $0x75c] sm:$0xf0] }
  0x19   :  { %v6663_v35 = vld [vmem:[%s15135_s1 + $0x100] sm:$0xf]  ;;  %v7464_v38 = vor.u32 %v9377_v32, %v7463_v31  ;;  %3365 = vmatpush.bf16.msra.mxu2 %v7208_v34  ;;  %v6409_v31 = vld [vmem:[%s15138_s0 + $0x20] sm:$0xf0] }
  0x1a   :  { %v9177_v36 = vld [vmem:[%s15135_s1 + $0x11c] sm:$0xf0] }
  0x1b   :  { %v6919_v37 = vld [vmem:[%s15135_s1 + $0x300] sm:$0xf]  ;;  %v6664_v44 = vor.u32 %v9177_v36, %v6663_v35  ;;  %3394 = vmatpush.bf16.msra.mxu3 %v7464_v38  ;;  %v6415_v35 = vld [vmem:[%s15138_s0 + $0x8] sm:$0xf] }
  0x1c   :  { %v9241_v39 = vld [vmem:[%s15135_s1 + $0x31c] sm:$0xf0] }
  0x1d   :  { %v7175_v40 = vld [vmem:[%s15135_s1 + $0x500] sm:$0xf]  ;;  %v6920_v45 = vor.u32 %v9241_v39, %v6919_v37  ;;  %3308 = vmatpush.bf16.msra.mxu0 %v6664_v44 }
  0x1e   :  { %v9305_v41 = vld [vmem:[%s15135_s1 + $0x51c] sm:$0xf0] }
  0x1f   :  { %v7431_v42 = vld [vmem:[%s15135_s1 + $0x700] sm:$0xf]  ;;  %v7176_v46 = vor.u32 %v9305_v41, %v7175_v40  ;;  %3337 = vmatpush.bf16.msra.mxu1 %v6920_v45  ;;  %v9114_v40 = vld [vmem:[%s15138_s0 + $0x24] sm:$0xf0]  ;;  %v9110_v41 = vld [vmem:[%s15138_s0 + $0xc] sm:$0xf] }
  0x20   :  { %v9369_v43 = vld [vmem:[%s15135_s1 + $0x71c] sm:$0xf0] }
  0x21   :  { %v6631_v47 = vld [vmem:[%s15135_s1 + $0xc0] sm:$0xf]  ;;  %v7432_v50 = vor.u32 %v9369_v43, %v7431_v42  ;;  %3366 = vmatpush.bf16.msra.mxu2 %v7176_v46  ;;  %v6417_v42 = vld [vmem:[%s15138_s0 + $0x28] sm:$0xf0] }
  0x22   :  { %v9169_v48 = vld [vmem:[%s15135_s1 + $0xdc] sm:$0xf0] }
  0x23   :  { %v6887_v49 = vld [vmem:[%s15135_s1 + $0x2c0] sm:$0xf]  ;;  %v6632_v56 = vor.u32 %v9169_v48, %v6631_v47  ;;  %3395 = vmatpush.bf16.msra.mxu3 %v7432_v50 }
  0x24   :  { %v9233_v51 = vld [vmem:[%s15135_s1 + $0x2dc] sm:$0xf0] }
  0x25   :  { %v7143_v52 = vld [vmem:[%s15135_s1 + $0x4c0] sm:$0xf]  ;;  %v6888_v57 = vor.u32 %v9233_v51, %v6887_v49  ;;  %3309 = vmatpush.bf16.msra.mxu0 %v6632_v56 }
  0x26   :  { %v9297_v53 = vld [vmem:[%s15135_s1 + $0x4dc] sm:$0xf0] }
  0x27   :  { %v7399_v54 = vld [vmem:[%s15135_s1 + $0x6c0] sm:$0xf]  ;;  %v7144_v58 = vor.u32 %v9297_v53, %v7143_v52  ;;  %3338 = vmatpush.bf16.msra.mxu1 %v6888_v57  ;;  %v10119_v53 = vor.u32 %v9109_v30, %v6409_v31  ;;  %v10129_v57 = vor.u32 %v9110_v41, %v6417_v42 }
  0x28   :  { %v9361_v55 = vld [vmem:[%s15135_s1 + $0x6dc] sm:$0xf0] }
  0x29   :  { %v6599_v59 = vld [vmem:[%s15135_s1 + $0x80] sm:$0xf]  ;;  %v7400_v62 = vor.u32 %v9361_v55, %v7399_v54  ;;  %3367 = vmatpush.bf16.msra.mxu2 %v7144_v58  ;;  %v10121_v54 = vor.u32 %v9114_v40, %v6415_v35  ;;  %v9122_v35 = vld [vmem:[%s15138_s0 + $0x64] sm:$0xf0] }
  0x2a   :  { %v9161_v60 = vld [vmem:[%s15135_s1 + $0x9c] sm:$0xf0] }
  0x2b   :  { %v6855_v61 = vld [vmem:[%s15135_s1 + $0x280] sm:$0xf]  ;;  %v6600_v4 = vor.u32 %v9161_v60, %v6599_v59  ;;  %3396 = vmatpush.bf16.msra.mxu3 %v7400_v62 }
  0x2c   :  { %v9225_v63 = vld [vmem:[%s15135_s1 + $0x29c] sm:$0xf0] }
  0x2d   :  { %v7111_v0 = vld [vmem:[%s15135_s1 + $0x480] sm:$0xf]  ;;  %v6856_v5 = vor.u32 %v9225_v63, %v6855_v61  ;;  %3310 = vmatpush.bf16.msra.mxu0 %v6600_v4 }
  0x2e   :  { %v9289_v1 = vld [vmem:[%s15135_s1 + $0x49c] sm:$0xf0] }
  0x2f   :  { %v7367_v2 = vld [vmem:[%s15135_s1 + $0x680] sm:$0xf]  ;;  %v7112_v6 = vor.u32 %v9289_v1, %v7111_v0  ;;  %3339 = vmatpush.bf16.msra.mxu1 %v6856_v5 }
  0x30   :  { %v9353_v3 = vld [vmem:[%s15135_s1 + $0x69c] sm:$0xf0] }
  0x31   :  { %v6567_v7 = vld [vmem:[%s15135_s1 + $0x40] sm:$0xf]  ;;  %v7368_v10 = vor.u32 %v9353_v3, %v7367_v2  ;;  %3368 = vmatpush.bf16.msra.mxu2 %v7112_v6 }
  0x32   :  { %v9153_v8 = vld [vmem:[%s15135_s1 + $0x5c] sm:$0xf0] }
  0x33   :  { %v6823_v9 = vld [vmem:[%s15135_s1 + $0x240] sm:$0xf]  ;;  %v6568_v17 = vor.u32 %v9153_v8, %v6567_v7  ;;  %3397 = vmatpush.bf16.msra.mxu3 %v7368_v10 }
  0x34   :  { %v9217_v11 = vld [vmem:[%s15135_s1 + $0x25c] sm:$0xf0] }
  0x35   :  { %v7079_v12 = vld [vmem:[%s15135_s1 + $0x440] sm:$0xf]  ;;  %v6824_v21 = vor.u32 %v9217_v11, %v6823_v9  ;;  %3311 = vmatpush.bf16.msra.mxu0 %v6568_v17 }
  0x36   :  { %v9281_v13 = vld [vmem:[%s15135_s1 + $0x45c] sm:$0xf0] }
  0x37   :  { %v7335_v14 = vld [vmem:[%s15135_s1 + $0x640] sm:$0xf]  ;;  %v7080_v22 = vor.u32 %v9281_v13, %v7079_v12  ;;  %3340 = vmatpush.bf16.msra.mxu1 %v6824_v21 }
  0x38   :  { %v9345_v15 = vld [vmem:[%s15135_s1 + $0x65c] sm:$0xf0] }
  0x39   :  { %v6535_v16 = vld [vmem:[%s15135_s1] sm:$0xf]  ;;  %v7336_v26 = vor.u32 %v9345_v15, %v7335_v14  ;;  %3369 = vmatpush.bf16.msra.mxu2 %v7080_v22 }
  0x3a   :  { %v9145_v18 = vld [vmem:[%s15135_s1 + $0x1c] sm:$0xf0] }
  0x3b   :  { %v6791_v19 = vld [vmem:[%s15135_s1 + $0x200] sm:$0xf]  ;;  %v6536_v34 = vor.u32 %v9145_v18, %v6535_v16  ;;  %3398 = vmatpush.bf16.msra.mxu3 %v7336_v26  ;;  %v9117_v26 = vld [vmem:[%s15138_s0 + $0x44] sm:$0xf] }
  0x3c   :  { %v9209_v20 = vld [vmem:[%s15135_s1 + $0x21c] sm:$0xf0] }
  0x3d   :  { %v7047_v23 = vld [vmem:[%s15135_s1 + $0x400] sm:$0xf]  ;;  %v6792_v38 = vor.u32 %v9209_v20, %v6791_v19  ;;  %3312 = vmatpush.bf16.msra.mxu0 %v6536_v34 }
  0x3e   :  { %v9273_v24 = vld [vmem:[%s15135_s1 + $0x41c] sm:$0xf0] }
  0x3f   :  { %v7303_v25 = vld [vmem:[%s15135_s1 + $0x600] sm:$0xf]  ;;  %v7048_v39 = vor.u32 %v9273_v24, %v7047_v23  ;;  %3341 = vmatpush.bf16.msra.mxu1 %v6792_v38 }
  0x40   :  { %v9337_v27 = vld [vmem:[%s15135_s1 + $0x61c] sm:$0xf0] }
  0x41   :  { %v6407_v28 = vld [vmem:[%s15138_s0] sm:$0xf]  ;;  %v7304_v43 = vor.u32 %v9337_v27, %v7303_v25  ;;  %3370 = vmatpush.bf16.msra.mxu2 %v7048_v39  ;;  %v6441_v27 = vld [vmem:[%s15138_s0 + $0x60] sm:$0xf0] }
  0x42   :  { %v9113_v29 = vld [vmem:[%s15138_s0 + $0x1c] sm:$0xf0]  ;;  %3342 = vmatmul.bf16.vlgmr.msra.gmra.mxu1 %v10119_v53 }
  0x43   :  { %v8295_v32 = vld [vmem:[%s15135_s1 + $0xdc0] sm:$0xf]  ;;  %v10108_v48 = vor.u32 %v9113_v29, %v6407_v28  ;;  %3399 = vmatpush.bf16.msra.mxu3 %v7304_v43 }
  0x44   :  { %v9585_v33 = vld [vmem:[%s15135_s1 + $0xddc] sm:$0xf0]  ;;  %3371 = vmatmul.bf16.vlgmr.msra.gmra.mxu2 %v10121_v54 }
  0x45   :  { %v8551_v36 = vld [vmem:[%s15135_s1 + $0xfc0] sm:$0xf]  ;;  %v8296_v44 = vor.u32 %v9585_v33, %v8295_v32  ;;  %3313 = vmatmul.bf16.vlgmr.msra.gmra.mxu0 %v10108_v48  ;;  %v6447_v32 = vld [vmem:[%s15138_s0 + $0x48] sm:$0xf] }
  0x46   :  { %v9649_v37 = vld [vmem:[%s15135_s1 + $0xfdc] sm:$0xf0]  ;;  %3400 = vmatmul.bf16.vlgmr.msra.gmra.mxu3 %v10129_v57 }
  0x47   :  { %v7783_v45 = vld [vmem:[%s15135_s1 + $0x9c0] sm:$0xf]  ;;  %v8552_v49 = vor.u32 %v9649_v37, %v8551_v36  ;;  %3479 = vmatpush.bf16.msrb.mxu2 %v8296_v44  ;;  %v9118_v36 = vld [vmem:[%s15138_s0 + $0x4c] sm:$0xf] }
  0x48   :  { %v9457_v46 = vld [vmem:[%s15135_s1 + $0x9dc] sm:$0xf0]  ;;  %v6449_v37 = vld [vmem:[%s15138_s0 + $0x68] sm:$0xf0] }
  0x49   :  { %v8039_v47 = vld [vmem:[%s15135_s1 + $0xbc0] sm:$0xf]  ;;  %v7784_v58 = vor.u32 %v9457_v46, %v7783_v45  ;;  %3508 = vmatpush.bf16.msrb.mxu3 %v8552_v49 }
  0x4a   :  { %v9521_v50 = vld [vmem:[%s15135_s1 + $0xbdc] sm:$0xf0] }
  0x4b   :  { %v8263_v51 = vld [vmem:[%s15135_s1 + $0xd80] sm:$0xf]  ;;  %v8040_v59 = vor.u32 %v9521_v50, %v8039_v47  ;;  %3421 = vmatpush.bf16.msrb.mxu0 %v7784_v58  ;;  %v10251_v50 = vor.u32 %v9117_v26, %v6441_v27 }
  0x4c   :  { %v9577_v52 = vld [vmem:[%s15135_s1 + $0xd9c] sm:$0xf0] }
  0x4d   :  { %v8519_v55 = vld [vmem:[%s15135_s1 + $0xf80] sm:$0xf]  ;;  %v8264_v60 = vor.u32 %v9577_v52, %v8263_v51  ;;  %3450 = vmatpush.bf16.msrb.mxu1 %v8040_v59  ;;  %15178 = vst [vmem:[#allocation6_spill] sm:$0xff] %v10251_v50  ;;  %v10253_v51 = vor.u32 %v9122_v35, %v6447_v32 }
  0x4e   :  { %v9641_v56 = vld [vmem:[%s15135_s1 + $0xf9c] sm:$0xf0] }
  0x4f   :  { %v7751_v61 = vld [vmem:[%s15135_s1 + $0x980] sm:$0xf]  ;;  %v8520_v0 = vor.u32 %v9641_v56, %v8519_v55  ;;  %3480 = vmatpush.bf16.msrb.mxu2 %v8264_v60  ;;  %15179 = vst [vmem:[#allocation7_spill] sm:$0xff] %v10253_v51  ;;  %v10261_v56 = vor.u32 %v9118_v36, %v6449_v37 }
  0x50   :  { %v9449_v62 = vld [vmem:[%s15135_s1 + $0x99c] sm:$0xf0] }
  0x51   :  { %v8007_v63 = vld [vmem:[%s15135_s1 + $0xb80] sm:$0xf]  ;;  %v7752_v6 = vor.u32 %v9449_v62, %v7751_v61  ;;  %3509 = vmatpush.bf16.msrb.mxu3 %v8520_v0  ;;  %15180 = vst [vmem:[#allocation8_spill] sm:$0xff] %v10261_v56 }
  0x52   :  { %v9513_v1 = vld [vmem:[%s15135_s1 + $0xb9c] sm:$0xf0]  ;;  %3347 = vmatmul.bf16.gmra.mxu1 %v10251_v50 }
  0x53   :  { %v8231_v2 = vld [vmem:[%s15135_s1 + $0xd40] sm:$0xf]  ;;  %v8008_v7 = vor.u32 %v9513_v1, %v8007_v63  ;;  %3422 = vmatpush.bf16.msrb.mxu0 %v7752_v6 }
  0x54   :  { %v9569_v3 = vld [vmem:[%s15135_s1 + $0xd5c] sm:$0xf0]  ;;  %3376 = vmatmul.bf16.gmra.mxu2 %v10253_v51 }
  0x55   :  { %v8487_v4 = vld [vmem:[%s15135_s1 + $0xf40] sm:$0xf]  ;;  %v8232_v8 = vor.u32 %v9569_v3, %v8231_v2  ;;  %3451 = vmatpush.bf16.msrb.mxu1 %v8008_v7 }
  0x56   :  { %v9633_v5 = vld [vmem:[%s15135_s1 + $0xf5c] sm:$0xf0]  ;;  %3405 = vmatmul.bf16.gmra.mxu3 %v10261_v56 }
  0x57   :  { %v7719_v9 = vld [vmem:[%s15135_s1 + $0x940] sm:$0xf]  ;;  %v8488_v12 = vor.u32 %v9633_v5, %v8487_v4  ;;  %3481 = vmatpush.bf16.msrb.mxu2 %v8232_v8 }
  0x58   :  { %v9441_v10 = vld [vmem:[%s15135_s1 + $0x95c] sm:$0xf0] }
  0x59   :  { %v7975_v11 = vld [vmem:[%s15135_s1 + $0xb40] sm:$0xf]  ;;  %v7720_v18 = vor.u32 %v9441_v10, %v7719_v9  ;;  %3510 = vmatpush.bf16.msrb.mxu3 %v8488_v12 }
  0x5a   :  { %v9505_v13 = vld [vmem:[%s15135_s1 + $0xb5c] sm:$0xf0] }
  0x5b   :  { %v8199_v14 = vld [vmem:[%s15135_s1 + $0xd00] sm:$0xf]  ;;  %v7976_v21 = vor.u32 %v9505_v13, %v7975_v11  ;;  %3423 = vmatpush.bf16.msrb.mxu0 %v7720_v18 }
  0x5c   :  { %v9561_v15 = vld [vmem:[%s15135_s1 + $0xd1c] sm:$0xf0] }
  0x5d   :  { %v8455_v16 = vld [vmem:[%s15135_s1 + $0xf00] sm:$0xf]  ;;  %v8200_v22 = vor.u32 %v9561_v15, %v8199_v14  ;;  %3452 = vmatpush.bf16.msrb.mxu1 %v7976_v21 }
  0x5e   :  { %v9625_v17 = vld [vmem:[%s15135_s1 + $0xf1c] sm:$0xf0] }
  0x5f   :  { %v6439_v19 = vld [vmem:[%s15138_s0 + $0x40] sm:$0xf]  ;;  %v8456_v28 = vor.u32 %v9625_v17, %v8455_v16  ;;  %3482 = vmatpush.bf16.msrb.mxu2 %v8200_v22 }
  0x60   :  { %v9121_v20 = vld [vmem:[%s15138_s0 + $0x5c] sm:$0xf0] }
  0x61   :  { %v7687_v23 = vld [vmem:[%s15135_s1 + $0x900] sm:$0xf]  ;;  %v10240_v44 = vor.u32 %v9121_v20, %v6439_v19  ;;  %3511 = vmatpush.bf16.msrb.mxu3 %v8456_v28  ;;  %v9125_v28 = vld [vmem:[%s15138_s0 + $0x84] sm:$0xf] }
  0x62   :  { %v9433_v24 = vld [vmem:[%s15135_s1 + $0x91c] sm:$0xf0] }
  0x63   :  { %v7943_v25 = vld [vmem:[%s15135_s1 + $0xb00] sm:$0xf]  ;;  %v7688_v38 = vor.u32 %v9433_v24, %v7687_v23  ;;  %15177 = vst [vmem:[#allocation5_spill] sm:$0xff] %v10240_v44  ;;  %3318 = vmatmul.bf16.gmra.mxu0 %v10240_v44 }
  0x64   :  { %v9497_v29 = vld [vmem:[%s15135_s1 + $0xb1c] sm:$0xf0] }
  0x65   :  { %v8167_v30 = vld [vmem:[%s15135_s1 + $0xcc0] sm:$0xf]  ;;  %v7944_v39 = vor.u32 %v9497_v29, %v7943_v25  ;;  %3424 = vmatpush.bf16.msrb.mxu0 %v7688_v38  ;;  %v6473_v29 = vld [vmem:[%s15138_s0 + $0xa0] sm:$0xf0] }
  0x66   :  { %v9553_v31 = vld [vmem:[%s15135_s1 + $0xcdc] sm:$0xf0]  ;;  %v10353_v37 = vor.u32 %v9125_v28, %v6473_v29  ;;  %v9245_v29 = vld [vmem:[%s15135_s1 + $0x344] sm:$0xf] }
  0x67   :  { %v8423_v33 = vld [vmem:[%s15135_s1 + $0xec0] sm:$0xf]  ;;  %v8168_v40 = vor.u32 %v9553_v31, %v8167_v30  ;;  %3453 = vmatpush.bf16.msrb.mxu1 %v7944_v39  ;;  %v6479_v30 = vld [vmem:[%s15138_s0 + $0x88] sm:$0xf] }
  0x68   :  { %v9617_v34 = vld [vmem:[%s15135_s1 + $0xedc] sm:$0xf0]  ;;  %v9130_v31 = vld [vmem:[%s15138_s0 + $0xa4] sm:$0xf0]  ;;  %15182 = vst [vmem:[#allocation10_spill] sm:$0xff] %v10353_v37  ;;  %3352 = vmatmul.bf16.gmra.mxu1 %v10353_v37 }
  0x69   :  { %v7655_v41 = vld [vmem:[%s15135_s1 + $0x8c0] sm:$0xf]  ;;  %v8424_v45 = vor.u32 %v9617_v34, %v8423_v33  ;;  %3483 = vmatpush.bf16.msrb.mxu2 %v8168_v40  ;;  %v9126_v33 = vld [vmem:[%s15138_s0 + $0x8c] sm:$0xf]  ;;  %v10355_v38 = vor.u32 %v9130_v31, %v6479_v30  ;;  %v9325_v40 = vld [vmem:[%s15135_s1 + $0x5c4] sm:$0xf] }
  0x6a   :  { %v9425_v42 = vld [vmem:[%s15135_s1 + $0x8dc] sm:$0xf0]  ;;  %v6481_v34 = vld [vmem:[%s15138_s0 + $0xa8] sm:$0xf0]  ;;  %v6953_v30 = vld [vmem:[%s15135_s1 + $0x360] sm:$0xf0] }
  0x6b   :  { %v7911_v43 = vld [vmem:[%s15135_s1 + $0xac0] sm:$0xf]  ;;  %v7656_v58 = vor.u32 %v9425_v42, %v7655_v41  ;;  %3512 = vmatpush.bf16.msrb.mxu3 %v8424_v45  ;;  %15183 = vst [vmem:[#allocation11_spill] sm:$0xff] %v10355_v38  ;;  %v10357_v39 = vor.u32 %v9126_v33, %v6481_v34  ;;  %3381 = vmatmul.bf16.gmra.mxu2 %v10355_v38  ;;  %v7273_v41 = vld [vmem:[%s15135_s1 + $0x5e0] sm:$0xf0] }
  0x6c   :  { %v9489_v46 = vld [vmem:[%s15135_s1 + $0xadc] sm:$0xf0]  ;;  %v9197_v42 = vld [vmem:[%s15135_s1 + $0x1c4] sm:$0xf] }
  0x6d   :  { %v8135_v47 = vld [vmem:[%s15135_s1 + $0xc80] sm:$0xf]  ;;  %v7912_v59 = vor.u32 %v9489_v46, %v7911_v43  ;;  %3425 = vmatpush.bf16.msrb.mxu0 %v7656_v58  ;;  %15184 = vst [vmem:[#allocation12_spill] sm:$0xff] %v10357_v39  ;;  %3410 = vmatmul.bf16.gmra.mxu3 %v10357_v39  ;;  %v7276_v43 = vor.u32 %v9325_v40, %v7273_v41  ;;  %v6761_v45 = vld [vmem:[%s15135_s1 + $0x1e0] sm:$0xf0] }
  0x6e   :  { %v9545_v49 = vld [vmem:[%s15135_s1 + $0xc9c] sm:$0xf0]  ;;  %v9389_v46 = vld [vmem:[%s15135_s1 + $0x7c4] sm:$0xf] }
  0x6f   :  { %v8391_v52 = vld [vmem:[%s15135_s1 + $0xe80] sm:$0xf]  ;;  %v8136_v60 = vor.u32 %v9545_v49, %v8135_v47  ;;  %3454 = vmatpush.bf16.msrb.mxu1 %v7912_v59  ;;  %v7529_v47 = vld [vmem:[%s15135_s1 + $0x7e0] sm:$0xf0]  ;;  %v6764_v49 = vor.u32 %v9197_v42, %v6761_v45 }
  0x70   :  { %v9609_v55 = vld [vmem:[%s15135_s1 + $0xe9c] sm:$0xf0]  ;;  %v7017_v58 = vld [vmem:[%s15135_s1 + $0x3e0] sm:$0xf0] }
  0x71   :  { %v7623_v61 = vld [vmem:[%s15135_s1 + $0x880] sm:$0xf]  ;;  %v8392_v63 = vor.u32 %v9609_v55, %v8391_v52  ;;  %3484 = vmatpush.bf16.msrb.mxu2 %v8136_v60  ;;  %v7532_v52 = vor.u32 %v9389_v46, %v7529_v47  ;;  %v9261_v55 = vld [vmem:[%s15135_s1 + $0x3c4] sm:$0xf] }
  0x72   :  { %v9417_v62 = vld [vmem:[%s15135_s1 + $0x89c] sm:$0xf0]  ;;  %v9317_v59 = vld [vmem:[%s15135_s1 + $0x584] sm:$0xf]  ;;  %v7020_v60 = vor.u32 %v9261_v55, %v7017_v58  ;;  %v9115_v55 = vld [vmem:[%s15138_s0 + $0x2c] sm:$0xf0] }
  0x73   :  { %v7879_v0 = vld [vmem:[%s15135_s1 + $0xa80] sm:$0xf]  ;;  %v7624_v2 = vor.u32 %v9417_v62, %v7623_v61  ;;  %3513 = vmatpush.bf16.msrb.mxu3 %v8392_v63  ;;  %v7241_v61 = vld [vmem:[%s15135_s1 + $0x5a0] sm:$0xf0]  ;;  %v9111_v58 = vld [vmem:[%s15138_s0 + $0x14] sm:$0xf] }
  0x74   :  { %v9481_v1 = vld [vmem:[%s15135_s1 + $0xa9c] sm:$0xf0]  ;;  %v9189_v62 = vld [vmem:[%s15135_s1 + $0x184] sm:$0xf] }
  0x75   :  { %v8103_v3 = vld [vmem:[%s15135_s1 + $0xc40] sm:$0xf]  ;;  %v7880_v6 = vor.u32 %v9481_v1, %v7879_v0  ;;  %3426 = vmatpush.bf16.msrb.mxu0 %v7624_v2  ;;  %v6729_v63 = vld [vmem:[%s15135_s1 + $0x1a0] sm:$0xf0]  ;;  %v7244_v0 = vor.u32 %v9317_v59, %v7241_v61  ;;  %v6425_v59 = vld [vmem:[%s15138_s0 + $0x30] sm:$0xf0] }
  0x76   :  { %v9537_v4 = vld [vmem:[%s15135_s1 + $0xc5c] sm:$0xf0]  ;;  %v6732_v1 = vor.u32 %v9189_v62, %v6729_v63  ;;  %v9381_v2 = vld [vmem:[%s15135_s1 + $0x784] sm:$0xf]  ;;  %v9116_v61 = vld [vmem:[%s15138_s0 + $0x34] sm:$0xf0] }
  0x77   :  { %v7591_v5 = vld [vmem:[%s15135_s1 + $0x840] sm:$0xf]  ;;  %v8104_v7 = vor.u32 %v9537_v4, %v8103_v3  ;;  %3455 = vmatpush.bf16.msrb.mxu1 %v7880_v6  ;;  %v7497_v3 = vld [vmem:[%s15135_s1 + $0x7a0] sm:$0xf0]  ;;  %v9112_v62 = vld [vmem:[%s15138_s0 + $0x1c] sm:$0xf] }
  0x78   :  { %v9409_v8 = vld [vmem:[%s15135_s1 + $0x85c] sm:$0xf0]  ;;  %v9253_v4 = vld [vmem:[%s15135_s1 + $0x384] sm:$0xf]  ;;  %v6433_v63 = vld [vmem:[%s15138_s0 + $0x38] sm:$0xf0] }
  0x79   :  { %v8359_v9 = vld [vmem:[%s15135_s1 + $0xe40] sm:$0xf]  ;;  %v7592_v16 = vor.u32 %v9409_v8, %v7591_v5  ;;  %3485 = vmatpush.bf16.msrb.mxu2 %v8104_v7  ;;  %v7500_v5 = vor.u32 %v9381_v2, %v7497_v3  ;;  %v6985_v6 = vld [vmem:[%s15135_s1 + $0x3a0] sm:$0xf0]  ;;  %v10525_v3 = vor.u32 %v9112_v62, %v6433_v63 }
  0x7a   :  { %v9601_v10 = vld [vmem:[%s15135_s1 + $0xe5c] sm:$0xf0]  ;;  %v6988_v7 = vor.u32 %v9253_v4, %v6985_v6  ;;  %v9301_v31 = vld [vmem:[%s15135_s1 + $0x504] sm:$0xf] }
  0x7b   :  { %v8360_v11 = vor.u32 %v9601_v10, %v8359_v9  ;;  %v7847_v12 = vld [vmem:[%s15135_s1 + $0xa40] sm:$0xf]  ;;  %3427 = vmatpush.bf16.msrb.mxu0 %v7592_v16  ;;  %v9133_v10 = vld [vmem:[%s15138_s0 + $0xc4] sm:$0xf]  ;;  %15192 = vst [vmem:[#allocation20_spill] sm:$0xff] %v10525_v3 }
  0x7c   :  { %v9473_v13 = vld [vmem:[%s15135_s1 + $0xa5c] sm:$0xf0]  ;;  %v7177_v33 = vld [vmem:[%s15135_s1 + $0x520] sm:$0xf0] }
  0x7d   :  { %v8071_v14 = vld [vmem:[%s15135_s1 + $0xc00] sm:$0xf]  ;;  %v7848_v19 = vor.u32 %v9473_v13, %v7847_v12  ;;  %3514 = vmatpush.bf16.msrb.mxu3 %v8360_v11  ;;  %v6505_v11 = vld [vmem:[%s15138_s0 + $0xe0] sm:$0xf0]  ;;  %v6511_v12 = vld [vmem:[%s15138_s0 + $0xc8] sm:$0xf]  ;;  %v7180_v40 = vor.u32 %v9301_v31, %v7177_v33 }
  0x7e   :  { %v9529_v15 = vld [vmem:[%s15135_s1 + $0xc1c] sm:$0xf0]  ;;  %v9138_v13 = vld [vmem:[%s15138_s0 + $0xe4] sm:$0xf0]  ;;  %v9173_v34 = vld [vmem:[%s15135_s1 + $0x104] sm:$0xf] }
  0x7f   :  { %v8327_v17 = vld [vmem:[%s15135_s1 + $0xe00] sm:$0xf]  ;;  %v8072_v20 = vor.u32 %v9529_v15, %v8071_v14  ;;  %3456 = vmatpush.bf16.msrb.mxu1 %v7848_v19  ;;  %v9134_v14 = vld [vmem:[%s15138_s0 + $0xcc] sm:$0xf]  ;;  %v9365_v42 = vld [vmem:[%s15135_s1 + $0x704] sm:$0xf] }
  0x80   :  { %v9593_v18 = vld [vmem:[%s15135_s1 + $0xe1c] sm:$0xf0]  ;;  %v6513_v15 = vld [vmem:[%s15138_s0 + $0xe8] sm:$0xf0]  ;;  %v9237_v45 = vld [vmem:[%s15135_s1 + $0x304] sm:$0xf] }
  0x81   :  { %v7559_v21 = vld [vmem:[%s15135_s1 + $0x800] sm:$0xf]  ;;  %v8328_v23 = vor.u32 %v9593_v18, %v8327_v17  ;;  %3486 = vmatpush.bf16.msrb.mxu2 %v8072_v20  ;;  %v10437_v17 = vor.u32 %v9133_v10, %v6505_v11  ;;  %v10439_v18 = vor.u32 %v9138_v13, %v6511_v12  ;;  %v10441_v19 = vor.u32 %v9134_v14, %v6513_v15  ;;  %v9309_v20 = vld [vmem:[%s15135_s1 + $0x544] sm:$0xf]  ;;  %v9123_v33 = vld [vmem:[%s15138_s0 + $0x6c] sm:$0xf0] }
  0x82   :  { %v9401_v22 = vld [vmem:[%s15135_s1 + $0x81c] sm:$0xf0]  ;;  %v6921_v47 = vld [vmem:[%s15135_s1 + $0x320] sm:$0xf0] }
  0x83   :  { %v7815_v24 = vld [vmem:[%s15135_s1 + $0xa00] sm:$0xf]  ;;  %v7560_v32 = vor.u32 %v9401_v22, %v7559_v21  ;;  %3515 = vmatpush.bf16.msrb.mxu3 %v8328_v23  ;;  %15186 = vst [vmem:[#allocation14_spill] sm:$0xff] %v10437_v17  ;;  %3357 = vmatmul.bf16.gmra.mxu1 %v10437_v17  ;;  %v7209_v21 = vld [vmem:[%s15135_s1 + $0x560] sm:$0xf0] }
  0x84   :  { %v9465_v25 = vld [vmem:[%s15135_s1 + $0xa1c] sm:$0xf0]  ;;  %15187 = vst [vmem:[#allocation15_spill] sm:$0xff] %v10439_v18  ;;  %3386 = vmatmul.bf16.gmra.mxu2 %v10439_v18  ;;  %3415 = vmatmul.bf16.gmra.mxu3 %v10441_v19  ;;  %v9181_v22 = vld [vmem:[%s15135_s1 + $0x144] sm:$0xf]  ;;  %v7212_v23 = vor.u32 %v9309_v20, %v7209_v21 }
  0x85   :  { %v6471_v26 = vld [vmem:[%s15138_s0 + $0x80] sm:$0xf]  ;;  %v7816_v35 = vor.u32 %v9465_v25, %v7815_v24  ;;  %3428 = vmatpush.bf16.msrb.mxu0 %v7560_v32  ;;  %3595 = vmatpush.bf16.msra.mxu2 %v7276_v43  ;;  %15188 = vst [vmem:[#allocation16_spill] sm:$0xff] %v10441_v19  ;;  %v6697_v24 = vld [vmem:[%s15135_s1 + $0x160] sm:$0xf0]  ;;  %v6956_v32 = vor.u32 %v9245_v29, %v6953_v30 }
  0x86   :  { %v9129_v27 = vld [vmem:[%s15138_s0 + $0x9c] sm:$0xf0]  ;;  %v9373_v25 = vld [vmem:[%s15135_s1 + $0x744] sm:$0xf] }
  0x87   :  { %v10351_v36 = vor.u32 %v9129_v27, %v6471_v26  ;;  %3457 = vmatpush.bf16.msrb.mxu1 %v7816_v35  ;;  %3624 = vmatpush.bf16.msra.mxu3 %v7532_v52  ;;  %v6503_v8 = vld [vmem:[%s15138_s0 + $0xc0] sm:$0xf]  ;;  %v7465_v26 = vld [vmem:[%s15135_s1 + $0x760] sm:$0xf0]  ;;  %v6700_v27 = vor.u32 %v9181_v22, %v6697_v24  ;;  %v6423_v52 = vld [vmem:[%s15138_s0 + $0x10] sm:$0xf] }
  0x88   :  { %v9137_v9 = vld [vmem:[%s15138_s0 + $0xdc] sm:$0xf0]  ;;  %v7468_v28 = vor.u32 %v9373_v25, %v7465_v26  ;;  %v6665_v35 = vld [vmem:[%s15135_s1 + $0x120] sm:$0xf0] }
  0x89   :  { %15181 = vst [vmem:[#allocation9_spill] sm:$0xff] %v10351_v36  ;;  %3323 = vmatmul.bf16.gmra.mxu0 %v10351_v36  ;;  %3596 = vmatpush.bf16.msra.mxu2 %v7244_v0  ;;  %v10435_v16 = vor.u32 %v9137_v9, %v6503_v8  ;;  %v6668_v41 = vor.u32 %v9173_v34, %v6665_v35  ;;  %v7433_v43 = vld [vmem:[%s15135_s1 + $0x720] sm:$0xf0]  ;;  %v9119_v34 = vld [vmem:[%s15138_s0 + $0x54] sm:$0xf] }
  0x8a   :  { %3537 = vmatpush.bf16.msra.mxu0 %v6764_v49  ;;  %v7436_v46 = vor.u32 %v9365_v42, %v7433_v43  ;;  %v6924_v49 = vor.u32 %v9237_v45, %v6921_v47  ;;  %v10519_v0 = vor.u32 %v9115_v55, %v6423_v52  ;;  %v9293_v4 = vld [vmem:[%s15135_s1 + $0x4c4] sm:$0xf]  ;;  %v6457_v35 = vld [vmem:[%s15138_s0 + $0x70] sm:$0xf0]  ;;  %v9120_v42 = vld [vmem:[%s15138_s0 + $0x5c] sm:$0xf] }
  0x8b   :  { %3566 = vmatpush.bf16.msra.mxu1 %v7020_v60  ;;  %3625 = vmatpush.bf16.msra.mxu3 %v7500_v5  ;;  %15185 = vst [vmem:[#allocation13_spill] sm:$0xff] %v10435_v16  ;;  %v6431_v60 = vld [vmem:[%s15138_s0 + $0x18] sm:$0xf]  ;;  %v7145_v5 = vld [vmem:[%s15135_s1 + $0x4e0] sm:$0xf0] }
  0x8c   :  { %15189 = vst [vmem:[#allocation17_spill] sm:$0xff] %v10519_v0  ;;  %v10523_v2 = vor.u32 %v9116_v61, %v6431_v60  ;;  %v9165_v6 = vld [vmem:[%s15135_s1 + $0xc4] sm:$0xf]  ;;  %v6465_v43 = vld [vmem:[%s15138_s0 + $0x78] sm:$0xf0] }
  0x8d   :  { %3597 = vmatpush.bf16.msra.mxu2 %v7212_v23  ;;  %v6633_v8 = vld [vmem:[%s15135_s1 + $0xe0] sm:$0xf0] }
  0x8e   :  { %3538 = vmatpush.bf16.msra.mxu0 %v6732_v1  ;;  %v10521_v1 = vor.u32 %v9111_v58, %v6425_v59  ;;  %15191 = vst [vmem:[#allocation19_spill] sm:$0xff] %v10523_v2  ;;  %v9357_v9 = vld [vmem:[%s15135_s1 + $0x6c4] sm:$0xf]  ;;  %v6636_v11 = vor.u32 %v9165_v6, %v6633_v8 }
  0x8f   :  { %3567 = vmatpush.bf16.msra.mxu1 %v6988_v7  ;;  %3626 = vmatpush.bf16.msra.mxu3 %v7468_v28  ;;  %v7148_v7 = vor.u32 %v9293_v4, %v7145_v5  ;;  %v7401_v10 = vld [vmem:[%s15135_s1 + $0x6e0] sm:$0xf0] }
  0x90   :  { %15190 = vst [vmem:[#allocation18_spill] sm:$0xff] %v10521_v1  ;;  %v7404_v12 = vor.u32 %v9357_v9, %v7401_v10  ;;  %v9229_v13 = vld [vmem:[%s15135_s1 + $0x2c4] sm:$0xf] }
  0x91   :  { %3598 = vmatpush.bf16.msra.mxu2 %v7180_v40  ;;  %v6889_v14 = vld [vmem:[%s15135_s1 + $0x2e0] sm:$0xf0]  ;;  %v6463_v40 = vld [vmem:[%s15138_s0 + $0x58] sm:$0xf] }
  0x92   :  { %3539 = vmatpush.bf16.msra.mxu0 %v6700_v27  ;;  %v9285_v15 = vld [vmem:[%s15135_s1 + $0x484] sm:$0xf]  ;;  %v6892_v20 = vor.u32 %v9229_v13, %v6889_v14 }
  0x93   :  { %3568 = vmatpush.bf16.msra.mxu1 %v6956_v32  ;;  %3627 = vmatpush.bf16.msra.mxu3 %v7436_v46  ;;  %v7113_v21 = vld [vmem:[%s15135_s1 + $0x4a0] sm:$0xf0]  ;;  %v6455_v32 = vld [vmem:[%s15138_s0 + $0x50] sm:$0xf]  ;;  %v10605_v46 = vor.u32 %v9119_v34, %v6457_v35 }
  0x94   :  { %3458 = vmatmul.bf16.vlgmr.msrb.gmra.mxu1 %v10521_v1  ;;  %3487 = vmatmul.bf16.vlgmr.msrb.gmra.mxu2 %v10523_v2  ;;  %v9157_v22 = vld [vmem:[%s15135_s1 + $0x84] sm:$0xf]  ;;  %v7116_v24 = vor.u32 %v9285_v15, %v7113_v21  ;;  %v10603_v45 = vor.u32 %v9123_v33, %v6455_v32 }
  0x95   :  { %3516 = vmatmul.bf16.vlgmr.msrb.gmra.mxu3 %v10525_v3  ;;  %3599 = vmatpush.bf16.msra.mxu2 %v7148_v7  ;;  %v6601_v23 = vld [vmem:[%s15135_s1 + $0xa0] sm:$0xf0] }
  0x96   :  { %3540 = vmatpush.bf16.msra.mxu0 %v6668_v41  ;;  %v6604_v25 = vor.u32 %v9157_v22, %v6601_v23  ;;  %v9349_v26 = vld [vmem:[%s15135_s1 + $0x684] sm:$0xf]  ;;  %v9124_v41 = vld [vmem:[%s15138_s0 + $0x74] sm:$0xf0] }
  0x97   :  { %3569 = vmatpush.bf16.msra.mxu1 %v6924_v49  ;;  %3628 = vmatpush.bf16.msra.mxu3 %v7404_v12  ;;  %v7369_v27 = vld [vmem:[%s15135_s1 + $0x6a0] sm:$0xf0]  ;;  %v10607_v47 = vor.u32 %v9124_v41, %v6463_v40  ;;  %v10609_v49 = vor.u32 %v9120_v42, %v6465_v43 }
  0x98   :  { %v9221_v28 = vld [vmem:[%s15135_s1 + $0x284] sm:$0xf]  ;;  %v7372_v29 = vor.u32 %v9349_v26, %v7369_v27  ;;  %v9127_v26 = vld [vmem:[%s15138_s0 + $0x94] sm:$0xf] }
  0x99   :  { %3328 = vmatmul.bf16.gmra.mxu0 %v10435_v16  ;;  %v6857_v30 = vld [vmem:[%s15135_s1 + $0x2a0] sm:$0xf0]  ;;  %3600 = vmatpush.bf16.msra.mxu2 %v7116_v24  ;;  %v6487_v24 = vld [vmem:[%s15138_s0 + $0x90] sm:$0xf]  ;;  %v6489_v27 = vld [vmem:[%s15138_s0 + $0xb0] sm:$0xf0] }
  0x9a   :  { %3541 = vmatpush.bf16.msra.mxu0 %v6636_v11  ;;  %v6860_v31 = vor.u32 %v9221_v28, %v6857_v30  ;;  %v9277_v52 = vld [vmem:[%s15135_s1 + $0x444] sm:$0xf]  ;;  %v6495_v28 = vld [vmem:[%s15138_s0 + $0x98] sm:$0xf]  ;;  %v9128_v30 = vld [vmem:[%s15138_s0 + $0x9c] sm:$0xf]  ;;  %v10689_v33 = vor.u32 %v9127_v26, %v6489_v27 }
  0x9b   :  { %3570 = vmatpush.bf16.msra.mxu1 %v6892_v20  ;;  %3629 = vmatpush.bf16.msra.mxu3 %v7372_v29  ;;  %v7081_v55 = vld [vmem:[%s15135_s1 + $0x460] sm:$0xf0]  ;;  %v9132_v29 = vld [vmem:[%s15138_s0 + $0xb4] sm:$0xf0] }
  0x9c   :  { %v9149_v58 = vld [vmem:[%s15135_s1 + $0x44] sm:$0xf]  ;;  %v7084_v59 = vor.u32 %v9277_v52, %v7081_v55  ;;  %v10691_v34 = vor.u32 %v9132_v29, %v6495_v28 }
  0x9d   :  { %v6569_v60 = vld [vmem:[%s15135_s1 + $0x60] sm:$0xf0] }
  0x9e   :  { %3542 = vmatpush.bf16.msra.mxu0 %v6604_v25  ;;  %v9341_v61 = vld [vmem:[%s15135_s1 + $0x644] sm:$0xf]  ;;  %v6572_v63 = vor.u32 %v9149_v58, %v6569_v60  ;;  %3601 = vmatpush.bf16.msra.mxu2 %v7084_v59  ;;  %v9131_v25 = vld [vmem:[%s15138_s0 + $0xac] sm:$0xf0] }
  0x9f   :  { %3571 = vmatpush.bf16.msra.mxu1 %v6860_v31  ;;  %v7337_v62 = vld [vmem:[%s15135_s1 + $0x660] sm:$0xf0]  ;;  %v6497_v31 = vld [vmem:[%s15138_s0 + $0xb8] sm:$0xf0]  ;;  %v10687_v32 = vor.u32 %v9131_v25, %v6487_v24 }
  0xa0   :  { %v7340_v4 = vor.u32 %v9341_v61, %v7337_v62  ;;  %v9213_v5 = vld [vmem:[%s15135_s1 + $0x244] sm:$0xf]  ;;  %v10693_v35 = vor.u32 %v9128_v30, %v6497_v31  ;;  %v6519_v61 = vld [vmem:[%s15138_s0 + $0xd0] sm:$0xf]  ;;  %v6529_v24 = vld [vmem:[%s15138_s0 + $0xf8] sm:$0xf0] }
  0xa1   :  { %v6825_v6 = vld [vmem:[%s15135_s1 + $0x260] sm:$0xf0]  ;;  %v9139_v62 = vld [vmem:[%s15138_s0 + $0xec] sm:$0xf0] }
  0xa2   :  { %v9269_v7 = vld [vmem:[%s15135_s1 + $0x404] sm:$0xf]  ;;  %v6828_v8 = vor.u32 %v9213_v5, %v6825_v6  ;;  %3543 = vmatpush.bf16.msra.mxu0 %v6572_v63  ;;  %3630 = vmatpush.bf16.msra.mxu3 %v7340_v4  ;;  %v9135_v5 = vld [vmem:[%s15138_s0 + $0xd4] sm:$0xf]  ;;  %v10765_v25 = vor.u32 %v9139_v62, %v6519_v61 }
  0xa3   :  { %v7049_v9 = vld [vmem:[%s15135_s1 + $0x420] sm:$0xf0] }
  0xa4   :  { %3463 = vmatmul.bf16.gmra.mxu1 %v10605_v46  ;;  %3492 = vmatmul.bf16.gmra.mxu2 %v10607_v47  ;;  %v9141_v10 = vld [vmem:[%s15135_s1 + $0x4] sm:$0xf]  ;;  %v7052_v12 = vor.u32 %v9269_v7, %v7049_v9 }
  0xa5   :  { %3521 = vmatmul.bf16.gmra.mxu3 %v10609_v49  ;;  %v6537_v11 = vld [vmem:[%s15135_s1 + $0x20] sm:$0xf0]  ;;  %3572 = vmatpush.bf16.msra.mxu1 %v6828_v8 }
  0xa6   :  { %v6540_v13 = vor.u32 %v9141_v10, %v6537_v11  ;;  %v9333_v14 = vld [vmem:[%s15135_s1 + $0x604] sm:$0xf]  ;;  %3602 = vmatpush.bf16.msra.mxu2 %v7052_v12 }
  0xa7   :  { %v7305_v15 = vld [vmem:[%s15135_s1 + $0x620] sm:$0xf0] }
  0xa8   :  { %v9205_v20 = vld [vmem:[%s15135_s1 + $0x204] sm:$0xf]  ;;  %v7308_v21 = vor.u32 %v9333_v14, %v7305_v15  ;;  %3544 = vmatpush.bf16.msra.mxu0 %v6540_v13  ;;  %v6521_v14 = vld [vmem:[%s15138_s0 + $0xf0] sm:$0xf0]  ;;  %v6527_v15 = vld [vmem:[%s15138_s0 + $0xd8] sm:$0xf] }
  0xa9   :  { %3429 = vmatmul.bf16.vlgmr.msrb.gmra.mxu0 %v10519_v0  ;;  %v6793_v22 = vld [vmem:[%s15135_s1 + $0x220] sm:$0xf0]  ;;  %v10767_v26 = vor.u32 %v9135_v5, %v6521_v14 }
  0xaa   :  { %v6796_v23 = vor.u32 %v9205_v20, %v6793_v22  ;;  %3631 = vmatpush.bf16.msra.mxu3 %v7308_v21  ;;  %v9581_v40 = vld [vmem:[%s15135_s1 + $0xdc4] sm:$0xf]  ;;  %v9140_v20 = vld [vmem:[%s15138_s0 + $0xf4] sm:$0xf0] }
  0xab   :  { %v8297_v41 = vld [vmem:[%s15135_s1 + $0xde0] sm:$0xf0]  ;;  %v10769_v27 = vor.u32 %v9140_v20, %v6527_v15 }
  0xac   :  { %3573 = vmatpush.bf16.msra.mxu1 %v6796_v23  ;;  %v9453_v42 = vld [vmem:[%s15135_s1 + $0x9c4] sm:$0xf]  ;;  %v8300_v43 = vor.u32 %v9581_v40, %v8297_v41  ;;  %v9136_v23 = vld [vmem:[%s15138_s0 + $0xdc] sm:$0xf] }
  0xad   :  { %v7785_v52 = vld [vmem:[%s15135_s1 + $0x9e0] sm:$0xf0]  ;;  %v10771_v28 = vor.u32 %v9136_v23, %v6529_v24 }
  0xae   :  { %v9645_v55 = vld [vmem:[%s15135_s1 + $0xfc4] sm:$0xf]  ;;  %v7788_v59 = vor.u32 %v9453_v42, %v7785_v52  ;;  %3711 = vmatpush.bf16.msrb.mxu2 %v8300_v43 }
  0xaf   :  { %v8553_v58 = vld [vmem:[%s15135_s1 + $0xfe0] sm:$0xf0] }
  0xb0   :  { %v8556_v60 = vor.u32 %v9645_v55, %v8553_v58  ;;  %3653 = vmatpush.bf16.msrb.mxu0 %v7788_v59  ;;  %v9517_v63 = vld [vmem:[%s15135_s1 + $0xbc4] sm:$0xf] }
  0xb1   :  { %v8041_v4 = vld [vmem:[%s15135_s1 + $0xbe0] sm:$0xf0] }
  0xb2   :  { %3740 = vmatpush.bf16.msrb.mxu3 %v8556_v60  ;;  %v8044_v6 = vor.u32 %v9517_v63, %v8041_v4  ;;  %v9573_v7 = vld [vmem:[%s15135_s1 + $0xd84] sm:$0xf] }
  0xb3   :  { %v8265_v8 = vld [vmem:[%s15135_s1 + $0xda0] sm:$0xf0] }
  0xb4   :  { %3468 = vmatmul.bf16.gmra.mxu1 %v10689_v33  ;;  %3497 = vmatmul.bf16.gmra.mxu2 %v10691_v34  ;;  %v9445_v9 = vld [vmem:[%s15135_s1 + $0x984] sm:$0xf]  ;;  %v8268_v10 = vor.u32 %v9573_v7, %v8265_v8 }
  0xb5   :  { %3526 = vmatmul.bf16.gmra.mxu3 %v10693_v35  ;;  %v7753_v11 = vld [vmem:[%s15135_s1 + $0x9a0] sm:$0xf0]  ;;  %3682 = vmatpush.bf16.msrb.mxu1 %v8044_v6 }
  0xb6   :  { %v9637_v12 = vld [vmem:[%s15135_s1 + $0xf84] sm:$0xf]  ;;  %v7756_v21 = vor.u32 %v9445_v9, %v7753_v11  ;;  %3712 = vmatpush.bf16.msrb.mxu2 %v8268_v10 }
  0xb7   :  { %v8521_v13 = vld [vmem:[%s15135_s1 + $0xfa0] sm:$0xf0] }
  0xb8   :  { %v8524_v22 = vor.u32 %v9637_v12, %v8521_v13  ;;  %3654 = vmatpush.bf16.msrb.mxu0 %v7756_v21  ;;  %v9509_v29 = vld [vmem:[%s15135_s1 + $0xb84] sm:$0xf] }
  0xb9   :  { %3434 = vmatmul.bf16.gmra.mxu0 %v10603_v45  ;;  %v8009_v30 = vld [vmem:[%s15135_s1 + $0xba0] sm:$0xf0] }
  0xba   :  { %3741 = vmatpush.bf16.msrb.mxu3 %v8524_v22  ;;  %v8012_v31 = vor.u32 %v9509_v29, %v8009_v30  ;;  %v9565_v40 = vld [vmem:[%s15135_s1 + $0xd44] sm:$0xf] }
  0xbb   :  { %v8233_v41 = vld [vmem:[%s15135_s1 + $0xd60] sm:$0xf0] }
  0xbc   :  { %3683 = vmatpush.bf16.msrb.mxu1 %v8012_v31  ;;  %v9437_v42 = vld [vmem:[%s15135_s1 + $0x944] sm:$0xf]  ;;  %v8236_v43 = vor.u32 %v9565_v40, %v8233_v41 }
  0xbd   :  { %v7721_v52 = vld [vmem:[%s15135_s1 + $0x960] sm:$0xf0] }
  0xbe   :  { %v9629_v55 = vld [vmem:[%s15135_s1 + $0xf44] sm:$0xf]  ;;  %v7724_v59 = vor.u32 %v9437_v42, %v7721_v52  ;;  %3713 = vmatpush.bf16.msrb.mxu2 %v8236_v43 }
  0xbf   :  { %v8489_v58 = vld [vmem:[%s15135_s1 + $0xf60] sm:$0xf0]  ;;  %v10827_v14 = vpop.f32.mrf.mxu1 }
  0xc0   :  { %v8492_v60 = vor.u32 %v9629_v55, %v8489_v58  ;;  %3655 = vmatpush.bf16.msrb.mxu0 %v7724_v59  ;;  %v9501_v61 = vld [vmem:[%s15135_s1 + $0xb44] sm:$0xf] }
  0xc1   :  { %v7977_v62 = vld [vmem:[%s15135_s1 + $0xb60] sm:$0xf0] }
  0xc2   :  { %3742 = vmatpush.bf16.msrb.mxu3 %v8492_v60  ;;  %v7980_v63 = vor.u32 %v9501_v61, %v7977_v62  ;;  %v9557_v4 = vld [vmem:[%s15135_s1 + $0xd04] sm:$0xf]  ;;  %v10825_v13 = vpop.f32.mrf.mxu0 }
  0xc3   :  { %v8201_v5 = vld [vmem:[%s15135_s1 + $0xd20] sm:$0xf0] }
  0xc4   :  { %3473 = vmatmul.bf16.gmra.mxu1 %v10767_v26  ;;  %3502 = vmatmul.bf16.gmra.mxu2 %v10769_v27  ;;  %v9429_v6 = vld [vmem:[%s15135_s1 + $0x904] sm:$0xf]  ;;  %v8204_v7 = vor.u32 %v9557_v4, %v8201_v5 }
  0xc5   :  { %3531 = vmatmul.bf16.gmra.mxu3 %v10771_v28  ;;  %v7689_v8 = vld [vmem:[%s15135_s1 + $0x920] sm:$0xf0]  ;;  %3684 = vmatpush.bf16.msrb.mxu1 %v7980_v63 }
  0xc6   :  { %v9621_v9 = vld [vmem:[%s15135_s1 + $0xf04] sm:$0xf]  ;;  %v7692_v11 = vor.u32 %v9429_v6, %v7689_v8  ;;  %3714 = vmatpush.bf16.msrb.mxu2 %v8204_v7 }
  0xc7   :  { %v8457_v10 = vld [vmem:[%s15135_s1 + $0xf20] sm:$0xf0]  ;;  %v10857_v41 = vpop.f32.mrf.mxu2  ;;  %v10863_v58 = vpop.f32.mrf.mxu1 }
  0xc8   :  { %v8460_v12 = vor.u32 %v9621_v9, %v8457_v10  ;;  %3656 = vmatpush.bf16.msrb.mxu0 %v7692_v11  ;;  %v9493_v15 = vld [vmem:[%s15135_s1 + $0xb04] sm:$0xf] }
  0xc9   :  { %3439 = vmatmul.bf16.gmra.mxu0 %v10687_v32  ;;  %v7945_v20 = vld [vmem:[%s15135_s1 + $0xb20] sm:$0xf0]  ;;  %v10859_v52 = vpop.f32.mrf.mxu3 }
  0xca   :  { %3743 = vmatpush.bf16.msrb.mxu3 %v8460_v12  ;;  %v7948_v21 = vor.u32 %v9493_v15, %v7945_v20  ;;  %v9549_v22 = vld [vmem:[%s15135_s1 + $0xcc4] sm:$0xf]  ;;  %v10861_v55 = vpop.f32.mrf.mxu0 }
  0xcb   :  { %v8169_v23 = vld [vmem:[%s15135_s1 + $0xce0] sm:$0xf0] }
  0xcc   :  { %3685 = vmatpush.bf16.msrb.mxu1 %v7948_v21  ;;  %v9421_v24 = vld [vmem:[%s15135_s1 + $0x8c4] sm:$0xf]  ;;  %v8172_v29 = vor.u32 %v9549_v22, %v8169_v23 }
  0xcd   :  { %v7657_v30 = vld [vmem:[%s15135_s1 + $0x8e0] sm:$0xf0] }
  0xce   :  { %v9613_v31 = vld [vmem:[%s15135_s1 + $0xec4] sm:$0xf]  ;;  %v7660_v42 = vor.u32 %v9421_v24, %v7657_v30  ;;  %3715 = vmatpush.bf16.msrb.mxu2 %v8172_v29 }
  0xcf   :  { %v8425_v40 = vld [vmem:[%s15135_s1 + $0xee0] sm:$0xf0]  ;;  %v10889_v11 = vpop.f32.mrf.mxu2  ;;  %v10895_v20 = vpop.f32.mrf.mxu1 }
  0xd0   :  { %v8428_v43 = vor.u32 %v9613_v31, %v8425_v40  ;;  %3657 = vmatpush.bf16.msrb.mxu0 %v7660_v42  ;;  %v9485_v59 = vld [vmem:[%s15135_s1 + $0xac4] sm:$0xf] }
  0xd1   :  { %v7913_v60 = vld [vmem:[%s15135_s1 + $0xae0] sm:$0xf0]  ;;  %v10891_v12 = vpop.f32.mrf.mxu3 }
  0xd2   :  { %3744 = vmatpush.bf16.msrb.mxu3 %v8428_v43  ;;  %v7916_v61 = vor.u32 %v9485_v59, %v7913_v60  ;;  %v9541_v62 = vld [vmem:[%s15135_s1 + $0xc84] sm:$0xf] }
  0xd3   :  { %v8137_v63 = vld [vmem:[%s15135_s1 + $0xca0] sm:$0xf0] }
  0xd4   :  { %3574 = vmatmul.bf16.vlgmr.msra.gmra.mxu1 %v10119_v53  ;;  %3603 = vmatmul.bf16.vlgmr.msra.gmra.mxu2 %v10121_v54  ;;  %v9413_v4 = vld [vmem:[%s15135_s1 + $0x884] sm:$0xf]  ;;  %v8140_v5 = vor.u32 %v9541_v62, %v8137_v63 }
  0xd5   :  { %3632 = vmatmul.bf16.vlgmr.msra.gmra.mxu3 %v10129_v57  ;;  %v7625_v6 = vld [vmem:[%s15135_s1 + $0x8a0] sm:$0xf0]  ;;  %3686 = vmatpush.bf16.msrb.mxu1 %v7916_v61 }
  0xd6   :  { %v9605_v7 = vld [vmem:[%s15135_s1 + $0xe84] sm:$0xf]  ;;  %v7628_v9 = vor.u32 %v9413_v4, %v7625_v6  ;;  %3716 = vmatpush.bf16.msrb.mxu2 %v8140_v5 }
  0xd7   :  { %v8393_v8 = vld [vmem:[%s15135_s1 + $0xea0] sm:$0xf0]  ;;  %v10925_v59 = vpop.f32.mrf.mxu2  ;;  %v10931_v4 = vpop.f32.mrf.mxu1 }
  0xd8   :  { %v8396_v10 = vor.u32 %v9605_v7, %v8393_v8  ;;  %3658 = vmatpush.bf16.msrb.mxu0 %v7628_v9  ;;  %v9477_v21 = vld [vmem:[%s15135_s1 + $0xa84] sm:$0xf] }
  0xd9   :  { %3444 = vmatmul.bf16.gmra.mxu0 %v10765_v25  ;;  %v7881_v22 = vld [vmem:[%s15135_s1 + $0xaa0] sm:$0xf0]  ;;  %v10927_v62 = vpop.f32.mrf.mxu3 }
  0xda   :  { %3745 = vmatpush.bf16.msrb.mxu3 %v8396_v10  ;;  %v7884_v23 = vor.u32 %v9477_v21, %v7881_v22  ;;  %v9533_v24 = vld [vmem:[%s15135_s1 + $0xc44] sm:$0xf] }
  0xdb   :  { %v8105_v29 = vld [vmem:[%s15135_s1 + $0xc60] sm:$0xf0] }
  0xdc   :  { %3687 = vmatpush.bf16.msrb.mxu1 %v7884_v23  ;;  %v9405_v30 = vld [vmem:[%s15135_s1 + $0x844] sm:$0xf]  ;;  %v8108_v31 = vor.u32 %v9533_v24, %v8105_v29 }
  0xdd   :  { %v7593_v40 = vld [vmem:[%s15135_s1 + $0x860] sm:$0xf0] }
  0xde   :  { %v9597_v42 = vld [vmem:[%s15135_s1 + $0xe44] sm:$0xf]  ;;  %v7596_v60 = vor.u32 %v9405_v30, %v7593_v40  ;;  %3717 = vmatpush.bf16.msrb.mxu2 %v8108_v31 }
  0xdf   :  { %v8361_v43 = vld [vmem:[%s15135_s1 + $0xe60] sm:$0xf0]  ;;  %v10957_v31 = vpop.f32.mrf.mxu2 }
  0xe0   :  { %v10893_v15 = vpop.f32.mrf.mxu0  ;;  %v8364_v61 = vor.u32 %v9597_v42, %v8361_v43  ;;  %3659 = vmatpush.bf16.msrb.mxu0 %v7596_v60  ;;  %v9469_v5 = vld [vmem:[%s15135_s1 + $0xa44] sm:$0xf] }
  0xe1   :  { %v7849_v6 = vld [vmem:[%s15135_s1 + $0xa60] sm:$0xf0]  ;;  %v10965_v43 = vpop.f32.mrf.mxu3 }
  0xe2   :  { %3746 = vmatpush.bf16.msrb.mxu3 %v8364_v61  ;;  %v7852_v7 = vor.u32 %v9469_v5, %v7849_v6  ;;  %v9525_v8 = vld [vmem:[%s15135_s1 + $0xc04] sm:$0xf]  ;;  %v7279_v6 = vld [vmem:[%s15135_s1 + $0x5c8] sm:$0xf] }
  0xe3   :  { %v8073_v9 = vld [vmem:[%s15135_s1 + $0xc20] sm:$0xf0] }
  0xe4   :  { %3579 = vmatmul.bf16.gmra.mxu1 %v10251_v50  ;;  %3608 = vmatmul.bf16.gmra.mxu2 %v10253_v51  ;;  %v9397_v10 = vld [vmem:[%s15135_s1 + $0x804] sm:$0xf]  ;;  %v8076_v21 = vor.u32 %v9525_v8, %v8073_v9  ;;  %v6767_v8 = vld [vmem:[%s15135_s1 + $0x1c8] sm:$0xf] }
  0xe5   :  { %3637 = vmatmul.bf16.gmra.mxu3 %v10261_v56  ;;  %v7561_v22 = vld [vmem:[%s15135_s1 + $0x820] sm:$0xf0]  ;;  %3688 = vmatpush.bf16.msrb.mxu1 %v7852_v7  ;;  %v10969_v5 = vpop.f32.mrf.mxu1  ;;  %v9330_v7 = vld [vmem:[%s15135_s1 + $0x5e4] sm:$0xf0] }
  0xe6   :  { %v9589_v23 = vld [vmem:[%s15135_s1 + $0xe04] sm:$0xf]  ;;  %v7564_v29 = vor.u32 %v9397_v10, %v7561_v22  ;;  %3718 = vmatpush.bf16.msrb.mxu2 %v8076_v21  ;;  %v7280_v9 = vor.u32 %v9330_v7, %v7279_v6  ;;  %v9202_v10 = vld [vmem:[%s15135_s1 + $0x1e4] sm:$0xf0] }
  0xe7   :  { %v8329_v24 = vld [vmem:[%s15135_s1 + $0xe20] sm:$0xf0]  ;;  %v7535_v21 = vld [vmem:[%s15135_s1 + $0x7c8] sm:$0xf] }
  0xe8   :  { %v10929_v63 = vpop.f32.mrf.mxu0  ;;  %v8332_v30 = vor.u32 %v9589_v23, %v8329_v24  ;;  %3660 = vmatpush.bf16.msrb.mxu0 %v7564_v29  ;;  %v9461_v40 = vld [vmem:[%s15135_s1 + $0xa04] sm:$0xf]  ;;  %v9394_v22 = vld [vmem:[%s15135_s1 + $0x7e4] sm:$0xf0]  ;;  %v6768_v24 = vor.u32 %v9202_v10, %v6767_v8 }
  0xe9   :  { %3545 = vmatmul.bf16.vlgmr.msra.gmra.mxu0 %v10108_v48  ;;  %v7817_v42 = vld [vmem:[%s15135_s1 + $0xa20] sm:$0xf0]  ;;  %v7536_v29 = vor.u32 %v9394_v22, %v7535_v21  ;;  %v7023_v6 = vld [vmem:[%s15135_s1 + $0x3c8] sm:$0xf] }
  0xea   :  { %3747 = vmatpush.bf16.msrb.mxu3 %v8332_v30  ;;  %v7820_v61 = vor.u32 %v9461_v40, %v7817_v42  ;;  %3827 = vmatpush.bf16.msra.mxu2 %v7280_v9  ;;  %v9266_v7 = vld [vmem:[%s15135_s1 + $0x3e4] sm:$0xf0] }
  0xeb   :  { %v7247_v8 = vld [vmem:[%s15135_s1 + $0x588] sm:$0xf]  ;;  %v7024_v9 = vor.u32 %v9266_v7, %v7023_v6 }
  0xec   :  { %3689 = vmatpush.bf16.msrb.mxu1 %v7820_v61  ;;  %3769 = vmatpush.bf16.msra.mxu0 %v6768_v24  ;;  %v11004_v61 = vld [vmem:[%s15139_s3] sm:$0xff]  ;;  %v9322_v10 = vld [vmem:[%s15135_s1 + $0x5a4] sm:$0xf0] }
  0xed   :  { %v10999_v42 = vpop.f32.mrf.mxu1  ;;  %15193 = vst [vmem:[#allocation21_spill] sm:$0xff] %v11004_v61  ;;  %v6735_v21 = vld [vmem:[%s15135_s1 + $0x188] sm:$0xf]  ;;  %v7248_v24 = vor.u32 %v9322_v10, %v7247_v8 }
  0xee   :  { %v10993_v23 = vpop.f32.mrf.mxu2  ;;  %3856 = vmatpush.bf16.msra.mxu3 %v7536_v29  ;;  %v9194_v22 = vld [vmem:[%s15135_s1 + $0x1a4] sm:$0xf0] }
  0xef   :  { %v6736_v29 = vor.u32 %v9194_v22, %v6735_v21  ;;  %v9386_v6 = vld [vmem:[%s15135_s1 + $0x7a4] sm:$0xf0]  ;;  %3828 = vmatpush.bf16.msra.mxu2 %v7248_v24 }
  0xf0   :  { %v10995_v30 = vpop.f32.mrf.mxu3  ;;  %3798 = vmatpush.bf16.msra.mxu1 %v7024_v9  ;;  %v9258_v9 = vld [vmem:[%s15135_s1 + $0x3a4] sm:$0xf0] }
  0xf1   :  { %3770 = vmatpush.bf16.msra.mxu0 %v6736_v29  ;;  %v7215_v21 = vld [vmem:[%s15135_s1 + $0x548] sm:$0xf] }
  0xf2   :  { %v6703_v22 = vld [vmem:[%s15135_s1 + $0x148] sm:$0xf] }
  0xf3   :  { %v9186_v29 = vld [vmem:[%s15135_s1 + $0x164] sm:$0xf0] }
  0xf4   :  { %3584 = vmatmul.bf16.gmra.mxu1 %v10353_v37  ;;  %3613 = vmatmul.bf16.gmra.mxu2 %v10355_v38  ;;  %v11033_v37 = vperm.slane %v11004_v61, 0  ;;  %v6959_v51 = vld [vmem:[%s15135_s1 + $0x348] sm:$0xf] }
  0xf5   :  { %3642 = vmatmul.bf16.gmra.mxu3 %v10357_v39  ;;  %v7503_v39 = vld [vmem:[%s15135_s1 + $0x788] sm:$0xf] }
  0xf6   :  { %v11030_v7 = vpop.f32.mrf.mxu2  ;;  %v7504_v38 = vor.u32 %v9386_v6, %v7503_v39  ;;  %v3315_v10 = vadd.f32 %v10825_v13, %v11033_v37  ;;  %v6991_v39 = vld [vmem:[%s15135_s1 + $0x388] sm:$0xf] }
  0xf7   :  { %v9314_v13 = vld [vmem:[%s15135_s1 + $0x564] sm:$0xf0] }
  0xf8   :  { %3857 = vmatpush.bf16.msra.mxu3 %v7504_v38  ;;  %v6992_v38 = vor.u32 %v9258_v9, %v6991_v39  ;;  %v7216_v24 = vor.u32 %v9314_v13, %v7215_v21  ;;  %v7471_v6 = vld [vmem:[%s15135_s1 + $0x748] sm:$0xf] }
  0xf9   :  { %3550 = vmatmul.bf16.gmra.mxu0 %v10240_v44  ;;  %v9378_v39 = vld [vmem:[%s15135_s1 + $0x764] sm:$0xf0] }
  0xfa   :  { %3799 = vmatpush.bf16.msra.mxu1 %v6992_v38  ;;  %3829 = vmatpush.bf16.msra.mxu2 %v7216_v24  ;;  %v9250_v38 = vld [vmem:[%s15135_s1 + $0x364] sm:$0xf0] }
 0x100   :  { %v11039_v8 = vpop.f32.mrf.mxu1 }
 0x104   :  { %3589 = vmatmul.bf16.gmra.mxu1 %v10437_v17  ;;  %3618 = vmatmul.bf16.gmra.mxu2 %v10439_v18  ;;  %v7472_v18 = vor.u32 %v9378_v39, %v7471_v6  ;;  %v3344_v17 = vadd.f32 %v10827_v14, %v3315_v10  ;;  %v7183_v14 = vld [vmem:[%s15135_s1 + $0x508] sm:$0xf]  ;;  %v6960_v10 = vor.u32 %v9250_v38, %v6959_v51 }
 0x105   :  { %3647 = vmatmul.bf16.gmra.mxu3 %v10441_v19  ;;  %v6704_v19 = vor.u32 %v9186_v29, %v6703_v22  ;;  %v7439_v51 = vld [vmem:[%s15135_s1 + $0x708] sm:$0xf] }
 0x106   :  { %v10967_v60 = vpop.f32.mrf.mxu0  ;;  %3858 = vmatpush.bf16.msra.mxu3 %v7472_v18  ;;  %v3373_v61 = vadd.f32 %v10857_v41, %v3344_v17  ;;  %v6671_v17 = vld [vmem:[%s15135_s1 + $0x108] sm:$0xf]  ;;  %v3317_v41 = vadd.f32 %v10861_v55, %v11033_v37  ;;  %3800 = vmatpush.bf16.msra.mxu1 %v6960_v10  ;;  %v3320_v10 = vadd.f32 %v10893_v15, %v11033_v37 }
 0x107   :  { %v11071_v9 = vpop.f32.mrf.mxu2  ;;  %3771 = vmatpush.bf16.msra.mxu0 %v6704_v19  ;;  %v9306_v19 = vld [vmem:[%s15135_s1 + $0x524] sm:$0xf0] }
 0x108   :  { %v9178_v18 = vld [vmem:[%s15135_s1 + $0x124] sm:$0xf0]  ;;  %v7184_v22 = vor.u32 %v9306_v19, %v7183_v14  ;;  %v3402_v38 = vadd.f32 %v10859_v52, %v3373_v61  ;;  %v3346_v14 = vadd.f32 %v10863_v58, %v3317_v41 }
 0x109   :  { %3555 = vmatmul.bf16.gmra.mxu0 %v10351_v36  ;;  %v11035_v36 = vpop.f32.mrf.mxu3  ;;  %v6672_v24 = vor.u32 %v9178_v18, %v6671_v17  ;;  %v9370_v29 = vld [vmem:[%s15135_s1 + $0x724] sm:$0xf0] }
 0x10a   :  { %v7440_v39 = vor.u32 %v9370_v29, %v7439_v51  ;;  %3830 = vmatpush.bf16.msra.mxu2 %v7184_v22  ;;  %v3375_v17 = vadd.f32 %v10889_v11, %v3346_v14  ;;  %v6927_v52 = vld [vmem:[%s15135_s1 + $0x308] sm:$0xf] }
 0x10b   :  { %3772 = vmatpush.bf16.msra.mxu0 %v6672_v24  ;;  %v9242_v58 = vld [vmem:[%s15135_s1 + $0x324] sm:$0xf0] }
 0x10c   :  { %3859 = vmatpush.bf16.msra.mxu3 %v7440_v39  ;;  %v7151_v11 = vld [vmem:[%s15135_s1 + $0x4c8] sm:$0xf]  ;;  %v3404_v14 = vadd.f32 %v10891_v12, %v3375_v17 }
 0x10d   :  { %v9298_v15 = vld [vmem:[%s15135_s1 + $0x4e4] sm:$0xf0] }
 0x10e   :  { %v10997_v40 = vpop.f32.mrf.mxu0  ;;  %v6639_v61 = vld [vmem:[%s15135_s1 + $0xc8] sm:$0xf]  ;;  %v7152_v41 = vor.u32 %v9298_v15, %v7151_v11 }
 0x10f   :  { %v11107_v6 = vpop.f32.mrf.mxu2  ;;  %v9170_v22 = vld [vmem:[%s15135_s1 + $0xe4] sm:$0xf0] }
 0x110   :  { %v7407_v24 = vld [vmem:[%s15135_s1 + $0x6c8] sm:$0xf]  ;;  %v6640_v39 = vor.u32 %v9170_v22, %v6639_v61  ;;  %3831 = vmatpush.bf16.msra.mxu2 %v7152_v41  ;;  %v3322_v61 = vadd.f32 %v10929_v63, %v11033_v37 }
 0x111   :  { %v11074_v21 = vpop.f32.mrf.mxu3  ;;  %v9362_v51 = vld [vmem:[%s15135_s1 + $0x6e4] sm:$0xf0] }
 0x112   :  { %3773 = vmatpush.bf16.msra.mxu0 %v6640_v39  ;;  %v9234_v12 = vld [vmem:[%s15135_s1 + $0x2e4] sm:$0xf0] }
 0x113   :  { %v7119_v17 = vld [vmem:[%s15135_s1 + $0x488] sm:$0xf] }
 0x114   :  { %3690 = vmatmul.bf16.vlgmr.msrb.gmra.mxu1 %v10521_v1  ;;  %3719 = vmatmul.bf16.vlgmr.msrb.gmra.mxu2 %v10523_v2  ;;  %v9162_v22 = vld [vmem:[%s15135_s1 + $0xa4] sm:$0xf0] }
 0x115   :  { %3748 = vmatmul.bf16.vlgmr.msrb.gmra.mxu3 %v10525_v3 }
 0x116   :  { %v11037_v56 = vpop.f32.mrf.mxu0 }
 0x117   :  { %v3488_v29 = vpop.f32.mrf.mxu2 }
 0x119   :  { %3560 = vmatmul.bf16.gmra.mxu0 %v10435_v16  ;;  %v11078_v16 = vpop.f32.mrf.mxu1  ;;  %v11110_v50 = vpop.f32.mrf.mxu3 }
 0x11e   :  { %v11076_v13 = vpop.f32.mrf.mxu0 }
 0x121   :  { %v3459_v55 = vpop.f32.mrf.mxu1 }
 0x124   :  { %3695 = vmatmul.bf16.gmra.mxu1 %v10605_v46  ;;  %3724 = vmatmul.bf16.gmra.mxu2 %v10607_v47 }
 0x125   :  { %3753 = vmatmul.bf16.gmra.mxu3 %v10609_v49 }
 0x126   :  { %v3430_v44 = vpop.f32.mrf.mxu0 }
 0x127   :  { %v3431_v19 = vadd.f32 %v3430_v44, %v3402_v38  ;;  %v6928_v44 = vor.u32 %v9242_v58, %v6927_v52  ;;  %v7408_v38 = vor.u32 %v9362_v51, %v7407_v24  ;;  %v3517_v52 = vpop.f32.mrf.mxu3  ;;  %v7375_v24 = vld [vmem:[%s15135_s1 + $0x688] sm:$0xf] }
 0x128   :  { %v9354_v51 = vld [vmem:[%s15135_s1 + $0x6a4] sm:$0xf0] }
 0x129   :  { %3661 = vmatmul.bf16.vlgmr.msrb.gmra.mxu0 %v10519_v0  ;;  %v3460_v18 = vadd.f32 %v3459_v55, %v3431_v19  ;;  %3801 = vmatpush.bf16.msra.mxu1 %v6928_v44  ;;  %v3349_v55 = vadd.f32 %v10895_v20, %v3320_v10  ;;  %v3461_v11 = vpop.f32.mrf.mxu1  ;;  %v6895_v44 = vld [vmem:[%s15135_s1 + $0x2c8] sm:$0xf] }
 0x12a   :  { %3860 = vmatpush.bf16.msra.mxu3 %v7408_v38  ;;  %v6896_v20 = vor.u32 %v9234_v12, %v6895_v44  ;;  %v9290_v10 = vld [vmem:[%s15135_s1 + $0x4a4] sm:$0xf0]  ;;  %v7376_v38 = vor.u32 %v9354_v51, %v7375_v24  ;;  %v3325_v44 = vadd.f32 %v10967_v60, %v11033_v37 }
 0x12b   :  { %v3489_v19 = vadd.f32 %v3488_v29, %v3460_v18  ;;  %v3378_v2 = vadd.f32 %v10925_v59, %v3349_v55  ;;  %v6607_v59 = vld [vmem:[%s15135_s1 + $0x88] sm:$0xf]  ;;  %v7120_v41 = vor.u32 %v9290_v10, %v7119_v17  ;;  %v3490_v29 = vpop.f32.mrf.mxu2 }
 0x12c   :  { %v6608_v39 = vor.u32 %v9162_v22, %v6607_v59  ;;  %v9282_v60 = vld [vmem:[%s15135_s1 + $0x464] sm:$0xf0]  ;;  %v3354_v51 = vadd.f32 %v10969_v5, %v3325_v44 }
 0x12d   :  { %v3518_v15 = vadd.f32 %v3517_v52, %v3489_v19  ;;  %3802 = vmatpush.bf16.msra.mxu1 %v6896_v20  ;;  %v3407_v63 = vadd.f32 %v10927_v62, %v3378_v2  ;;  %3832 = vmatpush.bf16.msra.mxu2 %v7120_v41  ;;  %v3351_v52 = vadd.f32 %v10931_v4, %v3322_v61  ;;  %v6863_v2 = vld [vmem:[%s15135_s1 + $0x288] sm:$0xf] }
 0x12e   :  { %v3432_v58 = vpop.f32.mrf.mxu0  ;;  %3774 = vmatpush.bf16.msra.mxu0 %v6608_v39  ;;  %3861 = vmatpush.bf16.msra.mxu3 %v7376_v38  ;;  %v9226_v62 = vld [vmem:[%s15135_s1 + $0x2a4] sm:$0xf0] }
 0x12f   :  { %v3433_v3 = vadd.f32 %v3432_v58, %v3404_v14  ;;  %5161 = vst [vmem:[#allocation2] sm:$0xff] %v3518_v15  ;;  %v3519_v14 = vpop.f32.mrf.mxu3  ;;  %v3380_v15 = vadd.f32 %v10957_v31, %v3351_v52  ;;  %v6864_v4 = vor.u32 %v9226_v62, %v6863_v2  ;;  %v7087_v31 = vld [vmem:[%s15135_s1 + $0x448] sm:$0xf]  ;;  %v3327_v2 = vadd.f32 %v10997_v40, %v11033_v37 }
 0x130   :  { %v6575_v12 = vld [vmem:[%s15135_s1 + $0x48] sm:$0xf]  ;;  %v7088_v17 = vor.u32 %v9282_v60, %v7087_v31 }
 0x131   :  { %v3462_v18 = vadd.f32 %v3461_v11, %v3433_v3  ;;  %v3464_v19 = vpop.f32.mrf.mxu1  ;;  %v9154_v10 = vld [vmem:[%s15135_s1 + $0x64] sm:$0xf0]  ;;  %3803 = vmatpush.bf16.msra.mxu1 %v6864_v4  ;;  %v3409_v24 = vadd.f32 %v10965_v43, %v3380_v15  ;;  %v3383_v43 = vadd.f32 %v10993_v23, %v3354_v51 }
 0x132   :  { %v7343_v59 = vld [vmem:[%s15135_s1 + $0x648] sm:$0xf]  ;;  %v6576_v41 = vor.u32 %v9154_v10, %v6575_v12  ;;  %3833 = vmatpush.bf16.msra.mxu2 %v7088_v17 }
 0x133   :  { %v3491_v3 = vadd.f32 %v3490_v29, %v3462_v18  ;;  %v9346_v61 = vld [vmem:[%s15135_s1 + $0x664] sm:$0xf0]  ;;  %v3493_v18 = vpop.f32.mrf.mxu2  ;;  %v3412_v40 = vadd.f32 %v10995_v30, %v3383_v43 }
 0x134   :  { %v7344_v22 = vor.u32 %v9346_v61, %v7343_v59  ;;  %3775 = vmatpush.bf16.msra.mxu0 %v6576_v41  ;;  %v7055_v52 = vld [vmem:[%s15135_s1 + $0x408] sm:$0xf]  ;;  %3700 = vmatmul.bf16.gmra.mxu1 %v10689_v33 }
 0x135   :  { %v3520_v58 = vadd.f32 %v3519_v14, %v3491_v3  ;;  %v6543_v15 = vld [vmem:[%s15135_s1 + $0x8] sm:$0xf]  ;;  %3729 = vmatmul.bf16.gmra.mxu2 %v10691_v34  ;;  %3758 = vmatmul.bf16.gmra.mxu3 %v10693_v35 }
 0x136   :  { %v3435_v55 = vpop.f32.mrf.mxu0  ;;  %3862 = vmatpush.bf16.msra.mxu3 %v7344_v22  ;;  %v9146_v44 = vld [vmem:[%s15135_s1 + $0x24] sm:$0xf0]  ;;  %v3356_v22 = vadd.f32 %v10999_v42, %v3327_v2 }
 0x137   :  { %v3436_v11 = vadd.f32 %v3435_v55, %v3407_v63  ;;  %5169 = vst [vmem:[#allocation2 + $0x40] sm:$0xff] %v3520_v58  ;;  %v3522_v39 = vpop.f32.mrf.mxu3  ;;  %v6831_v55 = vld [vmem:[%s15135_s1 + $0x248] sm:$0xf]  ;;  %v6544_v4 = vor.u32 %v9146_v44, %v6543_v15 }
 0x138   :  { %v9274_v58 = vld [vmem:[%s15135_s1 + $0x424] sm:$0xf0] }
 0x139   :  { %3666 = vmatmul.bf16.gmra.mxu0 %v10603_v45  ;;  %v3465_v20 = vadd.f32 %v3464_v19, %v3436_v11  ;;  %v3466_v63 = vpop.f32.mrf.mxu1  ;;  %v9218_v19 = vld [vmem:[%s15135_s1 + $0x264] sm:$0xf0]  ;;  %v7056_v11 = vor.u32 %v9274_v58, %v7055_v52 }
 0x13a   :  { %v6832_v5 = vor.u32 %v9218_v19, %v6831_v55  ;;  %v7311_v23 = vld [vmem:[%s15135_s1 + $0x608] sm:$0xf]  ;;  %3776 = vmatpush.bf16.msra.mxu0 %v6544_v4 }
 0x13b   :  { %v3494_v29 = vadd.f32 %v3493_v18, %v3465_v20  ;;  %v9338_v31 = vld [vmem:[%s15135_s1 + $0x624] sm:$0xf0]  ;;  %v3495_v60 = vpop.f32.mrf.mxu2  ;;  %3834 = vmatpush.bf16.msra.mxu2 %v7056_v11 }
 0x13c   :  { %3804 = vmatpush.bf16.msra.mxu1 %v6832_v5  ;;  %v7312_v12 = vor.u32 %v9338_v31, %v7311_v23  ;;  %v6799_v20 = vld [vmem:[%s15135_s1 + $0x208] sm:$0xf] }
 0x13d   :  { %v3523_v3 = vadd.f32 %v3522_v39, %v3494_v29  ;;  %v9210_v17 = vld [vmem:[%s15135_s1 + $0x224] sm:$0xf0]  ;;  %v3385_v29 = vadd.f32 %v11030_v7, %v3356_v22  ;;  %v3330_v39 = vadd.f32 %v11037_v56, %v11033_v37 }
 0x13e   :  { %v3437_v38 = vpop.f32.mrf.mxu0  ;;  %v6800_v18 = vor.u32 %v9210_v17, %v6799_v20  ;;  %3863 = vmatpush.bf16.msra.mxu3 %v7312_v12  ;;  %v8303_v30 = vld [vmem:[%s15135_s1 + $0xdc8] sm:$0xf] }
 0x13f   :  { %v3438_v14 = vadd.f32 %v3437_v38, %v3409_v24  ;;  %5177 = vst [vmem:[#allocation2 + $0x80] sm:$0xff] %v3523_v3  ;;  %v3524_v59 = vpop.f32.mrf.mxu3  ;;  %v9586_v42 = vld [vmem:[%s15135_s1 + $0xde4] sm:$0xf0]  ;;  %v3414_v5 = vadd.f32 %v11035_v36, %v3385_v29  ;;  %v3359_v52 = vadd.f32 %v11039_v8, %v3330_v39 }
 0x140   :  { %3805 = vmatpush.bf16.msra.mxu1 %v6800_v18  ;;  %v7791_v7 = vld [vmem:[%s15135_s1 + $0x9c8] sm:$0xf]  ;;  %v8304_v38 = vor.u32 %v9586_v42, %v8303_v30 }
 0x141   :  { %v3467_v62 = vadd.f32 %v3466_v63, %v3438_v14  ;;  %v3469_v41 = vpop.f32.mrf.mxu1  ;;  %v9458_v63 = vld [vmem:[%s15135_s1 + $0x9e4] sm:$0xf0]  ;;  %v3388_v12 = vadd.f32 %v11071_v9, %v3359_v52 }
 0x142   :  { %v8559_v3 = vld [vmem:[%s15135_s1 + $0xfc8] sm:$0xf]  ;;  %v7792_v19 = vor.u32 %v9458_v63, %v7791_v7  ;;  %3943 = vmatpush.bf16.msrb.mxu2 %v8304_v38 }
 0x143   :  { %v3496_v10 = vadd.f32 %v3495_v60, %v3467_v62  ;;  %v9650_v14 = vld [vmem:[%s15135_s1 + $0xfe4] sm:$0xf0]  ;;  %v3498_v55 = vpop.f32.mrf.mxu2  ;;  %v3417_v22 = vadd.f32 %v11074_v21, %v3388_v12 }
 0x144   :  { %v8560_v43 = vor.u32 %v9650_v14, %v8559_v3  ;;  %3885 = vmatpush.bf16.msrb.mxu0 %v7792_v19  ;;  %v8047_v62 = vld [vmem:[%s15135_s1 + $0xbc8] sm:$0xf]  ;;  %3705 = vmatmul.bf16.gmra.mxu1 %v10767_v26 }
 0x145   :  { %v3525_v24 = vadd.f32 %v3524_v59, %v3496_v10  ;;  %v9522_v4 = vld [vmem:[%s15135_s1 + $0xbe4] sm:$0xf0]  ;;  %3734 = vmatmul.bf16.gmra.mxu2 %v10769_v27  ;;  %3763 = vmatmul.bf16.gmra.mxu3 %v10771_v28 }
 0x146   :  { %v3440_v61 = vpop.f32.mrf.mxu0  ;;  %3972 = vmatpush.bf16.msrb.mxu3 %v8560_v43  ;;  %v8048_v36 = vor.u32 %v9522_v4, %v8047_v62  ;;  %v8271_v8 = vld [vmem:[%s15135_s1 + $0xd88] sm:$0xf] }
 0x147   :  { %v3441_v51 = vadd.f32 %v3440_v61, %v3412_v40  ;;  %5185 = vst [vmem:[#allocation2 + $0xc0] sm:$0xff] %v3525_v24  ;;  %v3527_v11 = vpop.f32.mrf.mxu3  ;;  %v9578_v31 = vld [vmem:[%s15135_s1 + $0xda4] sm:$0xf0]  ;;  %v3332_v61 = vadd.f32 %v11076_v13, %v11033_v37 }
 0x148   :  { %v7759_v60 = vld [vmem:[%s15135_s1 + $0x988] sm:$0xf]  ;;  %v8272_v20 = vor.u32 %v9578_v31, %v8271_v8  ;;  %3914 = vmatpush.bf16.msrb.mxu1 %v8048_v36 }
 0x149   :  { %3671 = vmatmul.bf16.gmra.mxu0 %v10687_v32  ;;  %v3470_v56 = vadd.f32 %v3469_v41, %v3441_v51  ;;  %v3471_v44 = vpop.f32.mrf.mxu1  ;;  %v9450_v17 = vld [vmem:[%s15135_s1 + $0x9a4] sm:$0xf0]  ;;  %v3361_v30 = vadd.f32 %v11078_v16, %v3332_v61 }
 0x14a   :  { %v8527_v40 = vld [vmem:[%s15135_s1 + $0xf88] sm:$0xf]  ;;  %v7760_v10 = vor.u32 %v9450_v17, %v7759_v60  ;;  %3944 = vmatpush.bf16.msrb.mxu2 %v8272_v20 }
 0x14b   :  { %v3499_v58 = vadd.f32 %v3498_v55, %v3470_v56  ;;  %v9642_v59 = vld [vmem:[%s15135_s1 + $0xfa4] sm:$0xf0]  ;;  %v3500_v41 = vpop.f32.mrf.mxu2  ;;  %v3390_v56 = vadd.f32 %v11107_v6, %v3361_v30 }
 0x14c   :  { %v8528_v18 = vor.u32 %v9642_v59, %v8527_v40  ;;  %3886 = vmatpush.bf16.msrb.mxu0 %v7760_v10  ;;  %v8015_v37 = vld [vmem:[%s15135_s1 + $0xb88] sm:$0xf] }
 0x14d   :  { %v3528_v23 = vadd.f32 %v3527_v11, %v3499_v58  ;;  %v9514_v13 = vld [vmem:[%s15135_s1 + $0xba4] sm:$0xf0]  ;;  %v3419_v58 = vadd.f32 %v11110_v50, %v3390_v56 }
 0x14e   :  { %v3442_v15 = vpop.f32.mrf.mxu0  ;;  %3973 = vmatpush.bf16.msrb.mxu3 %v8528_v18  ;;  %v8016_v21 = vor.u32 %v9514_v13, %v8015_v37  ;;  %v8239_v16 = vld [vmem:[%s15135_s1 + $0xd48] sm:$0xf] }
 0x14f   :  { %v3443_v2 = vadd.f32 %v3442_v15, %v3414_v5  ;;  %5193 = vst [vmem:[#allocation2 + $0x100] sm:$0xff] %v3528_v23  ;;  %v3529_v51 = vpop.f32.mrf.mxu3  ;;  %v9570_v38 = vld [vmem:[%s15135_s1 + $0xd64] sm:$0xf0] }
 0x150   :  { %3915 = vmatpush.bf16.msrb.mxu1 %v8016_v21  ;;  %v7727_v6 = vld [vmem:[%s15135_s1 + $0x948] sm:$0xf]  ;;  %v8240_v3 = vor.u32 %v9570_v38, %v8239_v16 }
 0x151   :  { %v3472_v9 = vadd.f32 %v3471_v44, %v3443_v2  ;;  %v3474_v39 = vpop.f32.mrf.mxu1  ;;  %v9442_v14 = vld [vmem:[%s15135_s1 + $0x964] sm:$0xf0] }
 0x152   :  { %v8495_v55 = vld [vmem:[%s15135_s1 + $0xf48] sm:$0xf]  ;;  %v7728_v5 = vor.u32 %v9442_v14, %v7727_v6  ;;  %3945 = vmatpush.bf16.msrb.mxu2 %v8240_v3 }
 0x153   :  { %v3501_v24 = vadd.f32 %v3500_v41, %v3472_v9  ;;  %v9634_v19 = vld [vmem:[%s15135_s1 + $0xf64] sm:$0xf0]  ;;  %v3503_v43 = vpop.f32.mrf.mxu2 }
 0x154   :  { %v8496_v52 = vor.u32 %v9634_v19, %v8495_v55  ;;  %3887 = vmatpush.bf16.msrb.mxu0 %v7728_v5  ;;  %v7983_v4 = vld [vmem:[%s15135_s1 + $0xb48] sm:$0xf]  ;;  %3806 = vmatmul.bf16.vlgmr.msra.gmra.mxu1 %v10119_v53 }
 0x155   :  { %v3530_v42 = vadd.f32 %v3529_v51, %v3501_v24  ;;  %v9506_v36 = vld [vmem:[%s15135_s1 + $0xb64] sm:$0xf0]  ;;  %3835 = vmatmul.bf16.vlgmr.msra.gmra.mxu2 %v10121_v54  ;;  %3864 = vmatmul.bf16.vlgmr.msra.gmra.mxu3 %v10129_v57 }
 0x156   :  { %v3445_v29 = vpop.f32.mrf.mxu0  ;;  %3974 = vmatpush.bf16.msrb.mxu3 %v8496_v52  ;;  %v7984_v8 = vor.u32 %v9506_v36, %v7983_v4  ;;  %v8207_v50 = vld [vmem:[%s15135_s1 + $0xd08] sm:$0xf] }
 0x157   :  { %v3446_v7 = vadd.f32 %v3445_v29, %v3417_v22  ;;  %5201 = vst [vmem:[#allocation2 + $0x140] sm:$0xff] %v3530_v42  ;;  %v3532_v15 = vpop.f32.mrf.mxu3  ;;  %v9562_v31 = vld [vmem:[%s15135_s1 + $0xd24] sm:$0xf0] }
 0x158   :  { %v7695_v60 = vld [vmem:[%s15135_s1 + $0x908] sm:$0xf]  ;;  %v8208_v12 = vor.u32 %v9562_v31, %v8207_v50  ;;  %3916 = vmatpush.bf16.msrb.mxu1 %v7984_v8 }
 0x159   :  { %3676 = vmatmul.bf16.gmra.mxu0 %v10765_v25  ;;  %v3475_v63 = vadd.f32 %v3474_v39, %v3446_v7  ;;  %v3476_v23 = vpop.f32.mrf.mxu1  ;;  %v9434_v20 = vld [vmem:[%s15135_s1 + $0x924] sm:$0xf0] }
 0x15a   :  { %v8463_v17 = vld [vmem:[%s15135_s1 + $0xf08] sm:$0xf]  ;;  %v7696_v40 = vor.u32 %v9434_v20, %v7695_v60  ;;  %3946 = vmatpush.bf16.msrb.mxu2 %v8208_v12  ;;  %v15194_v20 = vld [vmem:[#allocation5_spill] sm:$0xff] }
 0x15b   :  { %v3504_v11 = vadd.f32 %v3503_v43, %v3475_v63  ;;  %v9626_v10 = vld [vmem:[%s15135_s1 + $0xf24] sm:$0xf0]  ;;  %v3505_v9 = vpop.f32.mrf.mxu2 }
 0x15c   :  { %v8464_v61 = vor.u32 %v9626_v10, %v8463_v17  ;;  %3888 = vmatpush.bf16.msrb.mxu0 %v7696_v40  ;;  %v7951_v29 = vld [vmem:[%s15135_s1 + $0xb08] sm:$0xf]  ;;  %v15196_v10 = vld [vmem:[#allocation7_spill] sm:$0xff] }
 0x15d   :  { %v3533_v2 = vadd.f32 %v3532_v15, %v3504_v11  ;;  %v9498_v39 = vld [vmem:[%s15135_s1 + $0xb24] sm:$0xf0] }
 0x15e   :  { %v3447_v44 = vpop.f32.mrf.mxu0  ;;  %3975 = vmatpush.bf16.msrb.mxu3 %v8464_v61  ;;  %v7952_v30 = vor.u32 %v9498_v39, %v7951_v29  ;;  %v8175_v42 = vld [vmem:[%s15135_s1 + $0xcc8] sm:$0xf] }
 0x15f   :  { %v3448_v62 = vadd.f32 %v3447_v44, %v3419_v58  ;;  %5209 = vst [vmem:[#allocation2 + $0x180] sm:$0xff] %v3533_v2  ;;  %v3534_v41 = vpop.f32.mrf.mxu3  ;;  %v9554_v7 = vld [vmem:[%s15135_s1 + $0xce4] sm:$0xf0] }
 0x160   :  { %3917 = vmatpush.bf16.msrb.mxu1 %v7952_v30  ;;  %v7663_v37 = vld [vmem:[%s15135_s1 + $0x8c8] sm:$0xf]  ;;  %v8176_v13 = vor.u32 %v9554_v7, %v8175_v42 }
 0x161   :  { %v3477_v59 = vadd.f32 %v3476_v23, %v3448_v62  ;;  %v11355_v24 = vpop.f32.mrf.mxu1  ;;  %v9426_v21 = vld [vmem:[%s15135_s1 + $0x8e4] sm:$0xf0] }
 0x162   :  { %v8431_v56 = vld [vmem:[%s15135_s1 + $0xec8] sm:$0xf]  ;;  %v7664_v6 = vor.u32 %v9426_v21, %v7663_v37  ;;  %3947 = vmatpush.bf16.msrb.mxu2 %v8176_v13 }
 0x163   :  { %v3506_v18 = vadd.f32 %v3505_v9, %v3477_v59  ;;  %v9618_v16 = vld [vmem:[%s15135_s1 + $0xee4] sm:$0xf0]  ;;  %v11385_v38 = vpop.f32.mrf.mxu2  ;;  %v15197_v59 = vld [vmem:[#allocation8_spill] sm:$0xff] }
 0x164   :  { %v8432_v63 = vor.u32 %v9618_v16, %v8431_v56  ;;  %3889 = vmatpush.bf16.msrb.mxu0 %v7664_v6  ;;  %v7919_v19 = vld [vmem:[%s15135_s1 + $0xac8] sm:$0xf] }
 0x165   :  { %v3535_v51 = vadd.f32 %v3534_v41, %v3506_v18  ;;  %v9490_v43 = vld [vmem:[%s15135_s1 + $0xae4] sm:$0xf0]  ;;  %3840 = vmatmul.bf16.gmra.mxu2 %v15196_v10  ;;  %3869 = vmatmul.bf16.gmra.mxu3 %v15197_v59 }
 0x166   :  { %v11353_v22 = vpop.f32.mrf.mxu0  ;;  %3976 = vmatpush.bf16.msrb.mxu3 %v8432_v63  ;;  %v7920_v5 = vor.u32 %v9490_v43, %v7919_v19  ;;  %v8143_v52 = vld [vmem:[%s15135_s1 + $0xc88] sm:$0xf] }
 0x167   :  { %5217 = vst [vmem:[#allocation2 + $0x1c0] sm:$0xff] %v3535_v51  ;;  %v11387_v3 = vpop.f32.mrf.mxu3  ;;  %v9546_v58 = vld [vmem:[%s15135_s1 + $0xca4] sm:$0xf0] }
 0x168   :  { %v7631_v11 = vld [vmem:[%s15135_s1 + $0x888] sm:$0xf]  ;;  %v8144_v15 = vor.u32 %v9546_v58, %v8143_v52  ;;  %3918 = vmatpush.bf16.msrb.mxu1 %v7920_v5 }
 0x169   :  { %3777 = vmatmul.bf16.vlgmr.msra.gmra.mxu0 %v10108_v48  ;;  %v11391_v55 = vpop.f32.mrf.mxu1  ;;  %v9418_v44 = vld [vmem:[%s15135_s1 + $0x8a4] sm:$0xf0] }
 0x16a   :  { %v8399_v23 = vld [vmem:[%s15135_s1 + $0xe88] sm:$0xf]  ;;  %v7632_v62 = vor.u32 %v9418_v44, %v7631_v11  ;;  %3948 = vmatpush.bf16.msrb.mxu2 %v8144_v15 }
 0x16b   :  { %v9610_v2 = vld [vmem:[%s15135_s1 + $0xea4] sm:$0xf0]  ;;  %v11417_v36 = vpop.f32.mrf.mxu2 }
 0x16c   :  { %v8400_v4 = vor.u32 %v9610_v2, %v8399_v23  ;;  %3890 = vmatpush.bf16.msrb.mxu0 %v7632_v62  ;;  %v7887_v60 = vld [vmem:[%s15135_s1 + $0xa88] sm:$0xf] }
 0x16d   :  { %v9482_v12 = vld [vmem:[%s15135_s1 + $0xaa4] sm:$0xf0] }
 0x16e   :  { %v11389_v14 = vpop.f32.mrf.mxu0  ;;  %3977 = vmatpush.bf16.msrb.mxu3 %v8400_v4  ;;  %v7888_v17 = vor.u32 %v9482_v12, %v7887_v60  ;;  %v15195_v40 = vld [vmem:[#allocation6_spill] sm:$0xff] }
 0x16f   :  { %v11419_v8 = vpop.f32.mrf.mxu3  ;;  %3811 = vmatmul.bf16.gmra.mxu1 %v15195_v40  ;;  %v8111_v61 = vld [vmem:[%s15135_s1 + $0xc48] sm:$0xf] }
 0x170   :  { %3919 = vmatpush.bf16.msrb.mxu1 %v7888_v17  ;;  %v9538_v9 = vld [vmem:[%s15135_s1 + $0xc64] sm:$0xf0] }
 0x171   :  { %v11423_v31 = vpop.f32.mrf.mxu1  ;;  %v7599_v18 = vld [vmem:[%s15135_s1 + $0x848] sm:$0xf]  ;;  %v8112_v41 = vor.u32 %v9538_v9, %v8111_v61  ;;  %v15198_v61 = vld [vmem:[#allocation9_spill] sm:$0xff] }
 0x172   :  { %v9410_v51 = vld [vmem:[%s15135_s1 + $0x864] sm:$0xf0] }
 0x173   :  { %v8367_v29 = vld [vmem:[%s15135_s1 + $0xe48] sm:$0xf]  ;;  %v11453_v30 = vpop.f32.mrf.mxu2  ;;  %v7600_v42 = vor.u32 %v9410_v51, %v7599_v18  ;;  %3949 = vmatpush.bf16.msrb.mxu2 %v8112_v41  ;;  %v15200_v18 = vld [vmem:[#allocation11_spill] sm:$0xff]  ;;  %v15201_v41 = vld [vmem:[#allocation12_spill] sm:$0xff] }
 0x174   :  { %v9602_v39 = vld [vmem:[%s15135_s1 + $0xe64] sm:$0xf0]  ;;  %v9326_v51 = vld [vmem:[%s15135_s1 + $0x5cc] sm:$0xf] }
 0x175   :  { %v8368_v7 = vor.u32 %v9602_v39, %v8367_v29  ;;  %3891 = vmatpush.bf16.msrb.mxu0 %v7600_v42  ;;  %v7855_v56 = vld [vmem:[%s15135_s1 + $0xa48] sm:$0xf]  ;;  %3845 = vmatmul.bf16.gmra.mxu2 %v15200_v18  ;;  %v7281_v29 = vld [vmem:[%s15135_s1 + $0x5e8] sm:$0xf0] }
 0x176   :  { %v11421_v50 = vpop.f32.mrf.mxu0  ;;  %v9474_v16 = vld [vmem:[%s15135_s1 + $0xa64] sm:$0xf0]  ;;  %3874 = vmatmul.bf16.gmra.mxu3 %v15201_v41  ;;  %v9198_v39 = vld [vmem:[%s15135_s1 + $0x1cc] sm:$0xf]  ;;  %v7284_v42 = vor.u32 %v9326_v51, %v7281_v29 }
 0x177   :  { %v11455_v37 = vpop.f32.mrf.mxu3  ;;  %3978 = vmatpush.bf16.msrb.mxu3 %v8368_v7  ;;  %v7856_v6 = vor.u32 %v9474_v16, %v7855_v56  ;;  %v8079_v63 = vld [vmem:[%s15135_s1 + $0xc08] sm:$0xf]  ;;  %v6769_v7 = vld [vmem:[%s15135_s1 + $0x1e8] sm:$0xf0] }
 0x178   :  { %v9530_v19 = vld [vmem:[%s15135_s1 + $0xc24] sm:$0xf0]  ;;  %v9390_v56 = vld [vmem:[%s15135_s1 + $0x7cc] sm:$0xf] }
 0x179   :  { %3782 = vmatmul.bf16.gmra.mxu0 %v15194_v20  ;;  %v11459_v21 = vpop.f32.mrf.mxu1  ;;  %v7567_v43 = vld [vmem:[%s15135_s1 + $0x808] sm:$0xf]  ;;  %v8080_v5 = vor.u32 %v9530_v19, %v8079_v63  ;;  %3920 = vmatpush.bf16.msrb.mxu1 %v7856_v6  ;;  %v7537_v16 = vld [vmem:[%s15135_s1 + $0x7e8] sm:$0xf0]  ;;  %v6772_v63 = vor.u32 %v9198_v39, %v6769_v7 }
 0x17a   :  { %v9402_v52 = vld [vmem:[%s15135_s1 + $0x824] sm:$0xf0]  ;;  %v7540_v19 = vor.u32 %v9390_v56, %v7537_v16  ;;  %v9382_v39 = vld [vmem:[%s15135_s1 + $0x78c] sm:$0xf]  ;;  %v15202_v16 = vld [vmem:[#allocation21_spill] sm:$0xff] }
 0x17b   :  { %v8335_v58 = vld [vmem:[%s15135_s1 + $0xe08] sm:$0xf]  ;;  %v7568_v15 = vor.u32 %v9402_v52, %v7567_v43  ;;  %3950 = vmatpush.bf16.msrb.mxu2 %v8080_v5  ;;  %v11485_v23 = vpop.f32.mrf.mxu2 }
 0x17c   :  { %v9594_v11 = vld [vmem:[%s15135_s1 + $0xe24] sm:$0xf0] }
 0x17d   :  { %v8336_v44 = vor.u32 %v9594_v11, %v8335_v58  ;;  %3892 = vmatpush.bf16.msrb.mxu0 %v7568_v15  ;;  %v7823_v2 = vld [vmem:[%s15135_s1 + $0xa08] sm:$0xf]  ;;  %v9262_v58 = vld [vmem:[%s15135_s1 + $0x3cc] sm:$0xf] }
 0x17e   :  { %v11457_v13 = vpop.f32.mrf.mxu0  ;;  %v9466_v62 = vld [vmem:[%s15135_s1 + $0xa24] sm:$0xf0]  ;;  %v7025_v11 = vld [vmem:[%s15135_s1 + $0x3e8] sm:$0xf0] }
 0x17f   :  { %3979 = vmatpush.bf16.msrb.mxu3 %v8336_v44  ;;  %v11493_v4 = vpop.f32.mrf.mxu3  ;;  %v7824_v12 = vor.u32 %v9466_v62, %v7823_v2  ;;  %v15199_v9 = vld [vmem:[#allocation10_spill] sm:$0xff]  ;;  %4059 = vmatpush.bf16.msra.mxu2 %v7284_v42  ;;  %v7028_v44 = vor.u32 %v9262_v58, %v7025_v11 }
 0x180   :  { %3816 = vmatmul.bf16.gmra.mxu1 %v15199_v9  ;;  %v9318_v15 = vld [vmem:[%s15135_s1 + $0x58c] sm:$0xf] }
 0x181   :  { %v11497_v17 = vpop.f32.mrf.mxu1  ;;  %3921 = vmatpush.bf16.msrb.mxu1 %v7824_v12  ;;  %4001 = vmatpush.bf16.msra.mxu0 %v6772_v63  ;;  %v7249_v2 = vld [vmem:[%s15135_s1 + $0x5a8] sm:$0xf0]  ;;  %v11556_v63 = vperm.slane %v15202_v16, 1 }
 0x182   :  { %v9190_v62 = vld [vmem:[%s15135_s1 + $0x18c] sm:$0xf]  ;;  %v7252_v51 = vor.u32 %v9318_v15, %v7249_v2  ;;  %v15203_v15 = vld [vmem:[#allocation13_spill] sm:$0xff] }
 0x183   :  { %v11521_v6 = vpop.f32.mrf.mxu2  ;;  %4088 = vmatpush.bf16.msra.mxu3 %v7540_v19  ;;  %v6737_v12 = vld [vmem:[%s15135_s1 + $0x1a8] sm:$0xf0]  ;;  %v3547_v2 = vadd.f32 %v11353_v22, %v11556_v63 }
 0x184   :  { %v6740_v29 = vor.u32 %v9190_v62, %v6737_v12  ;;  %v7505_v42 = vld [vmem:[%s15135_s1 + $0x7a8] sm:$0xf0]  ;;  %4060 = vmatpush.bf16.msra.mxu2 %v7252_v51 }
 0x185   :  { %4030 = vmatpush.bf16.msra.mxu1 %v7028_v44  ;;  %v7508_v56 = vor.u32 %v9382_v39, %v7505_v42  ;;  %v15204_v62 = vld [vmem:[#allocation14_spill] sm:$0xff]  ;;  %v15205_v44 = vld [vmem:[#allocation15_spill] sm:$0xff]  ;;  %v3576_v41 = vadd.f32 %v11355_v24, %v3547_v2 }
 0x186   :  { %v11495_v60 = vpop.f32.mrf.mxu0  ;;  %4002 = vmatpush.bf16.msra.mxu0 %v6740_v29  ;;  %3850 = vmatmul.bf16.gmra.mxu2 %v15205_v44  ;;  %v9254_v12 = vld [vmem:[%s15135_s1 + $0x38c] sm:$0xf]  ;;  %v15206_v29 = vld [vmem:[#allocation16_spill] sm:$0xff] }
 0x187   :  { %v11523_v43 = vpop.f32.mrf.mxu3  ;;  %4089 = vmatpush.bf16.msra.mxu3 %v7508_v56  ;;  %v6993_v51 = vld [vmem:[%s15135_s1 + $0x3a8] sm:$0xf0]  ;;  %v3605_v9 = vadd.f32 %v11385_v38, %v3576_v41 }
 0x188   :  { %3879 = vmatmul.bf16.gmra.mxu3 %v15206_v29  ;;  %v6996_v39 = vor.u32 %v9254_v12, %v6993_v51  ;;  %v9310_v42 = vld [vmem:[%s15135_s1 + $0x54c] sm:$0xf] }
 0x189   :  { %3787 = vmatmul.bf16.gmra.mxu0 %v15198_v61  ;;  %v11527_v52 = vpop.f32.mrf.mxu1  ;;  %v7217_v22 = vld [vmem:[%s15135_s1 + $0x568] sm:$0xf0] }
 0x18a   :  { %v9182_v56 = vld [vmem:[%s15135_s1 + $0x14c] sm:$0xf]  ;;  %v7220_v16 = vor.u32 %v9310_v42, %v7217_v22  ;;  %4031 = vmatpush.bf16.msra.mxu1 %v6996_v39 }
 0x18b   :  { %v11553_v7 = vpop.f32.mrf.mxu2  ;;  %v6705_v44 = vld [vmem:[%s15135_s1 + $0x168] sm:$0xf0] }
 0x18c   :  { %v9374_v12 = vld [vmem:[%s15135_s1 + $0x74c] sm:$0xf]  ;;  %4061 = vmatpush.bf16.msra.mxu2 %v7220_v16 }
 0x18d   :  { %v7473_v51 = vld [vmem:[%s15135_s1 + $0x768] sm:$0xf0] }
 0x18e   :  { %v11525_v5 = vpop.f32.mrf.mxu0  ;;  %v9246_v61 = vld [vmem:[%s15135_s1 + $0x34c] sm:$0xf] }
 0x18f   :  { %v11558_v19 = vpop.f32.mrf.mxu3  ;;  %v9302_v24 = vld [vmem:[%s15135_s1 + $0x50c] sm:$0xf] }
 0x190   :  { %3821 = vmatmul.bf16.gmra.mxu1 %v15204_v62  ;;  %v6708_v62 = vor.u32 %v9182_v56, %v6705_v44  ;;  %v6961_v44 = vld [vmem:[%s15135_s1 + $0x368] sm:$0xf0] }
 0x191   :  { %v11562_v11 = vpop.f32.mrf.mxu1  ;;  %v6964_v2 = vor.u32 %v9246_v61, %v6961_v44  ;;  %v9174_v38 = vld [vmem:[%s15135_s1 + $0x10c] sm:$0xf]  ;;  %v3634_v44 = vadd.f32 %v11387_v3, %v3605_v9  ;;  %v15207_v3 = vld [vmem:[#allocation19_spill] sm:$0xff] }
 0x192   :  { %4003 = vmatpush.bf16.msra.mxu0 %v6708_v62  ;;  %v7185_v62 = vld [vmem:[%s15135_s1 + $0x528] sm:$0xf0] }
 0x193   :  { %v11594_v29 = vpop.f32.mrf.mxu2  ;;  %v6673_v41 = vld [vmem:[%s15135_s1 + $0x128] sm:$0xf0]  ;;  %v7188_v39 = vor.u32 %v9302_v24, %v7185_v62  ;;  %4032 = vmatpush.bf16.msra.mxu1 %v6964_v2  ;;  %v3552_v2 = vadd.f32 %v11421_v50, %v11556_v63 }
 0x194   :  { %v6676_v56 = vor.u32 %v9174_v38, %v6673_v41  ;;  %v9366_v61 = vld [vmem:[%s15135_s1 + $0x70c] sm:$0xf] }
 0x195   :  { %v7441_v16 = vld [vmem:[%s15135_s1 + $0x728] sm:$0xf0]  ;;  %4062 = vmatpush.bf16.msra.mxu2 %v7188_v39 }
 0x196   :  { %v11560_v58 = vpop.f32.mrf.mxu0  ;;  %4004 = vmatpush.bf16.msra.mxu0 %v6676_v56  ;;  %3951 = vmatmul.bf16.vlgmr.msrb.gmra.mxu2 %v15207_v3  ;;  %v9238_v9 = vld [vmem:[%s15135_s1 + $0x30c] sm:$0xf] }
 0x197   :  { %v11597_v42 = vpop.f32.mrf.mxu3  ;;  %v7153_v50 = vld [vmem:[%s15135_s1 + $0x4e8] sm:$0xf0] }
 0x199   :  { %3792 = vmatmul.bf16.gmra.mxu0 %v15203_v15  ;;  %v7476_v15 = vor.u32 %v9374_v12, %v7473_v51  ;;  %v11601_v18 = vpop.f32.mrf.mxu1  ;;  %v7444_v51 = vor.u32 %v9366_v61, %v7441_v16  ;;  %v6641_v61 = vld [vmem:[%s15135_s1 + $0xe8] sm:$0xf0] }
 0x19a   :  { %v9358_v16 = vld [vmem:[%s15135_s1 + $0x6cc] sm:$0xf] }
 0x19b   :  { %4090 = vmatpush.bf16.msra.mxu3 %v7476_v15  ;;  %v3549_v15 = vadd.f32 %v11389_v14, %v11556_v63  ;;  %v11630_v12 = vpop.f32.mrf.mxu2 }
 0x19d   :  { %v3578_v24 = vadd.f32 %v11391_v55, %v3549_v15  ;;  %v6929_v55 = vld [vmem:[%s15135_s1 + $0x328] sm:$0xf0] }
 0x19e   :  { %v11599_v22 = vpop.f32.mrf.mxu0  ;;  %v6932_v41 = vor.u32 %v9238_v9, %v6929_v55  ;;  %v9166_v15 = vld [vmem:[%s15135_s1 + $0xcc] sm:$0xf] }
 0x19f   :  { %v11633_v59 = vpop.f32.mrf.mxu3  ;;  %4091 = vmatpush.bf16.msra.mxu3 %v7444_v51  ;;  %v3607_v38 = vadd.f32 %v11417_v36, %v3578_v24  ;;  %v9294_v36 = vld [vmem:[%s15135_s1 + $0x4cc] sm:$0xf]  ;;  %v6644_v24 = vor.u32 %v9166_v15, %v6641_v61 }
 0x1a0   :  { %3922 = vmatmul.bf16.vlgmr.msrb.gmra.mxu1 %v10521_v1  ;;  %v7156_v56 = vor.u32 %v9294_v36, %v7153_v50  ;;  %v7409_v51 = vld [vmem:[%s15135_s1 + $0x6e8] sm:$0xf0] }
 0x1a1   :  { %v3691_v14 = vpop.f32.mrf.mxu1  ;;  %4033 = vmatpush.bf16.msra.mxu1 %v6932_v41  ;;  %v7412_v9 = vor.u32 %v9358_v16, %v7409_v51  ;;  %v3636_v55 = vadd.f32 %v11419_v8, %v3607_v38  ;;  %4005 = vmatpush.bf16.msra.mxu0 %v6644_v24  ;;  %v9230_v41 = vld [vmem:[%s15135_s1 + $0x2cc] sm:$0xf] }
 0x1a2   :  { %4063 = vmatpush.bf16.msra.mxu2 %v7156_v56  ;;  %v6897_v8 = vld [vmem:[%s15135_s1 + $0x2e8] sm:$0xf0] }
 0x1a3   :  { %4092 = vmatpush.bf16.msra.mxu3 %v7412_v9  ;;  %v9286_v38 = vld [vmem:[%s15135_s1 + $0x48c] sm:$0xf] }
 0x1a4   :  { %v6609_v56 = vld [vmem:[%s15135_s1 + $0xa8] sm:$0xf0] }
 0x1a5   :  { %v9350_v61 = vld [vmem:[%s15135_s1 + $0x68c] sm:$0xf] }
 0x1a6   :  { %v3662_v10 = vpop.f32.mrf.mxu0  ;;  %v7377_v16 = vld [vmem:[%s15135_s1 + $0x6a8] sm:$0xf0]  ;;  %3956 = vmatmul.bf16.gmra.mxu2 %v10607_v47 }
 0x1a7   :  { %v3663_v62 = vadd.f32 %v3662_v10, %v3634_v44  ;;  %v15208_v10 = vld [vmem:[#allocation20_spill] sm:$0xff]  ;;  %v3720_v44 = vpop.f32.mrf.mxu2  ;;  %v3749_v36 = vpop.f32.mrf.mxu3  ;;  %v7380_v24 = vor.u32 %v9350_v61, %v7377_v16 }
 0x1a8   :  { %3980 = vmatmul.bf16.vlgmr.msrb.gmra.mxu3 %v15208_v10 }
 0x1a9   :  { %3893 = vmatmul.bf16.vlgmr.msrb.gmra.mxu0 %v10519_v0  ;;  %v3692_v39 = vadd.f32 %v3691_v14, %v3663_v62  ;;  %v3581_v14 = vadd.f32 %v11423_v31, %v3552_v2  ;;  %v3693_v10 = vpop.f32.mrf.mxu1  ;;  %v6900_v31 = vor.u32 %v9230_v41, %v6897_v8  ;;  %v7121_v2 = vld [vmem:[%s15135_s1 + $0x4a8] sm:$0xf0]  ;;  %4093 = vmatpush.bf16.msra.mxu3 %v7380_v24 }
 0x1aa   :  { %v3557_v41 = vadd.f32 %v11495_v60, %v11556_v63  ;;  %v7089_v60 = vld [vmem:[%s15135_s1 + $0x468] sm:$0xf0] }
 0x1ab   :  { %v3721_v62 = vadd.f32 %v3720_v44, %v3692_v39  ;;  %v3610_v0 = vadd.f32 %v11453_v30, %v3581_v14  ;;  %v9158_v30 = vld [vmem:[%s15135_s1 + $0x8c] sm:$0xf]  ;;  %v7124_v39 = vor.u32 %v9286_v38, %v7121_v2  ;;  %4034 = vmatpush.bf16.msra.mxu1 %v6900_v31 }
 0x1ac   :  { %v6612_v44 = vor.u32 %v9158_v30, %v6609_v56  ;;  %v9150_v8 = vld [vmem:[%s15135_s1 + $0x4c] sm:$0xf]  ;;  %v3586_v16 = vadd.f32 %v11497_v17, %v3557_v41 }
 0x1ad   :  { %v3750_v3 = vadd.f32 %v3749_v36, %v3721_v62  ;;  %4064 = vmatpush.bf16.msra.mxu2 %v7124_v39  ;;  %v6577_v2 = vld [vmem:[%s15135_s1 + $0x68] sm:$0xf0] }
 0x1ae   :  { %v3664_v50 = vpop.f32.mrf.mxu0  ;;  %4006 = vmatpush.bf16.msra.mxu0 %v6612_v44  ;;  %v9342_v30 = vld [vmem:[%s15135_s1 + $0x64c] sm:$0xf]  ;;  %v6580_v39 = vor.u32 %v9150_v8, %v6577_v2 }
 0x1af   :  { %v3665_v1 = vadd.f32 %v3664_v50, %v3636_v55  ;;  %5162 = vst [vmem:[#allocation2 + $0x8] sm:$0xff] %v3750_v3  ;;  %v3554_v3 = vadd.f32 %v11457_v13, %v11556_v63  ;;  %v3722_v51 = vpop.f32.mrf.mxu2  ;;  %v3639_v13 = vadd.f32 %v11455_v37, %v3610_v0  ;;  %v9222_v0 = vld [vmem:[%s15135_s1 + $0x28c] sm:$0xf] }
 0x1b0   :  { %3927 = vmatmul.bf16.gmra.mxu1 %v10605_v46  ;;  %v6865_v37 = vld [vmem:[%s15135_s1 + $0x2a8] sm:$0xf0] }
 0x1b1   :  { %v3694_v15 = vadd.f32 %v3693_v10, %v3665_v1  ;;  %v3751_v10 = vpop.f32.mrf.mxu3  ;;  %v3696_v55 = vpop.f32.mrf.mxu1  ;;  %v3583_v14 = vadd.f32 %v11459_v21, %v3554_v3  ;;  %v6868_v21 = vor.u32 %v9222_v0, %v6865_v37  ;;  %v7345_v3 = vld [vmem:[%s15135_s1 + $0x668] sm:$0xf0]  ;;  %v3559_v0 = vadd.f32 %v11525_v5, %v11556_v63 }
 0x1b2   :  { %v7348_v56 = vor.u32 %v9342_v30, %v7345_v3  ;;  %4007 = vmatpush.bf16.msra.mxu0 %v6580_v39  ;;  %v6545_v41 = vld [vmem:[%s15135_s1 + $0x28] sm:$0xf0] }
 0x1b3   :  { %v3723_v1 = vadd.f32 %v3722_v51, %v3694_v15  ;;  %v3612_v50 = vadd.f32 %v11485_v23, %v3583_v14  ;;  %v9278_v23 = vld [vmem:[%s15135_s1 + $0x44c] sm:$0xf]  ;;  %4035 = vmatpush.bf16.msra.mxu1 %v6868_v21 }
 0x1b4   :  { %v7092_v38 = vor.u32 %v9278_v23, %v7089_v60  ;;  %4094 = vmatpush.bf16.msra.mxu3 %v7348_v56  ;;  %v9270_v14 = vld [vmem:[%s15135_s1 + $0x40c] sm:$0xf]  ;;  %v3588_v56 = vadd.f32 %v11527_v52, %v3559_v0 }
 0x1b5   :  { %v3752_v62 = vadd.f32 %v3751_v10, %v3723_v1  ;;  %v3641_v61 = vadd.f32 %v11493_v4, %v3612_v50  ;;  %v3615_v4 = vadd.f32 %v11521_v6, %v3586_v16  ;;  %v9142_v50 = vld [vmem:[%s15135_s1 + $0xc] sm:$0xf] }
 0x1b6   :  { %v3667_v9 = vpop.f32.mrf.mxu0  ;;  %4065 = vmatpush.bf16.msra.mxu2 %v7092_v38  ;;  %v9334_v6 = vld [vmem:[%s15135_s1 + $0x60c] sm:$0xf]  ;;  %v6548_v21 = vor.u32 %v9142_v50, %v6545_v41 }
 0x1b7   :  { %v3668_v36 = vadd.f32 %v3667_v9, %v3639_v13  ;;  %5170 = vst [vmem:[#allocation2 + $0x48] sm:$0xff] %v3752_v62  ;;  %v3725_v15 = vpop.f32.mrf.mxu2  ;;  %v9214_v9 = vld [vmem:[%s15135_s1 + $0x24c] sm:$0xf]  ;;  %v3644_v5 = vadd.f32 %v11523_v43, %v3615_v4  ;;  %3961 = vmatmul.bf16.gmra.mxu2 %v10691_v34 }
 0x1b8   :  { %3985 = vmatmul.bf16.gmra.mxu3 %v10609_v49  ;;  %v7057_v62 = vld [vmem:[%s15135_s1 + $0x428] sm:$0xf0]  ;;  %4008 = vmatpush.bf16.msra.mxu0 %v6548_v21 }
 0x1b9   :  { %3898 = vmatmul.bf16.gmra.mxu0 %v10603_v45  ;;  %v3697_v31 = vadd.f32 %v3696_v55, %v3668_v36  ;;  %v3754_v44 = vpop.f32.mrf.mxu3  ;;  %v3698_v13 = vpop.f32.mrf.mxu1  ;;  %v6833_v55 = vld [vmem:[%s15135_s1 + $0x268] sm:$0xf0]  ;;  %v7060_v36 = vor.u32 %v9270_v14, %v7057_v62 }
 0x1ba   :  { %v6836_v17 = vor.u32 %v9214_v9, %v6833_v55  ;;  %v7313_v23 = vld [vmem:[%s15135_s1 + $0x628] sm:$0xf0] }
 0x1bb   :  { %v3726_v51 = vadd.f32 %v3725_v15, %v3697_v31  ;;  %4066 = vmatpush.bf16.msra.mxu2 %v7060_v36  ;;  %v7316_v8 = vor.u32 %v9334_v6, %v7313_v23  ;;  %v9206_v31 = vld [vmem:[%s15135_s1 + $0x20c] sm:$0xf] }
 0x1bc   :  { %4036 = vmatpush.bf16.msra.mxu1 %v6836_v17  ;;  %v6801_v38 = vld [vmem:[%s15135_s1 + $0x228] sm:$0xf0] }
 0x1bd   :  { %v3755_v1 = vadd.f32 %v3754_v44, %v3726_v51  ;;  %v6804_v15 = vor.u32 %v9206_v31, %v6801_v38  ;;  %4095 = vmatpush.bf16.msra.mxu3 %v7316_v8  ;;  %v3617_v51 = vadd.f32 %v11553_v7, %v3588_v56  ;;  %v3562_v44 = vadd.f32 %v11560_v58, %v11556_v63  ;;  %v9582_v43 = vld [vmem:[%s15135_s1 + $0xdcc] sm:$0xf] }
 0x1be   :  { %v3669_v24 = vpop.f32.mrf.mxu0  ;;  %v8305_v52 = vld [vmem:[%s15135_s1 + $0xde8] sm:$0xf0] }
 0x1bf   :  { %v3670_v10 = vadd.f32 %v3669_v24, %v3641_v61  ;;  %5178 = vst [vmem:[#allocation2 + $0x88] sm:$0xff] %v3755_v1  ;;  %v3727_v60 = vpop.f32.mrf.mxu2  ;;  %v9454_v7 = vld [vmem:[%s15135_s1 + $0x9cc] sm:$0xf]  ;;  %v8308_v24 = vor.u32 %v9582_v43, %v8305_v52  ;;  %v3646_v17 = vadd.f32 %v11558_v19, %v3617_v51  ;;  %v3591_v14 = vadd.f32 %v11562_v11, %v3562_v44 }
 0x1c0   :  { %4037 = vmatpush.bf16.msra.mxu1 %v6804_v15  ;;  %v9646_v1 = vld [vmem:[%s15135_s1 + $0xfcc] sm:$0xf] }
 0x1c1   :  { %v3699_v37 = vadd.f32 %v3698_v13, %v3670_v10  ;;  %v3756_v30 = vpop.f32.mrf.mxu3  ;;  %v3701_v39 = vpop.f32.mrf.mxu1  ;;  %3932 = vmatmul.bf16.gmra.mxu1 %v10689_v33  ;;  %v7793_v13 = vld [vmem:[%s15135_s1 + $0x9e8] sm:$0xf0]  ;;  %4175 = vmatpush.bf16.msrb.mxu2 %v8308_v24  ;;  %v3620_v8 = vadd.f32 %v11594_v29, %v3591_v14 }
 0x1c2   :  { %v8561_v10 = vld [vmem:[%s15135_s1 + $0xfe8] sm:$0xf0]  ;;  %v7796_v55 = vor.u32 %v9454_v7, %v7793_v13 }
 0x1c3   :  { %v3728_v2 = vadd.f32 %v3727_v60, %v3699_v37  ;;  %v8564_v4 = vor.u32 %v9646_v1, %v8561_v10  ;;  %v9518_v37 = vld [vmem:[%s15135_s1 + $0xbcc] sm:$0xf]  ;;  %v3649_v56 = vadd.f32 %v11597_v42, %v3620_v8 }
 0x1c4   :  { %4117 = vmatpush.bf16.msrb.mxu0 %v7796_v55  ;;  %v8049_v21 = vld [vmem:[%s15135_s1 + $0xbe8] sm:$0xf0] }
 0x1c5   :  { %v3757_v61 = vadd.f32 %v3756_v30, %v3728_v2  ;;  %4204 = vmatpush.bf16.msrb.mxu3 %v8564_v4  ;;  %v8052_v19 = vor.u32 %v9518_v37, %v8049_v21  ;;  %v9574_v11 = vld [vmem:[%s15135_s1 + $0xd8c] sm:$0xf] }
 0x1c6   :  { %v3672_v3 = vpop.f32.mrf.mxu0  ;;  %v8273_v23 = vld [vmem:[%s15135_s1 + $0xda8] sm:$0xf0] }
 0x1c7   :  { %v3673_v16 = vadd.f32 %v3672_v3, %v3644_v5  ;;  %5186 = vst [vmem:[#allocation2 + $0xc8] sm:$0xff] %v3757_v61  ;;  %v3730_v9 = vpop.f32.mrf.mxu2  ;;  %v9446_v60 = vld [vmem:[%s15135_s1 + $0x98c] sm:$0xf]  ;;  %v8276_v31 = vor.u32 %v9574_v11, %v8273_v23  ;;  %4146 = vmatpush.bf16.msrb.mxu1 %v8052_v19  ;;  %v3564_v3 = vadd.f32 %v11599_v22, %v11556_v63 }
 0x1c8   :  { %3990 = vmatmul.bf16.gmra.mxu3 %v10693_v35  ;;  %v7761_v38 = vld [vmem:[%s15135_s1 + $0x9a8] sm:$0xf0]  ;;  %3966 = vmatmul.bf16.gmra.mxu2 %v10769_v27 }
 0x1c9   :  { %3903 = vmatmul.bf16.gmra.mxu0 %v10687_v32  ;;  %v3702_v58 = vadd.f32 %v3701_v39, %v3673_v16  ;;  %v3759_v36 = vpop.f32.mrf.mxu3  ;;  %v3703_v41 = vpop.f32.mrf.mxu1  ;;  %v9638_v5 = vld [vmem:[%s15135_s1 + $0xf8c] sm:$0xf]  ;;  %v7764_v2 = vor.u32 %v9446_v60, %v7761_v38  ;;  %4176 = vmatpush.bf16.msrb.mxu2 %v8276_v31  ;;  %v3593_v43 = vadd.f32 %v11601_v18, %v3564_v3 }
 0x1ca   :  { %v8529_v30 = vld [vmem:[%s15135_s1 + $0xfa8] sm:$0xf0] }
 0x1cb   :  { %v3731_v62 = vadd.f32 %v3730_v9, %v3702_v58  ;;  %v8532_v15 = vor.u32 %v9638_v5, %v8529_v30  ;;  %4118 = vmatpush.bf16.msrb.mxu0 %v7764_v2  ;;  %v9510_v63 = vld [vmem:[%s15135_s1 + $0xb8c] sm:$0xf]  ;;  %v3622_v58 = vadd.f32 %v11630_v12, %v3593_v43 }
 0x1cc   :  { %v8017_v22 = vld [vmem:[%s15135_s1 + $0xba8] sm:$0xf0] }
 0x1cd   :  { %v3760_v6 = vadd.f32 %v3759_v36, %v3731_v62  ;;  %4205 = vmatpush.bf16.msrb.mxu3 %v8532_v15  ;;  %v8020_v42 = vor.u32 %v9510_v63, %v8017_v22  ;;  %v9566_v18 = vld [vmem:[%s15135_s1 + $0xd4c] sm:$0xf]  ;;  %v3651_v62 = vadd.f32 %v11633_v59, %v3622_v58 }
 0x1ce   :  { %v3674_v50 = vpop.f32.mrf.mxu0  ;;  %v8241_v24 = vld [vmem:[%s15135_s1 + $0xd68] sm:$0xf0] }
 0x1cf   :  { %v3675_v0 = vadd.f32 %v3674_v50, %v3646_v17  ;;  %5194 = vst [vmem:[#allocation2 + $0x108] sm:$0xff] %v3760_v6  ;;  %v3732_v39 = vpop.f32.mrf.mxu2  ;;  %4147 = vmatpush.bf16.msrb.mxu1 %v8020_v42  ;;  %v9438_v12 = vld [vmem:[%s15135_s1 + $0x94c] sm:$0xf]  ;;  %v8244_v1 = vor.u32 %v9566_v18, %v8241_v24 }
 0x1d0   :  { %v7729_v10 = vld [vmem:[%s15135_s1 + $0x968] sm:$0xf0] }
 0x1d1   :  { %v3704_v29 = vadd.f32 %v3703_v41, %v3675_v0  ;;  %v3761_v16 = vpop.f32.mrf.mxu3  ;;  %v3706_v44 = vpop.f32.mrf.mxu1  ;;  %3937 = vmatmul.bf16.gmra.mxu1 %v10767_v26  ;;  %v9630_v9 = vld [vmem:[%s15135_s1 + $0xf4c] sm:$0xf]  ;;  %v7732_v17 = vor.u32 %v9438_v12, %v7729_v10  ;;  %4177 = vmatpush.bf16.msrb.mxu2 %v8244_v1 }
 0x1d2   :  { %v8497_v55 = vld [vmem:[%s15135_s1 + $0xf68] sm:$0xf0] }
 0x1d3   :  { %v3733_v61 = vadd.f32 %v3732_v39, %v3704_v29  ;;  %v8500_v14 = vor.u32 %v9630_v9, %v8497_v55  ;;  %4119 = vmatpush.bf16.msrb.mxu0 %v7732_v17  ;;  %v9502_v21 = vld [vmem:[%s15135_s1 + $0xb4c] sm:$0xf] }
 0x1d4   :  { %v7985_v19 = vld [vmem:[%s15135_s1 + $0xb68] sm:$0xf0] }
 0x1d5   :  { %v3762_v52 = vadd.f32 %v3761_v16, %v3733_v61  ;;  %4206 = vmatpush.bf16.msrb.mxu3 %v8500_v14  ;;  %v7988_v11 = vor.u32 %v9502_v21, %v7985_v19  ;;  %v9558_v59 = vld [vmem:[%s15135_s1 + $0xd0c] sm:$0xf] }
 0x1d6   :  { %v3677_v51 = vpop.f32.mrf.mxu0  ;;  %v8209_v23 = vld [vmem:[%s15135_s1 + $0xd28] sm:$0xf0] }
 0x1d7   :  { %v3678_v7 = vadd.f32 %v3677_v51, %v3649_v56  ;;  %5202 = vst [vmem:[#allocation2 + $0x148] sm:$0xff] %v3762_v52  ;;  %v3735_v4 = vpop.f32.mrf.mxu2  ;;  %v9430_v60 = vld [vmem:[%s15135_s1 + $0x90c] sm:$0xf]  ;;  %v8212_v8 = vor.u32 %v9558_v59, %v8209_v23  ;;  %4148 = vmatpush.bf16.msrb.mxu1 %v7988_v11 }
 0x1d8   :  { %3995 = vmatmul.bf16.gmra.mxu3 %v10771_v28  ;;  %v7697_v31 = vld [vmem:[%s15135_s1 + $0x928] sm:$0xf0]  ;;  %4067 = vmatmul.bf16.vlgmr.msra.gmra.mxu2 %v10121_v54 }
 0x1d9   :  { %3908 = vmatmul.bf16.gmra.mxu0 %v10765_v25  ;;  %v3707_v13 = vadd.f32 %v3706_v44, %v3678_v7  ;;  %v3764_v50 = vpop.f32.mrf.mxu3  ;;  %v3708_v6 = vpop.f32.mrf.mxu1  ;;  %v9622_v38 = vld [vmem:[%s15135_s1 + $0xf0c] sm:$0xf]  ;;  %v7700_v5 = vor.u32 %v9430_v60, %v7697_v31  ;;  %4178 = vmatpush.bf16.msrb.mxu2 %v8212_v8 }
 0x1da   :  { %v8465_v2 = vld [vmem:[%s15135_s1 + $0xf28] sm:$0xf0] }
 0x1db   :  { %v3736_v36 = vadd.f32 %v3735_v4, %v3707_v13  ;;  %v8468_v3 = vor.u32 %v9622_v38, %v8465_v2  ;;  %4120 = vmatpush.bf16.msrb.mxu0 %v7700_v5  ;;  %v9494_v51 = vld [vmem:[%s15135_s1 + $0xb0c] sm:$0xf]  ;;  %v15209_v38 = vld [vmem:[#allocation7_spill] sm:$0xff]  ;;  %v15210_v5 = vld [vmem:[#allocation8_spill] sm:$0xff] }
 0x1dc   :  { %v7953_v44 = vld [vmem:[%s15135_s1 + $0xb28] sm:$0xf0] }
 0x1dd   :  { %v3765_v0 = vadd.f32 %v3764_v50, %v3736_v36  ;;  %4207 = vmatpush.bf16.msrb.mxu3 %v8468_v3  ;;  %v7956_v43 = vor.u32 %v9494_v51, %v7953_v44  ;;  %v9550_v52 = vld [vmem:[%s15135_s1 + $0xccc] sm:$0xf] }
 0x1de   :  { %v3679_v41 = vpop.f32.mrf.mxu0  ;;  %v8177_v7 = vld [vmem:[%s15135_s1 + $0xce8] sm:$0xf0] }
 0x1df   :  { %v3680_v37 = vadd.f32 %v3679_v41, %v3651_v62  ;;  %5210 = vst [vmem:[#allocation2 + $0x188] sm:$0xff] %v3765_v0  ;;  %v3737_v29 = vpop.f32.mrf.mxu2  ;;  %4149 = vmatpush.bf16.msrb.mxu1 %v7956_v43  ;;  %v9422_v63 = vld [vmem:[%s15135_s1 + $0x8cc] sm:$0xf]  ;;  %v8180_v22 = vor.u32 %v9550_v52, %v8177_v7 }
 0x1e0   :  { %v7665_v42 = vld [vmem:[%s15135_s1 + $0x8e8] sm:$0xf0] }
 0x1e1   :  { %v3709_v30 = vadd.f32 %v3708_v6, %v3680_v37  ;;  %v3766_v39 = vpop.f32.mrf.mxu3  ;;  %v11878_v61 = vpop.f32.mrf.mxu1  ;;  %4038 = vmatmul.bf16.vlgmr.msra.gmra.mxu1 %v10119_v53  ;;  %v9614_v58 = vld [vmem:[%s15135_s1 + $0xecc] sm:$0xf]  ;;  %v7668_v12 = vor.u32 %v9422_v63, %v7665_v42  ;;  %4179 = vmatpush.bf16.msrb.mxu2 %v8180_v22 }
 0x1e2   :  { %v8433_v18 = vld [vmem:[%s15135_s1 + $0xee8] sm:$0xf0] }
 0x1e3   :  { %v3738_v15 = vadd.f32 %v3737_v29, %v3709_v30  ;;  %v8436_v13 = vor.u32 %v9614_v58, %v8433_v18  ;;  %4121 = vmatpush.bf16.msrb.mxu0 %v7668_v12  ;;  %v9486_v55 = vld [vmem:[%s15135_s1 + $0xacc] sm:$0xf] }
 0x1e4   :  { %v7921_v4 = vld [vmem:[%s15135_s1 + $0xae8] sm:$0xf0] }
 0x1e5   :  { %v3767_v16 = vadd.f32 %v3766_v39, %v3738_v15  ;;  %4208 = vmatpush.bf16.msrb.mxu3 %v8436_v13  ;;  %v7924_v17 = vor.u32 %v9486_v55, %v7921_v4  ;;  %v9542_v14 = vld [vmem:[%s15135_s1 + $0xc8c] sm:$0xf] }
 0x1e6   :  { %v11876_v56 = vpop.f32.mrf.mxu0  ;;  %v8145_v62 = vld [vmem:[%s15135_s1 + $0xca8] sm:$0xf0] }
 0x1e7   :  { %5218 = vst [vmem:[#allocation2 + $0x1c8] sm:$0xff] %v3767_v16  ;;  %v11908_v24 = vpop.f32.mrf.mxu2  ;;  %v9414_v36 = vld [vmem:[%s15135_s1 + $0x88c] sm:$0xf]  ;;  %v8148_v50 = vor.u32 %v9542_v14, %v8145_v62  ;;  %4150 = vmatpush.bf16.msrb.mxu1 %v7924_v17 }
 0x1e8   :  { %4096 = vmatmul.bf16.vlgmr.msra.gmra.mxu3 %v10129_v57  ;;  %v7633_v41 = vld [vmem:[%s15135_s1 + $0x8a8] sm:$0xf0]  ;;  %4072 = vmatmul.bf16.gmra.mxu2 %v15209_v38 }
 0x1e9   :  { %4009 = vmatmul.bf16.vlgmr.msra.gmra.mxu0 %v10108_v48  ;;  %v11910_v1 = vpop.f32.mrf.mxu3  ;;  %v11914_v9 = vpop.f32.mrf.mxu1  ;;  %v9606_v6 = vld [vmem:[%s15135_s1 + $0xe8c] sm:$0xf]  ;;  %v7636_v37 = vor.u32 %v9414_v36, %v7633_v41  ;;  %4180 = vmatpush.bf16.msrb.mxu2 %v8148_v50 }
 0x1ea   :  { %v8401_v0 = vld [vmem:[%s15135_s1 + $0xea8] sm:$0xf0] }
 0x1eb   :  { %v8404_v21 = vor.u32 %v9606_v6, %v8401_v0  ;;  %4122 = vmatpush.bf16.msrb.mxu0 %v7636_v37  ;;  %v9478_v60 = vld [vmem:[%s15135_s1 + $0xa8c] sm:$0xf] }
 0x1ec   :  { %v7889_v8 = vld [vmem:[%s15135_s1 + $0xaa8] sm:$0xf0] }
 0x1ed   :  { %4209 = vmatpush.bf16.msrb.mxu3 %v8404_v21  ;;  %v7892_v31 = vor.u32 %v9478_v60, %v7889_v8  ;;  %v9534_v2 = vld [vmem:[%s15135_s1 + $0xc4c] sm:$0xf]  ;;  %v15211_v8 = vld [vmem:[#allocation9_spill] sm:$0xff] }
 0x1ee   :  { %v11912_v10 = vpop.f32.mrf.mxu0  ;;  %v8113_v30 = vld [vmem:[%s15135_s1 + $0xc68] sm:$0xf0] }
 0x1ef   :  { %v11940_v19 = vpop.f32.mrf.mxu2  ;;  %4151 = vmatpush.bf16.msrb.mxu1 %v7892_v31  ;;  %v9406_v3 = vld [vmem:[%s15135_s1 + $0x84c] sm:$0xf]  ;;  %v8116_v29 = vor.u32 %v9534_v2, %v8113_v30  ;;  %v15213_v2 = vld [vmem:[#allocation11_spill] sm:$0xff]  ;;  %v15214_v30 = vld [vmem:[#allocation12_spill] sm:$0xff] }
 0x1f0   :  { %v7601_v15 = vld [vmem:[%s15135_s1 + $0x868] sm:$0xf0] }
 0x1f1   :  { %v11942_v11 = vpop.f32.mrf.mxu3  ;;  %v11946_v23 = vpop.f32.mrf.mxu1  ;;  %4043 = vmatmul.bf16.gmra.mxu1 %v15195_v40  ;;  %v9598_v39 = vld [vmem:[%s15135_s1 + $0xe4c] sm:$0xf]  ;;  %v7604_v44 = vor.u32 %v9406_v3, %v7601_v15  ;;  %4181 = vmatpush.bf16.msrb.mxu2 %v8116_v29  ;;  %v7287_v3 = vld [vmem:[%s15135_s1 + $0x5d0] sm:$0xf] }
 0x1f2   :  { %v8369_v16 = vld [vmem:[%s15135_s1 + $0xe68] sm:$0xf0]  ;;  %v9331_v29 = vld [vmem:[%s15135_s1 + $0x5ec] sm:$0xf0] }
 0x1f3   :  { %v8372_v43 = vor.u32 %v9598_v39, %v8369_v16  ;;  %4123 = vmatpush.bf16.msrb.mxu0 %v7604_v44  ;;  %v9470_v22 = vld [vmem:[%s15135_s1 + $0xa4c] sm:$0xf]  ;;  %v6775_v15 = vld [vmem:[%s15135_s1 + $0x1d0] sm:$0xf]  ;;  %v7288_v39 = vor.u32 %v9331_v29, %v7287_v3 }
 0x1f4   :  { %v7857_v42 = vld [vmem:[%s15135_s1 + $0xa68] sm:$0xf0]  ;;  %v9203_v16 = vld [vmem:[%s15135_s1 + $0x1ec] sm:$0xf0] }
 0x1f5   :  { %4210 = vmatpush.bf16.msrb.mxu3 %v8372_v43  ;;  %v7860_v58 = vor.u32 %v9470_v22, %v7857_v42  ;;  %v9526_v18 = vld [vmem:[%s15135_s1 + $0xc0c] sm:$0xf]  ;;  %v7543_v44 = vld [vmem:[%s15135_s1 + $0x7d0] sm:$0xf]  ;;  %v6776_v42 = vor.u32 %v9203_v16, %v6775_v15  ;;  %v12081_v16 = vld [vmem:[%s15139_s3] sm:$0xff] }
 0x1f6   :  { %v11944_v59 = vpop.f32.mrf.mxu0  ;;  %v8081_v12 = vld [vmem:[%s15135_s1 + $0xc28] sm:$0xf0]  ;;  %v9395_v43 = vld [vmem:[%s15135_s1 + $0x7ec] sm:$0xf0]  ;;  %15215 = vst [vmem:[#allocation5_spill] sm:$0xff] %v12081_v16 }
 0x1f7   :  { %v11976_v51 = vpop.f32.mrf.mxu2  ;;  %v9398_v13 = vld [vmem:[%s15135_s1 + $0x80c] sm:$0xf]  ;;  %v8084_v55 = vor.u32 %v9526_v18, %v8081_v12  ;;  %4152 = vmatpush.bf16.msrb.mxu1 %v7860_v58  ;;  %v7544_v58 = vor.u32 %v9395_v43, %v7543_v44  ;;  %v7511_v3 = vld [vmem:[%s15135_s1 + $0x790] sm:$0xf]  ;;  %v12084_v44 = vperm.slane %v12081_v16, 2 }
 0x1f8   :  { %4101 = vmatmul.bf16.gmra.mxu3 %v15210_v5  ;;  %v7569_v4 = vld [vmem:[%s15135_s1 + $0x828] sm:$0xf0]  ;;  %4077 = vmatmul.bf16.gmra.mxu2 %v15213_v2  ;;  %v9387_v29 = vld [vmem:[%s15135_s1 + $0x7ac] sm:$0xf0] }
 0x1f9   :  { %4014 = vmatmul.bf16.gmra.mxu0 %v15194_v20  ;;  %v11978_v52 = vpop.f32.mrf.mxu3  ;;  %v11982_v63 = vpop.f32.mrf.mxu1  ;;  %v9590_v17 = vld [vmem:[%s15135_s1 + $0xe0c] sm:$0xf]  ;;  %v7572_v62 = vor.u32 %v9398_v13, %v7569_v4  ;;  %4182 = vmatpush.bf16.msrb.mxu2 %v8084_v55  ;;  %v7031_v55 = vld [vmem:[%s15135_s1 + $0x3d0] sm:$0xf] }
 0x1fa   :  { %v8337_v14 = vld [vmem:[%s15135_s1 + $0xe28] sm:$0xf0]  ;;  %v9267_v4 = vld [vmem:[%s15135_s1 + $0x3ec] sm:$0xf0] }
 0x1fb   :  { %v8340_v36 = vor.u32 %v9590_v17, %v8337_v14  ;;  %4124 = vmatpush.bf16.msrb.mxu0 %v7572_v62  ;;  %v9462_v41 = vld [vmem:[%s15135_s1 + $0xa0c] sm:$0xf]  ;;  %v7255_v17 = vld [vmem:[%s15135_s1 + $0x590] sm:$0xf]  ;;  %v7032_v14 = vor.u32 %v9267_v4, %v7031_v55  ;;  %v15216_v55 = vld [vmem:[#allocation13_spill] sm:$0xff]  ;;  %v3779_v4 = vadd.f32 %v11876_v56, %v12084_v44 }
 0x1fc   :  { %v7825_v6 = vld [vmem:[%s15135_s1 + $0xa28] sm:$0xf0]  ;;  %v9323_v62 = vld [vmem:[%s15135_s1 + $0x5ac] sm:$0xf0] }
 0x1fd   :  { %4211 = vmatpush.bf16.msrb.mxu3 %v8340_v36  ;;  %v7828_v21 = vor.u32 %v9462_v41, %v7825_v6  ;;  %v15212_v31 = vld [vmem:[#allocation10_spill] sm:$0xff]  ;;  %4291 = vmatpush.bf16.msra.mxu2 %v7288_v39  ;;  %v6743_v36 = vld [vmem:[%s15135_s1 + $0x190] sm:$0xf]  ;;  %v7256_v6 = vor.u32 %v9323_v62, %v7255_v17  ;;  %v7512_v39 = vor.u32 %v9387_v29, %v7511_v3 }
 0x1fe   :  { %v11980_v7 = vpop.f32.mrf.mxu0  ;;  %v9195_v41 = vld [vmem:[%s15135_s1 + $0x1ac] sm:$0xf0]  ;;  %v15217_v17 = vld [vmem:[#allocation14_spill] sm:$0xff] }
 0x1ff   :  { %v12008_v50 = vpop.f32.mrf.mxu2  ;;  %4153 = vmatpush.bf16.msrb.mxu1 %v7828_v21  ;;  %4233 = vmatpush.bf16.msra.mxu0 %v6776_v42  ;;  %v6744_v21 = vor.u32 %v9195_v41, %v6743_v36  ;;  %v6999_v62 = vld [vmem:[%s15135_s1 + $0x390] sm:$0xf]  ;;  %v15219_v41 = vld [vmem:[#allocation16_spill] sm:$0xff] }
 0x200   :  { %v9259_v36 = vld [vmem:[%s15135_s1 + $0x3ac] sm:$0xf0] }
 0x201   :  { %v12016_v0 = vpop.f32.mrf.mxu3  ;;  %v12020_v60 = vpop.f32.mrf.mxu1  ;;  %4048 = vmatmul.bf16.gmra.mxu1 %v15212_v31  ;;  %4320 = vmatpush.bf16.msra.mxu3 %v7544_v58  ;;  %v9315_v56 = vld [vmem:[%s15135_s1 + $0x56c] sm:$0xf0] }
 0x202   :  { %4292 = vmatpush.bf16.msra.mxu2 %v7256_v6  ;;  %v7000_v6 = vor.u32 %v9259_v36, %v6999_v62  ;;  %v6711_v3 = vld [vmem:[%s15135_s1 + $0x150] sm:$0xf] }
 0x203   :  { %4262 = vmatpush.bf16.msra.mxu1 %v7032_v14  ;;  %4234 = vmatpush.bf16.msra.mxu0 %v6744_v21  ;;  %v15218_v14 = vld [vmem:[#allocation15_spill] sm:$0xff] }
 0x204   :  { %v7223_v21 = vld [vmem:[%s15135_s1 + $0x550] sm:$0xf] }
 0x205   :  { %4321 = vmatpush.bf16.msra.mxu3 %v7512_v39  ;;  %v7224_v29 = vor.u32 %v9315_v56, %v7223_v21  ;;  %v9187_v39 = vld [vmem:[%s15135_s1 + $0x16c] sm:$0xf0] }
 0x206   :  { %v12018_v37 = vpop.f32.mrf.mxu0  ;;  %v7479_v62 = vld [vmem:[%s15135_s1 + $0x750] sm:$0xf] }
 0x207   :  { %v12044_v22 = vpop.f32.mrf.mxu2  ;;  %v9379_v36 = vld [vmem:[%s15135_s1 + $0x76c] sm:$0xf0]  ;;  %4263 = vmatpush.bf16.msra.mxu1 %v7000_v6  ;;  %4293 = vmatpush.bf16.msra.mxu2 %v7224_v29 }
 0x208   :  { %4106 = vmatmul.bf16.gmra.mxu3 %v15214_v30  ;;  %4082 = vmatmul.bf16.gmra.mxu2 %v15218_v14  ;;  %v6712_v14 = vor.u32 %v9187_v39, %v6711_v3  ;;  %v6967_v2 = vld [vmem:[%s15135_s1 + $0x350] sm:$0xf] }
 0x209   :  { %4019 = vmatmul.bf16.gmra.mxu0 %v15211_v8  ;;  %v12046_v18 = vpop.f32.mrf.mxu3  ;;  %v12050_v13 = vpop.f32.mrf.mxu1  ;;  %v9251_v6 = vld [vmem:[%s15135_s1 + $0x36c] sm:$0xf0] }
 0x20a   :  { %4235 = vmatpush.bf16.msra.mxu0 %v6712_v14  ;;  %v9307_v14 = vld [vmem:[%s15135_s1 + $0x52c] sm:$0xf0] }
 0x20b   :  { %v9371_v39 = vld [vmem:[%s15135_s1 + $0x72c] sm:$0xf0] }
 0x20e   :  { %v12048_v12 = vpop.f32.mrf.mxu0 }
 0x20f   :  { %v12076_v15 = vpop.f32.mrf.mxu2 }
 0x211   :  { %v12086_v43 = vpop.f32.mrf.mxu3  ;;  %v12090_v58 = vpop.f32.mrf.mxu1  ;;  %4053 = vmatmul.bf16.gmra.mxu1 %v15217_v17  ;;  %v7480_v17 = vor.u32 %v9379_v36, %v7479_v62 }
 0x213   :  { %4322 = vmatpush.bf16.msra.mxu3 %v7480_v17  ;;  %v3781_v17 = vadd.f32 %v11912_v10, %v12084_v44 }
 0x216   :  { %v12088_v42 = vpop.f32.mrf.mxu0 }
 0x218   :  { %4111 = vmatmul.bf16.gmra.mxu3 %v15219_v41  ;;  %v12122_v41 = vpop.f32.mrf.mxu2 }
 0x219   :  { %4024 = vmatmul.bf16.gmra.mxu0 %v15216_v55  ;;  %v3808_v55 = vadd.f32 %v11878_v61, %v3779_v4  ;;  %v12125_v21 = vpop.f32.mrf.mxu3  ;;  %v12129_v16 = vpop.f32.mrf.mxu1  ;;  %v7191_v61 = vld [vmem:[%s15135_s1 + $0x510] sm:$0xf]  ;;  %v6968_v4 = vor.u32 %v9251_v6, %v6967_v2 }
 0x21a   :  { %v7192_v3 = vor.u32 %v9307_v14, %v7191_v61  ;;  %v7447_v2 = vld [vmem:[%s15135_s1 + $0x710] sm:$0xf]  ;;  %v3810_v61 = vadd.f32 %v11914_v9, %v3781_v17 }
 0x21b   :  { %v3837_v30 = vadd.f32 %v11908_v24, %v3808_v55  ;;  %v6679_v24 = vld [vmem:[%s15135_s1 + $0x110] sm:$0xf]  ;;  %4264 = vmatpush.bf16.msra.mxu1 %v6968_v4  ;;  %v7448_v36 = vor.u32 %v9371_v39, %v7447_v2  ;;  %v3784_v4 = vadd.f32 %v11944_v59, %v12084_v44  ;;  %v15221_v2 = vld [vmem:[#allocation18_spill] sm:$0xff] }
 0x21c   :  { %v9179_v55 = vld [vmem:[%s15135_s1 + $0x12c] sm:$0xf0]  ;;  %4294 = vmatpush.bf16.msra.mxu2 %v7192_v3 }
 0x21d   :  { %v6680_v29 = vor.u32 %v9179_v55, %v6679_v24  ;;  %v3866_v6 = vadd.f32 %v11910_v1, %v3837_v30  ;;  %4323 = vmatpush.bf16.msra.mxu3 %v7448_v36  ;;  %v15220_v24 = vld [vmem:[#allocation17_spill] sm:$0xff]  ;;  %v3839_v55 = vadd.f32 %v11940_v19, %v3810_v61  ;;  %v15222_v1 = vld [vmem:[#allocation19_spill] sm:$0xff] }
 0x21e   :  { %v12127_v56 = vpop.f32.mrf.mxu0  ;;  %4183 = vmatmul.bf16.vlgmr.msrb.gmra.mxu2 %v15222_v1  ;;  %v6935_v30 = vld [vmem:[%s15135_s1 + $0x310] sm:$0xf] }
 0x21f   :  { %4236 = vmatpush.bf16.msra.mxu0 %v6680_v29  ;;  %v9243_v9 = vld [vmem:[%s15135_s1 + $0x32c] sm:$0xf0]  ;;  %v3868_v1 = vadd.f32 %v11942_v11, %v3839_v55 }
 0x220   :  { %v12158_v62 = vpop.f32.mrf.mxu2  ;;  %v6936_v17 = vor.u32 %v9243_v9, %v6935_v30  ;;  %v7159_v19 = vld [vmem:[%s15135_s1 + $0x4d0] sm:$0xf] }
 0x221   :  { %v12161_v31 = vpop.f32.mrf.mxu3  ;;  %v3923_v10 = vpop.f32.mrf.mxu1  ;;  %4154 = vmatmul.bf16.vlgmr.msrb.gmra.mxu1 %v15221_v2  ;;  %v9299_v59 = vld [vmem:[%s15135_s1 + $0x4ec] sm:$0xf0] }
 0x222   :  { %v6647_v3 = vld [vmem:[%s15135_s1 + $0xd0] sm:$0xf]  ;;  %v7160_v39 = vor.u32 %v9299_v59, %v7159_v19  ;;  %4265 = vmatpush.bf16.msra.mxu1 %v6936_v17 }
 0x223   :  { %v9171_v36 = vld [vmem:[%s15135_s1 + $0xec] sm:$0xf0] }
 0x224   :  { %v9363_v61 = vld [vmem:[%s15135_s1 + $0x6ec] sm:$0xf0]  ;;  %v6648_v9 = vor.u32 %v9171_v36, %v6647_v3  ;;  %4295 = vmatpush.bf16.msra.mxu2 %v7160_v39 }
 0x225   :  { %v6903_v17 = vld [vmem:[%s15135_s1 + $0x2d0] sm:$0xf] }
 0x226   :  { %v3894_v8 = vpop.f32.mrf.mxu0  ;;  %4237 = vmatpush.bf16.msra.mxu0 %v6648_v9  ;;  %v9235_v11 = vld [vmem:[%s15135_s1 + $0x2ec] sm:$0xf0] }
 0x227   :  { %v3895_v14 = vadd.f32 %v3894_v8, %v3866_v6  ;;  %v15223_v8 = vld [vmem:[#allocation20_spill] sm:$0xff]  ;;  %v7415_v6 = vld [vmem:[%s15135_s1 + $0x6d0] sm:$0xf] }
 0x228   :  { %4212 = vmatmul.bf16.vlgmr.msrb.gmra.mxu3 %v15223_v8  ;;  %v3952_v30 = vpop.f32.mrf.mxu2  ;;  %v7416_v8 = vor.u32 %v9363_v61, %v7415_v6  ;;  %v7127_v55 = vld [vmem:[%s15135_s1 + $0x490] sm:$0xf] }
 0x229   :  { %4125 = vmatmul.bf16.vlgmr.msrb.gmra.mxu0 %v15220_v24  ;;  %v3924_v29 = vadd.f32 %v3923_v10, %v3895_v14  ;;  %v3813_v10 = vadd.f32 %v11946_v23, %v3784_v4  ;;  %v3925_v2 = vpop.f32.mrf.mxu1  ;;  %v6904_v23 = vor.u32 %v9235_v11, %v6903_v17  ;;  %v9291_v4 = vld [vmem:[%s15135_s1 + $0x4ac] sm:$0xf0]  ;;  %v3789_v17 = vadd.f32 %v12018_v37, %v12084_v44 }
 0x22a   :  { %4324 = vmatpush.bf16.msra.mxu3 %v7416_v8  ;;  %v7128_v8 = vor.u32 %v9291_v4, %v7127_v55  ;;  %v9163_v3 = vld [vmem:[%s15135_s1 + $0xac] sm:$0xf0] }
 0x22b   :  { %v3953_v14 = vadd.f32 %v3952_v30, %v3924_v29  ;;  %v3981_v19 = vpop.f32.mrf.mxu3  ;;  %v3842_v38 = vadd.f32 %v11976_v51, %v3813_v10  ;;  %v6615_v51 = vld [vmem:[%s15135_s1 + $0x90] sm:$0xf]  ;;  %4266 = vmatpush.bf16.msra.mxu1 %v6904_v23 }
 0x22c   :  { %v7383_v29 = vld [vmem:[%s15135_s1 + $0x690] sm:$0xf]  ;;  %v6616_v6 = vor.u32 %v9163_v3, %v6615_v51  ;;  %4296 = vmatpush.bf16.msra.mxu2 %v7128_v8 }
 0x22d   :  { %v3982_v24 = vadd.f32 %v3981_v19, %v3953_v14  ;;  %v9355_v39 = vld [vmem:[%s15135_s1 + $0x6ac] sm:$0xf0] }
 0x22e   :  { %v3896_v59 = vpop.f32.mrf.mxu0  ;;  %v7384_v61 = vor.u32 %v9355_v39, %v7383_v29  ;;  %4238 = vmatpush.bf16.msra.mxu0 %v6616_v6  ;;  %4188 = vmatmul.bf16.gmra.mxu2 %v10607_v47  ;;  %v9283_v37 = vld [vmem:[%s15135_s1 + $0x46c] sm:$0xf0]  ;;  %v3818_v39 = vadd.f32 %v12020_v60, %v3789_v17 }
 0x22f   :  { %v3897_v5 = vadd.f32 %v3896_v59, %v3868_v1  ;;  %5163 = vst [vmem:[#allocation2 + $0x10] sm:$0xff] %v3982_v24  ;;  %v3786_v24 = vadd.f32 %v11980_v7, %v12084_v44  ;;  %v3871_v7 = vadd.f32 %v11978_v52, %v3842_v38  ;;  %v6871_v38 = vld [vmem:[%s15135_s1 + $0x290] sm:$0xf] }
 0x230   :  { %v3954_v36 = vpop.f32.mrf.mxu2  ;;  %4325 = vmatpush.bf16.msra.mxu3 %v7384_v61  ;;  %v9227_v52 = vld [vmem:[%s15135_s1 + $0x2ac] sm:$0xf0] }
 0x231   :  { %v3926_v1 = vadd.f32 %v3925_v2, %v3897_v5  ;;  %v3928_v9 = vpop.f32.mrf.mxu1  ;;  %v3815_v10 = vadd.f32 %v11982_v63, %v3786_v24  ;;  %4159 = vmatmul.bf16.gmra.mxu1 %v10605_v46  ;;  %v6872_v63 = vor.u32 %v9227_v52, %v6871_v38  ;;  %v6583_v11 = vld [vmem:[%s15135_s1 + $0x50] sm:$0xf]  ;;  %v3791_v38 = vadd.f32 %v12048_v12, %v12084_v44 }
 0x232   :  { %v9155_v4 = vld [vmem:[%s15135_s1 + $0x6c] sm:$0xf0] }
 0x233   :  { %v3955_v5 = vadd.f32 %v3954_v36, %v3926_v1  ;;  %v3983_v2 = vpop.f32.mrf.mxu3  ;;  %v3844_v59 = vadd.f32 %v12008_v50, %v3815_v10  ;;  %v7095_v50 = vld [vmem:[%s15135_s1 + $0x450] sm:$0xf]  ;;  %4267 = vmatpush.bf16.msra.mxu1 %v6872_v63  ;;  %v6584_v8 = vor.u32 %v9155_v4, %v6583_v11 }
 0x234   :  { %v7096_v55 = vor.u32 %v9283_v37, %v7095_v50  ;;  %v7351_v51 = vld [vmem:[%s15135_s1 + $0x650] sm:$0xf] }
 0x235   :  { %v3984_v14 = vadd.f32 %v3983_v2, %v3955_v5  ;;  %v9347_v24 = vld [vmem:[%s15135_s1 + $0x66c] sm:$0xf0]  ;;  %v3873_v29 = vadd.f32 %v12016_v0, %v3844_v59  ;;  %4239 = vmatpush.bf16.msra.mxu0 %v6584_v8  ;;  %v3847_v0 = vadd.f32 %v12044_v22, %v3818_v39 }
 0x236   :  { %v3899_v30 = vpop.f32.mrf.mxu0  ;;  %v7352_v3 = vor.u32 %v9347_v24, %v7351_v51  ;;  %4297 = vmatpush.bf16.msra.mxu2 %v7096_v55  ;;  %v7063_v10 = vld [vmem:[%s15135_s1 + $0x410] sm:$0xf] }
 0x237   :  { %v3900_v19 = vadd.f32 %v3899_v30, %v3871_v7  ;;  %5171 = vst [vmem:[#allocation2 + $0x50] sm:$0xff] %v3984_v14  ;;  %v6839_v30 = vld [vmem:[%s15135_s1 + $0x250] sm:$0xf]  ;;  %v3876_v12 = vadd.f32 %v12046_v18, %v3847_v0 }
 0x238   :  { %4217 = vmatmul.bf16.gmra.mxu3 %v10609_v49  ;;  %v3957_v1 = vpop.f32.mrf.mxu2  ;;  %v9275_v14 = vld [vmem:[%s15135_s1 + $0x42c] sm:$0xf0] }
 0x239   :  { %4130 = vmatmul.bf16.gmra.mxu0 %v10603_v45  ;;  %v3929_v23 = vadd.f32 %v3928_v9, %v3900_v19  ;;  %v3930_v7 = vpop.f32.mrf.mxu1  ;;  %4326 = vmatpush.bf16.msra.mxu3 %v7352_v3  ;;  %v9219_v9 = vld [vmem:[%s15135_s1 + $0x26c] sm:$0xf0]  ;;  %v7064_v19 = vor.u32 %v9275_v14, %v7063_v10  ;;  %v3820_v3 = vadd.f32 %v12050_v13, %v3791_v38 }
 0x23a   :  { %v6840_v60 = vor.u32 %v9219_v9, %v6839_v30  ;;  %v6551_v59 = vld [vmem:[%s15135_s1 + $0x10] sm:$0xf] }
 0x23b   :  { %v3958_v36 = vadd.f32 %v3957_v1, %v3929_v23  ;;  %v3986_v6 = vpop.f32.mrf.mxu3  ;;  %v9147_v17 = vld [vmem:[%s15135_s1 + $0x2c] sm:$0xf0]  ;;  %4298 = vmatpush.bf16.msra.mxu2 %v7064_v19 }
 0x23c   :  { %v7319_v22 = vld [vmem:[%s15135_s1 + $0x610] sm:$0xf]  ;;  %4268 = vmatpush.bf16.msra.mxu1 %v6840_v60  ;;  %v6552_v63 = vor.u32 %v9147_v17, %v6551_v59 }
 0x23d   :  { %v3987_v5 = vadd.f32 %v3986_v6, %v3958_v36  ;;  %v9339_v50 = vld [vmem:[%s15135_s1 + $0x62c] sm:$0xf0]  ;;  %v3849_v36 = vadd.f32 %v12076_v15, %v3820_v3  ;;  %v3794_v6 = vadd.f32 %v12088_v42, %v12084_v44 }
 0x23e   :  { %v3901_v61 = vpop.f32.mrf.mxu0  ;;  %v7320_v11 = vor.u32 %v9339_v50, %v7319_v22  ;;  %v6807_v23 = vld [vmem:[%s15135_s1 + $0x210] sm:$0xf]  ;;  %4240 = vmatpush.bf16.msra.mxu0 %v6552_v63  ;;  %4193 = vmatmul.bf16.gmra.mxu2 %v10691_v34 }
 0x23f   :  { %v3902_v2 = vadd.f32 %v3901_v61, %v3873_v29  ;;  %5179 = vst [vmem:[#allocation2 + $0x90] sm:$0xff] %v3987_v5  ;;  %v9211_v55 = vld [vmem:[%s15135_s1 + $0x22c] sm:$0xf0]  ;;  %v3878_v60 = vadd.f32 %v12086_v43, %v3849_v36  ;;  %v3823_v10 = vadd.f32 %v12090_v58, %v3794_v6 }
 0x240   :  { %v3959_v37 = vpop.f32.mrf.mxu2  ;;  %v6808_v1 = vor.u32 %v9211_v55, %v6807_v23  ;;  %4327 = vmatpush.bf16.msra.mxu3 %v7320_v11  ;;  %v8311_v18 = vld [vmem:[%s15135_s1 + $0xdd0] sm:$0xf] }
 0x241   :  { %v3931_v52 = vadd.f32 %v3930_v7, %v3902_v2  ;;  %v3933_v8 = vpop.f32.mrf.mxu1  ;;  %4164 = vmatmul.bf16.gmra.mxu1 %v10689_v33  ;;  %v9587_v13 = vld [vmem:[%s15135_s1 + $0xdec] sm:$0xf0]  ;;  %v3852_v11 = vadd.f32 %v12122_v41, %v3823_v10 }
 0x242   :  { %4269 = vmatpush.bf16.msra.mxu1 %v6808_v1  ;;  %v7799_v15 = vld [vmem:[%s15135_s1 + $0x9d0] sm:$0xf]  ;;  %v8312_v61 = vor.u32 %v9587_v13, %v8311_v18 }
 0x243   :  { %v3960_v4 = vadd.f32 %v3959_v37, %v3931_v52  ;;  %v3988_v51 = vpop.f32.mrf.mxu3  ;;  %v9459_v7 = vld [vmem:[%s15135_s1 + $0x9ec] sm:$0xf0]  ;;  %v3881_v3 = vadd.f32 %v12125_v21, %v3852_v11 }
 0x244   :  { %v8567_v5 = vld [vmem:[%s15135_s1 + $0xfd0] sm:$0xf]  ;;  %v7800_v9 = vor.u32 %v9459_v7, %v7799_v15  ;;  %4407 = vmatpush.bf16.msrb.mxu2 %v8312_v61 }
 0x245   :  { %v3989_v29 = vadd.f32 %v3988_v51, %v3960_v4  ;;  %v9651_v2 = vld [vmem:[%s15135_s1 + $0xfec] sm:$0xf0] }
 0x246   :  { %v3904_v24 = vpop.f32.mrf.mxu0  ;;  %v8568_v0 = vor.u32 %v9651_v2, %v8567_v5  ;;  %4349 = vmatpush.bf16.msrb.mxu0 %v7800_v9  ;;  %v8055_v52 = vld [vmem:[%s15135_s1 + $0xbd0] sm:$0xf] }
 0x247   :  { %v3905_v39 = vadd.f32 %v3904_v24, %v3876_v12  ;;  %5187 = vst [vmem:[#allocation2 + $0xd0] sm:$0xff] %v3989_v29  ;;  %v9523_v63 = vld [vmem:[%s15135_s1 + $0xbec] sm:$0xf0]  ;;  %v3796_v24 = vadd.f32 %v12127_v56, %v12084_v44 }
 0x248   :  { %4222 = vmatmul.bf16.gmra.mxu3 %v10693_v35  ;;  %v3962_v30 = vpop.f32.mrf.mxu2  ;;  %v8056_v43 = vor.u32 %v9523_v63, %v8055_v52  ;;  %v8279_v58 = vld [vmem:[%s15135_s1 + $0xd90] sm:$0xf] }
 0x249   :  { %4135 = vmatmul.bf16.gmra.mxu0 %v10687_v32  ;;  %v3934_v42 = vadd.f32 %v3933_v8, %v3905_v39  ;;  %v3935_v17 = vpop.f32.mrf.mxu1  ;;  %4436 = vmatpush.bf16.msrb.mxu3 %v8568_v0  ;;  %v9579_v50 = vld [vmem:[%s15135_s1 + $0xdac] sm:$0xf0]  ;;  %v3825_v18 = vadd.f32 %v12129_v16, %v3796_v24 }
 0x24a   :  { %v7767_v37 = vld [vmem:[%s15135_s1 + $0x990] sm:$0xf]  ;;  %v8280_v23 = vor.u32 %v9579_v50, %v8279_v58  ;;  %4378 = vmatpush.bf16.msrb.mxu1 %v8056_v43 }
 0x24b   :  { %v3963_v14 = vadd.f32 %v3962_v30, %v3934_v42  ;;  %v3991_v19 = vpop.f32.mrf.mxu3  ;;  %v9451_v55 = vld [vmem:[%s15135_s1 + $0x9ac] sm:$0xf0]  ;;  %v3854_v42 = vadd.f32 %v12158_v62, %v3825_v18 }
 0x24c   :  { %v8535_v12 = vld [vmem:[%s15135_s1 + $0xf90] sm:$0xf]  ;;  %v7768_v4 = vor.u32 %v9451_v55, %v7767_v37  ;;  %4408 = vmatpush.bf16.msrb.mxu2 %v8280_v23 }
 0x24d   :  { %v3992_v22 = vadd.f32 %v3991_v19, %v3963_v14  ;;  %v9643_v51 = vld [vmem:[%s15135_s1 + $0xfac] sm:$0xf0]  ;;  %v3883_v14 = vadd.f32 %v12161_v31, %v3854_v42 }
 0x24e   :  { %v3906_v59 = vpop.f32.mrf.mxu0  ;;  %v8536_v1 = vor.u32 %v9643_v51, %v8535_v12  ;;  %4350 = vmatpush.bf16.msrb.mxu0 %v7768_v4  ;;  %v8023_v44 = vld [vmem:[%s15135_s1 + $0xb90] sm:$0xf]  ;;  %4198 = vmatmul.bf16.gmra.mxu2 %v10769_v27 }
 0x24f   :  { %v3907_v38 = vadd.f32 %v3906_v59, %v3878_v60  ;;  %5195 = vst [vmem:[#allocation2 + $0x110] sm:$0xff] %v3992_v22  ;;  %v9515_v56 = vld [vmem:[%s15135_s1 + $0xbac] sm:$0xf0] }
 0x250   :  { %v3964_v8 = vpop.f32.mrf.mxu2  ;;  %4437 = vmatpush.bf16.msrb.mxu3 %v8536_v1  ;;  %v8024_v21 = vor.u32 %v9515_v56, %v8023_v44  ;;  %v8247_v16 = vld [vmem:[%s15135_s1 + $0xd50] sm:$0xf] }
 0x251   :  { %v3936_v41 = vadd.f32 %v3935_v17, %v3907_v38  ;;  %v3938_v6 = vpop.f32.mrf.mxu1  ;;  %4169 = vmatmul.bf16.gmra.mxu1 %v10767_v26  ;;  %v9571_v61 = vld [vmem:[%s15135_s1 + $0xd6c] sm:$0xf0] }
 0x252   :  { %4379 = vmatpush.bf16.msrb.mxu1 %v8024_v21  ;;  %v7735_v62 = vld [vmem:[%s15135_s1 + $0x950] sm:$0xf]  ;;  %v8248_v5 = vor.u32 %v9571_v61, %v8247_v16 }
 0x253   :  { %v3965_v29 = vadd.f32 %v3964_v8, %v3936_v41  ;;  %v3993_v39 = vpop.f32.mrf.mxu3  ;;  %v9443_v2 = vld [vmem:[%s15135_s1 + $0x96c] sm:$0xf0] }
 0x254   :  { %v8503_v30 = vld [vmem:[%s15135_s1 + $0xf50] sm:$0xf]  ;;  %v7736_v60 = vor.u32 %v9443_v2, %v7735_v62  ;;  %4409 = vmatpush.bf16.msrb.mxu2 %v8248_v5 }
 0x255   :  { %v3994_v13 = vadd.f32 %v3993_v39, %v3965_v29  ;;  %v9635_v9 = vld [vmem:[%s15135_s1 + $0xf6c] sm:$0xf0] }
 0x256   :  { %v3909_v36 = vpop.f32.mrf.mxu0  ;;  %v8504_v10 = vor.u32 %v9635_v9, %v8503_v30  ;;  %4351 = vmatpush.bf16.msrb.mxu0 %v7736_v60  ;;  %v7991_v63 = vld [vmem:[%s15135_s1 + $0xb50] sm:$0xf] }
 0x257   :  { %v3910_v15 = vadd.f32 %v3909_v36, %v3881_v3  ;;  %5203 = vst [vmem:[#allocation2 + $0x150] sm:$0xff] %v3994_v13  ;;  %v9507_v43 = vld [vmem:[%s15135_s1 + $0xb6c] sm:$0xf0] }
 0x258   :  { %4227 = vmatmul.bf16.gmra.mxu3 %v10771_v28  ;;  %v3967_v0 = vpop.f32.mrf.mxu2  ;;  %v7992_v58 = vor.u32 %v9507_v43, %v7991_v63  ;;  %v8215_v31 = vld [vmem:[%s15135_s1 + $0xd10] sm:$0xf] }
 0x259   :  { %4140 = vmatmul.bf16.gmra.mxu0 %v10765_v25  ;;  %v3939_v7 = vadd.f32 %v3938_v6, %v3910_v15  ;;  %v3940_v22 = vpop.f32.mrf.mxu1  ;;  %4438 = vmatpush.bf16.msrb.mxu3 %v8504_v10  ;;  %v9563_v50 = vld [vmem:[%s15135_s1 + $0xd2c] sm:$0xf0] }
 0x25a   :  { %v7703_v37 = vld [vmem:[%s15135_s1 + $0x910] sm:$0xf]  ;;  %v8216_v11 = vor.u32 %v9563_v50, %v8215_v31  ;;  %4380 = vmatpush.bf16.msrb.mxu1 %v7992_v58 }
 0x25b   :  { %v3968_v19 = vadd.f32 %v3967_v0, %v3939_v7  ;;  %v3996_v59 = vpop.f32.mrf.mxu3  ;;  %v9435_v23 = vld [vmem:[%s15135_s1 + $0x92c] sm:$0xf0] }
 0x25c   :  { %v8471_v55 = vld [vmem:[%s15135_s1 + $0xf10] sm:$0xf]  ;;  %v7704_v12 = vor.u32 %v9435_v23, %v7703_v37  ;;  %4410 = vmatpush.bf16.msrb.mxu2 %v8216_v11 }
 0x25d   :  { %v3997_v38 = vadd.f32 %v3996_v59, %v3968_v19  ;;  %v9627_v4 = vld [vmem:[%s15135_s1 + $0xf2c] sm:$0xf0] }
 0x25e   :  { %v3911_v17 = vpop.f32.mrf.mxu0  ;;  %v8472_v24 = vor.u32 %v9627_v4, %v8471_v55  ;;  %4352 = vmatpush.bf16.msrb.mxu0 %v7704_v12  ;;  %v7959_v36 = vld [vmem:[%s15135_s1 + $0xb10] sm:$0xf]  ;;  %4299 = vmatmul.bf16.vlgmr.msra.gmra.mxu2 %v10121_v54  ;;  %v15225_v12 = vld [vmem:[#allocation8_spill] sm:$0xff] }
 0x25f   :  { %v3912_v52 = vadd.f32 %v3911_v17, %v3883_v14  ;;  %5211 = vst [vmem:[#allocation2 + $0x190] sm:$0xff] %v3997_v38  ;;  %v9499_v6 = vld [vmem:[%s15135_s1 + $0xb2c] sm:$0xf0] }
 0x260   :  { %v3969_v41 = vpop.f32.mrf.mxu2  ;;  %4439 = vmatpush.bf16.msrb.mxu3 %v8472_v24  ;;  %v7960_v18 = vor.u32 %v9499_v6, %v7959_v36  ;;  %v8183_v13 = vld [vmem:[%s15135_s1 + $0xcd0] sm:$0xf] }
 0x261   :  { %v3941_v51 = vadd.f32 %v3940_v22, %v3912_v52  ;;  %v12406_v29 = vpop.f32.mrf.mxu1  ;;  %4270 = vmatmul.bf16.vlgmr.msra.gmra.mxu1 %v10119_v53  ;;  %v9555_v15 = vld [vmem:[%s15135_s1 + $0xcec] sm:$0xf0] }
 0x262   :  { %4381 = vmatpush.bf16.msrb.mxu1 %v7960_v18  ;;  %v7671_v44 = vld [vmem:[%s15135_s1 + $0x8d0] sm:$0xf]  ;;  %v8184_v56 = vor.u32 %v9555_v15, %v8183_v13 }
 0x263   :  { %v3970_v1 = vadd.f32 %v3969_v41, %v3941_v51  ;;  %v3998_v8 = vpop.f32.mrf.mxu3  ;;  %v9427_v21 = vld [vmem:[%s15135_s1 + $0x8ec] sm:$0xf0] }
 0x264   :  { %v8439_v42 = vld [vmem:[%s15135_s1 + $0xed0] sm:$0xf]  ;;  %v7672_v62 = vor.u32 %v9427_v21, %v7671_v44  ;;  %4411 = vmatpush.bf16.msrb.mxu2 %v8184_v56 }
 0x265   :  { %v3999_v39 = vadd.f32 %v3998_v8, %v3970_v1  ;;  %v9619_v16 = vld [vmem:[%s15135_s1 + $0xeec] sm:$0xf0] }
 0x266   :  { %v12404_v3 = vpop.f32.mrf.mxu0  ;;  %v8440_v7 = vor.u32 %v9619_v16, %v8439_v42  ;;  %4353 = vmatpush.bf16.msrb.mxu0 %v7672_v62  ;;  %v7927_v9 = vld [vmem:[%s15135_s1 + $0xad0] sm:$0xf] }
 0x267   :  { %5219 = vst [vmem:[#allocation2 + $0x1d0] sm:$0xff] %v3999_v39  ;;  %v9491_v0 = vld [vmem:[%s15135_s1 + $0xaec] sm:$0xf0] }
 0x268   :  { %4328 = vmatmul.bf16.vlgmr.msra.gmra.mxu3 %v10129_v57  ;;  %v12436_v61 = vpop.f32.mrf.mxu2  ;;  %v7928_v60 = vor.u32 %v9491_v0, %v7927_v9  ;;  %v8151_v10 = vld [vmem:[%s15135_s1 + $0xc90] sm:$0xf] }
 0x269   :  { %4241 = vmatmul.bf16.vlgmr.msra.gmra.mxu0 %v10108_v48  ;;  %v12442_v30 = vpop.f32.mrf.mxu1  ;;  %4440 = vmatpush.bf16.msrb.mxu3 %v8440_v7  ;;  %v9547_v14 = vld [vmem:[%s15135_s1 + $0xcac] sm:$0xf0] }
 0x26a   :  { %v7639_v19 = vld [vmem:[%s15135_s1 + $0x890] sm:$0xf]  ;;  %v8152_v59 = vor.u32 %v9547_v14, %v8151_v10  ;;  %4382 = vmatpush.bf16.msrb.mxu1 %v7928_v60 }
 0x26b   :  { %v12438_v5 = vpop.f32.mrf.mxu3  ;;  %v9419_v17 = vld [vmem:[%s15135_s1 + $0x8ac] sm:$0xf0] }
 0x26c   :  { %v8407_v22 = vld [vmem:[%s15135_s1 + $0xe90] sm:$0xf]  ;;  %v7640_v52 = vor.u32 %v9419_v17, %v7639_v19  ;;  %4412 = vmatpush.bf16.msrb.mxu2 %v8152_v59 }
 0x26d   :  { %v9611_v38 = vld [vmem:[%s15135_s1 + $0xeac] sm:$0xf0] }
 0x26e   :  { %v12440_v2 = vpop.f32.mrf.mxu0  ;;  %v8408_v63 = vor.u32 %v9611_v38, %v8407_v22  ;;  %4354 = vmatpush.bf16.msrb.mxu0 %v7640_v52  ;;  %v7895_v37 = vld [vmem:[%s15135_s1 + $0xa90] sm:$0xf] }
 0x26f   :  { %v9483_v11 = vld [vmem:[%s15135_s1 + $0xaac] sm:$0xf0] }
 0x270   :  { %v12468_v43 = vpop.f32.mrf.mxu2  ;;  %4441 = vmatpush.bf16.msrb.mxu3 %v8408_v63  ;;  %v7896_v23 = vor.u32 %v9483_v11, %v7895_v37  ;;  %v15224_v55 = vld [vmem:[#allocation7_spill] sm:$0xff]  ;;  %v15226_v11 = vld [vmem:[#allocation9_spill] sm:$0xff] }
 0x271   :  { %v12474_v50 = vpop.f32.mrf.mxu1  ;;  %4275 = vmatmul.bf16.gmra.mxu1 %v15195_v40  ;;  %4304 = vmatmul.bf16.gmra.mxu2 %v15224_v55  ;;  %v8119_v4 = vld [vmem:[%s15135_s1 + $0xc50] sm:$0xf] }
 0x272   :  { %4383 = vmatpush.bf16.msrb.mxu1 %v7896_v23  ;;  %v9539_v51 = vld [vmem:[%s15135_s1 + $0xc6c] sm:$0xf0]  ;;  %v15227_v23 = vld [vmem:[#allocation10_spill] sm:$0xff] }
 0x273   :  { %v12470_v58 = vpop.f32.mrf.mxu3  ;;  %v7607_v24 = vld [vmem:[%s15135_s1 + $0x850] sm:$0xf]  ;;  %v8120_v41 = vor.u32 %v9539_v51, %v8119_v4  ;;  %v15229_v51 = vld [vmem:[#allocation12_spill] sm:$0xff] }
 0x274   :  { %v9411_v1 = vld [vmem:[%s15135_s1 + $0x86c] sm:$0xf0] }
 0x275   :  { %v8375_v8 = vld [vmem:[%s15135_s1 + $0xe50] sm:$0xf]  ;;  %v7608_v6 = vor.u32 %v9411_v1, %v7607_v24  ;;  %4413 = vmatpush.bf16.msrb.mxu2 %v8120_v41  ;;  %v9327_v24 = vld [vmem:[%s15135_s1 + $0x5d4] sm:$0xf] }
 0x276   :  { %v12472_v31 = vpop.f32.mrf.mxu0  ;;  %v9603_v39 = vld [vmem:[%s15135_s1 + $0xe6c] sm:$0xf0]  ;;  %v7289_v41 = vld [vmem:[%s15135_s1 + $0x5f0] sm:$0xf0] }
 0x277   :  { %v8376_v18 = vor.u32 %v9603_v39, %v8375_v8  ;;  %4355 = vmatpush.bf16.msrb.mxu0 %v7608_v6  ;;  %v7863_v56 = vld [vmem:[%s15135_s1 + $0xa50] sm:$0xf]  ;;  %v9199_v1 = vld [vmem:[%s15135_s1 + $0x1d4] sm:$0xf]  ;;  %v7292_v8 = vor.u32 %v9327_v24, %v7289_v41 }
 0x278   :  { %4333 = vmatmul.bf16.gmra.mxu3 %v15225_v12  ;;  %v12504_v36 = vpop.f32.mrf.mxu2  ;;  %v9475_v21 = vld [vmem:[%s15135_s1 + $0xa6c] sm:$0xf0]  ;;  %v6777_v39 = vld [vmem:[%s15135_s1 + $0x1f0] sm:$0xf0] }
 0x279   :  { %4246 = vmatmul.bf16.gmra.mxu0 %v15194_v20  ;;  %v12510_v44 = vpop.f32.mrf.mxu1  ;;  %4442 = vmatpush.bf16.msrb.mxu3 %v8376_v18  ;;  %v7864_v42 = vor.u32 %v9475_v21, %v7863_v56  ;;  %v8087_v16 = vld [vmem:[%s15135_s1 + $0xc10] sm:$0xf]  ;;  %v9391_v6 = vld [vmem:[%s15135_s1 + $0x7d4] sm:$0xf]  ;;  %v6780_v21 = vor.u32 %v9199_v1, %v6777_v39  ;;  %v15230_v39 = vld [vmem:[#allocation5_spill] sm:$0xff] }
 0x27a   :  { %v9531_v62 = vld [vmem:[%s15135_s1 + $0xc2c] sm:$0xf0]  ;;  %v7545_v18 = vld [vmem:[%s15135_s1 + $0x7f0] sm:$0xf0] }
 0x27b   :  { %v12506_v13 = vpop.f32.mrf.mxu3  ;;  %v7575_v7 = vld [vmem:[%s15135_s1 + $0x810] sm:$0xf]  ;;  %v8088_v9 = vor.u32 %v9531_v62, %v8087_v16  ;;  %4384 = vmatpush.bf16.msrb.mxu1 %v7864_v42  ;;  %v7548_v42 = vor.u32 %v9391_v6, %v7545_v18  ;;  %v9383_v24 = vld [vmem:[%s15135_s1 + $0x794] sm:$0xf]  ;;  %v12607_v6 = vperm.slane %v15230_v39, 3 }
 0x27c   :  { %v9403_v0 = vld [vmem:[%s15135_s1 + $0x82c] sm:$0xf0]  ;;  %v7513_v41 = vld [vmem:[%s15135_s1 + $0x7b0] sm:$0xf0] }
 0x27d   :  { %v8343_v60 = vld [vmem:[%s15135_s1 + $0xe10] sm:$0xf]  ;;  %v7576_v14 = vor.u32 %v9403_v0, %v7575_v7  ;;  %4414 = vmatpush.bf16.msrb.mxu2 %v8088_v9  ;;  %v9263_v9 = vld [vmem:[%s15135_s1 + $0x3d4] sm:$0xf] }
 0x27e   :  { %v12508_v15 = vpop.f32.mrf.mxu0  ;;  %v9595_v10 = vld [vmem:[%s15135_s1 + $0xe2c] sm:$0xf0]  ;;  %v7033_v0 = vld [vmem:[%s15135_s1 + $0x3f0] sm:$0xf0] }
 0x27f   :  { %v8344_v19 = vor.u32 %v9595_v10, %v8343_v60  ;;  %4356 = vmatpush.bf16.msrb.mxu0 %v7576_v14  ;;  %v7831_v17 = vld [vmem:[%s15135_s1 + $0xa10] sm:$0xf]  ;;  %v9319_v60 = vld [vmem:[%s15135_s1 + $0x594] sm:$0xf]  ;;  %v7036_v10 = vor.u32 %v9263_v9, %v7033_v0  ;;  %v15231_v9 = vld [vmem:[#allocation13_spill] sm:$0xff]  ;;  %v4011_v0 = vadd.f32 %v12404_v3, %v12607_v6 }
 0x280   :  { %v12536_v59 = vpop.f32.mrf.mxu2  ;;  %v9467_v22 = vld [vmem:[%s15135_s1 + $0xa2c] sm:$0xf0]  ;;  %v7257_v14 = vld [vmem:[%s15135_s1 + $0x5b0] sm:$0xf0] }
 0x281   :  { %4443 = vmatpush.bf16.msrb.mxu3 %v8344_v19  ;;  %v7832_v63 = vor.u32 %v9467_v22, %v7831_v17  ;;  %v12548_v37 = vpop.f32.mrf.mxu1  ;;  %4280 = vmatmul.bf16.gmra.mxu1 %v15227_v23  ;;  %v15228_v4 = vld [vmem:[#allocation11_spill] sm:$0xff]  ;;  %v7260_v22 = vor.u32 %v9319_v60, %v7257_v14  ;;  %v15232_v60 = vld [vmem:[#allocation14_spill] sm:$0xff] }
 0x282   :  { %4309 = vmatmul.bf16.gmra.mxu2 %v15228_v4  ;;  %v9191_v19 = vld [vmem:[%s15135_s1 + $0x194] sm:$0xf] }
 0x283   :  { %v12544_v38 = vpop.f32.mrf.mxu3  ;;  %4385 = vmatpush.bf16.msrb.mxu1 %v7832_v63  ;;  %4523 = vmatpush.bf16.msra.mxu2 %v7292_v8  ;;  %v6745_v17 = vld [vmem:[%s15135_s1 + $0x1b0] sm:$0xf0]  ;;  %v7516_v8 = vor.u32 %v9383_v24, %v7513_v41 }
 0x284   :  { %4465 = vmatpush.bf16.msra.mxu0 %v6780_v21  ;;  %v6748_v63 = vor.u32 %v9191_v19, %v6745_v17  ;;  %v9255_v14 = vld [vmem:[%s15135_s1 + $0x394] sm:$0xf]  ;;  %v15234_v17 = vld [vmem:[#allocation16_spill] sm:$0xff] }
 0x285   :  { %4552 = vmatpush.bf16.msra.mxu3 %v7548_v42  ;;  %v7001_v19 = vld [vmem:[%s15135_s1 + $0x3b0] sm:$0xf0] }
 0x286   :  { %v12546_v52 = vpop.f32.mrf.mxu0  ;;  %v7225_v3 = vld [vmem:[%s15135_s1 + $0x570] sm:$0xf0] }
 0x287   :  { %4494 = vmatpush.bf16.msra.mxu1 %v7036_v10  ;;  %4524 = vmatpush.bf16.msra.mxu2 %v7260_v22  ;;  %v15233_v10 = vld [vmem:[#allocation15_spill] sm:$0xff]  ;;  %v7004_v22 = vor.u32 %v9255_v14, %v7001_v19 }
 0x288   :  { %4338 = vmatmul.bf16.gmra.mxu3 %v15229_v51  ;;  %v12572_v56 = vpop.f32.mrf.mxu2  ;;  %4466 = vmatpush.bf16.msra.mxu0 %v6748_v63  ;;  %v9311_v63 = vld [vmem:[%s15135_s1 + $0x554] sm:$0xf] }
 0x289   :  { %4251 = vmatmul.bf16.gmra.mxu0 %v15226_v11  ;;  %v12578_v7 = vpop.f32.mrf.mxu1  ;;  %4553 = vmatpush.bf16.msra.mxu3 %v7516_v8  ;;  %v9183_v24 = vld [vmem:[%s15135_s1 + $0x154] sm:$0xf]  ;;  %v7228_v41 = vor.u32 %v9311_v63, %v7225_v3 }
 0x28a   :  { %v6713_v8 = vld [vmem:[%s15135_s1 + $0x170] sm:$0xf0] }
 0x28b   :  { %v12574_v16 = vpop.f32.mrf.mxu3  ;;  %v9375_v39 = vld [vmem:[%s15135_s1 + $0x754] sm:$0xf]  ;;  %4495 = vmatpush.bf16.msra.mxu1 %v7004_v22  ;;  %4525 = vmatpush.bf16.msra.mxu2 %v7228_v41 }
 0x28c   :  { %v7481_v14 = vld [vmem:[%s15135_s1 + $0x770] sm:$0xf0] }
 0x28d   :  { %v9247_v4 = vld [vmem:[%s15135_s1 + $0x354] sm:$0xf] }
 0x28e   :  { %v12576_v62 = vpop.f32.mrf.mxu0  ;;  %v6969_v22 = vld [vmem:[%s15135_s1 + $0x370] sm:$0xf0] }
 0x290   :  { %v12604_v1 = vpop.f32.mrf.mxu2 }
 0x291   :  { %v12613_v42 = vpop.f32.mrf.mxu1  ;;  %4285 = vmatmul.bf16.gmra.mxu1 %v15232_v60  ;;  %v4040_v60 = vadd.f32 %v12406_v29, %v4011_v0  ;;  %v9303_v29 = vld [vmem:[%s15135_s1 + $0x514] sm:$0xf]  ;;  %v6972_v0 = vor.u32 %v9247_v4, %v6969_v22 }
 0x292   :  { %4314 = vmatmul.bf16.gmra.mxu2 %v15233_v10  ;;  %v7484_v10 = vor.u32 %v9375_v39, %v7481_v14  ;;  %v9367_v4 = vld [vmem:[%s15135_s1 + $0x714] sm:$0xf] }
 0x293   :  { %v12609_v18 = vpop.f32.mrf.mxu3  ;;  %v4069_v51 = vadd.f32 %v12436_v61, %v4040_v60  ;;  %v9175_v61 = vld [vmem:[%s15135_s1 + $0x114] sm:$0xf]  ;;  %4496 = vmatpush.bf16.msra.mxu1 %v6972_v0  ;;  %v4016_v0 = vadd.f32 %v12472_v31, %v12607_v6 }
 0x294   :  { %4554 = vmatpush.bf16.msra.mxu3 %v7484_v10  ;;  %v6681_v60 = vld [vmem:[%s15135_s1 + $0x130] sm:$0xf0]  ;;  %v4013_v10 = vadd.f32 %v12440_v2, %v12607_v6 }
 0x295   :  { %v6684_v41 = vor.u32 %v9175_v61, %v6681_v60  ;;  %v4098_v22 = vadd.f32 %v12438_v5, %v4069_v51  ;;  %v15235_v61 = vld [vmem:[#allocation17_spill] sm:$0xff]  ;;  %v15237_v5 = vld [vmem:[#allocation19_spill] sm:$0xff] }
 0x296   :  { %v12611_v21 = vpop.f32.mrf.mxu0  ;;  %v9239_v51 = vld [vmem:[%s15135_s1 + $0x314] sm:$0xf] }
 0x297   :  { %v7161_v31 = vld [vmem:[%s15135_s1 + $0x4f0] sm:$0xf0] }
 0x298   :  { %4343 = vmatmul.bf16.gmra.mxu3 %v15234_v17  ;;  %v12645_v19 = vpop.f32.mrf.mxu2  ;;  %v6716_v17 = vor.u32 %v9183_v24, %v6713_v8  ;;  %v7449_v8 = vld [vmem:[%s15135_s1 + $0x730] sm:$0xf0] }
 0x299   :  { %4256 = vmatmul.bf16.gmra.mxu0 %v15231_v9  ;;  %v12652_v9 = vpop.f32.mrf.mxu1  ;;  %v7452_v14 = vor.u32 %v9367_v4, %v7449_v8  ;;  %v15236_v4 = vld [vmem:[#allocation18_spill] sm:$0xff] }
 0x29a   :  { %4467 = vmatpush.bf16.msra.mxu0 %v6716_v17  ;;  %v7193_v17 = vld [vmem:[%s15135_s1 + $0x530] sm:$0xf0] }
 0x29b   :  { %v12648_v63 = vpop.f32.mrf.mxu3  ;;  %v7196_v24 = vor.u32 %v9303_v29, %v7193_v17  ;;  %4555 = vmatpush.bf16.msra.mxu3 %v7452_v14  ;;  %v4042_v29 = vadd.f32 %v12442_v30, %v4013_v10  ;;  %v6937_v30 = vld [vmem:[%s15135_s1 + $0x330] sm:$0xf0] }
 0x29c   :  { %v6940_v10 = vor.u32 %v9239_v51, %v6937_v30  ;;  %v6649_v14 = vld [vmem:[%s15135_s1 + $0xf0] sm:$0xf0] }
 0x29d   :  { %4526 = vmatpush.bf16.msra.mxu2 %v7196_v24  ;;  %v4071_v60 = vadd.f32 %v12468_v43, %v4042_v29  ;;  %v9295_v43 = vld [vmem:[%s15135_s1 + $0x4d4] sm:$0xf] }
 0x29e   :  { %v12650_v3 = vpop.f32.mrf.mxu0  ;;  %4468 = vmatpush.bf16.msra.mxu0 %v6684_v41  ;;  %v9167_v24 = vld [vmem:[%s15135_s1 + $0xd4] sm:$0xf]  ;;  %v7164_v8 = vor.u32 %v9295_v43, %v7161_v31  ;;  %4497 = vmatpush.bf16.msra.mxu1 %v6940_v10 }
 0x29f   :  { %v7417_v29 = vld [vmem:[%s15135_s1 + $0x6f0] sm:$0xf0]  ;;  %v6652_v30 = vor.u32 %v9167_v24, %v6649_v14 }
 0x2a0   :  { %v12681_v39 = vpop.f32.mrf.mxu2  ;;  %v9231_v10 = vld [vmem:[%s15135_s1 + $0x2d4] sm:$0xf] }
 0x2a1   :  { %v4155_v2 = vpop.f32.mrf.mxu1  ;;  %4386 = vmatmul.bf16.vlgmr.msrb.gmra.mxu1 %v15236_v4  ;;  %4527 = vmatpush.bf16.msra.mxu2 %v7164_v8  ;;  %v6617_v24 = vld [vmem:[%s15135_s1 + $0xb0] sm:$0xf0] }
 0x2a2   :  { %4415 = vmatmul.bf16.vlgmr.msrb.gmra.mxu2 %v15237_v5  ;;  %v4100_v5 = vadd.f32 %v12470_v58, %v4071_v60  ;;  %4469 = vmatpush.bf16.msra.mxu0 %v6652_v30  ;;  %v6905_v58 = vld [vmem:[%s15135_s1 + $0x2f0] sm:$0xf0] }
 0x2a3   :  { %v12684_v23 = vpop.f32.mrf.mxu3  ;;  %v9287_v60 = vld [vmem:[%s15135_s1 + $0x494] sm:$0xf] }
 0x2a4   :  { %v7385_v8 = vld [vmem:[%s15135_s1 + $0x6b0] sm:$0xf0] }
 0x2a6   :  { %v4126_v11 = vpop.f32.mrf.mxu0 }
 0x2a7   :  { %v4127_v17 = vadd.f32 %v4126_v11, %v4098_v22  ;;  %v15238_v11 = vld [vmem:[#allocation20_spill] sm:$0xff]  ;;  %v9359_v22 = vld [vmem:[%s15135_s1 + $0x6d4] sm:$0xf] }
 0x2a8   :  { %4444 = vmatmul.bf16.vlgmr.msrb.gmra.mxu3 %v15238_v11  ;;  %v4184_v51 = vpop.f32.mrf.mxu2  ;;  %v7420_v11 = vor.u32 %v9359_v22, %v7417_v29 }
 0x2a9   :  { %4357 = vmatmul.bf16.vlgmr.msrb.gmra.mxu0 %v15235_v61  ;;  %v4156_v41 = vadd.f32 %v4155_v2, %v4127_v17  ;;  %v4045_v2 = vadd.f32 %v12474_v50, %v4016_v0  ;;  %v4157_v4 = vpop.f32.mrf.mxu1  ;;  %v6908_v50 = vor.u32 %v9231_v10, %v6905_v58  ;;  %v7129_v0 = vld [vmem:[%s15135_s1 + $0x4b0] sm:$0xf0]  ;;  %v4021_v10 = vadd.f32 %v12546_v52, %v12607_v6 }
 0x2aa   :  { %4556 = vmatpush.bf16.msra.mxu3 %v7420_v11  ;;  %v7132_v11 = vor.u32 %v9287_v60, %v7129_v0  ;;  %v7097_v52 = vld [vmem:[%s15135_s1 + $0x470] sm:$0xf0] }
 0x2ab   :  { %v4185_v17 = vadd.f32 %v4184_v51, %v4156_v41  ;;  %v4213_v43 = vpop.f32.mrf.mxu3  ;;  %v4074_v55 = vadd.f32 %v12504_v36, %v4045_v2  ;;  %v9159_v36 = vld [vmem:[%s15135_s1 + $0x94] sm:$0xf]  ;;  %4498 = vmatpush.bf16.msra.mxu1 %v6908_v50 }
 0x2ac   :  { %v9351_v41 = vld [vmem:[%s15135_s1 + $0x694] sm:$0xf]  ;;  %v6620_v22 = vor.u32 %v9159_v36, %v6617_v24  ;;  %4528 = vmatpush.bf16.msra.mxu2 %v7132_v11 }
 0x2ad   :  { %v4214_v61 = vadd.f32 %v4213_v43, %v4185_v17  ;;  %v7388_v29 = vor.u32 %v9351_v41, %v7385_v8  ;;  %v9151_v58 = vld [vmem:[%s15135_s1 + $0x54] sm:$0xf]  ;;  %v4050_v8 = vadd.f32 %v12548_v37, %v4021_v10 }
 0x2ae   :  { %v4128_v31 = vpop.f32.mrf.mxu0  ;;  %4470 = vmatpush.bf16.msra.mxu0 %v6620_v22  ;;  %v6585_v0 = vld [vmem:[%s15135_s1 + $0x70] sm:$0xf0] }
 0x2af   :  { %v4129_v12 = vadd.f32 %v4128_v31, %v4100_v5  ;;  %5164 = vst [vmem:[#allocation2 + $0x18] sm:$0xff] %v4214_v61  ;;  %v4018_v61 = vadd.f32 %v12508_v15, %v12607_v6  ;;  %v4103_v15 = vadd.f32 %v12506_v13, %v4074_v55  ;;  %4557 = vmatpush.bf16.msra.mxu3 %v7388_v29  ;;  %v9223_v55 = vld [vmem:[%s15135_s1 + $0x294] sm:$0xf] }
 0x2b0   :  { %v4186_v14 = vpop.f32.mrf.mxu2  ;;  %v6873_v13 = vld [vmem:[%s15135_s1 + $0x2b0] sm:$0xf0]  ;;  %v6588_v11 = vor.u32 %v9151_v58, %v6585_v0 }
 0x2b1   :  { %v4158_v5 = vadd.f32 %v4157_v4, %v4129_v12  ;;  %v4160_v30 = vpop.f32.mrf.mxu1  ;;  %v4047_v2 = vadd.f32 %v12510_v44, %v4018_v61  ;;  %4391 = vmatmul.bf16.gmra.mxu1 %v10605_v46  ;;  %v6876_v44 = vor.u32 %v9223_v55, %v6873_v13  ;;  %v9343_v36 = vld [vmem:[%s15135_s1 + $0x654] sm:$0xf]  ;;  %v4023_v55 = vadd.f32 %v12576_v62, %v12607_v6 }
 0x2b2   :  { %4420 = vmatmul.bf16.gmra.mxu2 %v10607_v47  ;;  %v7353_v61 = vld [vmem:[%s15135_s1 + $0x670] sm:$0xf0]  ;;  %4471 = vmatpush.bf16.msra.mxu0 %v6588_v11 }
 0x2b3   :  { %v4187_v12 = vadd.f32 %v4186_v14, %v4158_v5  ;;  %v4215_v4 = vpop.f32.mrf.mxu3  ;;  %v4076_v31 = vadd.f32 %v12536_v59, %v4047_v2  ;;  %v9279_v59 = vld [vmem:[%s15135_s1 + $0x454] sm:$0xf]  ;;  %4499 = vmatpush.bf16.msra.mxu1 %v6876_v44  ;;  %v7356_v24 = vor.u32 %v9343_v36, %v7353_v61 }
 0x2b4   :  { %v7100_v60 = vor.u32 %v9279_v59, %v7097_v52  ;;  %v9271_v2 = vld [vmem:[%s15135_s1 + $0x414] sm:$0xf] }
 0x2b5   :  { %v4216_v17 = vadd.f32 %v4215_v4, %v4187_v12  ;;  %v4105_v41 = vadd.f32 %v12544_v38, %v4076_v31  ;;  %4558 = vmatpush.bf16.msra.mxu3 %v7356_v24  ;;  %v4079_v38 = vadd.f32 %v12572_v56, %v4050_v8  ;;  %v9143_v31 = vld [vmem:[%s15135_s1 + $0x14] sm:$0xf]  ;;  %v4052_v24 = vadd.f32 %v12578_v7, %v4023_v55 }
 0x2b6   :  { %v4131_v51 = vpop.f32.mrf.mxu0  ;;  %4529 = vmatpush.bf16.msra.mxu2 %v7100_v60  ;;  %v6553_v10 = vld [vmem:[%s15135_s1 + $0x30] sm:$0xf0] }
 0x2b7   :  { %v4132_v43 = vadd.f32 %v4131_v51, %v4103_v15  ;;  %5172 = vst [vmem:[#allocation2 + $0x58] sm:$0xff] %v4216_v17  ;;  %v9215_v51 = vld [vmem:[%s15135_s1 + $0x254] sm:$0xf]  ;;  %v6556_v44 = vor.u32 %v9143_v31, %v6553_v10  ;;  %v4108_v62 = vadd.f32 %v12574_v16, %v4079_v38 }
 0x2b8   :  { %4449 = vmatmul.bf16.gmra.mxu3 %v10609_v49  ;;  %v4189_v5 = vpop.f32.mrf.mxu2  ;;  %v7065_v17 = vld [vmem:[%s15135_s1 + $0x430] sm:$0xf0] }
 0x2b9   :  { %4362 = vmatmul.bf16.gmra.mxu0 %v10603_v45  ;;  %v4161_v50 = vadd.f32 %v4160_v30, %v4132_v43  ;;  %v4162_v15 = vpop.f32.mrf.mxu1  ;;  %v6841_v30 = vld [vmem:[%s15135_s1 + $0x270] sm:$0xf0]  ;;  %v7068_v43 = vor.u32 %v9271_v2, %v7065_v17 }
 0x2ba   :  { %v6844_v37 = vor.u32 %v9215_v51, %v6841_v30  ;;  %v9335_v56 = vld [vmem:[%s15135_s1 + $0x614] sm:$0xf]  ;;  %4472 = vmatpush.bf16.msra.mxu0 %v6556_v44 }
 0x2bb   :  { %v4190_v14 = vadd.f32 %v4189_v5, %v4161_v50  ;;  %v4218_v22 = vpop.f32.mrf.mxu3  ;;  %v7321_v59 = vld [vmem:[%s15135_s1 + $0x630] sm:$0xf0]  ;;  %4530 = vmatpush.bf16.msra.mxu2 %v7068_v43 }
 0x2bc   :  { %4500 = vmatpush.bf16.msra.mxu1 %v6844_v37  ;;  %v7324_v58 = vor.u32 %v9335_v56, %v7321_v59  ;;  %v9207_v50 = vld [vmem:[%s15135_s1 + $0x214] sm:$0xf] }
 0x2bd   :  { %v4219_v12 = vadd.f32 %v4218_v22, %v4190_v14  ;;  %v6809_v60 = vld [vmem:[%s15135_s1 + $0x230] sm:$0xf0]  ;;  %v4081_v14 = vadd.f32 %v12604_v1, %v4052_v24  ;;  %v4026_v22 = vadd.f32 %v12611_v21, %v12607_v6 }
 0x2be   :  { %v4133_v29 = vpop.f32.mrf.mxu0  ;;  %v6812_v5 = vor.u32 %v9207_v50, %v6809_v60  ;;  %4559 = vmatpush.bf16.msra.mxu3 %v7324_v58  ;;  %v9583_v16 = vld [vmem:[%s15135_s1 + $0xdd4] sm:$0xf] }
 0x2bf   :  { %v4134_v4 = vadd.f32 %v4133_v29, %v4105_v41  ;;  %5180 = vst [vmem:[#allocation2 + $0x98] sm:$0xff] %v4219_v12  ;;  %v8313_v7 = vld [vmem:[%s15135_s1 + $0xdf0] sm:$0xf0]  ;;  %v4110_v37 = vadd.f32 %v12609_v18, %v4081_v14  ;;  %v4055_v2 = vadd.f32 %v12613_v42, %v4026_v22 }
 0x2c0   :  { %v4191_v52 = vpop.f32.mrf.mxu2  ;;  %4501 = vmatpush.bf16.msra.mxu1 %v6812_v5  ;;  %v9455_v1 = vld [vmem:[%s15135_s1 + $0x9d4] sm:$0xf]  ;;  %v8316_v29 = vor.u32 %v9583_v16, %v8313_v7 }
 0x2c1   :  { %v4163_v13 = vadd.f32 %v4162_v15, %v4134_v4  ;;  %v4165_v11 = vpop.f32.mrf.mxu1  ;;  %4396 = vmatmul.bf16.gmra.mxu1 %v10689_v33  ;;  %v7801_v15 = vld [vmem:[%s15135_s1 + $0x9f0] sm:$0xf0]  ;;  %v4084_v58 = vadd.f32 %v12645_v19, %v4055_v2 }
 0x2c2   :  { %4425 = vmatmul.bf16.gmra.mxu2 %v10691_v34  ;;  %v9647_v12 = vld [vmem:[%s15135_s1 + $0xfd4] sm:$0xf]  ;;  %v7804_v30 = vor.u32 %v9455_v1, %v7801_v15 }
 0x2c3   :  { %v4192_v0 = vadd.f32 %v4191_v52, %v4163_v13  ;;  %v4220_v36 = vpop.f32.mrf.mxu3  ;;  %v8569_v4 = vld [vmem:[%s15135_s1 + $0xff0] sm:$0xf0]  ;;  %4639 = vmatpush.bf16.msrb.mxu2 %v8316_v29  ;;  %v4113_v24 = vadd.f32 %v12648_v63, %v4084_v58 }
 0x2c4   :  { %v8572_v38 = vor.u32 %v9647_v12, %v8569_v4  ;;  %4581 = vmatpush.bf16.msrb.mxu0 %v7804_v30  ;;  %v9519_v13 = vld [vmem:[%s15135_s1 + $0xbd4] sm:$0xf] }
 0x2c5   :  { %v4221_v41 = vadd.f32 %v4220_v36, %v4192_v0  ;;  %v8057_v44 = vld [vmem:[%s15135_s1 + $0xbf0] sm:$0xf0] }
 0x2c6   :  { %v4136_v61 = vpop.f32.mrf.mxu0  ;;  %4668 = vmatpush.bf16.msrb.mxu3 %v8572_v38  ;;  %v8060_v18 = vor.u32 %v9519_v13, %v8057_v44  ;;  %v9575_v42 = vld [vmem:[%s15135_s1 + $0xd94] sm:$0xf] }
 0x2c7   :  { %v4137_v8 = vadd.f32 %v4136_v61, %v4108_v62  ;;  %5188 = vst [vmem:[#allocation2 + $0xd8] sm:$0xff] %v4221_v41  ;;  %v8281_v59 = vld [vmem:[%s15135_s1 + $0xdb0] sm:$0xf0]  ;;  %v4028_v61 = vadd.f32 %v12650_v3, %v12607_v6 }
 0x2c8   :  { %4454 = vmatmul.bf16.gmra.mxu3 %v10693_v35  ;;  %v4194_v51 = vpop.f32.mrf.mxu2  ;;  %v9447_v52 = vld [vmem:[%s15135_s1 + $0x994] sm:$0xf]  ;;  %v8284_v50 = vor.u32 %v9575_v42, %v8281_v59  ;;  %4610 = vmatpush.bf16.msrb.mxu1 %v8060_v18 }
 0x2c9   :  { %4367 = vmatmul.bf16.gmra.mxu0 %v10687_v32  ;;  %v4166_v21 = vadd.f32 %v4165_v11, %v4137_v8  ;;  %v4167_v10 = vpop.f32.mrf.mxu1  ;;  %v7769_v60 = vld [vmem:[%s15135_s1 + $0x9b0] sm:$0xf0]  ;;  %v4057_v16 = vadd.f32 %v12652_v9, %v4028_v61 }
 0x2ca   :  { %v9639_v62 = vld [vmem:[%s15135_s1 + $0xf94] sm:$0xf]  ;;  %v7772_v0 = vor.u32 %v9447_v52, %v7769_v60  ;;  %4640 = vmatpush.bf16.msrb.mxu2 %v8284_v50 }
 0x2cb   :  { %v4195_v17 = vadd.f32 %v4194_v51, %v4166_v21  ;;  %v4223_v43 = vpop.f32.mrf.mxu3  ;;  %v8537_v36 = vld [vmem:[%s15135_s1 + $0xfb0] sm:$0xf0]  ;;  %v4086_v21 = vadd.f32 %v12681_v39, %v4057_v16 }
 0x2cc   :  { %v8540_v5 = vor.u32 %v9639_v62, %v8537_v36  ;;  %4582 = vmatpush.bf16.msrb.mxu0 %v7772_v0  ;;  %v9511_v6 = vld [vmem:[%s15135_s1 + $0xb94] sm:$0xf] }
 0x2cd   :  { %v4224_v56 = vadd.f32 %v4223_v43, %v4195_v17  ;;  %v8025_v3 = vld [vmem:[%s15135_s1 + $0xbb0] sm:$0xf0]  ;;  %v4115_v17 = vadd.f32 %v12684_v23, %v4086_v21 }
 0x2ce   :  { %v4138_v31 = vpop.f32.mrf.mxu0  ;;  %4669 = vmatpush.bf16.msrb.mxu3 %v8540_v5  ;;  %v8028_v63 = vor.u32 %v9511_v6, %v8025_v3  ;;  %v9567_v9 = vld [vmem:[%s15135_s1 + $0xd54] sm:$0xf] }
 0x2cf   :  { %v4139_v55 = vadd.f32 %v4138_v31, %v4110_v37  ;;  %5196 = vst [vmem:[#allocation2 + $0x118] sm:$0xff] %v4224_v56  ;;  %v8249_v29 = vld [vmem:[%s15135_s1 + $0xd70] sm:$0xf0] }
 0x2d0   :  { %v4196_v11 = vpop.f32.mrf.mxu2  ;;  %4611 = vmatpush.bf16.msrb.mxu1 %v8028_v63  ;;  %v9439_v39 = vld [vmem:[%s15135_s1 + $0x954] sm:$0xf]  ;;  %v8252_v12 = vor.u32 %v9567_v9, %v8249_v29 }
 0x2d1   :  { %v4168_v19 = vadd.f32 %v4167_v10, %v4139_v55  ;;  %v4170_v22 = vpop.f32.mrf.mxu1  ;;  %4401 = vmatmul.bf16.gmra.mxu1 %v10767_v26  ;;  %v7737_v4 = vld [vmem:[%s15135_s1 + $0x970] sm:$0xf0] }
 0x2d2   :  { %4430 = vmatmul.bf16.gmra.mxu2 %v10769_v27  ;;  %v9631_v51 = vld [vmem:[%s15135_s1 + $0xf54] sm:$0xf]  ;;  %v7740_v37 = vor.u32 %v9439_v39, %v7737_v4 }
 0x2d3   :  { %v4197_v41 = vadd.f32 %v4196_v11, %v4168_v19  ;;  %v4225_v8 = vpop.f32.mrf.mxu3  ;;  %v8505_v30 = vld [vmem:[%s15135_s1 + $0xf70] sm:$0xf0]  ;;  %4641 = vmatpush.bf16.msrb.mxu2 %v8252_v12 }
 0x2d4   :  { %v8508_v2 = vor.u32 %v9631_v51, %v8505_v30  ;;  %4583 = vmatpush.bf16.msrb.mxu0 %v7740_v37  ;;  %v9503_v44 = vld [vmem:[%s15135_s1 + $0xb54] sm:$0xf] }
 0x2d5   :  { %v4226_v7 = vadd.f32 %v4225_v8, %v4197_v41  ;;  %v7993_v18 = vld [vmem:[%s15135_s1 + $0xb70] sm:$0xf0] }
 0x2d6   :  { %v4141_v14 = vpop.f32.mrf.mxu0  ;;  %4670 = vmatpush.bf16.msrb.mxu3 %v8508_v2  ;;  %v7996_v42 = vor.u32 %v9503_v44, %v7993_v18  ;;  %v9559_v23 = vld [vmem:[%s15135_s1 + $0xd14] sm:$0xf] }
 0x2d7   :  { %v4142_v1 = vadd.f32 %v4141_v14, %v4113_v24  ;;  %5204 = vst [vmem:[#allocation2 + $0x158] sm:$0xff] %v4226_v7  ;;  %v8217_v59 = vld [vmem:[%s15135_s1 + $0xd30] sm:$0xf0] }
 0x2d8   :  { %4459 = vmatmul.bf16.gmra.mxu3 %v10771_v28  ;;  %v4199_v38 = vpop.f32.mrf.mxu2  ;;  %v9431_v52 = vld [vmem:[%s15135_s1 + $0x914] sm:$0xf]  ;;  %v8220_v58 = vor.u32 %v9559_v23, %v8217_v59  ;;  %4612 = vmatpush.bf16.msrb.mxu1 %v7996_v42 }
 0x2d9   :  { %4372 = vmatmul.bf16.gmra.mxu0 %v10765_v25  ;;  %v4171_v15 = vadd.f32 %v4170_v22, %v4142_v1  ;;  %v4172_v56 = vpop.f32.mrf.mxu1  ;;  %v7705_v50 = vld [vmem:[%s15135_s1 + $0x930] sm:$0xf0] }
 0x2da   :  { %v9623_v60 = vld [vmem:[%s15135_s1 + $0xf14] sm:$0xf]  ;;  %v7708_v62 = vor.u32 %v9431_v52, %v7705_v50  ;;  %4642 = vmatpush.bf16.msrb.mxu2 %v8220_v58 }
 0x2db   :  { %v4200_v43 = vadd.f32 %v4199_v38, %v4171_v15  ;;  %v4228_v31 = vpop.f32.mrf.mxu3  ;;  %v8473_v0 = vld [vmem:[%s15135_s1 + $0xf30] sm:$0xf0] }
 0x2dc   :  { %v8476_v61 = vor.u32 %v9623_v60, %v8473_v0  ;;  %4584 = vmatpush.bf16.msrb.mxu0 %v7708_v62  ;;  %v9495_v14 = vld [vmem:[%s15135_s1 + $0xb14] sm:$0xf]  ;;  %v15240_v62 = vld [vmem:[#allocation8_spill] sm:$0xff] }
 0x2dd   :  { %v4229_v55 = vadd.f32 %v4228_v31, %v4200_v43  ;;  %v7961_v22 = vld [vmem:[%s15135_s1 + $0xb30] sm:$0xf0] }
 0x2de   :  { %v4143_v10 = vpop.f32.mrf.mxu0  ;;  %4671 = vmatpush.bf16.msrb.mxu3 %v8476_v61  ;;  %v7964_v16 = vor.u32 %v9495_v14, %v7961_v22  ;;  %v9551_v7 = vld [vmem:[%s15135_s1 + $0xcd4] sm:$0xf] }
 0x2df   :  { %v4144_v13 = vadd.f32 %v4143_v10, %v4115_v17  ;;  %5212 = vst [vmem:[#allocation2 + $0x198] sm:$0xff] %v4229_v55  ;;  %v8185_v1 = vld [vmem:[%s15135_s1 + $0xcf0] sm:$0xf0] }
 0x2e0   :  { %v4201_v19 = vpop.f32.mrf.mxu2  ;;  %4613 = vmatpush.bf16.msrb.mxu1 %v7964_v16  ;;  %v9423_v6 = vld [vmem:[%s15135_s1 + $0x8d4] sm:$0xf]  ;;  %v8188_v3 = vor.u32 %v9551_v7, %v8185_v1 }
 0x2e1   :  { %v4173_v36 = vadd.f32 %v4172_v56, %v4144_v13  ;;  %v12929_v41 = vpop.f32.mrf.mxu1  ;;  %4502 = vmatmul.bf16.vlgmr.msra.gmra.mxu1 %v10119_v53  ;;  %v7673_v63 = vld [vmem:[%s15135_s1 + $0x8f0] sm:$0xf0] }
 0x2e2   :  { %4531 = vmatmul.bf16.vlgmr.msra.gmra.mxu2 %v10121_v54  ;;  %v9615_v21 = vld [vmem:[%s15135_s1 + $0xed4] sm:$0xf]  ;;  %v7676_v39 = vor.u32 %v9423_v6, %v7673_v63 }
 0x2e3   :  { %v4202_v5 = vadd.f32 %v4201_v19, %v4173_v36  ;;  %v4230_v11 = vpop.f32.mrf.mxu3  ;;  %v8441_v9 = vld [vmem:[%s15135_s1 + $0xef0] sm:$0xf0]  ;;  %4643 = vmatpush.bf16.msrb.mxu2 %v8188_v3 }
 0x2e4   :  { %v8444_v15 = vor.u32 %v9615_v21, %v8441_v9  ;;  %4585 = vmatpush.bf16.msrb.mxu0 %v7676_v39  ;;  %v9487_v30 = vld [vmem:[%s15135_s1 + $0xad4] sm:$0xf] }
 0x2e5   :  { %v4231_v8 = vadd.f32 %v4230_v11, %v4202_v5  ;;  %v7929_v38 = vld [vmem:[%s15135_s1 + $0xaf0] sm:$0xf0] }
 0x2e6   :  { %v12927_v24 = vpop.f32.mrf.mxu0  ;;  %4672 = vmatpush.bf16.msrb.mxu3 %v8444_v15  ;;  %v7932_v37 = vor.u32 %v9487_v30, %v7929_v38  ;;  %v9543_v2 = vld [vmem:[%s15135_s1 + $0xc94] sm:$0xf] }
 0x2e7   :  { %5220 = vst [vmem:[#allocation2 + $0x1d8] sm:$0xff] %v4231_v8  ;;  %v8153_v17 = vld [vmem:[%s15135_s1 + $0xcb0] sm:$0xf0] }
 0x2e8   :  { %4560 = vmatmul.bf16.vlgmr.msra.gmra.mxu3 %v10129_v57  ;;  %v12959_v29 = vpop.f32.mrf.mxu2  ;;  %v9415_v43 = vld [vmem:[%s15135_s1 + $0x894] sm:$0xf]  ;;  %v8156_v31 = vor.u32 %v9543_v2, %v8153_v17  ;;  %4614 = vmatpush.bf16.msrb.mxu1 %v7932_v37 }
 0x2e9   :  { %4473 = vmatmul.bf16.vlgmr.msra.gmra.mxu0 %v10108_v48  ;;  %v12965_v51 = vpop.f32.mrf.mxu1  ;;  %v7641_v10 = vld [vmem:[%s15135_s1 + $0x8b0] sm:$0xf0] }
 0x2ea   :  { %v9607_v56 = vld [vmem:[%s15135_s1 + $0xe94] sm:$0xf]  ;;  %v7644_v13 = vor.u32 %v9415_v43, %v7641_v10  ;;  %4644 = vmatpush.bf16.msrb.mxu2 %v8156_v31 }
 0x2eb   :  { %v12961_v12 = vpop.f32.mrf.mxu3  ;;  %v8409_v55 = vld [vmem:[%s15135_s1 + $0xeb0] sm:$0xf0] }
 0x2ec   :  { %v8412_v44 = vor.u32 %v9607_v56, %v8409_v55  ;;  %4586 = vmatpush.bf16.msrb.mxu0 %v7644_v13  ;;  %v9479_v52 = vld [vmem:[%s15135_s1 + $0xa94] sm:$0xf] }
 0x2ed   :  { %v7897_v58 = vld [vmem:[%s15135_s1 + $0xab0] sm:$0xf0] }
 0x2ee   :  { %v12963_v4 = vpop.f32.mrf.mxu0  ;;  %4673 = vmatpush.bf16.msrb.mxu3 %v8412_v44  ;;  %v7900_v50 = vor.u32 %v9479_v52, %v7897_v58  ;;  %v15239_v60 = vld [vmem:[#allocation7_spill] sm:$0xff]  ;;  %v15241_v58 = vld [vmem:[#allocation9_spill] sm:$0xff] }
 0x2ef   :  { %v9535_v0 = vld [vmem:[%s15135_s1 + $0xc54] sm:$0xf] }
 0x2f0   :  { %v12991_v18 = vpop.f32.mrf.mxu2  ;;  %4615 = vmatpush.bf16.msrb.mxu1 %v7900_v50  ;;  %v8121_v36 = vld [vmem:[%s15135_s1 + $0xc70] sm:$0xf0]  ;;  %v15242_v50 = vld [vmem:[#allocation10_spill] sm:$0xff] }
 0x2f1   :  { %v12997_v59 = vpop.f32.mrf.mxu1  ;;  %4507 = vmatmul.bf16.gmra.mxu1 %v15195_v40  ;;  %v9407_v61 = vld [vmem:[%s15135_s1 + $0x854] sm:$0xf]  ;;  %v8124_v19 = vor.u32 %v9535_v0, %v8121_v36  ;;  %v15244_v36 = vld [vmem:[#allocation12_spill] sm:$0xff] }
 0x2f2   :  { %4536 = vmatmul.bf16.gmra.mxu2 %v15239_v60  ;;  %v7609_v5 = vld [vmem:[%s15135_s1 + $0x870] sm:$0xf0] }
 0x2f3   :  { %v12993_v42 = vpop.f32.mrf.mxu3  ;;  %v9599_v11 = vld [vmem:[%s15135_s1 + $0xe54] sm:$0xf]  ;;  %v7612_v22 = vor.u32 %v9407_v61, %v7609_v5  ;;  %4645 = vmatpush.bf16.msrb.mxu2 %v8124_v19  ;;  %v7295_v61 = vld [vmem:[%s15135_s1 + $0x5d8] sm:$0xf] }
 0x2f4   :  { %v8377_v8 = vld [vmem:[%s15135_s1 + $0xe70] sm:$0xf0]  ;;  %v9332_v19 = vld [vmem:[%s15135_s1 + $0x5f4] sm:$0xf0] }
 0x2f5   :  { %v8380_v16 = vor.u32 %v9599_v11, %v8377_v8  ;;  %4587 = vmatpush.bf16.msrb.mxu0 %v7612_v22  ;;  %v9471_v3 = vld [vmem:[%s15135_s1 + $0xa54] sm:$0xf]  ;;  %v6783_v5 = vld [vmem:[%s15135_s1 + $0x1d8] sm:$0xf]  ;;  %v7296_v11 = vor.u32 %v9332_v19, %v7295_v61 }
 0x2f6   :  { %v12995_v23 = vpop.f32.mrf.mxu0  ;;  %v7865_v63 = vld [vmem:[%s15135_s1 + $0xa70] sm:$0xf0]  ;;  %v9204_v8 = vld [vmem:[%s15135_s1 + $0x1f4] sm:$0xf0] }
 0x2f7   :  { %4674 = vmatpush.bf16.msrb.mxu3 %v8380_v16  ;;  %v7868_v21 = vor.u32 %v9471_v3, %v7865_v63  ;;  %v9527_v9 = vld [vmem:[%s15135_s1 + $0xc14] sm:$0xf]  ;;  %v7551_v22 = vld [vmem:[%s15135_s1 + $0x7d8] sm:$0xf]  ;;  %v6784_v63 = vor.u32 %v9204_v8, %v6783_v5  ;;  %v13132_v8 = vld [vmem:[%s15139_s3] sm:$0xff] }
 0x2f8   :  { %4565 = vmatmul.bf16.gmra.mxu3 %v15240_v62  ;;  %v13027_v14 = vpop.f32.mrf.mxu2  ;;  %v8089_v39 = vld [vmem:[%s15135_s1 + $0xc30] sm:$0xf0]  ;;  %v9396_v16 = vld [vmem:[%s15135_s1 + $0x7f4] sm:$0xf0]  ;;  %15245 = vst [vmem:[#allocation6_spill] sm:$0xff] %v13132_v8 }
 0x2f9   :  { %4478 = vmatmul.bf16.gmra.mxu0 %v15194_v20  ;;  %v13033_v6 = vpop.f32.mrf.mxu1  ;;  %v9399_v15 = vld [vmem:[%s15135_s1 + $0x814] sm:$0xf]  ;;  %v8092_v30 = vor.u32 %v9527_v9, %v8089_v39  ;;  %4616 = vmatpush.bf16.msrb.mxu1 %v7868_v21  ;;  %v7552_v21 = vor.u32 %v9396_v16, %v7551_v22  ;;  %v7519_v61 = vld [vmem:[%s15135_s1 + $0x798] sm:$0xf]  ;;  %v13135_v22 = vperm.slane %v13132_v8, 4 }
 0x2fa   :  { %v7577_v38 = vld [vmem:[%s15135_s1 + $0x830] sm:$0xf0]  ;;  %v9388_v19 = vld [vmem:[%s15135_s1 + $0x7b4] sm:$0xf0] }
 0x2fb   :  { %v13029_v7 = vpop.f32.mrf.mxu3  ;;  %v9591_v37 = vld [vmem:[%s15135_s1 + $0xe14] sm:$0xf]  ;;  %v7580_v17 = vor.u32 %v9399_v15, %v7577_v38  ;;  %4646 = vmatpush.bf16.msrb.mxu2 %v8092_v30  ;;  %v7039_v30 = vld [vmem:[%s15135_s1 + $0x3d8] sm:$0xf] }
 0x2fc   :  { %v8345_v2 = vld [vmem:[%s15135_s1 + $0xe30] sm:$0xf0]  ;;  %v9268_v38 = vld [vmem:[%s15135_s1 + $0x3f4] sm:$0xf0] }
 0x2fd   :  { %v8348_v43 = vor.u32 %v9591_v37, %v8345_v2  ;;  %4588 = vmatpush.bf16.msrb.mxu0 %v7580_v17  ;;  %v9463_v10 = vld [vmem:[%s15135_s1 + $0xa14] sm:$0xf]  ;;  %v7263_v37 = vld [vmem:[%s15135_s1 + $0x598] sm:$0xf]  ;;  %v7040_v2 = vor.u32 %v9268_v38, %v7039_v30  ;;  %v15246_v30 = vld [vmem:[#allocation13_spill] sm:$0xff]  ;;  %v4243_v38 = vadd.f32 %v12927_v24, %v13135_v22 }
 0x2fe   :  { %v13031_v1 = vpop.f32.mrf.mxu0  ;;  %v7833_v56 = vld [vmem:[%s15135_s1 + $0xa30] sm:$0xf0]  ;;  %v9324_v17 = vld [vmem:[%s15135_s1 + $0x5b4] sm:$0xf0] }
 0x2ff   :  { %4675 = vmatpush.bf16.msrb.mxu3 %v8348_v43  ;;  %v7836_v44 = vor.u32 %v9463_v10, %v7833_v56  ;;  %v15243_v0 = vld [vmem:[#allocation11_spill] sm:$0xff]  ;;  %4755 = vmatpush.bf16.msra.mxu2 %v7296_v11  ;;  %v6751_v43 = vld [vmem:[%s15135_s1 + $0x198] sm:$0xf]  ;;  %v7264_v56 = vor.u32 %v9324_v17, %v7263_v37  ;;  %v7520_v11 = vor.u32 %v9388_v19, %v7519_v61  ;;  %v15247_v37 = vld [vmem:[#allocation14_spill] sm:$0xff] }
 0x300   :  { %v13059_v31 = vpop.f32.mrf.mxu2  ;;  %v9196_v10 = vld [vmem:[%s15135_s1 + $0x1b4] sm:$0xf0] }
 0x301   :  { %v13071_v52 = vpop.f32.mrf.mxu1  ;;  %4617 = vmatpush.bf16.msrb.mxu1 %v7836_v44  ;;  %4697 = vmatpush.bf16.msra.mxu0 %v6784_v63  ;;  %v6752_v44 = vor.u32 %v9196_v10, %v6751_v43  ;;  %v7007_v17 = vld [vmem:[%s15135_s1 + $0x398] sm:$0xf] }
 0x302   :  { %4512 = vmatmul.bf16.gmra.mxu1 %v15242_v50  ;;  %4541 = vmatmul.bf16.gmra.mxu2 %v15243_v0  ;;  %v9260_v43 = vld [vmem:[%s15135_s1 + $0x3b4] sm:$0xf0] }
 0x303   :  { %v13067_v55 = vpop.f32.mrf.mxu3  ;;  %4784 = vmatpush.bf16.msra.mxu3 %v7552_v21  ;;  %4756 = vmatpush.bf16.msra.mxu2 %v7264_v56  ;;  %v15249_v10 = vld [vmem:[#allocation16_spill] sm:$0xff]  ;;  %v7008_v56 = vor.u32 %v9260_v43, %v7007_v17 }
 0x304   :  { %v9316_v24 = vld [vmem:[%s15135_s1 + $0x574] sm:$0xf0] }
 0x305   :  { %4726 = vmatpush.bf16.msra.mxu1 %v7040_v2  ;;  %4698 = vmatpush.bf16.msra.mxu0 %v6752_v44  ;;  %v15248_v2 = vld [vmem:[#allocation15_spill] sm:$0xff]  ;;  %v7231_v44 = vld [vmem:[%s15135_s1 + $0x558] sm:$0xf] }
 0x306   :  { %v13069_v13 = vpop.f32.mrf.mxu0  ;;  %v6719_v61 = vld [vmem:[%s15135_s1 + $0x158] sm:$0xf]  ;;  %v7232_v19 = vor.u32 %v9316_v24, %v7231_v44 }
 0x307   :  { %4785 = vmatpush.bf16.msra.mxu3 %v7520_v11  ;;  %v9188_v11 = vld [vmem:[%s15135_s1 + $0x174] sm:$0xf0] }
 0x308   :  { %4570 = vmatmul.bf16.gmra.mxu3 %v15244_v36  ;;  %v13095_v3 = vpop.f32.mrf.mxu2  ;;  %v7487_v17 = vld [vmem:[%s15135_s1 + $0x758] sm:$0xf]  ;;  %4757 = vmatpush.bf16.msra.mxu2 %v7232_v19 }
 0x309   :  { %4483 = vmatmul.bf16.gmra.mxu0 %v15241_v58  ;;  %v13101_v15 = vpop.f32.mrf.mxu1  ;;  %v9380_v43 = vld [vmem:[%s15135_s1 + $0x774] sm:$0xf0]  ;;  %4727 = vmatpush.bf16.msra.mxu1 %v7008_v56 }
 0x30a   :  { %v6975_v0 = vld [vmem:[%s15135_s1 + $0x358] sm:$0xf] }
 0x30b   :  { %v13097_v9 = vpop.f32.mrf.mxu3  ;;  %v9252_v56 = vld [vmem:[%s15135_s1 + $0x374] sm:$0xf0] }
 0x30e   :  { %v13099_v39 = vpop.f32.mrf.mxu0 }
 0x310   :  { %v13127_v5 = vpop.f32.mrf.mxu2 }
 0x311   :  { %v13141_v21 = vpop.f32.mrf.mxu1 }
 0x312   :  { %4517 = vmatmul.bf16.gmra.mxu1 %v15247_v37  ;;  %4546 = vmatmul.bf16.gmra.mxu2 %v15248_v2  ;;  %v6720_v2 = vor.u32 %v9188_v11, %v6719_v61  ;;  %v7488_v37 = vor.u32 %v9380_v43, %v7487_v17  ;;  %v9372_v11 = vld [vmem:[%s15135_s1 + $0x734] sm:$0xf0] }
 0x313   :  { %v13137_v16 = vpop.f32.mrf.mxu3 }
 0x314   :  { %4699 = vmatpush.bf16.msra.mxu0 %v6720_v2  ;;  %4786 = vmatpush.bf16.msra.mxu3 %v7488_v37  ;;  %v9308_v2 = vld [vmem:[%s15135_s1 + $0x534] sm:$0xf0]  ;;  %v4245_v37 = vadd.f32 %v12963_v4, %v13135_v22 }
 0x316   :  { %v13139_v63 = vpop.f32.mrf.mxu0 }
 0x318   :  { %4575 = vmatmul.bf16.gmra.mxu3 %v15249_v10  ;;  %v13173_v10 = vpop.f32.mrf.mxu2 }
 0x319   :  { %4488 = vmatmul.bf16.gmra.mxu0 %v15246_v30  ;;  %v4272_v30 = vadd.f32 %v12929_v41, %v4243_v38  ;;  %v13180_v8 = vpop.f32.mrf.mxu1  ;;  %v7199_v41 = vld [vmem:[%s15135_s1 + $0x518] sm:$0xf]  ;;  %v6976_v38 = vor.u32 %v9252_v56, %v6975_v0 }
 0x31a   :  { %v7200_v61 = vor.u32 %v9308_v2, %v7199_v41  ;;  %v7455_v0 = vld [vmem:[%s15135_s1 + $0x718] sm:$0xf]  ;;  %v4274_v41 = vadd.f32 %v12965_v51, %v4245_v37 }
 0x31b   :  { %v13176_v44 = vpop.f32.mrf.mxu3  ;;  %v4301_v36 = vadd.f32 %v12959_v29, %v4272_v30  ;;  %v6687_v29 = vld [vmem:[%s15135_s1 + $0x118] sm:$0xf]  ;;  %4728 = vmatpush.bf16.msra.mxu1 %v6976_v38  ;;  %v7456_v43 = vor.u32 %v9372_v11, %v7455_v0  ;;  %v4248_v38 = vadd.f32 %v12995_v23, %v13135_v22  ;;  %v15251_v0 = vld [vmem:[#allocation18_spill] sm:$0xff] }
 0x31c   :  { %v9180_v30 = vld [vmem:[%s15135_s1 + $0x134] sm:$0xf0]  ;;  %4758 = vmatpush.bf16.msra.mxu2 %v7200_v61 }
 0x31d   :  { %v6688_v19 = vor.u32 %v9180_v30, %v6687_v29  ;;  %v4330_v56 = vadd.f32 %v12961_v12, %v4301_v36  ;;  %4787 = vmatpush.bf16.msra.mxu3 %v7456_v43  ;;  %v15250_v29 = vld [vmem:[#allocation17_spill] sm:$0xff]  ;;  %v4303_v30 = vadd.f32 %v12991_v18, %v4274_v41  ;;  %v15252_v12 = vld [vmem:[#allocation19_spill] sm:$0xff]  ;;  %v6943_v36 = vld [vmem:[%s15135_s1 + $0x318] sm:$0xf] }
 0x31e   :  { %v13178_v24 = vpop.f32.mrf.mxu0  ;;  %v9244_v51 = vld [vmem:[%s15135_s1 + $0x334] sm:$0xf0] }
 0x31f   :  { %4700 = vmatpush.bf16.msra.mxu0 %v6688_v19  ;;  %v6944_v37 = vor.u32 %v9244_v51, %v6943_v36  ;;  %v7167_v18 = vld [vmem:[%s15135_s1 + $0x4d8] sm:$0xf] }
 0x320   :  { %v13209_v17 = vpop.f32.mrf.mxu2  ;;  %v9300_v23 = vld [vmem:[%s15135_s1 + $0x4f4] sm:$0xf0] }
 0x321   :  { %v4387_v4 = vpop.f32.mrf.mxu1  ;;  %v6655_v61 = vld [vmem:[%s15135_s1 + $0xd8] sm:$0xf]  ;;  %v7168_v11 = vor.u32 %v9300_v23, %v7167_v18  ;;  %4729 = vmatpush.bf16.msra.mxu1 %v6944_v37 }
 0x322   :  { %4618 = vmatmul.bf16.vlgmr.msrb.gmra.mxu1 %v15251_v0  ;;  %4647 = vmatmul.bf16.vlgmr.msrb.gmra.mxu2 %v15252_v12  ;;  %v9172_v43 = vld [vmem:[%s15135_s1 + $0xf4] sm:$0xf0]  ;;  %v4332_v12 = vadd.f32 %v12993_v42, %v4303_v30 }
 0x323   :  { %v13212_v50 = vpop.f32.mrf.mxu3  ;;  %v9364_v41 = vld [vmem:[%s15135_s1 + $0x6f4] sm:$0xf0]  ;;  %v6656_v51 = vor.u32 %v9172_v43, %v6655_v61  ;;  %4759 = vmatpush.bf16.msra.mxu2 %v7168_v11 }
 0x324   :  { %v6911_v37 = vld [vmem:[%s15135_s1 + $0x2d8] sm:$0xf] }
 0x325   :  { %4701 = vmatpush.bf16.msra.mxu0 %v6656_v51  ;;  %v9236_v42 = vld [vmem:[%s15135_s1 + $0x2f4] sm:$0xf0] }
 0x326   :  { %v4358_v58 = vpop.f32.mrf.mxu0  ;;  %v7135_v30 = vld [vmem:[%s15135_s1 + $0x498] sm:$0xf] }
 0x327   :  { %v4359_v2 = vadd.f32 %v4358_v58, %v4330_v56  ;;  %v15253_v58 = vld [vmem:[#allocation20_spill] sm:$0xff] }
 0x328   :  { %4676 = vmatmul.bf16.vlgmr.msrb.gmra.mxu3 %v15253_v58  ;;  %v7423_v56 = vld [vmem:[%s15135_s1 + $0x6d8] sm:$0xf]  ;;  %v4416_v36 = vpop.f32.mrf.mxu2 }
 0x329   :  { %4589 = vmatmul.bf16.vlgmr.msrb.gmra.mxu0 %v15250_v29  ;;  %v4388_v19 = vadd.f32 %v4387_v4, %v4359_v2  ;;  %v7424_v58 = vor.u32 %v9364_v41, %v7423_v56  ;;  %v4277_v4 = vadd.f32 %v12997_v59, %v4248_v38  ;;  %v4389_v0 = vpop.f32.mrf.mxu1  ;;  %v6912_v59 = vor.u32 %v9236_v42, %v6911_v37  ;;  %v9292_v38 = vld [vmem:[%s15135_s1 + $0x4b4] sm:$0xf0] }
 0x32a   :  { %v9164_v61 = vld [vmem:[%s15135_s1 + $0xb4] sm:$0xf0]  ;;  %v4253_v37 = vadd.f32 %v13069_v13, %v13135_v22 }
 0x32b   :  { %v4417_v2 = vadd.f32 %v4416_v36, %v4388_v19  ;;  %v4445_v18 = vpop.f32.mrf.mxu3  ;;  %4788 = vmatpush.bf16.msra.mxu3 %v7424_v58  ;;  %v4306_v60 = vadd.f32 %v13027_v14, %v4277_v4  ;;  %v6623_v14 = vld [vmem:[%s15135_s1 + $0x98] sm:$0xf]  ;;  %v7136_v58 = vor.u32 %v9292_v38, %v7135_v30  ;;  %4730 = vmatpush.bf16.msra.mxu1 %v6912_v59 }
 0x32c   :  { %v7391_v19 = vld [vmem:[%s15135_s1 + $0x698] sm:$0xf]  ;;  %v6624_v56 = vor.u32 %v9164_v61, %v6623_v14 }
 0x32d   :  { %v4446_v29 = vadd.f32 %v4445_v18, %v4417_v2  ;;  %v9356_v11 = vld [vmem:[%s15135_s1 + $0x6b4] sm:$0xf0]  ;;  %4760 = vmatpush.bf16.msra.mxu2 %v7136_v58 }
 0x32e   :  { %v4360_v23 = vpop.f32.mrf.mxu0  ;;  %v7392_v41 = vor.u32 %v9356_v11, %v7391_v19  ;;  %4702 = vmatpush.bf16.msra.mxu0 %v6624_v56  ;;  %v9284_v13 = vld [vmem:[%s15135_s1 + $0x474] sm:$0xf0]  ;;  %v4282_v11 = vadd.f32 %v13071_v52, %v4253_v37 }
 0x32f   :  { %v4361_v62 = vadd.f32 %v4360_v23, %v4332_v12  ;;  %5165 = vst [vmem:[#allocation2 + $0x20] sm:$0xff] %v4446_v29  ;;  %v4250_v29 = vadd.f32 %v13031_v1, %v13135_v22  ;;  %v4335_v1 = vadd.f32 %v13029_v7, %v4306_v60  ;;  %v6879_v60 = vld [vmem:[%s15135_s1 + $0x298] sm:$0xf] }
 0x330   :  { %v4418_v43 = vpop.f32.mrf.mxu2  ;;  %4789 = vmatpush.bf16.msra.mxu3 %v7392_v41  ;;  %v9228_v7 = vld [vmem:[%s15135_s1 + $0x2b4] sm:$0xf0] }
 0x331   :  { %v4390_v12 = vadd.f32 %v4389_v0, %v4361_v62  ;;  %v4392_v51 = vpop.f32.mrf.mxu1  ;;  %v4279_v4 = vadd.f32 %v13033_v6, %v4250_v29  ;;  %v6880_v6 = vor.u32 %v9228_v7, %v6879_v60  ;;  %v6591_v42 = vld [vmem:[%s15135_s1 + $0x58] sm:$0xf]  ;;  %v4255_v60 = vadd.f32 %v13099_v39, %v13135_v22 }
 0x332   :  { %4623 = vmatmul.bf16.gmra.mxu1 %v10605_v46  ;;  %4652 = vmatmul.bf16.gmra.mxu2 %v10607_v47  ;;  %v9156_v38 = vld [vmem:[%s15135_s1 + $0x74] sm:$0xf0] }
 0x333   :  { %v4419_v62 = vadd.f32 %v4418_v43, %v4390_v12  ;;  %v4447_v0 = vpop.f32.mrf.mxu3  ;;  %v4308_v23 = vadd.f32 %v13059_v31, %v4279_v4  ;;  %v7103_v31 = vld [vmem:[%s15135_s1 + $0x458] sm:$0xf]  ;;  %4731 = vmatpush.bf16.msra.mxu1 %v6880_v6  ;;  %v6592_v58 = vor.u32 %v9156_v38, %v6591_v42 }
 0x334   :  { %v7104_v30 = vor.u32 %v9284_v13, %v7103_v31  ;;  %v7359_v14 = vld [vmem:[%s15135_s1 + $0x658] sm:$0xf] }
 0x335   :  { %v4448_v2 = vadd.f32 %v4447_v0, %v4419_v62  ;;  %v9348_v29 = vld [vmem:[%s15135_s1 + $0x674] sm:$0xf0]  ;;  %v4337_v19 = vadd.f32 %v13067_v55, %v4308_v23  ;;  %4703 = vmatpush.bf16.msra.mxu0 %v6592_v58  ;;  %v4311_v55 = vadd.f32 %v13095_v3, %v4282_v11 }
 0x336   :  { %v4363_v36 = vpop.f32.mrf.mxu0  ;;  %v7360_v61 = vor.u32 %v9348_v29, %v7359_v14  ;;  %4761 = vmatpush.bf16.msra.mxu2 %v7104_v30  ;;  %v7071_v4 = vld [vmem:[%s15135_s1 + $0x418] sm:$0xf] }
 0x337   :  { %v4364_v18 = vadd.f32 %v4363_v36, %v4335_v1  ;;  %5173 = vst [vmem:[#allocation2 + $0x60] sm:$0xff] %v4448_v2  ;;  %v6847_v36 = vld [vmem:[%s15135_s1 + $0x258] sm:$0xf]  ;;  %v4340_v39 = vadd.f32 %v13097_v9, %v4311_v55 }
 0x338   :  { %4681 = vmatmul.bf16.gmra.mxu3 %v10609_v49  ;;  %v4421_v12 = vpop.f32.mrf.mxu2  ;;  %v9276_v2 = vld [vmem:[%s15135_s1 + $0x434] sm:$0xf0] }
 0x339   :  { %4594 = vmatmul.bf16.gmra.mxu0 %v10603_v45  ;;  %v4393_v59 = vadd.f32 %v4392_v51, %v4364_v18  ;;  %v4394_v1 = vpop.f32.mrf.mxu1  ;;  %4790 = vmatpush.bf16.msra.mxu3 %v7360_v61  ;;  %v9220_v51 = vld [vmem:[%s15135_s1 + $0x274] sm:$0xf0]  ;;  %v7072_v18 = vor.u32 %v9276_v2, %v7071_v4  ;;  %v4284_v61 = vadd.f32 %v13101_v15, %v4255_v60 }
 0x33a   :  { %v6848_v52 = vor.u32 %v9220_v51, %v6847_v36  ;;  %v6559_v23 = vld [vmem:[%s15135_s1 + $0x18] sm:$0xf] }
 0x33b   :  { %v4422_v43 = vadd.f32 %v4421_v12, %v4393_v59  ;;  %v4450_v56 = vpop.f32.mrf.mxu3  ;;  %v9148_v37 = vld [vmem:[%s15135_s1 + $0x34] sm:$0xf0]  ;;  %4762 = vmatpush.bf16.msra.mxu2 %v7072_v18 }
 0x33c   :  { %v7327_v3 = vld [vmem:[%s15135_s1 + $0x618] sm:$0xf]  ;;  %4732 = vmatpush.bf16.msra.mxu1 %v6848_v52  ;;  %v6560_v6 = vor.u32 %v9148_v37, %v6559_v23 }
 0x33d   :  { %v4451_v62 = vadd.f32 %v4450_v56, %v4422_v43  ;;  %v9340_v31 = vld [vmem:[%s15135_s1 + $0x634] sm:$0xf0]  ;;  %v4313_v43 = vadd.f32 %v13127_v5, %v4284_v61  ;;  %v4258_v56 = vadd.f32 %v13139_v63, %v13135_v22 }
 0x33e   :  { %v4365_v41 = vpop.f32.mrf.mxu0  ;;  %v7328_v42 = vor.u32 %v9340_v31, %v7327_v3  ;;  %v6815_v59 = vld [vmem:[%s15135_s1 + $0x218] sm:$0xf]  ;;  %4704 = vmatpush.bf16.msra.mxu0 %v6560_v6 }
 0x33f   :  { %v4366_v0 = vadd.f32 %v4365_v41, %v4337_v19  ;;  %5181 = vst [vmem:[#allocation2 + $0xa0] sm:$0xff] %v4451_v62  ;;  %v9212_v30 = vld [vmem:[%s15135_s1 + $0x234] sm:$0xf0]  ;;  %v4342_v52 = vadd.f32 %v13137_v16, %v4313_v43  ;;  %v4287_v4 = vadd.f32 %v13141_v21, %v4258_v56 }
 0x340   :  { %v4423_v13 = vpop.f32.mrf.mxu2  ;;  %v6816_v12 = vor.u32 %v9212_v30, %v6815_v59  ;;  %4791 = vmatpush.bf16.msra.mxu3 %v7328_v42  ;;  %v8319_v9 = vld [vmem:[%s15135_s1 + $0xdd8] sm:$0xf] }
 0x341   :  { %v4395_v7 = vadd.f32 %v4394_v1, %v4366_v0  ;;  %v4397_v58 = vpop.f32.mrf.mxu1  ;;  %v9588_v15 = vld [vmem:[%s15135_s1 + $0xdf4] sm:$0xf0]  ;;  %v4316_v42 = vadd.f32 %v13173_v10, %v4287_v4 }
 0x342   :  { %4733 = vmatpush.bf16.msra.mxu1 %v6816_v12  ;;  %4657 = vmatmul.bf16.gmra.mxu2 %v10691_v34  ;;  %v7807_v5 = vld [vmem:[%s15135_s1 + $0x9d8] sm:$0xf]  ;;  %v8320_v41 = vor.u32 %v9588_v15, %v8319_v9 }
 0x343   :  { %v4424_v38 = vadd.f32 %v4423_v13, %v4395_v7  ;;  %v4452_v14 = vpop.f32.mrf.mxu3  ;;  %4628 = vmatmul.bf16.gmra.mxu1 %v10689_v33  ;;  %v9460_v1 = vld [vmem:[%s15135_s1 + $0x9f4] sm:$0xf0]  ;;  %v4345_v61 = vadd.f32 %v13176_v44, %v4316_v42 }
 0x344   :  { %v8575_v62 = vld [vmem:[%s15135_s1 + $0xfd8] sm:$0xf]  ;;  %v7808_v51 = vor.u32 %v9460_v1, %v7807_v5  ;;  %4871 = vmatpush.bf16.msrb.mxu2 %v8320_v41 }
 0x345   :  { %v4453_v19 = vadd.f32 %v4452_v14, %v4424_v38  ;;  %v9652_v0 = vld [vmem:[%s15135_s1 + $0xff4] sm:$0xf0] }
 0x346   :  { %v4368_v29 = vpop.f32.mrf.mxu0  ;;  %v8576_v55 = vor.u32 %v9652_v0, %v8575_v62  ;;  %4813 = vmatpush.bf16.msrb.mxu0 %v7808_v51  ;;  %v8063_v7 = vld [vmem:[%s15135_s1 + $0xbd8] sm:$0xf] }
 0x347   :  { %v4369_v11 = vadd.f32 %v4368_v29, %v4340_v39  ;;  %5189 = vst [vmem:[#allocation2 + $0xe0] sm:$0xff] %v4453_v19  ;;  %v9524_v6 = vld [vmem:[%s15135_s1 + $0xbf4] sm:$0xf0]  ;;  %v4260_v29 = vadd.f32 %v13178_v24, %v13135_v22 }
 0x348   :  { %4686 = vmatmul.bf16.gmra.mxu3 %v10693_v35  ;;  %v4426_v36 = vpop.f32.mrf.mxu2  ;;  %v8064_v16 = vor.u32 %v9524_v6, %v8063_v7  ;;  %v8287_v21 = vld [vmem:[%s15135_s1 + $0xd98] sm:$0xf] }
 0x349   :  { %4599 = vmatmul.bf16.gmra.mxu0 %v10687_v32  ;;  %v4398_v63 = vadd.f32 %v4397_v58, %v4369_v11  ;;  %v4399_v37 = vpop.f32.mrf.mxu1  ;;  %4900 = vmatpush.bf16.msrb.mxu3 %v8576_v55  ;;  %v9580_v31 = vld [vmem:[%s15135_s1 + $0xdb4] sm:$0xf0]  ;;  %v4289_v9 = vadd.f32 %v13180_v8, %v4260_v29 }
 0x34a   :  { %v7775_v13 = vld [vmem:[%s15135_s1 + $0x998] sm:$0xf]  ;;  %v8288_v59 = vor.u32 %v9580_v31, %v8287_v21  ;;  %4842 = vmatpush.bf16.msrb.mxu1 %v8064_v16 }
 0x34b   :  { %v4427_v2 = vadd.f32 %v4426_v36, %v4398_v63  ;;  %v4455_v18 = vpop.f32.mrf.mxu3  ;;  %v9452_v30 = vld [vmem:[%s15135_s1 + $0x9b4] sm:$0xf0]  ;;  %v4318_v63 = vadd.f32 %v13209_v17, %v4289_v9 }
 0x34c   :  { %v8543_v39 = vld [vmem:[%s15135_s1 + $0xf98] sm:$0xf]  ;;  %v7776_v38 = vor.u32 %v9452_v30, %v7775_v13  ;;  %4872 = vmatpush.bf16.msrb.mxu2 %v8288_v59 }
 0x34d   :  { %v4456_v3 = vadd.f32 %v4455_v18, %v4427_v2  ;;  %v9644_v14 = vld [vmem:[%s15135_s1 + $0xfb4] sm:$0xf0]  ;;  %v4347_v2 = vadd.f32 %v13212_v50, %v4318_v63 }
 0x34e   :  { %v4370_v23 = vpop.f32.mrf.mxu0  ;;  %v8544_v12 = vor.u32 %v9644_v14, %v8543_v39  ;;  %4814 = vmatpush.bf16.msrb.mxu0 %v7776_v38  ;;  %v8031_v22 = vld [vmem:[%s15135_s1 + $0xb98] sm:$0xf] }
 0x34f   :  { %v4371_v60 = vadd.f32 %v4370_v23, %v4342_v52  ;;  %5197 = vst [vmem:[#allocation2 + $0x120] sm:$0xff] %v4456_v3  ;;  %v9516_v24 = vld [vmem:[%s15135_s1 + $0xbb4] sm:$0xf0] }
 0x350   :  { %v4428_v58 = vpop.f32.mrf.mxu2  ;;  %4901 = vmatpush.bf16.msrb.mxu3 %v8544_v12  ;;  %v8032_v44 = vor.u32 %v9516_v24, %v8031_v22  ;;  %v8255_v8 = vld [vmem:[%s15135_s1 + $0xd58] sm:$0xf] }
 0x351   :  { %v4400_v10 = vadd.f32 %v4399_v37, %v4371_v60  ;;  %v4402_v56 = vpop.f32.mrf.mxu1  ;;  %v9572_v41 = vld [vmem:[%s15135_s1 + $0xd74] sm:$0xf0] }
 0x352   :  { %4662 = vmatmul.bf16.gmra.mxu2 %v10769_v27  ;;  %4843 = vmatpush.bf16.msrb.mxu1 %v8032_v44  ;;  %v7743_v17 = vld [vmem:[%s15135_s1 + $0x958] sm:$0xf]  ;;  %v8256_v62 = vor.u32 %v9572_v41, %v8255_v8 }
 0x353   :  { %v4429_v19 = vadd.f32 %v4428_v58, %v4400_v10  ;;  %v4457_v11 = vpop.f32.mrf.mxu3  ;;  %4633 = vmatmul.bf16.gmra.mxu1 %v10767_v26  ;;  %v9444_v0 = vld [vmem:[%s15135_s1 + $0x974] sm:$0xf0] }
 0x354   :  { %v8511_v36 = vld [vmem:[%s15135_s1 + $0xf58] sm:$0xf]  ;;  %v7744_v52 = vor.u32 %v9444_v0, %v7743_v17  ;;  %4873 = vmatpush.bf16.msrb.mxu2 %v8256_v62 }
 0x355   :  { %v4458_v15 = vadd.f32 %v4457_v11, %v4429_v19  ;;  %v9636_v51 = vld [vmem:[%s15135_s1 + $0xf74] sm:$0xf0] }
 0x356   :  { %v4373_v43 = vpop.f32.mrf.mxu0  ;;  %v8512_v4 = vor.u32 %v9636_v51, %v8511_v36  ;;  %4815 = vmatpush.bf16.msrb.mxu0 %v7744_v52  ;;  %v7999_v6 = vld [vmem:[%s15135_s1 + $0xb58] sm:$0xf] }
 0x357   :  { %v4374_v5 = vadd.f32 %v4373_v43, %v4345_v61  ;;  %5205 = vst [vmem:[#allocation2 + $0x160] sm:$0xff] %v4458_v15  ;;  %v9508_v16 = vld [vmem:[%s15135_s1 + $0xb74] sm:$0xf0] }
 0x358   :  { %4691 = vmatmul.bf16.gmra.mxu3 %v10771_v28  ;;  %v4431_v55 = vpop.f32.mrf.mxu2  ;;  %v8000_v21 = vor.u32 %v9508_v16, %v7999_v6  ;;  %v8223_v50 = vld [vmem:[%s15135_s1 + $0xd18] sm:$0xf] }
 0x359   :  { %4604 = vmatmul.bf16.gmra.mxu0 %v10765_v25  ;;  %v4403_v1 = vadd.f32 %v4402_v56, %v4374_v5  ;;  %v4404_v3 = vpop.f32.mrf.mxu1  ;;  %4902 = vmatpush.bf16.msrb.mxu3 %v8512_v4  ;;  %v9564_v31 = vld [vmem:[%s15135_s1 + $0xd34] sm:$0xf0] }
 0x35a   :  { %v7711_v13 = vld [vmem:[%s15135_s1 + $0x918] sm:$0xf]  ;;  %v8224_v42 = vor.u32 %v9564_v31, %v8223_v50  ;;  %4844 = vmatpush.bf16.msrb.mxu1 %v8000_v21 }
 0x35b   :  { %v4432_v18 = vadd.f32 %v4431_v55, %v4403_v1  ;;  %v4460_v23 = vpop.f32.mrf.mxu3  ;;  %v9436_v59 = vld [vmem:[%s15135_s1 + $0x934] sm:$0xf0] }
 0x35c   :  { %v8479_v30 = vld [vmem:[%s15135_s1 + $0xf18] sm:$0xf]  ;;  %v7712_v39 = vor.u32 %v9436_v59, %v7711_v13  ;;  %4874 = vmatpush.bf16.msrb.mxu2 %v8224_v42 }
 0x35d   :  { %v4461_v60 = vadd.f32 %v4460_v23, %v4432_v18  ;;  %v9628_v38 = vld [vmem:[%s15135_s1 + $0xf34] sm:$0xf0] }
 0x35e   :  { %v4375_v37 = vpop.f32.mrf.mxu0  ;;  %v8480_v29 = vor.u32 %v9628_v38, %v8479_v30  ;;  %4816 = vmatpush.bf16.msrb.mxu0 %v7712_v39  ;;  %v7967_v43 = vld [vmem:[%s15135_s1 + $0xb18] sm:$0xf]  ;;  %v15254_v30 = vld [vmem:[#allocation7_spill] sm:$0xff] }
 0x35f   :  { %v4376_v7 = vadd.f32 %v4375_v37, %v4347_v2  ;;  %5213 = vst [vmem:[#allocation2 + $0x1a0] sm:$0xff] %v4461_v60  ;;  %v9500_v56 = vld [vmem:[%s15135_s1 + $0xb34] sm:$0xf0] }
 0x360   :  { %v4433_v10 = vpop.f32.mrf.mxu2  ;;  %4903 = vmatpush.bf16.msrb.mxu3 %v8480_v29  ;;  %v7968_v9 = vor.u32 %v9500_v56, %v7967_v43  ;;  %v8191_v15 = vld [vmem:[%s15135_s1 + $0xcd8] sm:$0xf] }
 0x361   :  { %v4405_v14 = vadd.f32 %v4404_v3, %v4376_v7  ;;  %v13457_v19 = vpop.f32.mrf.mxu1  ;;  %v9556_v5 = vld [vmem:[%s15135_s1 + $0xcf4] sm:$0xf0] }
 0x362   :  { %4763 = vmatmul.bf16.vlgmr.msra.gmra.mxu2 %v10121_v54  ;;  %4845 = vmatpush.bf16.msrb.mxu1 %v7968_v9  ;;  %v7679_v22 = vld [vmem:[%s15135_s1 + $0x8d8] sm:$0xf]  ;;  %v8192_v24 = vor.u32 %v9556_v5, %v8191_v15 }
 0x363   :  { %v4434_v12 = vadd.f32 %v4433_v10, %v4405_v14  ;;  %v4462_v58 = vpop.f32.mrf.mxu3  ;;  %4734 = vmatmul.bf16.vlgmr.msra.gmra.mxu1 %v10119_v53  ;;  %v9428_v44 = vld [vmem:[%s15135_s1 + $0x8f4] sm:$0xf0] }
 0x364   :  { %v8447_v63 = vld [vmem:[%s15135_s1 + $0xed8] sm:$0xf]  ;;  %v7680_v17 = vor.u32 %v9428_v44, %v7679_v22  ;;  %4875 = vmatpush.bf16.msrb.mxu2 %v8192_v24 }
 0x365   :  { %v4463_v11 = vadd.f32 %v4462_v58, %v4434_v12  ;;  %v9620_v8 = vld [vmem:[%s15135_s1 + $0xef4] sm:$0xf0] }
 0x366   :  { %v13455_v61 = vpop.f32.mrf.mxu0  ;;  %v8448_v1 = vor.u32 %v9620_v8, %v8447_v63  ;;  %4817 = vmatpush.bf16.msrb.mxu0 %v7680_v17  ;;  %v7935_v51 = vld [vmem:[%s15135_s1 + $0xad8] sm:$0xf] }
 0x367   :  { %5221 = vst [vmem:[#allocation2 + $0x1e0] sm:$0xff] %v4463_v11  ;;  %v9492_v55 = vld [vmem:[%s15135_s1 + $0xaf4] sm:$0xf0] }
 0x368   :  { %4792 = vmatmul.bf16.vlgmr.msra.gmra.mxu3 %v10129_v57  ;;  %v13487_v41 = vpop.f32.mrf.mxu2  ;;  %v7936_v52 = vor.u32 %v9492_v55, %v7935_v51  ;;  %v8159_v4 = vld [vmem:[%s15135_s1 + $0xc98] sm:$0xf] }
 0x369   :  { %4705 = vmatmul.bf16.vlgmr.msra.gmra.mxu0 %v10108_v48  ;;  %v13493_v36 = vpop.f32.mrf.mxu1  ;;  %4904 = vmatpush.bf16.msrb.mxu3 %v8448_v1  ;;  %v9548_v2 = vld [vmem:[%s15135_s1 + $0xcb4] sm:$0xf0] }
 0x36a   :  { %v7647_v18 = vld [vmem:[%s15135_s1 + $0x898] sm:$0xf]  ;;  %v8160_v23 = vor.u32 %v9548_v2, %v8159_v4  ;;  %4846 = vmatpush.bf16.msrb.mxu1 %v7936_v52 }
 0x36b   :  { %v13489_v62 = vpop.f32.mrf.mxu3  ;;  %v9420_v37 = vld [vmem:[%s15135_s1 + $0x8b4] sm:$0xf0] }
 0x36c   :  { %v8415_v3 = vld [vmem:[%s15135_s1 + $0xe98] sm:$0xf]  ;;  %v7648_v7 = vor.u32 %v9420_v37, %v7647_v18  ;;  %4876 = vmatpush.bf16.msrb.mxu2 %v8160_v23 }
 0x36d   :  { %v9612_v60 = vld [vmem:[%s15135_s1 + $0xeb4] sm:$0xf0] }
 0x36e   :  { %v13491_v0 = vpop.f32.mrf.mxu0  ;;  %v8416_v6 = vor.u32 %v9612_v60, %v8415_v3  ;;  %4818 = vmatpush.bf16.msrb.mxu0 %v7648_v7  ;;  %v7903_v13 = vld [vmem:[%s15135_s1 + $0xa98] sm:$0xf] }
 0x36f   :  { %v9484_v42 = vld [vmem:[%s15135_s1 + $0xab4] sm:$0xf0] }
 0x370   :  { %v13519_v16 = vpop.f32.mrf.mxu2  ;;  %4905 = vmatpush.bf16.msrb.mxu3 %v8416_v6  ;;  %v7904_v59 = vor.u32 %v9484_v42, %v7903_v13  ;;  %v15255_v39 = vld [vmem:[#allocation8_spill] sm:$0xff]  ;;  %v15256_v42 = vld [vmem:[#allocation9_spill] sm:$0xff] }
 0x371   :  { %v13525_v31 = vpop.f32.mrf.mxu1  ;;  %v8127_v38 = vld [vmem:[%s15135_s1 + $0xc58] sm:$0xf] }
 0x372   :  { %4768 = vmatmul.bf16.gmra.mxu2 %v15254_v30  ;;  %4847 = vmatpush.bf16.msrb.mxu1 %v7904_v59  ;;  %v9540_v14 = vld [vmem:[%s15135_s1 + $0xc74] sm:$0xf0]  ;;  %v15257_v59 = vld [vmem:[#allocation10_spill] sm:$0xff] }
 0x373   :  { %v13521_v21 = vpop.f32.mrf.mxu3  ;;  %4739 = vmatmul.bf16.gmra.mxu1 %v15195_v40  ;;  %v7615_v29 = vld [vmem:[%s15135_s1 + $0x858] sm:$0xf]  ;;  %v8128_v10 = vor.u32 %v9540_v14, %v8127_v38  ;;  %v15258_v38 = vld [vmem:[#allocation11_spill] sm:$0xff] }
 0x374   :  { %v9412_v12 = vld [vmem:[%s15135_s1 + $0x874] sm:$0xf0] }
 0x375   :  { %v8383_v58 = vld [vmem:[%s15135_s1 + $0xe58] sm:$0xf]  ;;  %v7616_v56 = vor.u32 %v9412_v12, %v7615_v29  ;;  %4877 = vmatpush.bf16.msrb.mxu2 %v8128_v10  ;;  %v9328_v29 = vld [vmem:[%s15135_s1 + $0x5dc] sm:$0xf] }
 0x376   :  { %v13523_v50 = vpop.f32.mrf.mxu0  ;;  %v9604_v11 = vld [vmem:[%s15135_s1 + $0xe74] sm:$0xf0]  ;;  %v7297_v10 = vld [vmem:[%s15135_s1 + $0x5f8] sm:$0xf0] }
 0x377   :  { %v8384_v9 = vor.u32 %v9604_v11, %v8383_v58  ;;  %4819 = vmatpush.bf16.msrb.mxu0 %v7616_v56  ;;  %v7871_v24 = vld [vmem:[%s15135_s1 + $0xa58] sm:$0xf]  ;;  %v9200_v12 = vld [vmem:[%s15135_s1 + $0x1dc] sm:$0xf]  ;;  %v7300_v58 = vor.u32 %v9328_v29, %v7297_v10 }
 0x378   :  { %4797 = vmatmul.bf16.gmra.mxu3 %v15255_v39  ;;  %v13555_v43 = vpop.f32.mrf.mxu2  ;;  %v9476_v44 = vld [vmem:[%s15135_s1 + $0xa74] sm:$0xf0]  ;;  %v6785_v11 = vld [vmem:[%s15135_s1 + $0x1f8] sm:$0xf0] }
 0x379   :  { %4710 = vmatmul.bf16.gmra.mxu0 %v15194_v20  ;;  %v13561_v22 = vpop.f32.mrf.mxu1  ;;  %4906 = vmatpush.bf16.msrb.mxu3 %v8384_v9  ;;  %v7872_v63 = vor.u32 %v9476_v44, %v7871_v24  ;;  %v8095_v8 = vld [vmem:[%s15135_s1 + $0xc18] sm:$0xf]  ;;  %v9392_v56 = vld [vmem:[%s15135_s1 + $0x7dc] sm:$0xf]  ;;  %v6788_v44 = vor.u32 %v9200_v12, %v6785_v11  ;;  %v15260_v11 = vld [vmem:[#allocation6_spill] sm:$0xff] }
 0x37a   :  { %v9532_v17 = vld [vmem:[%s15135_s1 + $0xc34] sm:$0xf0]  ;;  %v7553_v9 = vld [vmem:[%s15135_s1 + $0x7f8] sm:$0xf0] }
 0x37b   :  { %v13557_v15 = vpop.f32.mrf.mxu3  ;;  %v7583_v1 = vld [vmem:[%s15135_s1 + $0x818] sm:$0xf]  ;;  %v8096_v51 = vor.u32 %v9532_v17, %v8095_v8  ;;  %4848 = vmatpush.bf16.msrb.mxu1 %v7872_v63  ;;  %v7556_v63 = vor.u32 %v9392_v56, %v7553_v9  ;;  %v9384_v29 = vld [vmem:[%s15135_s1 + $0x79c] sm:$0xf]  ;;  %v13658_v56 = vperm.slane %v15260_v11, 5 }
 0x37c   :  { %v9404_v55 = vld [vmem:[%s15135_s1 + $0x834] sm:$0xf0]  ;;  %v7521_v10 = vld [vmem:[%s15135_s1 + $0x7b8] sm:$0xf0] }
 0x37d   :  { %v8351_v52 = vld [vmem:[%s15135_s1 + $0xe18] sm:$0xf]  ;;  %v7584_v2 = vor.u32 %v9404_v55, %v7583_v1  ;;  %4878 = vmatpush.bf16.msrb.mxu2 %v8096_v51  ;;  %v9264_v51 = vld [vmem:[%s15135_s1 + $0x3dc] sm:$0xf] }
 0x37e   :  { %v13559_v5 = vpop.f32.mrf.mxu0  ;;  %v9596_v4 = vld [vmem:[%s15135_s1 + $0xe34] sm:$0xf0]  ;;  %v7041_v55 = vld [vmem:[%s15135_s1 + $0x3f8] sm:$0xf0] }
 0x37f   :  { %v8352_v18 = vor.u32 %v9596_v4, %v8351_v52  ;;  %4820 = vmatpush.bf16.msrb.mxu0 %v7584_v2  ;;  %v7839_v37 = vld [vmem:[%s15135_s1 + $0xa18] sm:$0xf]  ;;  %v9320_v52 = vld [vmem:[%s15135_s1 + $0x59c] sm:$0xf]  ;;  %v7044_v4 = vor.u32 %v9264_v51, %v7041_v55  ;;  %v15261_v51 = vld [vmem:[#allocation13_spill] sm:$0xff]  ;;  %v4475_v55 = vadd.f32 %v13455_v61, %v13658_v56 }
 0x380   :  { %v13587_v23 = vpop.f32.mrf.mxu2  ;;  %v9468_v3 = vld [vmem:[%s15135_s1 + $0xa34] sm:$0xf0]  ;;  %v7265_v2 = vld [vmem:[%s15135_s1 + $0x5b8] sm:$0xf0] }
 0x381   :  { %4907 = vmatpush.bf16.msrb.mxu3 %v8352_v18  ;;  %v7840_v6 = vor.u32 %v9468_v3, %v7839_v37  ;;  %v13599_v13 = vpop.f32.mrf.mxu1  ;;  %v15259_v14 = vld [vmem:[#allocation12_spill] sm:$0xff]  ;;  %4987 = vmatpush.bf16.msra.mxu2 %v7300_v58  ;;  %v7268_v3 = vor.u32 %v9320_v52, %v7265_v2  ;;  %v7524_v58 = vor.u32 %v9384_v29, %v7521_v10  ;;  %v15262_v52 = vld [vmem:[#allocation14_spill] sm:$0xff] }
 0x382   :  { %4773 = vmatmul.bf16.gmra.mxu2 %v15258_v38  ;;  %v9192_v18 = vld [vmem:[%s15135_s1 + $0x19c] sm:$0xf] }
 0x383   :  { %v13595_v60 = vpop.f32.mrf.mxu3  ;;  %4849 = vmatpush.bf16.msrb.mxu1 %v7840_v6  ;;  %4929 = vmatpush.bf16.msra.mxu0 %v6788_v44  ;;  %v6753_v37 = vld [vmem:[%s15135_s1 + $0x1b8] sm:$0xf0] }
 0x384   :  { %4744 = vmatmul.bf16.gmra.mxu1 %v15257_v59  ;;  %v6756_v6 = vor.u32 %v9192_v18, %v6753_v37  ;;  %v9256_v2 = vld [vmem:[%s15135_s1 + $0x39c] sm:$0xf] }
 0x385   :  { %5016 = vmatpush.bf16.msra.mxu3 %v7556_v63  ;;  %4988 = vmatpush.bf16.msra.mxu2 %v7268_v3  ;;  %v7009_v18 = vld [vmem:[%s15135_s1 + $0x3b8] sm:$0xf0] }
 0x386   :  { %v13597_v7 = vpop.f32.mrf.mxu0  ;;  %v15264_v37 = vld [vmem:[#allocation16_spill] sm:$0xff]  ;;  %v7012_v3 = vor.u32 %v9256_v2, %v7009_v18 }
 0x387   :  { %4958 = vmatpush.bf16.msra.mxu1 %v7044_v4  ;;  %4930 = vmatpush.bf16.msra.mxu0 %v6756_v6  ;;  %v15263_v4 = vld [vmem:[#allocation15_spill] sm:$0xff]  ;;  %v9312_v6 = vld [vmem:[%s15135_s1 + $0x55c] sm:$0xf] }
 0x388   :  { %4802 = vmatmul.bf16.gmra.mxu3 %v15259_v14  ;;  %v13623_v24 = vpop.f32.mrf.mxu2  ;;  %v7233_v61 = vld [vmem:[%s15135_s1 + $0x578] sm:$0xf0] }
 0x389   :  { %4715 = vmatmul.bf16.gmra.mxu0 %v15256_v42  ;;  %v13629_v1 = vpop.f32.mrf.mxu1  ;;  %5017 = vmatpush.bf16.msra.mxu3 %v7524_v58  ;;  %v9184_v29 = vld [vmem:[%s15135_s1 + $0x15c] sm:$0xf]  ;;  %v7236_v10 = vor.u32 %v9312_v6, %v7233_v61 }
 0x38a   :  { %v6721_v58 = vld [vmem:[%s15135_s1 + $0x178] sm:$0xf0] }
 0x38b   :  { %v13625_v8 = vpop.f32.mrf.mxu3  ;;  %v9376_v11 = vld [vmem:[%s15135_s1 + $0x75c] sm:$0xf]  ;;  %4959 = vmatpush.bf16.msra.mxu1 %v7012_v3  ;;  %4989 = vmatpush.bf16.msra.mxu2 %v7236_v10 }
 0x38c   :  { %v7489_v2 = vld [vmem:[%s15135_s1 + $0x778] sm:$0xf0] }
 0x38d   :  { %v9248_v38 = vld [vmem:[%s15135_s1 + $0x35c] sm:$0xf] }
 0x38e   :  { %v13627_v17 = vpop.f32.mrf.mxu0  ;;  %v6977_v3 = vld [vmem:[%s15135_s1 + $0x378] sm:$0xf0] }
 0x390   :  { %v13655_v12 = vpop.f32.mrf.mxu2 }
 0x391   :  { %v13664_v63 = vpop.f32.mrf.mxu1 }
 0x392   :  { %4778 = vmatmul.bf16.gmra.mxu2 %v15263_v4  ;;  %v7492_v4 = vor.u32 %v9376_v11, %v7489_v2 }
 0x393   :  { %v13660_v9 = vpop.f32.mrf.mxu3 }
 0x394   :  { %4749 = vmatmul.bf16.gmra.mxu1 %v15262_v52  ;;  %v4504_v52 = vadd.f32 %v13457_v19, %v4475_v55  ;;  %5018 = vmatpush.bf16.msra.mxu3 %v7492_v4  ;;  %v9304_v19 = vld [vmem:[%s15135_s1 + $0x51c] sm:$0xf]  ;;  %v6980_v55 = vor.u32 %v9248_v38, %v6977_v3  ;;  %v4477_v4 = vadd.f32 %v13491_v0, %v13658_v56 }
 0x395   :  { %v9368_v38 = vld [vmem:[%s15135_s1 + $0x71c] sm:$0xf] }
 0x396   :  { %v13662_v44 = vpop.f32.mrf.mxu0  ;;  %v4533_v14 = vadd.f32 %v13487_v41, %v4504_v52  ;;  %v9176_v41 = vld [vmem:[%s15135_s1 + $0x11c] sm:$0xf]  ;;  %4960 = vmatpush.bf16.msra.mxu1 %v6980_v55  ;;  %v4480_v55 = vadd.f32 %v13523_v50, %v13658_v56 }
 0x397   :  { %v6689_v52 = vld [vmem:[%s15135_s1 + $0x138] sm:$0xf0] }
 0x398   :  { %4807 = vmatmul.bf16.gmra.mxu3 %v15264_v37  ;;  %v13696_v18 = vpop.f32.mrf.mxu2  ;;  %v6724_v37 = vor.u32 %v9184_v29, %v6721_v58  ;;  %v6692_v10 = vor.u32 %v9176_v41, %v6689_v52  ;;  %v7457_v58 = vld [vmem:[%s15135_s1 + $0x738] sm:$0xf0]  ;;  %v4562_v3 = vadd.f32 %v13489_v62, %v4533_v14  ;;  %v15265_v41 = vld [vmem:[#allocation17_spill] sm:$0xff]  ;;  %v15267_v62 = vld [vmem:[#allocation19_spill] sm:$0xff] }
 0x399   :  { %4720 = vmatmul.bf16.gmra.mxu0 %v15261_v51  ;;  %v13703_v51 = vpop.f32.mrf.mxu1  ;;  %v7460_v2 = vor.u32 %v9368_v38, %v7457_v58  ;;  %v15266_v38 = vld [vmem:[#allocation18_spill] sm:$0xff]  ;;  %v9240_v14 = vld [vmem:[%s15135_s1 + $0x31c] sm:$0xf] }
 0x39a   :  { %4931 = vmatpush.bf16.msra.mxu0 %v6724_v37  ;;  %v7201_v37 = vld [vmem:[%s15135_s1 + $0x538] sm:$0xf0] }
 0x39b   :  { %v13699_v6 = vpop.f32.mrf.mxu3  ;;  %v7204_v29 = vor.u32 %v9304_v19, %v7201_v37  ;;  %5019 = vmatpush.bf16.msra.mxu3 %v7460_v2  ;;  %v4506_v19 = vadd.f32 %v13493_v36, %v4477_v4  ;;  %v6945_v36 = vld [vmem:[%s15135_s1 + $0x338] sm:$0xf0] }
 0x39c   :  { %v6948_v4 = vor.u32 %v9240_v14, %v6945_v36  ;;  %v7169_v50 = vld [vmem:[%s15135_s1 + $0x4f8] sm:$0xf0] }
 0x39d   :  { %4990 = vmatpush.bf16.msra.mxu2 %v7204_v29  ;;  %v4535_v52 = vadd.f32 %v13519_v16, %v4506_v19  ;;  %v9296_v16 = vld [vmem:[%s15135_s1 + $0x4dc] sm:$0xf] }
 0x39e   :  { %v13701_v61 = vpop.f32.mrf.mxu0  ;;  %4932 = vmatpush.bf16.msra.mxu0 %v6692_v10  ;;  %v9168_v29 = vld [vmem:[%s15135_s1 + $0xdc] sm:$0xf]  ;;  %v7172_v58 = vor.u32 %v9296_v16, %v7169_v50  ;;  %4961 = vmatpush.bf16.msra.mxu1 %v6948_v4 }
 0x39f   :  { %v6657_v2 = vld [vmem:[%s15135_s1 + $0xf8] sm:$0xf0] }
 0x3a0   :  { %v13732_v11 = vpop.f32.mrf.mxu2  ;;  %v7425_v19 = vld [vmem:[%s15135_s1 + $0x6f8] sm:$0xf0]  ;;  %v6660_v36 = vor.u32 %v9168_v29, %v6657_v2 }
 0x3a1   :  { %v4619_v0 = vpop.f32.mrf.mxu1  ;;  %4991 = vmatpush.bf16.msra.mxu2 %v7172_v58  ;;  %v9232_v4 = vld [vmem:[%s15135_s1 + $0x2dc] sm:$0xf] }
 0x3a2   :  { %4879 = vmatmul.bf16.vlgmr.msrb.gmra.mxu2 %v15267_v62  ;;  %v4564_v62 = vadd.f32 %v13521_v21, %v4535_v52  ;;  %4933 = vmatpush.bf16.msra.mxu0 %v6660_v36  ;;  %v6913_v21 = vld [vmem:[%s15135_s1 + $0x2f8] sm:$0xf0] }
 0x3a3   :  { %v13735_v59 = vpop.f32.mrf.mxu3  ;;  %v9288_v52 = vld [vmem:[%s15135_s1 + $0x49c] sm:$0xf] }
 0x3a4   :  { %4850 = vmatmul.bf16.vlgmr.msrb.gmra.mxu1 %v15266_v38  ;;  %v6625_v29 = vld [vmem:[%s15135_s1 + $0xb8] sm:$0xf0] }
 0x3a5   :  { %v7393_v58 = vld [vmem:[%s15135_s1 + $0x6b8] sm:$0xf0] }
 0x3a6   :  { %v4590_v42 = vpop.f32.mrf.mxu0 }
 0x3a7   :  { %v4591_v37 = vadd.f32 %v4590_v42, %v4562_v3  ;;  %v15268_v42 = vld [vmem:[#allocation20_spill] sm:$0xff] }
 0x3a8   :  { %4908 = vmatmul.bf16.vlgmr.msrb.gmra.mxu3 %v15268_v42  ;;  %v9360_v3 = vld [vmem:[%s15135_s1 + $0x6dc] sm:$0xf]  ;;  %v4648_v14 = vpop.f32.mrf.mxu2 }
 0x3a9   :  { %4821 = vmatmul.bf16.vlgmr.msrb.gmra.mxu0 %v15265_v41  ;;  %v4620_v10 = vadd.f32 %v4619_v0, %v4591_v37  ;;  %v7428_v42 = vor.u32 %v9360_v3, %v7425_v19  ;;  %v4509_v0 = vadd.f32 %v13525_v31, %v4480_v55  ;;  %v4621_v38 = vpop.f32.mrf.mxu1  ;;  %v6916_v31 = vor.u32 %v9232_v4, %v6913_v21  ;;  %v7137_v55 = vld [vmem:[%s15135_s1 + $0x4b8] sm:$0xf0] }
 0x3aa   :  { %v4485_v4 = vadd.f32 %v13597_v7, %v13658_v56  ;;  %v7105_v7 = vld [vmem:[%s15135_s1 + $0x478] sm:$0xf0] }
 0x3ab   :  { %v4649_v37 = vadd.f32 %v4648_v14, %v4620_v10  ;;  %v4677_v16 = vpop.f32.mrf.mxu3  ;;  %5020 = vmatpush.bf16.msra.mxu3 %v7428_v42  ;;  %v4538_v30 = vadd.f32 %v13555_v43, %v4509_v0  ;;  %v9160_v43 = vld [vmem:[%s15135_s1 + $0x9c] sm:$0xf]  ;;  %v7140_v42 = vor.u32 %v9288_v52, %v7137_v55  ;;  %4962 = vmatpush.bf16.msra.mxu1 %v6916_v31 }
 0x3ac   :  { %v9352_v10 = vld [vmem:[%s15135_s1 + $0x69c] sm:$0xf]  ;;  %v6628_v3 = vor.u32 %v9160_v43, %v6625_v29 }
 0x3ad   :  { %v4678_v41 = vadd.f32 %v4677_v16, %v4649_v37  ;;  %v7396_v19 = vor.u32 %v9352_v10, %v7393_v58  ;;  %4992 = vmatpush.bf16.msra.mxu2 %v7140_v42  ;;  %v9152_v21 = vld [vmem:[%s15135_s1 + $0x5c] sm:$0xf]  ;;  %v4514_v58 = vadd.f32 %v13599_v13, %v4485_v4 }
 0x3ae   :  { %v4592_v50 = vpop.f32.mrf.mxu0  ;;  %4934 = vmatpush.bf16.msra.mxu0 %v6628_v3  ;;  %v6593_v55 = vld [vmem:[%s15135_s1 + $0x78] sm:$0xf0] }
 0x3af   :  { %v4593_v39 = vadd.f32 %v4592_v50, %v4564_v62  ;;  %5166 = vst [vmem:[#allocation2 + $0x28] sm:$0xff] %v4678_v41  ;;  %v4482_v41 = vadd.f32 %v13559_v5, %v13658_v56  ;;  %v4567_v5 = vadd.f32 %v13557_v15, %v4538_v30  ;;  %5021 = vmatpush.bf16.msra.mxu3 %v7396_v19  ;;  %v9224_v30 = vld [vmem:[%s15135_s1 + $0x29c] sm:$0xf] }
 0x3b0   :  { %v4650_v2 = vpop.f32.mrf.mxu2  ;;  %v6881_v15 = vld [vmem:[%s15135_s1 + $0x2b8] sm:$0xf0]  ;;  %v6596_v42 = vor.u32 %v9152_v21, %v6593_v55 }
 0x3b1   :  { %v4622_v62 = vadd.f32 %v4621_v38, %v4593_v39  ;;  %v4624_v36 = vpop.f32.mrf.mxu1  ;;  %v4511_v0 = vadd.f32 %v13561_v22, %v4482_v41  ;;  %v6884_v22 = vor.u32 %v9224_v30, %v6881_v15  ;;  %v9344_v43 = vld [vmem:[%s15135_s1 + $0x65c] sm:$0xf]  ;;  %v4487_v30 = vadd.f32 %v13627_v17, %v13658_v56 }
 0x3b2   :  { %4884 = vmatmul.bf16.gmra.mxu2 %v10607_v47  ;;  %v7361_v41 = vld [vmem:[%s15135_s1 + $0x678] sm:$0xf0]  ;;  %4935 = vmatpush.bf16.msra.mxu0 %v6596_v42 }
 0x3b3   :  { %v4651_v39 = vadd.f32 %v4650_v2, %v4622_v62  ;;  %v4679_v38 = vpop.f32.mrf.mxu3  ;;  %v4540_v50 = vadd.f32 %v13587_v23, %v4511_v0  ;;  %v9280_v23 = vld [vmem:[%s15135_s1 + $0x45c] sm:$0xf]  ;;  %4963 = vmatpush.bf16.msra.mxu1 %v6884_v22  ;;  %v7364_v29 = vor.u32 %v9344_v43, %v7361_v41 }
 0x3b4   :  { %4855 = vmatmul.bf16.gmra.mxu1 %v10605_v46  ;;  %v7108_v52 = vor.u32 %v9280_v23, %v7105_v7  ;;  %v9272_v0 = vld [vmem:[%s15135_s1 + $0x41c] sm:$0xf] }
 0x3b5   :  { %v4680_v37 = vadd.f32 %v4679_v38, %v4651_v39  ;;  %v4569_v10 = vadd.f32 %v13595_v60, %v4540_v50  ;;  %5022 = vmatpush.bf16.msra.mxu3 %v7364_v29  ;;  %v4543_v60 = vadd.f32 %v13623_v24, %v4514_v58  ;;  %v9144_v50 = vld [vmem:[%s15135_s1 + $0x1c] sm:$0xf]  ;;  %v4516_v29 = vadd.f32 %v13629_v1, %v4487_v30 }
 0x3b6   :  { %v4595_v14 = vpop.f32.mrf.mxu0  ;;  %4993 = vmatpush.bf16.msra.mxu2 %v7108_v52  ;;  %v6561_v4 = vld [vmem:[%s15135_s1 + $0x38] sm:$0xf0] }
 0x3b7   :  { %v4596_v16 = vadd.f32 %v4595_v14, %v4567_v5  ;;  %5174 = vst [vmem:[#allocation2 + $0x68] sm:$0xff] %v4680_v37  ;;  %v9216_v14 = vld [vmem:[%s15135_s1 + $0x25c] sm:$0xf]  ;;  %v6564_v22 = vor.u32 %v9144_v50, %v6561_v4  ;;  %v4572_v17 = vadd.f32 %v13625_v8, %v4543_v60 }
 0x3b8   :  { %4913 = vmatmul.bf16.gmra.mxu3 %v10609_v49  ;;  %v4653_v62 = vpop.f32.mrf.mxu2  ;;  %v7073_v37 = vld [vmem:[%s15135_s1 + $0x438] sm:$0xf0] }
 0x3b9   :  { %4826 = vmatmul.bf16.gmra.mxu0 %v10603_v45  ;;  %v4625_v31 = vadd.f32 %v4624_v36, %v4596_v16  ;;  %v4626_v5 = vpop.f32.mrf.mxu1  ;;  %v6849_v36 = vld [vmem:[%s15135_s1 + $0x278] sm:$0xf0]  ;;  %v7076_v16 = vor.u32 %v9272_v0, %v7073_v37 }
 0x3ba   :  { %v6852_v13 = vor.u32 %v9216_v14, %v6849_v36  ;;  %v9336_v24 = vld [vmem:[%s15135_s1 + $0x61c] sm:$0xf]  ;;  %4936 = vmatpush.bf16.msra.mxu0 %v6564_v22 }
 0x3bb   :  { %v4654_v2 = vadd.f32 %v4653_v62, %v4625_v31  ;;  %v4682_v3 = vpop.f32.mrf.mxu3  ;;  %v7329_v23 = vld [vmem:[%s15135_s1 + $0x638] sm:$0xf0]  ;;  %4994 = vmatpush.bf16.msra.mxu2 %v7076_v16 }
 0x3bc   :  { %4964 = vmatpush.bf16.msra.mxu1 %v6852_v13  ;;  %v7332_v21 = vor.u32 %v9336_v24, %v7329_v23  ;;  %v9208_v31 = vld [vmem:[%s15135_s1 + $0x21c] sm:$0xf] }
 0x3bd   :  { %v4683_v39 = vadd.f32 %v4682_v3, %v4654_v2  ;;  %v6817_v52 = vld [vmem:[%s15135_s1 + $0x238] sm:$0xf0]  ;;  %v4545_v2 = vadd.f32 %v13655_v12, %v4516_v29  ;;  %v4490_v3 = vadd.f32 %v13662_v44, %v13658_v56 }
 0x3be   :  { %v4597_v19 = vpop.f32.mrf.mxu0  ;;  %v6820_v62 = vor.u32 %v9208_v31, %v6817_v52  ;;  %5023 = vmatpush.bf16.msra.mxu3 %v7332_v21  ;;  %v9584_v8 = vld [vmem:[%s15135_s1 + $0xddc] sm:$0xf] }
 0x3bf   :  { %v4598_v38 = vadd.f32 %v4597_v19, %v4569_v10  ;;  %5182 = vst [vmem:[#allocation2 + $0xa8] sm:$0xff] %v4683_v39  ;;  %v8321_v1 = vld [vmem:[%s15135_s1 + $0xdf8] sm:$0xf0]  ;;  %v4574_v13 = vadd.f32 %v13660_v9, %v4545_v2  ;;  %v4519_v0 = vadd.f32 %v13664_v63, %v4490_v3 }
 0x3c0   :  { %v4655_v7 = vpop.f32.mrf.mxu2  ;;  %4965 = vmatpush.bf16.msra.mxu1 %v6820_v62  ;;  %v9456_v12 = vld [vmem:[%s15135_s1 + $0x9dc] sm:$0xf]  ;;  %v8324_v19 = vor.u32 %v9584_v8, %v8321_v1 }
 0x3c1   :  { %v4627_v15 = vadd.f32 %v4626_v5, %v4598_v38  ;;  %v4629_v42 = vpop.f32.mrf.mxu1  ;;  %v7809_v5 = vld [vmem:[%s15135_s1 + $0x9f8] sm:$0xf0]  ;;  %v4548_v21 = vadd.f32 %v13696_v18, %v4519_v0 }
 0x3c2   :  { %4889 = vmatmul.bf16.gmra.mxu2 %v10691_v34  ;;  %v9648_v39 = vld [vmem:[%s15135_s1 + $0xfdc] sm:$0xf]  ;;  %v7812_v36 = vor.u32 %v9456_v12, %v7809_v5 }
 0x3c3   :  { %v4656_v55 = vadd.f32 %v4655_v7, %v4627_v15  ;;  %v4684_v43 = vpop.f32.mrf.mxu3  ;;  %v8577_v38 = vld [vmem:[%s15135_s1 + $0xff8] sm:$0xf0]  ;;  %5103 = vmatpush.bf16.msrb.mxu2 %v8324_v19  ;;  %v4577_v29 = vadd.f32 %v13699_v6, %v4548_v21 }
 0x3c4   :  { %4860 = vmatmul.bf16.gmra.mxu1 %v10689_v33  ;;  %v8580_v60 = vor.u32 %v9648_v39, %v8577_v38  ;;  %5045 = vmatpush.bf16.msrb.mxu0 %v7812_v36  ;;  %v9520_v15 = vld [vmem:[%s15135_s1 + $0xbdc] sm:$0xf] }
 0x3c5   :  { %v4685_v10 = vadd.f32 %v4684_v43, %v4656_v55  ;;  %v8065_v22 = vld [vmem:[%s15135_s1 + $0xbf8] sm:$0xf0] }
 0x3c6   :  { %v4600_v41 = vpop.f32.mrf.mxu0  ;;  %5132 = vmatpush.bf16.msrb.mxu3 %v8580_v60  ;;  %v8068_v9 = vor.u32 %v9520_v15, %v8065_v22  ;;  %v9576_v63 = vld [vmem:[%s15135_s1 + $0xd9c] sm:$0xf] }
 0x3c7   :  { %v4601_v58 = vadd.f32 %v4600_v41, %v4572_v17  ;;  %5190 = vst [vmem:[#allocation2 + $0xe8] sm:$0xff] %v4685_v10  ;;  %v8289_v23 = vld [vmem:[%s15135_s1 + $0xdb8] sm:$0xf0]  ;;  %v4492_v41 = vadd.f32 %v13701_v61, %v13658_v56 }
 0x3c8   :  { %4918 = vmatmul.bf16.gmra.mxu3 %v10693_v35  ;;  %v4658_v14 = vpop.f32.mrf.mxu2  ;;  %v9448_v7 = vld [vmem:[%s15135_s1 + $0x99c] sm:$0xf]  ;;  %v8292_v31 = vor.u32 %v9576_v63, %v8289_v23  ;;  %5074 = vmatpush.bf16.msrb.mxu1 %v8068_v9 }
 0x3c9   :  { %4831 = vmatmul.bf16.gmra.mxu0 %v10687_v32  ;;  %v4630_v44 = vadd.f32 %v4629_v42, %v4601_v58  ;;  %v4631_v4 = vpop.f32.mrf.mxu1  ;;  %v7777_v52 = vld [vmem:[%s15135_s1 + $0x9b8] sm:$0xf0]  ;;  %v4521_v8 = vadd.f32 %v13703_v51, %v4492_v41 }
 0x3ca   :  { %v9640_v17 = vld [vmem:[%s15135_s1 + $0xf9c] sm:$0xf]  ;;  %v7780_v55 = vor.u32 %v9448_v7, %v7777_v52  ;;  %5104 = vmatpush.bf16.msrb.mxu2 %v8292_v31 }
 0x3cb   :  { %v4659_v37 = vadd.f32 %v4658_v14, %v4630_v44  ;;  %v4687_v16 = vpop.f32.mrf.mxu3  ;;  %v8545_v43 = vld [vmem:[%s15135_s1 + $0xfb8] sm:$0xf0]  ;;  %v4550_v44 = vadd.f32 %v13732_v11, %v4521_v8 }
 0x3cc   :  { %v8548_v62 = vor.u32 %v9640_v17, %v8545_v43  ;;  %5046 = vmatpush.bf16.msrb.mxu0 %v7780_v55  ;;  %v9512_v56 = vld [vmem:[%s15135_s1 + $0xb9c] sm:$0xf] }
 0x3cd   :  { %v4688_v24 = vadd.f32 %v4687_v16, %v4659_v37  ;;  %v8033_v61 = vld [vmem:[%s15135_s1 + $0xbb8] sm:$0xf0]  ;;  %v4579_v37 = vadd.f32 %v13735_v59, %v4550_v44 }
 0x3ce   :  { %v4602_v50 = vpop.f32.mrf.mxu0  ;;  %5133 = vmatpush.bf16.msrb.mxu3 %v8548_v62  ;;  %v8036_v6 = vor.u32 %v9512_v56, %v8033_v61  ;;  %v9568_v51 = vld [vmem:[%s15135_s1 + $0xd5c] sm:$0xf] }
 0x3cf   :  { %v4603_v30 = vadd.f32 %v4602_v50, %v4574_v13  ;;  %5198 = vst [vmem:[#allocation2 + $0x128] sm:$0xff] %v4688_v24  ;;  %v8257_v19 = vld [vmem:[%s15135_s1 + $0xd78] sm:$0xf0] }
 0x3d0   :  { %v4660_v42 = vpop.f32.mrf.mxu2  ;;  %5075 = vmatpush.bf16.msrb.mxu1 %v8036_v6  ;;  %v9440_v11 = vld [vmem:[%s15135_s1 + $0x95c] sm:$0xf]  ;;  %v8260_v39 = vor.u32 %v9568_v51, %v8257_v19 }
 0x3d1   :  { %v4632_v18 = vadd.f32 %v4631_v4, %v4603_v30  ;;  %v4634_v3 = vpop.f32.mrf.mxu1  ;;  %v7745_v38 = vld [vmem:[%s15135_s1 + $0x978] sm:$0xf0] }
 0x3d2   :  { %4894 = vmatmul.bf16.gmra.mxu2 %v10769_v27  ;;  %v9632_v14 = vld [vmem:[%s15135_s1 + $0xf5c] sm:$0xf]  ;;  %v7748_v13 = vor.u32 %v9440_v11, %v7745_v38 }
 0x3d3   :  { %v4661_v10 = vadd.f32 %v4660_v42, %v4632_v18  ;;  %v4689_v58 = vpop.f32.mrf.mxu3  ;;  %v8513_v36 = vld [vmem:[%s15135_s1 + $0xf78] sm:$0xf0]  ;;  %5105 = vmatpush.bf16.msrb.mxu2 %v8260_v39 }
 0x3d4   :  { %4865 = vmatmul.bf16.gmra.mxu1 %v10767_v26  ;;  %v8516_v0 = vor.u32 %v9632_v14, %v8513_v36  ;;  %5047 = vmatpush.bf16.msrb.mxu0 %v7748_v13  ;;  %v9504_v22 = vld [vmem:[%s15135_s1 + $0xb5c] sm:$0xf] }
 0x3d5   :  { %v4690_v1 = vadd.f32 %v4689_v58, %v4661_v10  ;;  %v8001_v9 = vld [vmem:[%s15135_s1 + $0xb78] sm:$0xf0] }
 0x3d6   :  { %v4605_v2 = vpop.f32.mrf.mxu0  ;;  %5134 = vmatpush.bf16.msrb.mxu3 %v8516_v0  ;;  %v8004_v63 = vor.u32 %v9504_v22, %v8001_v9  ;;  %v9560_v59 = vld [vmem:[%s15135_s1 + $0xd1c] sm:$0xf] }
 0x3d7   :  { %v4606_v12 = vadd.f32 %v4605_v2, %v4577_v29  ;;  %5206 = vst [vmem:[#allocation2 + $0x168] sm:$0xff] %v4690_v1  ;;  %v8225_v23 = vld [vmem:[%s15135_s1 + $0xd38] sm:$0xf0] }
 0x3d8   :  { %4923 = vmatmul.bf16.gmra.mxu3 %v10771_v28  ;;  %v4663_v60 = vpop.f32.mrf.mxu2  ;;  %v9432_v7 = vld [vmem:[%s15135_s1 + $0x91c] sm:$0xf]  ;;  %v8228_v21 = vor.u32 %v9560_v59, %v8225_v23  ;;  %5076 = vmatpush.bf16.msrb.mxu1 %v8004_v63  ;;  %v15269_v23 = vld [vmem:[#allocation7_spill] sm:$0xff] }
 0x3d9   :  { %4836 = vmatmul.bf16.gmra.mxu0 %v10765_v25  ;;  %v4635_v5 = vadd.f32 %v4634_v3, %v4606_v12  ;;  %v4636_v24 = vpop.f32.mrf.mxu1  ;;  %v7713_v31 = vld [vmem:[%s15135_s1 + $0x938] sm:$0xf0] }
 0x3da   :  { %v9624_v52 = vld [vmem:[%s15135_s1 + $0xf1c] sm:$0xf]  ;;  %v7716_v17 = vor.u32 %v9432_v7, %v7713_v31  ;;  %5106 = vmatpush.bf16.msrb.mxu2 %v8228_v21 }
 0x3db   :  { %v4664_v16 = vadd.f32 %v4663_v60, %v4635_v5  ;;  %v4692_v50 = vpop.f32.mrf.mxu3  ;;  %v8481_v55 = vld [vmem:[%s15135_s1 + $0xf38] sm:$0xf0] }
 0x3dc   :  { %v8484_v41 = vor.u32 %v9624_v52, %v8481_v55  ;;  %5048 = vmatpush.bf16.msrb.mxu0 %v7716_v17  ;;  %v9496_v2 = vld [vmem:[%s15135_s1 + $0xb1c] sm:$0xf] }
 0x3dd   :  { %v4693_v30 = vadd.f32 %v4692_v50, %v4664_v16  ;;  %v7969_v3 = vld [vmem:[%s15135_s1 + $0xb38] sm:$0xf0] }
 0x3de   :  { %v4607_v4 = vpop.f32.mrf.mxu0  ;;  %5135 = vmatpush.bf16.msrb.mxu3 %v8484_v41  ;;  %v7972_v8 = vor.u32 %v9496_v2, %v7969_v3  ;;  %v9552_v1 = vld [vmem:[%s15135_s1 + $0xcdc] sm:$0xf] }
 0x3df   :  { %v4608_v15 = vadd.f32 %v4607_v4, %v4579_v37  ;;  %5214 = vst [vmem:[#allocation2 + $0x1a8] sm:$0xff] %v4693_v30  ;;  %v8193_v12 = vld [vmem:[%s15135_s1 + $0xcf8] sm:$0xf0] }
 0x3e0   :  { %v4665_v18 = vpop.f32.mrf.mxu2  ;;  %5077 = vmatpush.bf16.msrb.mxu1 %v7972_v8  ;;  %v8196_v56 = vor.u32 %v9552_v1, %v8193_v12  ;;  %v9488_v5 = vld [vmem:[%s15135_s1 + $0xadc] sm:$0xf] }
 0x3e1   :  { %v4637_v43 = vadd.f32 %v4636_v24, %v4608_v15  ;;  %v13980_v10 = vpop.f32.mrf.mxu1  ;;  %v7937_v39 = vld [vmem:[%s15135_s1 + $0xaf8] sm:$0xf0] }
 0x3e2   :  { %4995 = vmatmul.bf16.vlgmr.msra.gmra.mxu2 %v10121_v54  ;;  %v9616_v54 = vld [vmem:[%s15135_s1 + $0xedc] sm:$0xf]  ;;  %v7940_v38 = vor.u32 %v9488_v5, %v7937_v39 }
 0x3e3   :  { %v4666_v62 = vadd.f32 %v4665_v18, %v4637_v43  ;;  %v4694_v42 = vpop.f32.mrf.mxu3  ;;  %5107 = vmatpush.bf16.msrb.mxu2 %v8196_v56  ;;  %v9544_v14 = vld [vmem:[%s15135_s1 + $0xc9c] sm:$0xf] }
 0x3e4   :  { %4966 = vmatmul.bf16.vlgmr.msra.gmra.mxu1 %v10119_v53  ;;  %v7681_v53 = vld [vmem:[%s15135_s1 + $0x8f8] sm:$0xf0] }
 0x3e5   :  { %v4695_v58 = vadd.f32 %v4694_v42, %v4666_v62  ;;  %v8161_v36 = vld [vmem:[%s15135_s1 + $0xcb8] sm:$0xf0]  ;;  %5078 = vmatpush.bf16.msrb.mxu1 %v7940_v38 }
 0x3e6   :  { %v13978_v29 = vpop.f32.mrf.mxu0  ;;  %v9416_v60 = vld [vmem:[%s15135_s1 + $0x89c] sm:$0xf]  ;;  %v8164_v13 = vor.u32 %v9544_v14, %v8161_v36 }
 0x3e7   :  { %5222 = vst [vmem:[#allocation2 + $0x1e8] sm:$0xff] %v4695_v58  ;;  %v7649_v0 = vld [vmem:[%s15135_s1 + $0x8b8] sm:$0xf0] }
 0x3e8   :  { %5024 = vmatmul.bf16.vlgmr.msra.gmra.mxu3 %v10129_v57  ;;  %v8449_v57 = vld [vmem:[%s15135_s1 + $0xef8] sm:$0xf0]  ;;  %v14010_v61 = vpop.f32.mrf.mxu2  ;;  %v7652_v50 = vor.u32 %v9416_v60, %v7649_v0  ;;  %5108 = vmatpush.bf16.msrb.mxu2 %v8164_v13  ;;  %v15271_v0 = vld [vmem:[#allocation9_spill] sm:$0xff] }
 0x3e9   :  { %4937 = vmatmul.bf16.vlgmr.msra.gmra.mxu0 %v10108_v48  ;;  %v9424_v48 = vld [vmem:[%s15135_s1 + $0x8dc] sm:$0xf]  ;;  %v8452_v44 = vor.u32 %v9616_v54, %v8449_v57  ;;  %v14016_v11 = vpop.f32.mrf.mxu1 }
 0x3ea   :  { %v7684_v6 = vor.u32 %v9424_v48, %v7681_v53  ;;  %v9608_v37 = vld [vmem:[%s15135_s1 + $0xe9c] sm:$0xf] }
 0x3eb   :  { %v14012_v51 = vpop.f32.mrf.mxu3  ;;  %5136 = vmatpush.bf16.msrb.mxu3 %v8452_v44  ;;  %v8417_v16 = vld [vmem:[%s15135_s1 + $0xeb8] sm:$0xf0] }
 0x3ec   :  { %5049 = vmatpush.bf16.msrb.mxu0 %v7684_v6  ;;  %v8420_v4 = vor.u32 %v9608_v37, %v8417_v16  ;;  %v9480_v9 = vld [vmem:[%s15135_s1 + $0xa9c] sm:$0xf]  ;;  %v15272_v37 = vld [vmem:[#allocation10_spill] sm:$0xff]  ;;  %v15273_v16 = vld [vmem:[#allocation11_spill] sm:$0xff] }
 0x3ed   :  { %v7905_v63 = vld [vmem:[%s15135_s1 + $0xab8] sm:$0xf0] }
 0x3ee   :  { %v14014_v19 = vpop.f32.mrf.mxu0  ;;  %v7908_v59 = vor.u32 %v9480_v9, %v7905_v63  ;;  %v15270_v7 = vld [vmem:[#allocation8_spill] sm:$0xff] }
 0x3ef   :  { %5137 = vmatpush.bf16.msrb.mxu3 %v8420_v4  ;;  %v9536_v21 = vld [vmem:[%s15135_s1 + $0xc5c] sm:$0xf] }
 0x3f0   :  { %v14042_v24 = vpop.f32.mrf.mxu2  ;;  %5050 = vmatpush.bf16.msrb.mxu0 %v7652_v50  ;;  %5079 = vmatpush.bf16.msrb.mxu1 %v7908_v59  ;;  %v8129_v31 = vld [vmem:[%s15135_s1 + $0xc78] sm:$0xf0] }
 0x3f1   :  { %v14048_v22 = vpop.f32.mrf.mxu1  ;;  %v8132_v52 = vor.u32 %v9536_v21, %v8129_v31  ;;  %v9600_v17 = vld [vmem:[%s15135_s1 + $0xe5c] sm:$0xf] }
 0x3f2   :  { %5000 = vmatmul.bf16.gmra.mxu2 %v15269_v23  ;;  %v8385_v55 = vld [vmem:[%s15135_s1 + $0xe78] sm:$0xf0] }
 0x3f3   :  { %v14044_v30 = vpop.f32.mrf.mxu3  ;;  %v8388_v18 = vor.u32 %v9600_v17, %v8385_v55  ;;  %5109 = vmatpush.bf16.msrb.mxu2 %v8132_v52  ;;  %v9472_v2 = vld [vmem:[%s15135_s1 + $0xa5c] sm:$0xf]  ;;  %v15276_v55 = vld [vmem:[#allocation14_spill] sm:$0xff] }
 0x3f4   :  { %4971 = vmatmul.bf16.gmra.mxu1 %v15195_v40  ;;  %v7617_v40 = vld [vmem:[%s15135_s1 + $0x878] sm:$0xf0] }
 0x3f5   :  { %5138 = vmatpush.bf16.msrb.mxu3 %v8388_v18  ;;  %v7873_v3 = vld [vmem:[%s15135_s1 + $0xa78] sm:$0xf0] }
 0x3f6   :  { %v14046_v15 = vpop.f32.mrf.mxu0  ;;  %v7876_v8 = vor.u32 %v9472_v2, %v7873_v3  ;;  %v9528_v1 = vld [vmem:[%s15135_s1 + $0xc1c] sm:$0xf] }
 0x3f7   :  { %v8097_v12 = vld [vmem:[%s15135_s1 + $0xc38] sm:$0xf0] }
 0x3f8   :  { %5029 = vmatmul.bf16.gmra.mxu3 %v15270_v7  ;;  %v14078_v43 = vpop.f32.mrf.mxu2  ;;  %v9400_v48 = vld [vmem:[%s15135_s1 + $0x81c] sm:$0xf]  ;;  %v8100_v56 = vor.u32 %v9528_v1, %v8097_v12  ;;  %5080 = vmatpush.bf16.msrb.mxu1 %v7876_v8  ;;  %v14141_v7 = vld [vmem:[%s15139_s3] sm:$0xff] }
 0x3f9   :  { %4942 = vmatmul.bf16.gmra.mxu0 %v15194_v20  ;;  %v9408_v20 = vld [vmem:[%s15135_s1 + $0x85c] sm:$0xf]  ;;  %v14084_v58 = vpop.f32.mrf.mxu1  ;;  %v14144_v21 = vperm.slane %v14141_v7, 6 }
 0x3fa   :  { %v7620_v41 = vor.u32 %v9408_v20, %v7617_v40  ;;  %v7585_v53 = vld [vmem:[%s15135_s1 + $0x838] sm:$0xf0]  ;;  %5110 = vmatpush.bf16.msrb.mxu2 %v8100_v56  ;;  %v15275_v40 = vld [vmem:[#allocation13_spill] sm:$0xff] }
 0x3fb   :  { %v14080_v62 = vpop.f32.mrf.mxu3  ;;  %v9592_v54 = vld [vmem:[%s15135_s1 + $0xe1c] sm:$0xf]  ;;  %v7588_v6 = vor.u32 %v9400_v48, %v7585_v53  ;;  %v4707_v17 = vadd.f32 %v13978_v29, %v14144_v21  ;;  %v4709_v29 = vadd.f32 %v14014_v19, %v14144_v21  ;;  %v15281_v19 = vld [vmem:[#allocation19_spill] sm:$0xff] }
 0x3fc   :  { %5051 = vmatpush.bf16.msrb.mxu0 %v7620_v41  ;;  %v8353_v57 = vld [vmem:[%s15135_s1 + $0xe38] sm:$0xf0]  ;;  %v15277_v41 = vld [vmem:[#allocation15_spill] sm:$0xff] }
 0x3fd   :  { %v8356_v44 = vor.u32 %v9592_v54, %v8353_v57  ;;  %v9464_v39 = vld [vmem:[%s15135_s1 + $0xa1c] sm:$0xf]  ;;  %v4736_v3 = vadd.f32 %v13980_v10, %v4707_v17  ;;  %v4738_v10 = vadd.f32 %v14016_v11, %v4709_v29 }
 0x3fe   :  { %v14082_v42 = vpop.f32.mrf.mxu0  ;;  %v7841_v38 = vld [vmem:[%s15135_s1 + $0xa38] sm:$0xf0] }
 0x3ff   :  { %5139 = vmatpush.bf16.msrb.mxu3 %v8356_v44  ;;  %v7844_v60 = vor.u32 %v9464_v39, %v7841_v38  ;;  %v15274_v50 = vld [vmem:[#allocation12_spill] sm:$0xff]  ;;  %v4765_v48 = vadd.f32 %v14010_v61, %v4736_v3  ;;  %v15279_v39 = vld [vmem:[#allocation17_spill] sm:$0xff]  ;;  %v4767_v38 = vadd.f32 %v14042_v24, %v4738_v10  ;;  %v4712_v61 = vadd.f32 %v14046_v15, %v14144_v21 }
 0x400   :  { %v14110_v5 = vpop.f32.mrf.mxu2  ;;  %5052 = vmatpush.bf16.msrb.mxu0 %v7588_v6  ;;  %v15278_v18 = vld [vmem:[#allocation16_spill] sm:$0xff] }
 0x401   :  { %v14122_v13 = vpop.f32.mrf.mxu1  ;;  %5081 = vmatpush.bf16.msrb.mxu1 %v7844_v60  ;;  %v4794_v53 = vadd.f32 %v14012_v51, %v4765_v48  ;;  %v15280_v60 = vld [vmem:[#allocation18_spill] sm:$0xff]  ;;  %v4741_v11 = vadd.f32 %v14048_v22, %v4712_v61 }
 0x402   :  { %5005 = vmatmul.bf16.gmra.mxu2 %v15273_v16  ;;  %v4796_v16 = vadd.f32 %v14044_v30, %v4767_v38 }
 0x403   :  { %v14118_v14 = vpop.f32.mrf.mxu3  ;;  %v4770_v15 = vadd.f32 %v14078_v43, %v4741_v11 }
 0x404   :  { %4976 = vmatmul.bf16.gmra.mxu1 %v15272_v37 }
 0x405   :  { %v4799_v29 = vadd.f32 %v14080_v62, %v4770_v15 }
 0x406   :  { %v14120_v36 = vpop.f32.mrf.mxu0 }
 0x408   :  { %5034 = vmatmul.bf16.gmra.mxu3 %v15274_v50  ;;  %v14128_v4 = vpop.f32.mrf.mxu2 }
 0x409   :  { %4947 = vmatmul.bf16.gmra.mxu0 %v15271_v0  ;;  %v14134_v59 = vpop.f32.mrf.mxu1  ;;  %v15282_v0 = vld [vmem:[#allocation20_spill] sm:$0xff] }
 0x40b   :  { %v14130_v9 = vpop.f32.mrf.mxu3 }
 0x40e   :  { %v14132_v63 = vpop.f32.mrf.mxu0 }
 0x410   :  { %v14136_v23 = vpop.f32.mrf.mxu2 }
 0x411   :  { %v14150_v52 = vpop.f32.mrf.mxu1 }
 0x412   :  { %5010 = vmatmul.bf16.gmra.mxu2 %v15277_v41 }
 0x413   :  { %v14146_v31 = vpop.f32.mrf.mxu3 }
 0x414   :  { %4981 = vmatmul.bf16.gmra.mxu1 %v15276_v55 }
 0x416   :  { %v14148_v20 = vpop.f32.mrf.mxu0 }
 0x418   :  { %5039 = vmatmul.bf16.gmra.mxu3 %v15278_v18  ;;  %v14158_v2 = vpop.f32.mrf.mxu2  ;;  %v4714_v18 = vadd.f32 %v14082_v42, %v14144_v21 }
 0x419   :  { %4952 = vmatmul.bf16.gmra.mxu0 %v15275_v40  ;;  %v14165_v12 = vpop.f32.mrf.mxu1 }
 0x41b   :  { %v14161_v8 = vpop.f32.mrf.mxu3 }
 0x41e   :  { %v14163_v1 = vpop.f32.mrf.mxu0 }
 0x420   :  { %v14170_v56 = vpop.f32.mrf.mxu2 }
 0x421   :  { %v4851_v6 = vpop.f32.mrf.mxu1 }
 0x422   :  { %5111 = vmatmul.bf16.vlgmr.msrb.gmra.mxu2 %v15281_v19 }
 0x423   :  { %v14173_v54 = vpop.f32.mrf.mxu3 }
 0x424   :  { %5082 = vmatmul.bf16.vlgmr.msrb.gmra.mxu1 %v15280_v60 }
 0x426   :  { %v4822_v57 = vpop.f32.mrf.mxu0 }
 0x427   :  { %v4823_v44 = vadd.f32 %v4822_v57, %v4794_v53 }
 0x428   :  { %5140 = vmatmul.bf16.vlgmr.msrb.gmra.mxu3 %v15282_v0  ;;  %v4880_v37 = vpop.f32.mrf.mxu2 }
 0x429   :  { %5053 = vmatmul.bf16.vlgmr.msrb.gmra.mxu0 %v15279_v39  ;;  %v4852_v51 = vadd.f32 %v4851_v6, %v4823_v44  ;;  %v4853_v55 = vpop.f32.mrf.mxu1  ;;  %v4743_v6 = vadd.f32 %v14084_v58, %v4714_v18  ;;  %v4717_v39 = vadd.f32 %v14120_v36, %v14144_v21 }
 0x42b   :  { %v4881_v50 = vadd.f32 %v4880_v37, %v4852_v51  ;;  %v4909_v40 = vpop.f32.mrf.mxu3  ;;  %v4772_v43 = vadd.f32 %v14110_v5, %v4743_v6  ;;  %v4746_v38 = vadd.f32 %v14122_v13, %v4717_v39 }
 0x42d   :  { %v4910_v24 = vadd.f32 %v4909_v40, %v4881_v50  ;;  %v4801_v58 = vadd.f32 %v14118_v14, %v4772_v43  ;;  %v4775_v36 = vadd.f32 %v14128_v4, %v4746_v38 }
 0x42e   :  { %v4824_v17 = vpop.f32.mrf.mxu0 }
 0x42f   :  { %v4825_v41 = vadd.f32 %v4824_v17, %v4796_v16  ;;  %5167 = vst [vmem:[#allocation2 + $0x30] sm:$0xff] %v4910_v24  ;;  %v4804_v51 = vadd.f32 %v14130_v9, %v4775_v36  ;;  %v4722_v17 = vadd.f32 %v14148_v20, %v14144_v21 }
 0x430   :  { %v4882_v48 = vpop.f32.mrf.mxu2 }
 0x431   :  { %v4854_v3 = vadd.f32 %v4853_v55, %v4825_v41  ;;  %v4856_v22 = vpop.f32.mrf.mxu1  ;;  %v4751_v55 = vadd.f32 %v14150_v52, %v4722_v17 }
 0x432   :  { %5116 = vmatmul.bf16.gmra.mxu2 %v10607_v47 }
 0x433   :  { %v4883_v53 = vadd.f32 %v4882_v48, %v4854_v3  ;;  %v4911_v30 = vpop.f32.mrf.mxu3  ;;  %v4780_v20 = vadd.f32 %v14158_v2, %v4751_v55 }
 0x434   :  { %5087 = vmatmul.bf16.gmra.mxu1 %v10605_v46  ;;  %v4719_v46 = vadd.f32 %v14132_v63, %v14144_v21 }
 0x435   :  { %v4912_v10 = vadd.f32 %v4911_v30, %v4883_v53  ;;  %v4809_v3 = vadd.f32 %v14161_v8, %v4780_v20 }
 0x436   :  { %v4827_v57 = vpop.f32.mrf.mxu0  ;;  %v4748_v11 = vadd.f32 %v14134_v59, %v4719_v46 }
 0x437   :  { %v4828_v44 = vadd.f32 %v4827_v57, %v4799_v29  ;;  %5175 = vst [vmem:[#allocation2 + $0x70] sm:$0xff] %v4912_v10 }
 0x438   :  { %5145 = vmatmul.bf16.gmra.mxu3 %v10609_v49  ;;  %v4885_v42 = vpop.f32.mrf.mxu2  ;;  %v4777_v4 = vadd.f32 %v14136_v23, %v4748_v11 }
 0x439   :  { %5058 = vmatmul.bf16.gmra.mxu0 %v10603_v45  ;;  %v4857_v62 = vadd.f32 %v4856_v22, %v4828_v44  ;;  %v4858_v5 = vpop.f32.mrf.mxu1 }
 0x43a   :  { %v4806_v59 = vadd.f32 %v14146_v31, %v4777_v4 }
 0x43b   :  { %v4886_v61 = vadd.f32 %v4885_v42, %v4857_v62  ;;  %v4914_v45 = vpop.f32.mrf.mxu3 }
 0x43d   :  { %v4915_v19 = vadd.f32 %v4914_v45, %v4886_v61 }
 0x43e   :  { %v4829_v60 = vpop.f32.mrf.mxu0 }
 0x43f   :  { %v4830_v0 = vadd.f32 %v4829_v60, %v4801_v58  ;;  %5183 = vst [vmem:[#allocation2 + $0xb0] sm:$0xff] %v4915_v19 }
 0x440   :  { %v4887_v49 = vpop.f32.mrf.mxu2 }
 0x441   :  { %v4859_v47 = vadd.f32 %v4858_v5, %v4830_v0  ;;  %v4861_v13 = vpop.f32.mrf.mxu1 }
 0x442   :  { %5121 = vmatmul.bf16.gmra.mxu2 %v10691_v34 }
 0x443   :  { %v4888_v37 = vadd.f32 %v4887_v49, %v4859_v47  ;;  %v4916_v14 = vpop.f32.mrf.mxu3 }
 0x444   :  { %5092 = vmatmul.bf16.gmra.mxu1 %v10689_v33  ;;  %v4724_v33 = vadd.f32 %v14163_v1, %v14144_v21 }
 0x445   :  { %v4917_v50 = vadd.f32 %v4916_v14, %v4888_v37 }
 0x446   :  { %v4832_v16 = vpop.f32.mrf.mxu0  ;;  %v4753_v53 = vadd.f32 %v14165_v12, %v4724_v33 }
 0x447   :  { %v4833_v40 = vadd.f32 %v4832_v16, %v4804_v51  ;;  %5191 = vst [vmem:[#allocation2 + $0xf0] sm:$0xff] %v4917_v50 }
 0x448   :  { %5150 = vmatmul.bf16.gmra.mxu3 %v10693_v35  ;;  %v4890_v63 = vpop.f32.mrf.mxu2  ;;  %v4782_v2 = vadd.f32 %v14170_v56, %v4753_v53 }
 0x449   :  { %5063 = vmatmul.bf16.gmra.mxu0 %v10687_v32  ;;  %v4862_v9 = vadd.f32 %v4861_v13, %v4833_v40  ;;  %v4863_v23 = vpop.f32.mrf.mxu1  ;;  %v14231_v40 = vperm.slane %v14141_v7, 7 }
 0x44a   :  { %v4811_v1 = vadd.f32 %v14173_v54, %v4782_v2 }
 0x44b   :  { %v4891_v24 = vadd.f32 %v4890_v63, %v4862_v9  ;;  %v4919_v32 = vpop.f32.mrf.mxu3 }
 0x44d   :  { %v4920_v15 = vadd.f32 %v4919_v32, %v4891_v24 }
 0x44e   :  { %v4834_v41 = vpop.f32.mrf.mxu0 }
 0x44f   :  { %v4835_v18 = vadd.f32 %v4834_v41, %v4806_v59  ;;  %5199 = vst [vmem:[#allocation2 + $0x130] sm:$0xff] %v4920_v15 }
 0x450   :  { %v4892_v35 = vpop.f32.mrf.mxu2 }
 0x451   :  { %v4864_v34 = vadd.f32 %v4863_v23, %v4835_v18  ;;  %v4866_v52 = vpop.f32.mrf.mxu1 }
 0x452   :  { %5126 = vmatmul.bf16.gmra.mxu2 %v10769_v27 }
 0x453   :  { %v4893_v48 = vadd.f32 %v4892_v35, %v4864_v34  ;;  %v4921_v31 = vpop.f32.mrf.mxu3 }
 0x454   :  { %5097 = vmatmul.bf16.gmra.mxu1 %v10767_v26 }
 0x455   :  { %v4922_v30 = vadd.f32 %v4921_v31, %v4893_v48 }
 0x456   :  { %v4837_v29 = vpop.f32.mrf.mxu0 }
 0x457   :  { %v4838_v57 = vadd.f32 %v4837_v29, %v4809_v3  ;;  %5207 = vst [vmem:[#allocation2 + $0x170] sm:$0xff] %v4922_v30 }
 0x458   :  { %5155 = vmatmul.bf16.gmra.mxu3 %v10771_v28  ;;  %v4895_v8 = vpop.f32.mrf.mxu2 }
 0x459   :  { %5068 = vmatmul.bf16.gmra.mxu0 %v10765_v25  ;;  %v4867_v21 = vadd.f32 %v4866_v52, %v4838_v57  ;;  %v4868_v10 = vpop.f32.mrf.mxu1 }
 0x45b   :  { %v4896_v22 = vadd.f32 %v4895_v8, %v4867_v21  ;;  %v4924_v6 = vpop.f32.mrf.mxu3 }
 0x45d   :  { %v4925_v44 = vadd.f32 %v4924_v6, %v4896_v22 }
 0x45e   :  { %v4839_v12 = vpop.f32.mrf.mxu0 }
 0x45f   :  { %v4840_v43 = vadd.f32 %v4839_v12, %v4811_v1  ;;  %5215 = vst [vmem:[#allocation2 + $0x1b0] sm:$0xff] %v4925_v44 }
 0x460   :  { %v4897_v56 = vpop.f32.mrf.mxu2 }
 0x461   :  { %v4869_v25 = vadd.f32 %v4868_v10, %v4840_v43  ;;  %v4967_v42 = vpop.f32.mrf.mxu1 }
 0x463   :  { %v4898_v39 = vadd.f32 %v4897_v56, %v4869_v25  ;;  %v4926_v62 = vpop.f32.mrf.mxu3 }
 0x465   :  { %v4927_v27 = vadd.f32 %v4926_v62, %v4898_v39 }
 0x466   :  { %v4938_v26 = vpop.f32.mrf.mxu0 }
 0x467   :  { %5223 = vst [vmem:[#allocation2 + $0x1f0] sm:$0xff] %v4927_v27  ;;  %v4939_v63 = vadd.f32 %v4938_v26, %v14231_v40 }
 0x468   :  { %v4996_v28 = vpop.f32.mrf.mxu2 }
 0x469   :  { %v4969_v61 = vpop.f32.mrf.mxu1  ;;  %v4968_v55 = vadd.f32 %v4967_v42, %v4939_v63 }
 0x46b   :  { %v5025_v58 = vpop.f32.mrf.mxu3  ;;  %v4997_v23 = vadd.f32 %v4996_v28, %v4968_v55 }
 0x46d   :  { %v5026_v18 = vadd.f32 %v5025_v58, %v4997_v23 }
 0x46e   :  { %v4940_v38 = vpop.f32.mrf.mxu0 }
 0x46f   :  { %v4941_v7 = vadd.f32 %v4940_v38, %v14231_v40 }
 0x470   :  { %v4998_v54 = vpop.f32.mrf.mxu2 }
 0x471   :  { %v4972_v5 = vpop.f32.mrf.mxu1  ;;  %v4970_v35 = vadd.f32 %v4969_v61, %v4941_v7 }
 0x473   :  { %v5027_v45 = vpop.f32.mrf.mxu3  ;;  %v4999_v48 = vadd.f32 %v4998_v54, %v4970_v35 }
 0x475   :  { %v5028_v53 = vadd.f32 %v5027_v45, %v4999_v48 }
 0x476   :  { %v4943_v60 = vpop.f32.mrf.mxu0 }
 0x477   :  { %v4944_v31 = vadd.f32 %v4943_v60, %v14231_v40 }
 0x478   :  { %v5001_v19 = vpop.f32.mrf.mxu2 }
 0x479   :  { %v4974_v46 = vpop.f32.mrf.mxu1  ;;  %v4973_v30 = vadd.f32 %v4972_v5, %v4944_v31 }
 0x47b   :  { %v5030_v0 = vpop.f32.mrf.mxu3  ;;  %v5002_v6 = vadd.f32 %v5001_v19, %v4973_v30 }
 0x47d   :  { %v5031_v43 = vadd.f32 %v5030_v0, %v5002_v6 }
 0x47e   :  { %v4945_v36 = vpop.f32.mrf.mxu0 }
 0x47f   :  { %v4946_v12 = vadd.f32 %v4945_v36, %v14231_v40 }
 0x480   :  { %v5003_v47 = vpop.f32.mrf.mxu2 }
 0x481   :  { %v4977_v37 = vpop.f32.mrf.mxu1  ;;  %v4975_v26 = vadd.f32 %v4974_v46, %v4946_v12 }
 0x483   :  { %v5032_v49 = vpop.f32.mrf.mxu3  ;;  %v5004_v28 = vadd.f32 %v5003_v47, %v4975_v26 }
 0x485   :  { %v5033_v54 = vadd.f32 %v5032_v49, %v5004_v28 }
 0x486   :  { %v4948_v51 = vpop.f32.mrf.mxu0 }
 0x487   :  { %v4949_v58 = vadd.f32 %v4948_v51, %v14231_v40 }
 0x488   :  { %v5006_v14 = vpop.f32.mrf.mxu2 }
 0x489   :  { %v14226_v11 = vpop.f32.mrf.mxu1  ;;  %v4978_v45 = vadd.f32 %v4977_v37, %v4949_v58 }
 0x48b   :  { %v14224_v16 = vpop.f32.mrf.mxu3  ;;  %v5007_v55 = vadd.f32 %v5006_v14, %v4978_v45 }
 0x48d   :  { %v5036_v47 = vadd.f32 %v14224_v16, %v5007_v55  ;;  %v5226_v16 = vld [vmem:[%s15140_s4 + $0x8] sm:$0xff] }
 0x48e   :  { %v4950_v13 = vpop.f32.mrf.mxu0  ;;  %5228 = vst [vmem:[#allocation3 + $0x8] sm:$0xff] %v5226_v16 }
 0x48f   :  { %v4951_v46 = vadd.f32 %v4950_v13, %v14231_v40  ;;  %v5225_v13 = vld [vmem:[%s15140_s4] sm:$0xff]  ;;  %s14283_s4 = smov 0  }
 0x490   :  { %v14228_v50 = vpop.f32.mrf.mxu2  ;;  %5227 = vst [vmem:[#allocation3] sm:$0xff] %v5225_v13 }
 0x491   :  { %v14237_v9 = vpop.f32.mrf.mxu1  ;;  %v4980_v49 = vadd.f32 %v14226_v11, %v4951_v46  ;;  %v5229_v11 = vld [vmem:[%s15141_s5] sm:$0xff] }
 0x492   :  { %5231 = vst [vmem:[#allocation4 + $0x8] sm:$0xff] %v5229_v11 }
 0x493   :  { %v14233_v4 = vpop.f32.mrf.mxu3 }
 0x496   :  { %v14235_v17 = vpop.f32.mrf.mxu0 }
 0x497   :  { %v4954_v14 = vadd.f32 %v14235_v17, %v14231_v40 }
 0x498   :  { %v14240_v59 = vpop.f32.mrf.mxu2 }
 0x499   :  { %v14246_v41 = vpop.f32.mrf.mxu1 }
 0x49b   :  { %v14242_v24 = vpop.f32.mrf.mxu3 }
 0x49e   :  { %v14244_v32 = vpop.f32.mrf.mxu0 }
 0x4a0   :  { %v14249_v15 = vpop.f32.mrf.mxu2 }
 0x4a1   :  { %v5083_v34 = vpop.f32.mrf.mxu1 }
 0x4a3   :  { %v14251_v20 = vpop.f32.mrf.mxu3 }
 0x4a6   :  { %v5054_v33 = vpop.f32.mrf.mxu0 }
 0x4a7   :  { %v5055_v3 = vadd.f32 %v5054_v33, %v5026_v18 }
 0x4a8   :  { %v5112_v52 = vpop.f32.mrf.mxu2 }
 0x4a9   :  { %v5084_v29 = vadd.f32 %v5083_v34, %v5055_v3  ;;  %v5085_v8 = vpop.f32.mrf.mxu1  ;;  %v5009_v3 = vadd.f32 %v14228_v50, %v4980_v49  ;;  %v5230_v50 = vld [vmem:[%s15141_s5 + $0x8] sm:$0xff] }
 0x4aa   :  { %5232 = vst [vmem:[#allocation4] sm:$0xff] %v5230_v50 }
 0x4ab   :  { %v5113_v57 = vadd.f32 %v5112_v52, %v5084_v29  ;;  %v5141_v2 = vpop.f32.mrf.mxu3  ;;  %v5038_v31 = vadd.f32 %v14233_v4, %v5009_v3  ;;  %v4983_v29 = vadd.f32 %v14237_v9, %v4954_v14 }
 0x4ad   :  { %v5142_v1 = vadd.f32 %v5141_v2, %v5113_v57 }
 0x4ae   :  { %v5056_v21 = vpop.f32.mrf.mxu0 }
 0x4af   :  { %v5057_v22 = vadd.f32 %v5056_v21, %v5028_v53  ;;  %5168 = vst [vmem:[#allocation2 + $0x38] sm:$0xff] %v5142_v1  ;;  %v4956_v1 = vadd.f32 %v14244_v32, %v14231_v40 }
 0x4b0   :  { %v5114_v44 = vpop.f32.mrf.mxu2 }
 0x4b1   :  { %v5086_v10 = vadd.f32 %v5085_v8, %v5057_v22  ;;  %v5088_v62 = vpop.f32.mrf.mxu1  ;;  %v5012_v8 = vadd.f32 %v14240_v59, %v4983_v29 }
 0x4b3   :  { %v5115_v25 = vadd.f32 %v5114_v44, %v5086_v10  ;;  %v5143_v56 = vpop.f32.mrf.mxu3  ;;  %v5041_v12 = vadd.f32 %v14242_v24, %v5012_v8  ;;  %v4985_v44 = vadd.f32 %v14246_v41, %v4956_v1 }
 0x4b5   :  { %v5144_v42 = vadd.f32 %v5143_v56, %v5115_v25 }
 0x4b6   :  { %v5059_v39 = vpop.f32.mrf.mxu0 }
 0x4b7   :  { %v5060_v27 = vadd.f32 %v5059_v39, %v5031_v43  ;;  %5176 = vst [vmem:[#allocation2 + $0x78] sm:$0xff] %v5144_v42  ;;  %v5014_v39 = vadd.f32 %v14249_v15, %v4985_v44 }
 0x4b8   :  { %v5117_v61 = vpop.f32.mrf.mxu2 }
 0x4b9   :  { %v5089_v38 = vadd.f32 %v5088_v62, %v5060_v27  ;;  %v5090_v36 = vpop.f32.mrf.mxu1  ;;  %v5043_v26 = vadd.f32 %v14251_v20, %v5014_v39 }
 0x4bb   :  { %v5118_v60 = vadd.f32 %v5117_v61, %v5089_v38  ;;  %v5146_v5 = vpop.f32.mrf.mxu3 }
 0x4bd   :  { %v5147_v0 = vadd.f32 %v5146_v5, %v5118_v60 }
 0x4be   :  { %v5061_v19 = vpop.f32.mrf.mxu0 }
 0x4bf   :  { %v5062_v63 = vadd.f32 %v5061_v19, %v5033_v54  ;;  %5184 = vst [vmem:[#allocation2 + $0xb8] sm:$0xff] %v5147_v0 }
 0x4c0   :  { %v5119_v7 = vpop.f32.mrf.mxu2 }
 0x4c1   :  { %v5091_v23 = vadd.f32 %v5090_v36, %v5062_v63  ;;  %v5093_v34 = vpop.f32.mrf.mxu1 }
 0x4c3   :  { %v5120_v51 = vadd.f32 %v5119_v7, %v5091_v23  ;;  %v5148_v18 = vpop.f32.mrf.mxu3 }
 0x4c5   :  { %v5149_v37 = vadd.f32 %v5148_v18, %v5120_v51 }
 0x4c6   :  { %v5064_v33 = vpop.f32.mrf.mxu0 }
 0x4c7   :  { %v5065_v35 = vadd.f32 %v5064_v33, %v5036_v47  ;;  %5192 = vst [vmem:[#allocation2 + $0xf8] sm:$0xff] %v5149_v37 }
 0x4c8   :  { %v5122_v17 = vpop.f32.mrf.mxu2 }
 0x4c9   :  { %v5094_v48 = vadd.f32 %v5093_v34, %v5065_v35  ;;  %v5095_v57 = vpop.f32.mrf.mxu1 }
 0x4cb   :  { %v5123_v52 = vadd.f32 %v5122_v17, %v5094_v48  ;;  %v5151_v53 = vpop.f32.mrf.mxu3 }
 0x4cd   :  { %v5152_v2 = vadd.f32 %v5151_v53, %v5123_v52 }
 0x4ce   :  { %v5066_v30 = vpop.f32.mrf.mxu0 }
 0x4cf   :  { %v5067_v21 = vadd.f32 %v5066_v30, %v5038_v31  ;;  %5200 = vst [vmem:[#allocation2 + $0x138] sm:$0xff] %v5152_v2 }
 0x4d0   :  { %v5124_v6 = vpop.f32.mrf.mxu2 }
 0x4d1   :  { %v5096_v22 = vadd.f32 %v5095_v57, %v5067_v21  ;;  %v5098_v56 = vpop.f32.mrf.mxu1 }
 0x4d3   :  { %v5125_v4 = vadd.f32 %v5124_v6, %v5096_v22  ;;  %v5153_v10 = vpop.f32.mrf.mxu3 }
 0x4d5   :  { %v5154_v43 = vadd.f32 %v5153_v10, %v5125_v4 }
 0x4d6   :  { %v5069_v9 = vpop.f32.mrf.mxu0 }
 0x4d7   :  { %v5070_v25 = vadd.f32 %v5069_v9, %v5041_v12  ;;  %5208 = vst [vmem:[#allocation2 + $0x178] sm:$0xff] %v5154_v43 }
 0x4d8   :  { %v5127_v62 = vpop.f32.mrf.mxu2 }
 0x4d9   :  { %v5099_v59 = vadd.f32 %v5098_v56, %v5070_v25  ;;  %v5100_v28 = vpop.f32.mrf.mxu1 }
 0x4db   :  { %v5128_v40 = vadd.f32 %v5127_v62, %v5099_v59  ;;  %v5156_v32 = vpop.f32.mrf.mxu3 }
 0x4dd   :  { %v5157_v27 = vadd.f32 %v5156_v32, %v5128_v40 }
 0x4de   :  { %v5071_v42 = vpop.f32.mrf.mxu0 }
 0x4df   :  { %v5072_v24 = vadd.f32 %v5071_v42, %v5043_v26  ;;  %5216 = vst [vmem:[#allocation2 + $0x1b8] sm:$0xff] %v5157_v27 }
 0x4e0   :  { %v5129_v38 = vpop.f32.mrf.mxu2 }
 0x4e1   :  { %v5101_v58 = vadd.f32 %v5100_v28, %v5072_v24 }
 0x4e3   :  { %v5130_v41 = vadd.f32 %v5129_v38, %v5101_v58  ;;  %v5158_v61 = vpop.f32.mrf.mxu3 }
 0x4e5   :  { %v5159_v54 = vadd.f32 %v5158_v61, %v5130_v41 }
 0x4e7   :  { %5224 = vst [vmem:[#allocation2 + $0x1f8] sm:$0xff] %v5159_v54 }
 0x4e8 LB: > { %v8809_v15 = vld [vmem:[%s15136_s2 + $0x1c0] sm:$0xf]  ;;  %v9709_v19 = vld [vmem:[%s15136_s2 + $0x1c4] sm:$0xf]  ;;  %s8581_s15 = sshll.u32 %s9834_s4, 3  ;;  %s5240_s19 = ssub.s32 7, %s9834_s4  ;;  %s9834_s4 = sphi %s14283_s4, %s5238_s4  }
 0x4e9   : > { %v9713_v20 = vld [vmem:[%s15136_s2 + $0x1dc] sm:$0xf0]  ;;  %v8811_v36 = vld [vmem:[%s15136_s2 + $0x1e0] sm:$0xf0]  ;;  %s15077_s16 = sshra.s32 %s8581_s15, 3  ;;  %s15100_s20 = sshll.u32 %s5240_s19, 3 }
 0x4ea   : > { %v9065_v45 = vld [vmem:[%s15136_s2 + $0x3c0] sm:$0xf]  ;;  %v8810_v60 = vor.u32 %v9713_v20, %v8809_v15  ;;  %v8814_v63 = vor.u32 %v9709_v19, %v8811_v36  ;;  %v9773_v55 = vld [vmem:[%s15136_s2 + $0x3c4] sm:$0xf]  ;;  %s9781_s17 = sshll.u32 %s15077_s16, 6  ;;  %s6235_s21 = sshra.s32 %s15100_s20, 3 }
 0x4eb   : > { %v9777_v5 = vld [vmem:[%s15136_s2 + $0x3dc] sm:$0xf0]  ;;  %v9067_v46 = vld [vmem:[%s15136_s2 + $0x3e0] sm:$0xf0]  ;;  %s15080_s18 = scalar_lea.vmem [#allocation2], %s9781_s17  ;;  %s9782_s22 = sshll.u32 %s6235_s21, 6 }
 0x4ec   : > { %v9066_v0 = vor.u32 %v9777_v5, %v9065_v45  ;;  %v8777_v23 = vld [vmem:[%s15136_s2 + $0x180] sm:$0xf]  ;;  %6014 = vmatpush.bf16.msra.mxu0 %v8810_v60  ;;  %v9070_v7 = vor.u32 %v9773_v55, %v9067_v46  ;;  %6040 = vmatpush.bf16.msra.mxu2 %v8814_v63  ;;  %v9701_v49 = vld [vmem:[%s15136_s2 + $0x184] sm:$0xf]  ;;  %s9783_s23 = sshll.u32 %s15077_s16, 4  ;;  %s15106_s24 = scalar_lea.vmem [#allocation2], %s9782_s22 }
 0x4ed   : > { %v9705_v47 = vld [vmem:[%s15136_s2 + $0x19c] sm:$0xf0]  ;;  %v8779_v37 = vld [vmem:[%s15136_s2 + $0x1a0] sm:$0xf0]  ;;  %s6382_s3 = scalar_lea.vmem %s15137_s6, %s9783_s23  ;;  %s9784_s26 = sshll.u32 %s6235_s21, 4 }
 0x4ee   : > { %v9033_v51 = vld [vmem:[%s15136_s2 + $0x380] sm:$0xf]  ;;  %6027 = vmatpush.bf16.msra.mxu1 %v9066_v0  ;;  %v8778_v33 = vor.u32 %v9705_v47, %v8777_v23  ;;  %v9765_v35 = vld [vmem:[%s15136_s2 + $0x384] sm:$0xf]  ;;  %6053 = vmatpush.bf16.msra.mxu3 %v9070_v7  ;;  %v8782_v3 = vor.u32 %v9701_v49, %v8779_v37  ;;  %s6386_s29 = scalar_lea.vmem %s15137_s6, %s9784_s26  ;;  %s5238_s4 = sadd.s32 1, %s9834_s4  }
 0x4ef   : > { %v9769_v18 = vld [vmem:[%s15136_s2 + $0x39c] sm:$0xf0]  ;;  %v9035_v14 = vld [vmem:[%s15136_s2 + $0x3a0] sm:$0xf0]  ;;  %p5235_p0 = scmp.ge.s32.totalorder %s5238_s4, 8  }
 0x4f0   : > { %v9034_v34 = vor.u32 %v9769_v18, %v9033_v51  ;;  %v8745_v13 = vld [vmem:[%s15136_s2 + $0x140] sm:$0xf]  ;;  %v9038_v11 = vor.u32 %v9765_v35, %v9035_v14  ;;  %v9693_v17 = vld [vmem:[%s15136_s2 + $0x144] sm:$0xf]  ;;  %6015 = vmatpush.bf16.msra.mxu0 %v8778_v33  ;;  %6041 = vmatpush.bf16.msra.mxu2 %v8782_v3 }
 0x4f1   : > { %v9697_v16 = vld [vmem:[%s15136_s2 + $0x15c] sm:$0xf0]  ;;  %v8747_v29 = vld [vmem:[%s15136_s2 + $0x160] sm:$0xf0] }
 0x4f2   : > { %v9001_v50 = vld [vmem:[%s15136_s2 + $0x340] sm:$0xf]  ;;  %v8746_v31 = vor.u32 %v9697_v16, %v8745_v13  ;;  %v9757_v52 = vld [vmem:[%s15136_s2 + $0x344] sm:$0xf]  ;;  %6028 = vmatpush.bf16.msra.mxu1 %v9034_v34  ;;  %v8750_v57 = vor.u32 %v9693_v17, %v8747_v29  ;;  %6054 = vmatpush.bf16.msra.mxu3 %v9038_v11  ;;  %v8817_v17 = vld [vmem:[%s15136_s2 + $0x1c8] sm:$0xf] }
 0x4f3   : > { %v9761_v48 = vld [vmem:[%s15136_s2 + $0x35c] sm:$0xf0]  ;;  %v9003_v53 = vld [vmem:[%s15136_s2 + $0x360] sm:$0xf0]  ;;  %v9073_v29 = vld [vmem:[%s15136_s2 + $0x3c8] sm:$0xf] }
 0x4f4   : > { %v9002_v30 = vor.u32 %v9761_v48, %v9001_v50  ;;  %v8713_v2 = vld [vmem:[%s15136_s2 + $0x100] sm:$0xf]  ;;  %v9006_v1 = vor.u32 %v9757_v52, %v9003_v53  ;;  %v9685_v6 = vld [vmem:[%s15136_s2 + $0x104] sm:$0xf]  ;;  %6016 = vmatpush.bf16.msra.mxu0 %v8746_v31  ;;  %6042 = vmatpush.bf16.msra.mxu2 %v8750_v57  ;;  %v9714_v31 = vld [vmem:[%s15136_s2 + $0x1e4] sm:$0xf0] }
 0x4f5   : > { %v9689_v21 = vld [vmem:[%s15136_s2 + $0x11c] sm:$0xf0]  ;;  %v8715_v12 = vld [vmem:[%s15136_s2 + $0x120] sm:$0xf0]  ;;  %v9778_v53 = vld [vmem:[%s15136_s2 + $0x3e4] sm:$0xf0] }
 0x4f6   : > { %v8969_v8 = vld [vmem:[%s15136_s2 + $0x300] sm:$0xf]  ;;  %v9749_v4 = vld [vmem:[%s15136_s2 + $0x304] sm:$0xf]  ;;  %v8714_v9 = vor.u32 %v9689_v21, %v8713_v2  ;;  %6029 = vmatpush.bf16.msra.mxu1 %v9002_v30  ;;  %v8718_v43 = vor.u32 %v9685_v6, %v8715_v12  ;;  %6055 = vmatpush.bf16.msra.mxu3 %v9006_v1  ;;  %v9710_v30 = vld [vmem:[%s15136_s2 + $0x1cc] sm:$0xf]  ;;  %v8818_v6 = vor.u32 %v9714_v31, %v8817_v17 }
 0x4f7   : > { %v9753_v22 = vld [vmem:[%s15136_s2 + $0x31c] sm:$0xf0]  ;;  %v8971_v10 = vld [vmem:[%s15136_s2 + $0x320] sm:$0xf0]  ;;  %v8819_v57 = vld [vmem:[%s15136_s2 + $0x1e8] sm:$0xf0] }
 0x4f8   : > { %v8970_v44 = vor.u32 %v9753_v22, %v8969_v8  ;;  %v8681_v25 = vld [vmem:[%s15136_s2 + $0xc0] sm:$0xf]  ;;  %v8974_v59 = vor.u32 %v9749_v4, %v8971_v10  ;;  %v9677_v26 = vld [vmem:[%s15136_s2 + $0xc4] sm:$0xf]  ;;  %6017 = vmatpush.bf16.msra.mxu0 %v8714_v9  ;;  %6043 = vmatpush.bf16.msra.mxu2 %v8718_v43  ;;  %v9774_v8 = vld [vmem:[%s15136_s2 + $0x3cc] sm:$0xf]  ;;  %v9074_v10 = vor.u32 %v9778_v53, %v9073_v29 }
 0x4f9   : > { %v9681_v56 = vld [vmem:[%s15136_s2 + $0xdc] sm:$0xf0]  ;;  %v8683_v40 = vld [vmem:[%s15136_s2 + $0xe0] sm:$0xf0]  ;;  %v9075_v1 = vld [vmem:[%s15136_s2 + $0x3e8] sm:$0xf0]  ;;  %v8822_v9 = vor.u32 %v9710_v30, %v8819_v57 }
 0x4fa   : > { %v8937_v39 = vld [vmem:[%s15136_s2 + $0x2c0] sm:$0xf]  ;;  %v9741_v32 = vld [vmem:[%s15136_s2 + $0x2c4] sm:$0xf]  ;;  %v8682_v27 = vor.u32 %v9681_v56, %v8681_v25  ;;  %6030 = vmatpush.bf16.msra.mxu1 %v8970_v44  ;;  %v8686_v28 = vor.u32 %v9677_v26, %v8683_v40  ;;  %6056 = vmatpush.bf16.msra.mxu3 %v8974_v59  ;;  %v5243_v4 = vld [vmem:[#allocation3 + $0x8] sm:$0xff]  ;;  %v9078_v56 = vor.u32 %v9774_v8, %v9075_v1 }
 0x4fb   : > { %v9745_v62 = vld [vmem:[%s15136_s2 + $0x2dc] sm:$0xf0]  ;;  %v8939_v42 = vld [vmem:[%s15136_s2 + $0x2e0] sm:$0xf0]  ;;  %v8785_v44 = vld [vmem:[%s15136_s2 + $0x188] sm:$0xf] }
 0x4fc   : > { %v8938_v24 = vor.u32 %v9745_v62, %v8937_v39  ;;  %v8649_v58 = vld [vmem:[%s15136_s2 + $0x80] sm:$0xf]  ;;  %v8942_v61 = vor.u32 %v9741_v32, %v8939_v42  ;;  %v9669_v15 = vld [vmem:[%s15136_s2 + $0x84] sm:$0xf]  ;;  %6018 = vmatpush.bf16.msra.mxu0 %v8682_v27  ;;  %6044 = vmatpush.bf16.msra.mxu2 %v8686_v28  ;;  %v9706_v43 = vld [vmem:[%s15136_s2 + $0x1a4] sm:$0xf0]  ;;  %v14530_v42 = vpack.c.bf16 %v5243_v4, %v5243_v4 }
 0x4fd   : > { %v9673_v38 = vld [vmem:[%s15136_s2 + $0x9c] sm:$0xf0]  ;;  %v8651_v20 = vld [vmem:[%s15136_s2 + $0xa0] sm:$0xf0]  ;;  %v9041_v25 = vld [vmem:[%s15136_s2 + $0x388] sm:$0xf]  ;;  %v8786_v27 = vor.u32 %v9706_v43, %v8785_v44 }
 0x4fe   : > { %v8905_v41 = vld [vmem:[%s15136_s2 + $0x280] sm:$0xf]  ;;  %v9733_v45 = vld [vmem:[%s15136_s2 + $0x284] sm:$0xf]  ;;  %v8650_v5 = vor.u32 %v9673_v38, %v8649_v58  ;;  %6031 = vmatpush.bf16.msra.mxu1 %v8938_v24  ;;  %v8654_v36 = vor.u32 %v9669_v15, %v8651_v20  ;;  %6057 = vmatpush.bf16.msra.mxu3 %v8942_v61  ;;  %v9770_v39 = vld [vmem:[%s15136_s2 + $0x3a4] sm:$0xf0] }
 0x4ff   : > { %v9737_v54 = vld [vmem:[%s15136_s2 + $0x29c] sm:$0xf0]  ;;  %v8907_v60 = vld [vmem:[%s15136_s2 + $0x2a0] sm:$0xf0]  ;;  %v9702_v59 = vld [vmem:[%s15136_s2 + $0x18c] sm:$0xf]  ;;  %v9042_v24 = vor.u32 %v9770_v39, %v9041_v25 }
 0x500   : > { %v8906_v19 = vor.u32 %v9737_v54, %v8905_v41  ;;  %v8617_v0 = vld [vmem:[%s15136_s2 + $0x40] sm:$0xf]  ;;  %v8910_v46 = vor.u32 %v9733_v45, %v8907_v60  ;;  %v9661_v7 = vld [vmem:[%s15136_s2 + $0x44] sm:$0xf]  ;;  %6019 = vmatpush.bf16.msra.mxu0 %v8650_v5  ;;  %6045 = vmatpush.bf16.msra.mxu2 %v8654_v36  ;;  %v8787_v62 = vld [vmem:[%s15136_s2 + $0x1a8] sm:$0xf0] }
 0x501   : > { %v9665_v63 = vld [vmem:[%s15136_s2 + $0x5c] sm:$0xf0]  ;;  %v8619_v47 = vld [vmem:[%s15136_s2 + $0x60] sm:$0xf0]  ;;  %v9766_v40 = vld [vmem:[%s15136_s2 + $0x38c] sm:$0xf]  ;;  %v8790_v28 = vor.u32 %v9702_v59, %v8787_v62 }
 0x502   : > { %v8873_v55 = vld [vmem:[%s15136_s2 + $0x240] sm:$0xf]  ;;  %v9725_v51 = vld [vmem:[%s15136_s2 + $0x244] sm:$0xf]  ;;  %v8618_v33 = vor.u32 %v9665_v63, %v8617_v0  ;;  %6032 = vmatpush.bf16.msra.mxu1 %v8906_v19  ;;  %v8622_v35 = vor.u32 %v9661_v7, %v8619_v47  ;;  %6058 = vmatpush.bf16.msra.mxu3 %v8910_v46  ;;  %v9043_v32 = vld [vmem:[%s15136_s2 + $0x3a8] sm:$0xf0] }
 0x503   : > { %v9729_v23 = vld [vmem:[%s15136_s2 + $0x25c] sm:$0xf0]  ;;  %v8875_v18 = vld [vmem:[%s15136_s2 + $0x260] sm:$0xf0]  ;;  %v8753_v58 = vld [vmem:[%s15136_s2 + $0x148] sm:$0xf]  ;;  %v9046_v61 = vor.u32 %v9766_v40, %v9043_v32 }
 0x504   : > { %v8585_v34 = vld [vmem:[%s15136_s2] sm:$0xf]  ;;  %v8874_v37 = vor.u32 %v9729_v23, %v8873_v55  ;;  %v9653_v13 = vld [vmem:[%s15136_s2 + $0x4] sm:$0xf]  ;;  %v8878_v16 = vor.u32 %v9725_v51, %v8875_v18  ;;  %6020 = vmatpush.bf16.msra.mxu0 %v8618_v33  ;;  %6046 = vmatpush.bf16.msra.mxu2 %v8622_v35  ;;  %v9698_v38 = vld [vmem:[%s15136_s2 + $0x164] sm:$0xf0] }
 0x505   : > { %v9657_v49 = vld [vmem:[%s15136_s2 + $0x1c] sm:$0xf0]  ;;  %v8587_v11 = vld [vmem:[%s15136_s2 + $0x20] sm:$0xf0]  ;;  %v9009_v41 = vld [vmem:[%s15136_s2 + $0x348] sm:$0xf]  ;;  %v8754_v5 = vor.u32 %v9698_v38, %v8753_v58 }
 0x506   : > { %v8841_v3 = vld [vmem:[%s15136_s2 + $0x200] sm:$0xf]  ;;  %v9717_v50 = vld [vmem:[%s15136_s2 + $0x204] sm:$0xf]  ;;  %v8586_v52 = vor.u32 %v9657_v49, %v8585_v34  ;;  %6033 = vmatpush.bf16.msra.mxu1 %v8874_v37  ;;  %v8590_v21 = vor.u32 %v9653_v13, %v8587_v11  ;;  %6059 = vmatpush.bf16.msra.mxu3 %v8878_v16  ;;  %v9762_v54 = vld [vmem:[%s15136_s2 + $0x364] sm:$0xf0] }
 0x507   : > { %v9721_v14 = vld [vmem:[%s15136_s2 + $0x21c] sm:$0xf0]  ;;  %v8843_v48 = vld [vmem:[%s15136_s2 + $0x220] sm:$0xf0]  ;;  %v9694_v15 = vld [vmem:[%s15136_s2 + $0x14c] sm:$0xf]  ;;  %v9010_v19 = vor.u32 %v9762_v54, %v9009_v41 }
 0x508   : > { %v8842_v2 = vor.u32 %v9721_v14, %v8841_v3  ;;  %v8846_v22 = vor.u32 %v9717_v50, %v8843_v48  ;;  %v5242_v12 = vld [vmem:[#allocation3] sm:$0xff]  ;;  %6021 = vmatpush.bf16.msra.mxu0 %v8586_v52  ;;  %6047 = vmatpush.bf16.msra.mxu2 %v8590_v21  ;;  %v8755_v20 = vld [vmem:[%s15136_s2 + $0x168] sm:$0xf0]  ;;  %v8721_v0 = vld [vmem:[%s15136_s2 + $0x108] sm:$0xf] }
 0x509   : > { %v14522_v26 = vpack.c.bf16 %v5242_v12, %v5242_v12  ;;  %v9758_v45 = vld [vmem:[%s15136_s2 + $0x34c] sm:$0xf]  ;;  %v8758_v36 = vor.u32 %v9694_v15, %v8755_v20  ;;  %v9690_v63 = vld [vmem:[%s15136_s2 + $0x124] sm:$0xf0] }
 0x50a   : > { %6034 = vmatpush.bf16.msra.mxu1 %v8842_v2  ;;  %6060 = vmatpush.bf16.msra.mxu3 %v8846_v22  ;;  %v9011_v60 = vld [vmem:[%s15136_s2 + $0x368] sm:$0xf0]  ;;  %v8977_v55 = vld [vmem:[%s15136_s2 + $0x308] sm:$0xf]  ;;  %v8722_v33 = vor.u32 %v9690_v63, %v8721_v0  ;;  %v9711_v0 = vld [vmem:[%s15136_s2 + $0x1d4] sm:$0xf] }
 0x50b   : > { %6048 = vmatmul.bf16.vlgmr.msra.gmra.mxu2 %v14522_v26  ;;  %6022 = vmatmul.bf16.vlgmr.msra.gmra.mxu0 %v14522_v26  ;;  %v9014_v46 = vor.u32 %v9758_v45, %v9011_v60  ;;  %v9754_v23 = vld [vmem:[%s15136_s2 + $0x324] sm:$0xf0]  ;;  %v9686_v7 = vld [vmem:[%s15136_s2 + $0x10c] sm:$0xf]  ;;  %v8825_v45 = vld [vmem:[%s15136_s2 + $0x1d0] sm:$0xf] }
 0x50c   : > { %6066 = vmatpush.bf16.msrb.mxu0 %v8818_v6  ;;  %6092 = vmatpush.bf16.msrb.mxu2 %v8822_v9  ;;  %v8723_v47 = vld [vmem:[%s15136_s2 + $0x128] sm:$0xf0]  ;;  %v8978_v34 = vor.u32 %v9754_v23, %v8977_v55  ;;  %v8689_v37 = vld [vmem:[%s15136_s2 + $0xc8] sm:$0xf]  ;;  %v9715_v60 = vld [vmem:[%s15136_s2 + $0x1ec] sm:$0xf0] }
 0x50d   : > { %6061 = vmatmul.bf16.vlgmr.msra.gmra.mxu3 %v14530_v42  ;;  %6035 = vmatmul.bf16.vlgmr.msra.gmra.mxu1 %v14530_v42  ;;  %v9750_v51 = vld [vmem:[%s15136_s2 + $0x30c] sm:$0xf]  ;;  %v8726_v49 = vor.u32 %v9686_v7, %v8723_v47  ;;  %v9682_v35 = vld [vmem:[%s15136_s2 + $0xe4] sm:$0xf0]  ;;  %v8827_v63 = vld [vmem:[%s15136_s2 + $0x1f0] sm:$0xf0] }
 0x50e   : > { %6079 = vmatpush.bf16.msrb.mxu1 %v9074_v10  ;;  %6105 = vmatpush.bf16.msrb.mxu3 %v9078_v56  ;;  %v8979_v18 = vld [vmem:[%s15136_s2 + $0x328] sm:$0xf0]  ;;  %v8945_v3 = vld [vmem:[%s15136_s2 + $0x2c8] sm:$0xf]  ;;  %v8690_v17 = vor.u32 %v9682_v35, %v8689_v37  ;;  %v9775_v23 = vld [vmem:[%s15136_s2 + $0x3d4] sm:$0xf] }
 0x50f   : > { %v8982_v14 = vor.u32 %v9750_v51, %v8979_v18  ;;  %v9746_v13 = vld [vmem:[%s15136_s2 + $0x2e4] sm:$0xf0]  ;;  %v9678_v16 = vld [vmem:[%s15136_s2 + $0xcc] sm:$0xf]  ;;  %v9083_v7 = vld [vmem:[%s15136_s2 + $0x3f0] sm:$0xf0]  ;;  %v8826_v51 = vor.u32 %v9715_v60, %v8825_v45 }
 0x510   : > { %6067 = vmatpush.bf16.msrb.mxu0 %v8786_v27  ;;  %6093 = vmatpush.bf16.msrb.mxu2 %v8790_v28  ;;  %v8691_v11 = vld [vmem:[%s15136_s2 + $0xe8] sm:$0xf0]  ;;  %v8946_v31 = vor.u32 %v9746_v13, %v8945_v3  ;;  %v8657_v52 = vld [vmem:[%s15136_s2 + $0x88] sm:$0xf]  ;;  %v9049_v37 = vld [vmem:[%s15136_s2 + $0x390] sm:$0xf]  ;;  %v9086_v35 = vor.u32 %v9775_v23, %v9083_v7 }
 0x511   : > { %v9742_v50 = vld [vmem:[%s15136_s2 + $0x2cc] sm:$0xf]  ;;  %v8694_v29 = vor.u32 %v9678_v16, %v8691_v11  ;;  %v9674_v53 = vld [vmem:[%s15136_s2 + $0xa4] sm:$0xf0]  ;;  %v9771_v3 = vld [vmem:[%s15136_s2 + $0x3ac] sm:$0xf0] }
 0x512   : > { %6080 = vmatpush.bf16.msrb.mxu1 %v9042_v24  ;;  %6106 = vmatpush.bf16.msrb.mxu3 %v9046_v61  ;;  %v8947_v48 = vld [vmem:[%s15136_s2 + $0x2e8] sm:$0xf0]  ;;  %v8913_v30 = vld [vmem:[%s15136_s2 + $0x288] sm:$0xf]  ;;  %v8658_v6 = vor.u32 %v9674_v53, %v8657_v52  ;;  %v8795_v13 = vld [vmem:[%s15136_s2 + $0x1b0] sm:$0xf0] }
 0x513   : > { %v8950_v57 = vor.u32 %v9742_v50, %v8947_v48  ;;  %v9738_v2 = vld [vmem:[%s15136_s2 + $0x2a4] sm:$0xf0]  ;;  %v9670_v21 = vld [vmem:[%s15136_s2 + $0x8c] sm:$0xf]  ;;  %v9767_v16 = vld [vmem:[%s15136_s2 + $0x394] sm:$0xf]  ;;  %v9050_v48 = vor.u32 %v9771_v3, %v9049_v37 }
 0x514   : > { %6068 = vmatpush.bf16.msrb.mxu0 %v8754_v5  ;;  %6094 = vmatpush.bf16.msrb.mxu2 %v8758_v36  ;;  %v8659_v8 = vld [vmem:[%s15136_s2 + $0xa8] sm:$0xf0]  ;;  %v8914_v12 = vor.u32 %v9738_v2, %v8913_v30  ;;  %v8625_v10 = vld [vmem:[%s15136_s2 + $0x48] sm:$0xf]  ;;  %v9081_v5 = vld [vmem:[%s15136_s2 + $0x3d0] sm:$0xf] }
 0x515   : > { %v9734_v1 = vld [vmem:[%s15136_s2 + $0x28c] sm:$0xf]  ;;  %v8662_v4 = vor.u32 %v9670_v21, %v8659_v8  ;;  %v9666_v9 = vld [vmem:[%s15136_s2 + $0x64] sm:$0xf0]  ;;  %v9779_v36 = vld [vmem:[%s15136_s2 + $0x3ec] sm:$0xf0] }
 0x516   : > { %6081 = vmatpush.bf16.msrb.mxu1 %v9010_v19  ;;  %6107 = vmatpush.bf16.msrb.mxu3 %v9014_v46  ;;  %v8915_v22 = vld [vmem:[%s15136_s2 + $0x2a8] sm:$0xf0]  ;;  %v8881_v44 = vld [vmem:[%s15136_s2 + $0x248] sm:$0xf]  ;;  %v8626_v40 = vor.u32 %v9666_v9, %v8625_v10  ;;  %v9082_v18 = vor.u32 %v9779_v36, %v9081_v5  ;;  %v9051_v11 = vld [vmem:[%s15136_s2 + $0x3b0] sm:$0xf0] }
 0x517   : > { %v8918_v43 = vor.u32 %v9734_v1, %v8915_v22  ;;  %v9730_v25 = vld [vmem:[%s15136_s2 + $0x264] sm:$0xf0]  ;;  %v9662_v56 = vld [vmem:[%s15136_s2 + $0x4c] sm:$0xf]  ;;  %v9017_v52 = vld [vmem:[%s15136_s2 + $0x350] sm:$0xf]  ;;  %v9054_v53 = vor.u32 %v9767_v16, %v9051_v11 }
 0x518   : > { %6069 = vmatpush.bf16.msrb.mxu0 %v8722_v33  ;;  %6095 = vmatpush.bf16.msrb.mxu2 %v8726_v49  ;;  %v8627_v39 = vld [vmem:[%s15136_s2 + $0x68] sm:$0xf0]  ;;  %v8593_v32 = vld [vmem:[%s15136_s2 + $0x8] sm:$0xf]  ;;  %v8882_v24 = vor.u32 %v9730_v25, %v8881_v44  ;;  %v8830_v33 = vor.u32 %v9711_v0, %v8827_v63  ;;  %v9707_v49 = vld [vmem:[%s15136_s2 + $0x1ac] sm:$0xf0] }
 0x519   : > { %v9726_v59 = vld [vmem:[%s15136_s2 + $0x24c] sm:$0xf]  ;;  %v9658_v27 = vld [vmem:[%s15136_s2 + $0x24] sm:$0xf0]  ;;  %v8630_v28 = vor.u32 %v9662_v56, %v8627_v39  ;;  %v9763_v30 = vld [vmem:[%s15136_s2 + $0x36c] sm:$0xf0] }
 0x51a   : > { %6082 = vmatpush.bf16.msrb.mxu1 %v8978_v34  ;;  %6108 = vmatpush.bf16.msrb.mxu3 %v8982_v14  ;;  %v8883_v62 = vld [vmem:[%s15136_s2 + $0x268] sm:$0xf0]  ;;  %v8849_v58 = vld [vmem:[%s15136_s2 + $0x208] sm:$0xf]  ;;  %v8594_v19 = vor.u32 %v9658_v27, %v8593_v32  ;;  %v8793_v34 = vld [vmem:[%s15136_s2 + $0x190] sm:$0xf]  ;;  %v9018_v22 = vor.u32 %v9763_v30, %v9017_v52 }
 0x51b   : > { %v9722_v38 = vld [vmem:[%s15136_s2 + $0x224] sm:$0xf0]  ;;  %v9654_v41 = vld [vmem:[%s15136_s2 + $0xc] sm:$0xf]  ;;  %v8886_v61 = vor.u32 %v9726_v59, %v8883_v62  ;;  %v9703_v14 = vld [vmem:[%s15136_s2 + $0x194] sm:$0xf]  ;;  %v8794_v50 = vor.u32 %v9707_v49, %v8793_v34 }
 0x51c   : > { %6070 = vmatpush.bf16.msrb.mxu0 %v8690_v17  ;;  %6096 = vmatpush.bf16.msrb.mxu2 %v8694_v29  ;;  %v8595_v54 = vld [vmem:[%s15136_s2 + $0x28] sm:$0xf0]  ;;  %v8850_v55 = vor.u32 %v9722_v38, %v8849_v58  ;;  %v8798_v17 = vor.u32 %v9703_v14, %v8795_v13  ;;  %v9699_v29 = vld [vmem:[%s15136_s2 + $0x16c] sm:$0xf0]  ;;  %v8763_v2 = vld [vmem:[%s15136_s2 + $0x170] sm:$0xf0] }
 0x51d   : > { %v9718_v15 = vld [vmem:[%s15136_s2 + $0x20c] sm:$0xf]  ;;  %v8598_v46 = vor.u32 %v9654_v41, %v8595_v54  ;;  %v9759_v21 = vld [vmem:[%s15136_s2 + $0x354] sm:$0xf]  ;;  %v8985_v10 = vld [vmem:[%s15136_s2 + $0x310] sm:$0xf] }
 0x51e   : > { %6083 = vmatpush.bf16.msrb.mxu1 %v8946_v31  ;;  %6109 = vmatpush.bf16.msrb.mxu3 %v8950_v57  ;;  %v8851_v20 = vld [vmem:[%s15136_s2 + $0x228] sm:$0xf0]  ;;  %v8761_v31 = vld [vmem:[%s15136_s2 + $0x150] sm:$0xf]  ;;  %v9695_v57 = vld [vmem:[%s15136_s2 + $0x154] sm:$0xf] }
 0x51f   : > { %v8854_v47 = vor.u32 %v9718_v15, %v8851_v20  ;;  %v9019_v8 = vld [vmem:[%s15136_s2 + $0x370] sm:$0xf0]  ;;  %v8762_v1 = vor.u32 %v9699_v29, %v8761_v31  ;;  %v9755_v44 = vld [vmem:[%s15136_s2 + $0x32c] sm:$0xf0] }
 0x520   : > { %6071 = vmatpush.bf16.msrb.mxu0 %v8658_v6  ;;  %6097 = vmatpush.bf16.msrb.mxu2 %v8662_v4  ;;  %v8766_v6 = vor.u32 %v9695_v57, %v8763_v2  ;;  %v9691_v4 = vld [vmem:[%s15136_s2 + $0x12c] sm:$0xf0]  ;;  %v9022_v9 = vor.u32 %v9759_v21, %v9019_v8  ;;  %v8731_v25 = vld [vmem:[%s15136_s2 + $0x130] sm:$0xf0]  ;;  %v8986_v62 = vor.u32 %v9755_v44, %v8985_v10  ;;  %v8833_v21 = vld [vmem:[%s15136_s2 + $0x1d8] sm:$0xf] }
 0x521   : > { %v9751_v56 = vld [vmem:[%s15136_s2 + $0x314] sm:$0xf]  ;;  %v8697_v32 = vld [vmem:[%s15136_s2 + $0xd0] sm:$0xf]  ;;  %v9716_v8 = vld [vmem:[%s15136_s2 + $0x1f4] sm:$0xf0] }
 0x522   : > { %6084 = vmatpush.bf16.msrb.mxu1 %v8914_v12  ;;  %6110 = vmatpush.bf16.msrb.mxu3 %v8918_v43  ;;  %v8729_v12 = vld [vmem:[%s15136_s2 + $0x110] sm:$0xf]  ;;  %v9687_v43 = vld [vmem:[%s15136_s2 + $0x114] sm:$0xf]  ;;  %v9776_v44 = vld [vmem:[%s15136_s2 + $0x3dc] sm:$0xf] }
 0x523   : > { %v8987_v39 = vld [vmem:[%s15136_s2 + $0x330] sm:$0xf0]  ;;  %v8730_v59 = vor.u32 %v9691_v4, %v8729_v12  ;;  %v9683_v27 = vld [vmem:[%s15136_s2 + $0xec] sm:$0xf0]  ;;  %v9712_v12 = vld [vmem:[%s15136_s2 + $0x1dc] sm:$0xf] }
 0x524   : > { %6072 = vmatpush.bf16.msrb.mxu0 %v8626_v40  ;;  %6098 = vmatpush.bf16.msrb.mxu2 %v8630_v28  ;;  %v8734_v40 = vor.u32 %v9687_v43, %v8731_v25  ;;  %v8990_v28 = vor.u32 %v9751_v56, %v8987_v39  ;;  %v9747_v58 = vld [vmem:[%s15136_s2 + $0x2ec] sm:$0xf0]  ;;  %v9679_v38 = vld [vmem:[%s15136_s2 + $0xd4] sm:$0xf]  ;;  %v8698_v15 = vor.u32 %v9683_v27, %v8697_v32  ;;  %v8835_v4 = vld [vmem:[%s15136_s2 + $0x1f8] sm:$0xf0] }
 0x525   : > { %v8699_v41 = vld [vmem:[%s15136_s2 + $0xf0] sm:$0xf0]  ;;  %v8665_v60 = vld [vmem:[%s15136_s2 + $0x90] sm:$0xf]  ;;  %v9091_v43 = vld [vmem:[%s15136_s2 + $0x3f8] sm:$0xf0]  ;;  %v8834_v56 = vor.u32 %v9716_v8, %v8833_v21 }
 0x526   : > { %6085 = vmatpush.bf16.msrb.mxu1 %v8882_v24  ;;  %6111 = vmatpush.bf16.msrb.mxu3 %v8886_v61  ;;  %v8953_v24 = vld [vmem:[%s15136_s2 + $0x2d0] sm:$0xf]  ;;  %v9743_v61 = vld [vmem:[%s15136_s2 + $0x2d4] sm:$0xf]  ;;  %v8702_v45 = vor.u32 %v9679_v38, %v8699_v41  ;;  %v9057_v32 = vld [vmem:[%s15136_s2 + $0x398] sm:$0xf]  ;;  %v9094_v27 = vor.u32 %v9776_v44, %v9091_v43 }
 0x527   : > { %v8955_v54 = vld [vmem:[%s15136_s2 + $0x2f0] sm:$0xf0]  ;;  %v8954_v20 = vor.u32 %v9747_v58, %v8953_v24  ;;  %v9675_v5 = vld [vmem:[%s15136_s2 + $0xac] sm:$0xf0]  ;;  %v9772_v24 = vld [vmem:[%s15136_s2 + $0x3b4] sm:$0xf0] }
 0x528   : > { %6073 = vmatpush.bf16.msrb.mxu0 %v8594_v19  ;;  %6099 = vmatpush.bf16.msrb.mxu2 %v8598_v46  ;;  %v8921_v19 = vld [vmem:[%s15136_s2 + $0x290] sm:$0xf]  ;;  %v8958_v36 = vor.u32 %v9743_v61, %v8955_v54  ;;  %v9671_v63 = vld [vmem:[%s15136_s2 + $0x94] sm:$0xf]  ;;  %v8666_v7 = vor.u32 %v9675_v5, %v8665_v60  ;;  %v8803_v58 = vld [vmem:[%s15136_s2 + $0x1b8] sm:$0xf0]  ;;  %v9058_v54 = vor.u32 %v9772_v24, %v9057_v32 }
 0x529   : > { %v9739_v0 = vld [vmem:[%s15136_s2 + $0x2ac] sm:$0xf0]  ;;  %v9735_v46 = vld [vmem:[%s15136_s2 + $0x294] sm:$0xf]  ;;  %v9768_v38 = vld [vmem:[%s15136_s2 + $0x39c] sm:$0xf] }
 0x52a   : > { %6086 = vmatpush.bf16.msrb.mxu1 %v8850_v55  ;;  %6112 = vmatpush.bf16.msrb.mxu3 %v8854_v47  ;;  %v8667_v55 = vld [vmem:[%s15136_s2 + $0xb0] sm:$0xf0]  ;;  %v8922_v47 = vor.u32 %v9739_v0, %v8921_v19  ;;  %v8889_v34 = vld [vmem:[%s15136_s2 + $0x250] sm:$0xf]  ;;  %v9059_v41 = vld [vmem:[%s15136_s2 + $0x3b8] sm:$0xf0] }
 0x52b   : > { %6074 = vmatmul.bf16.vlgmr.msrb.gmra.mxu0 %v14522_v26  ;;  %6100 = vmatmul.bf16.vlgmr.msrb.gmra.mxu2 %v14522_v26  ;;  %v8923_v23 = vld [vmem:[%s15136_s2 + $0x2b0] sm:$0xf0]  ;;  %v9731_v37 = vld [vmem:[%s15136_s2 + $0x26c] sm:$0xf0]  ;;  %v9025_v60 = vld [vmem:[%s15136_s2 + $0x358] sm:$0xf]  ;;  %v9062_v5 = vor.u32 %v9768_v38, %v9059_v41 }
 0x52c   : > { %6118 = vmatpush.bf16.msra.mxu0 %v8826_v51  ;;  %6144 = vmatpush.bf16.msra.mxu2 %v8830_v33  ;;  %v8670_v51 = vor.u32 %v9671_v63, %v8667_v55  ;;  %v9667_v33 = vld [vmem:[%s15136_s2 + $0x6c] sm:$0xf0]  ;;  %v8926_v49 = vor.u32 %v9735_v46, %v8923_v23  ;;  %v8635_v3 = vld [vmem:[%s15136_s2 + $0x70] sm:$0xf0]  ;;  %v9764_v19 = vld [vmem:[%s15136_s2 + $0x374] sm:$0xf0] }
 0x52d   : > { %6087 = vmatmul.bf16.vlgmr.msrb.gmra.mxu1 %v14530_v42  ;;  %6113 = vmatmul.bf16.vlgmr.msrb.gmra.mxu3 %v14530_v42  ;;  %v9727_v14 = vld [vmem:[%s15136_s2 + $0x254] sm:$0xf]  ;;  %v8601_v11 = vld [vmem:[%s15136_s2 + $0x10] sm:$0xf]  ;;  %v8771_v0 = vld [vmem:[%s15136_s2 + $0x178] sm:$0xf0]  ;;  %v9026_v23 = vor.u32 %v9764_v19, %v9025_v60 }
 0x52e   : > { %6131 = vmatpush.bf16.msra.mxu1 %v9082_v18  ;;  %6157 = vmatpush.bf16.msra.mxu3 %v9086_v35  ;;  %v8633_v18 = vld [vmem:[%s15136_s2 + $0x50] sm:$0xf]  ;;  %v9663_v35 = vld [vmem:[%s15136_s2 + $0x54] sm:$0xf]  ;;  %v9760_v63 = vld [vmem:[%s15136_s2 + $0x35c] sm:$0xf] }
 0x52f   : > { %v8891_v13 = vld [vmem:[%s15136_s2 + $0x270] sm:$0xf0]  ;;  %v8634_v16 = vor.u32 %v9667_v33, %v8633_v18  ;;  %v8857_v31 = vld [vmem:[%s15136_s2 + $0x210] sm:$0xf]  ;;  %v9027_v55 = vld [vmem:[%s15136_s2 + $0x378] sm:$0xf0] }
 0x530   : > { %6119 = vmatpush.bf16.msra.mxu0 %v8794_v50  ;;  %6145 = vmatpush.bf16.msra.mxu2 %v8798_v17  ;;  %v9659_v50 = vld [vmem:[%s15136_s2 + $0x2c] sm:$0xf0]  ;;  %v8638_v17 = vor.u32 %v9663_v35, %v8635_v3  ;;  %v9655_v52 = vld [vmem:[%s15136_s2 + $0x14] sm:$0xf]  ;;  %v8993_v18 = vld [vmem:[%s15136_s2 + $0x318] sm:$0xf]  ;;  %v9030_v33 = vor.u32 %v9760_v63, %v9027_v55 }
 0x531   : > { %v9723_v29 = vld [vmem:[%s15136_s2 + $0x22c] sm:$0xf0]  ;;  %v8603_v30 = vld [vmem:[%s15136_s2 + $0x30] sm:$0xf0]  ;;  %v9752_v35 = vld [vmem:[%s15136_s2 + $0x31c] sm:$0xf] }
 0x532   : > { %6132 = vmatpush.bf16.msra.mxu1 %v9050_v48  ;;  %6158 = vmatpush.bf16.msra.mxu3 %v9054_v53  ;;  %v8890_v48 = vor.u32 %v9731_v37, %v8889_v34  ;;  %v8894_v53 = vor.u32 %v9727_v14, %v8891_v13  ;;  %v9719_v57 = vld [vmem:[%s15136_s2 + $0x214] sm:$0xf]  ;;  %v8858_v10 = vor.u32 %v9723_v29, %v8857_v31  ;;  %v9756_v34 = vld [vmem:[%s15136_s2 + $0x334] sm:$0xf0]  ;;  %v8739_v37 = vld [vmem:[%s15136_s2 + $0x138] sm:$0xf0] }
 0x533   : > { %v8859_v2 = vld [vmem:[%s15136_s2 + $0x230] sm:$0xf0]  ;;  %v8995_v3 = vld [vmem:[%s15136_s2 + $0x338] sm:$0xf0]  ;;  %v8994_v13 = vor.u32 %v9756_v34, %v8993_v18  ;;  %v9748_v31 = vld [vmem:[%s15136_s2 + $0x2f4] sm:$0xf0] }
 0x534   : > { %6120 = vmatpush.bf16.msra.mxu0 %v8762_v1  ;;  %6146 = vmatpush.bf16.msra.mxu2 %v8766_v6  ;;  %v9089_v1 = vld [vmem:[%s15136_s2 + $0x3d8] sm:$0xf]  ;;  %v8862_v25 = vor.u32 %v9719_v57, %v8859_v2  ;;  %v9680_v29 = vld [vmem:[%s15136_s2 + $0xdc] sm:$0xf] }
 0x535   : > { %v9780_v6 = vld [vmem:[%s15136_s2 + $0x3f4] sm:$0xf0]  ;;  %v8931_v44 = vld [vmem:[%s15136_s2 + $0x2b8] sm:$0xf0] }
 0x536   : > { %6133 = vmatpush.bf16.msra.mxu1 %v9018_v22  ;;  %6159 = vmatpush.bf16.msra.mxu3 %v9022_v9  ;;  %v8602_v22 = vor.u32 %v9659_v50, %v8601_v11  ;;  %v8606_v9 = vor.u32 %v9655_v52, %v8603_v30  ;;  %v9090_v39 = vor.u32 %v9780_v6, %v9089_v1  ;;  %v8705_v11 = vld [vmem:[%s15136_s2 + $0xd8] sm:$0xf]  ;;  %v8707_v52 = vld [vmem:[%s15136_s2 + $0xf8] sm:$0xf0] }
 0x537   : > { %v9684_v50 = vld [vmem:[%s15136_s2 + $0xf4] sm:$0xf0]  ;;  %v8963_v30 = vld [vmem:[%s15136_s2 + $0x2f8] sm:$0xf0]  ;;  %v8710_v21 = vor.u32 %v9680_v29, %v8707_v52 }
 0x538   : > { %6121 = vmatpush.bf16.msra.mxu0 %v8730_v59  ;;  %6147 = vmatpush.bf16.msra.mxu2 %v8734_v40  ;;  %v8838_v59 = vor.u32 %v9712_v12, %v8835_v4  ;;  %v9708_v40 = vld [vmem:[%s15136_s2 + $0x1b4] sm:$0xf0]  ;;  %v8706_v57 = vor.u32 %v9684_v50, %v8705_v11  ;;  %v9672_v4 = vld [vmem:[%s15136_s2 + $0x9c] sm:$0xf] }
 0x539   : > { %v8673_v8 = vld [vmem:[%s15136_s2 + $0x98] sm:$0xf]  ;;  %v8643_v24 = vld [vmem:[%s15136_s2 + $0x78] sm:$0xf0] }
 0x53a   : > { %6134 = vmatpush.bf16.msra.mxu1 %v8986_v62  ;;  %6160 = vmatpush.bf16.msra.mxu3 %v8990_v28  ;;  %v8801_v62 = vld [vmem:[%s15136_s2 + $0x198] sm:$0xf]  ;;  %v9704_v28 = vld [vmem:[%s15136_s2 + $0x19c] sm:$0xf] }
 0x53b   : > { %v8802_v61 = vor.u32 %v9708_v40, %v8801_v62  ;;  %v9676_v1 = vld [vmem:[%s15136_s2 + $0xb4] sm:$0xf0]  ;;  %v8611_v19 = vld [vmem:[%s15136_s2 + $0x38] sm:$0xf0] }
 0x53c   : > { %6122 = vmatpush.bf16.msra.mxu0 %v8698_v15  ;;  %6148 = vmatpush.bf16.msra.mxu2 %v8702_v45  ;;  %v8806_v15 = vor.u32 %v9704_v28, %v8803_v58  ;;  %v9700_v45 = vld [vmem:[%s15136_s2 + $0x174] sm:$0xf0]  ;;  %v8674_v43 = vor.u32 %v9676_v1, %v8673_v8  ;;  %v9728_v28 = vld [vmem:[%s15136_s2 + $0x25c] sm:$0xf] }
 0x53d   : > { %v9740_v12 = vld [vmem:[%s15136_s2 + $0x2b4] sm:$0xf0]  ;;  %v8899_v58 = vld [vmem:[%s15136_s2 + $0x278] sm:$0xf0] }
 0x53e   : > { %6135 = vmatpush.bf16.msra.mxu1 %v8954_v20  ;;  %6161 = vmatpush.bf16.msra.mxu3 %v8958_v36  ;;  %v8769_v20 = vld [vmem:[%s15136_s2 + $0x158] sm:$0xf]  ;;  %v9696_v36 = vld [vmem:[%s15136_s2 + $0x15c] sm:$0xf] }
 0x53f   : > { %v8770_v46 = vor.u32 %v9700_v45, %v8769_v20  ;;  %v8897_v62 = vld [vmem:[%s15136_s2 + $0x258] sm:$0xf]  ;;  %v8902_v45 = vor.u32 %v9728_v28, %v8899_v58 }
 0x540   : > { %6123 = vmatpush.bf16.msra.mxu0 %v8666_v7  ;;  %6149 = vmatpush.bf16.msra.mxu2 %v8670_v51  ;;  %v8774_v7 = vor.u32 %v9696_v36, %v8771_v0  ;;  %v9692_v51 = vld [vmem:[%s15136_s2 + $0x134] sm:$0xf0]  ;;  %v9720_v36 = vld [vmem:[%s15136_s2 + $0x21c] sm:$0xf] }
 0x541   : > { %v9732_v32 = vld [vmem:[%s15136_s2 + $0x274] sm:$0xf0]  ;;  %v8867_v0 = vld [vmem:[%s15136_s2 + $0x238] sm:$0xf0] }
 0x542   : > { %6136 = vmatpush.bf16.msra.mxu1 %v8922_v47  ;;  %6162 = vmatpush.bf16.msra.mxu3 %v8926_v49  ;;  %v8737_v47 = vld [vmem:[%s15136_s2 + $0x118] sm:$0xf]  ;;  %v9688_v49 = vld [vmem:[%s15136_s2 + $0x11c] sm:$0xf]  ;;  %v8898_v41 = vor.u32 %v9732_v32, %v8897_v62 }
 0x543   : > { %v8738_v14 = vor.u32 %v9692_v51, %v8737_v47  ;;  %v8865_v20 = vld [vmem:[%s15136_s2 + $0x218] sm:$0xf]  ;;  %v6227_v51 = vld [vmem:[%s15080_s18] sm:$0xff] }
 0x544   : > { %6124 = vmatpush.bf16.msra.mxu0 %v8634_v16  ;;  %6150 = vmatpush.bf16.msra.mxu2 %v8638_v17  ;;  %v8742_v16 = vor.u32 %v9688_v49, %v8739_v37  ;;  %v8998_v17 = vor.u32 %v9752_v35, %v8995_v3  ;;  %v9724_v60 = vld [vmem:[%s15136_s2 + $0x234] sm:$0xf0] }
 0x545   : > { %v8866_v55 = vor.u32 %v9724_v60, %v8865_v20  ;;  %v6248_v60 = vld [vmem:[#allocation4 + $0x8] sm:$0xff] }
 0x546   : > { %6137 = vmatpush.bf16.msra.mxu1 %v8890_v48  ;;  %6163 = vmatpush.bf16.msra.mxu3 %v8894_v53  ;;  %v8961_v48 = vld [vmem:[%s15136_s2 + $0x2d8] sm:$0xf]  ;;  %v9744_v53 = vld [vmem:[%s15136_s2 + $0x2dc] sm:$0xf] }
 0x547   : > { %v8962_v2 = vor.u32 %v9748_v31, %v8961_v48  ;;  %v8966_v6 = vor.u32 %v9744_v53, %v8963_v30 }
 0x548   : > { %6125 = vmatpush.bf16.msra.mxu0 %v8602_v22  ;;  %6151 = vmatpush.bf16.msra.mxu2 %v8606_v9  ;;  %v8929_v22 = vld [vmem:[%s15136_s2 + $0x298] sm:$0xf]  ;;  %v9736_v9 = vld [vmem:[%s15136_s2 + $0x29c] sm:$0xf] }
 0x549   : > { %v8934_v40 = vor.u32 %v9736_v9, %v8931_v44 }
 0x54a   : > { %6138 = vmatpush.bf16.msra.mxu1 %v8858_v10  ;;  %6164 = vmatpush.bf16.msra.mxu3 %v8862_v25  ;;  %v8675_v10 = vld [vmem:[%s15136_s2 + $0xb8] sm:$0xf0]  ;;  %v8930_v25 = vor.u32 %v9740_v12, %v8929_v22 }
 0x54b   : > { %6126 = vmatmul.bf16.vlgmr.msra.gmra.mxu0 %v14522_v26  ;;  %6152 = vmatmul.bf16.vlgmr.msra.gmra.mxu2 %v14522_v26 }
 0x54c   : > { %6170 = vmatpush.bf16.msrb.mxu0 %v8834_v56  ;;  %6196 = vmatpush.bf16.msrb.mxu2 %v8838_v59  ;;  %v8678_v56 = vor.u32 %v9672_v4, %v8675_v10  ;;  %v9668_v59 = vld [vmem:[%s15136_s2 + $0x74] sm:$0xf0] }
 0x54d   : > { %6139 = vmatmul.bf16.vlgmr.msra.gmra.mxu1 %v14530_v42  ;;  %6165 = vmatmul.bf16.vlgmr.msra.gmra.mxu3 %v14530_v42 }
 0x54e   : > { %6183 = vmatpush.bf16.msrb.mxu1 %v9090_v39  ;;  %6209 = vmatpush.bf16.msrb.mxu3 %v9094_v27  ;;  %v8641_v39 = vld [vmem:[%s15136_s2 + $0x58] sm:$0xf]  ;;  %v9664_v27 = vld [vmem:[%s15136_s2 + $0x5c] sm:$0xf] }
 0x54f   : > { %v8642_v38 = vor.u32 %v9668_v59, %v8641_v39 }
 0x550   : > { %6171 = vmatpush.bf16.msrb.mxu0 %v8802_v61  ;;  %6197 = vmatpush.bf16.msrb.mxu2 %v8806_v15  ;;  %v8646_v61 = vor.u32 %v9664_v27, %v8643_v24  ;;  %v9660_v15 = vld [vmem:[%s15136_s2 + $0x34] sm:$0xf0] }
 0x552   : > { %6184 = vmatpush.bf16.msrb.mxu1 %v9058_v54  ;;  %6210 = vmatpush.bf16.msrb.mxu3 %v9062_v5  ;;  %v8609_v54 = vld [vmem:[%s15136_s2 + $0x18] sm:$0xf]  ;;  %v9656_v5 = vld [vmem:[%s15136_s2 + $0x1c] sm:$0xf] }
 0x553   : > { %v8610_v63 = vor.u32 %v9660_v15, %v8609_v54 }
 0x554   : > { %6172 = vmatpush.bf16.msrb.mxu0 %v8770_v46  ;;  %6198 = vmatpush.bf16.msrb.mxu2 %v8774_v7  ;;  %v8614_v46 = vor.u32 %v9656_v5, %v8611_v19 }
 0x556   : > { %6185 = vmatpush.bf16.msrb.mxu1 %v9026_v23  ;;  %6211 = vmatpush.bf16.msrb.mxu3 %v9030_v33  ;;  %v8870_v23 = vor.u32 %v9720_v36, %v8867_v0 }
 0x558   : > { %6173 = vmatpush.bf16.msrb.mxu0 %v8738_v14  ;;  %6199 = vmatpush.bf16.msrb.mxu2 %v8742_v16 }
 0x55a   : > { %6186 = vmatpush.bf16.msrb.mxu1 %v8994_v13  ;;  %6212 = vmatpush.bf16.msrb.mxu3 %v8998_v17 }
 0x55c   : > { %6174 = vmatpush.bf16.msrb.mxu0 %v8706_v57  ;;  %6200 = vmatpush.bf16.msrb.mxu2 %v8710_v21  ;;  %v6229_v21 = vld [vmem:[%s15080_s18 + $0x10] sm:$0xff] }
 0x55e   : > { %6187 = vmatpush.bf16.msrb.mxu1 %v8962_v2  ;;  %6213 = vmatpush.bf16.msrb.mxu3 %v8966_v6 }
 0x560   : > { %6175 = vmatpush.bf16.msrb.mxu0 %v8674_v43  ;;  %6201 = vmatpush.bf16.msrb.mxu2 %v8678_v56 }
 0x562   : > { %6188 = vmatpush.bf16.msrb.mxu1 %v8930_v25  ;;  %6214 = vmatpush.bf16.msrb.mxu3 %v8934_v40  ;;  %v6230_v25 = vld [vmem:[%s15080_s18 + $0x18] sm:$0xff] }
 0x564   : > { %6176 = vmatpush.bf16.msrb.mxu0 %v8642_v38  ;;  %6202 = vmatpush.bf16.msrb.mxu2 %v8646_v61 }
 0x566   : > { %6189 = vmatpush.bf16.msrb.mxu1 %v8898_v41  ;;  %6215 = vmatpush.bf16.msrb.mxu3 %v8902_v45 }
 0x568   : > { %6177 = vmatpush.bf16.msrb.mxu0 %v8610_v63  ;;  %6203 = vmatpush.bf16.msrb.mxu2 %v8614_v46 }
 0x56a   : > { %6190 = vmatpush.bf16.msrb.mxu1 %v8866_v55  ;;  %6216 = vmatpush.bf16.msrb.mxu3 %v8870_v23 }
 0x56b   : > { %6178 = vmatmul.bf16.vlgmr.msrb.gmra.mxu0 %v14522_v26  ;;  %6204 = vmatmul.bf16.vlgmr.msrb.gmra.mxu2 %v14522_v26  ;;  %v6228_v26 = vld [vmem:[%s15080_s18 + $0x8] sm:$0xff] }
 0x56d   : > { %6191 = vmatmul.bf16.vlgmr.msrb.gmra.mxu1 %v14530_v42  ;;  %6217 = vmatmul.bf16.vlgmr.msrb.gmra.mxu3 %v14530_v42 }
 0x588   : > { %v6023_v7 = vpop.f32.mrf.mxu0 }
 0x58a   : > { %v6036_v47 = vpop.f32.mrf.mxu1 }
 0x58b   : > { %v6037_v18 = vadd.f32 %v6036_v47, %v6023_v7 }
 0x58d   : > { %v6231_v33 = vadd.f32 %v6227_v51, %v6037_v18 }
 0x58e   : > { %v6049_v34 = vpop.f32.mrf.mxu2 }
 0x58f   : > { %v9099_v49 = vmul.f32 -1.442695, %v6231_v33 }
 0x590   : > { %v6062_v37 = vpop.f32.mrf.mxu3  ;;  %v6025_v42 = vpop.f32.mrf.mxu0 }
 0x591   : > { %v6063_v35 = vadd.f32 %v6062_v37, %v6049_v34  ;;  %9796 = vpow2.f32 %v9099_v49  ;;  %v6240_v42 = vld [vmem:[%s15106_s24 + $0x20] sm:$0xff] }
 0x592   : > { %v6038_v14 = vpop.f32.mrf.mxu1 }
 0x593   : > { %v6232_v3 = vadd.f32 %v6228_v26, %v6063_v35 }
 0x595   : > { %v9100_v13 = vmul.f32 -1.442695, %v6232_v3 }
 0x596   : > { %v6051_v16 = vpop.f32.mrf.mxu2 }
 0x597   : > { %9798 = vpow2.f32 %v9100_v13  ;;  %v9797_v11 = vpop.eup %9796 }
 0x598   : > { %v6064_v50 = vpop.f32.mrf.mxu3  ;;  %v6258_v48 = vadd.f32 1.0, %v9797_v11 }
 0x59a   : > { %9800 = vrcp.f32 %v6258_v48  ;;  %vm6266_vm2 = vweird.f32 %v6258_v48  ;;  %v6272_v32 = vand.u32 2147483648, %v6258_v48  ;;  %v6270_v28 = vand.u32 2147483647, %v6258_v48 }
 0x59c   : > { %v6273_v54 = vor.u32 1.1754944e-38, %v6272_v32  ;;  %vm6271_vm7 = vcmp.eq.f32.partialorder %v6270_v28, 8.507059e+37 }
 0x59d   : > { %v9799_v17 = vpop.eup %9798 }
 0x59e   : > { %v6259_v31 = vadd.f32 1.0, %v9799_v17 }
 0x5a0   : > { %9802 = vrcp.f32 %v6259_v31  ;;  %v9801_v29 = vpop.eup %9800  ;;  %vm6281_vm0 = vweird.f32 %v6259_v31  ;;  %v6287_v9 = vand.u32 2147483648, %v6259_v31  ;;  %v6285_v39 = vand.u32 2147483647, %v6259_v31 }
 0x5a1   : > { %v6262_v52 = vmul.f32 %v9801_v29, %v6258_v48  ;;  %vm6267_vm3 = vweird.f32 %v9801_v29 }
 0x5a2   : > { %v6288_v58 = vor.u32 1.1754944e-38, %v6287_v9  ;;  %vm15091_vm5 = vmor %vm6266_vm2, %vm6267_vm3  ;;  %vm6286_vm6 = vcmp.eq.f32.partialorder %v6285_v39, 8.507059e+37 }
 0x5a3   : > { %v6263_v8 = vsub.f32 1.0, %v6262_v52 }
 0x5a5   : > { %v6264_v10 = vmul.f32 %v9801_v29, %v6263_v8 }
 0x5a6   : > { %v9803_v53 = vpop.eup %9802 }
 0x5a7   : > { %v6277_v30 = vmul.f32 %v9803_v53, %v6259_v31  ;;  %vm6282_vm1 = vweird.f32 %v9803_v53  ;;  %v6265_v24 = vadd.f32 %v9801_v29, %v6264_v10 }
 0x5a8   : > { %v6075_v57 = vpop.f32.mrf.mxu0  ;;  %vm15086_vm4 = vmor %vm6281_vm0, %vm6282_vm1 }
 0x5a9   : > { %v6278_v1 = vsub.f32 1.0, %v6277_v30  ;;  %v6269_v20 = vsel %vm15091_vm5, %v9801_v29, %v6265_v24  ;;  %v6241_v29 = vld [vmem:[%s15106_s24 + $0x28] sm:$0xff] }
 0x5aa   : > { %v6088_v2 = vpop.f32.mrf.mxu1  ;;  %v6274_v0 = vsel %vm6271_vm7, %v6273_v54, %v6269_v20 }
 0x5ab   : > { %v6089_v22 = vadd.f32 %v6088_v2, %v6075_v57  ;;  %v6279_v6 = vmul.f32 %v9803_v53, %v6278_v1 }
 0x5ad   : > { %v6233_v12 = vadd.f32 %v6229_v21, %v6089_v22  ;;  %v6280_v56 = vadd.f32 %v9803_v53, %v6279_v6 }
 0x5ae   : > { %v6101_v44 = vpop.f32.mrf.mxu2 }
 0x5af   : > { %v9101_v4 = vmul.f32 -1.442695, %v6233_v12  ;;  %v6284_v61 = vsel %vm15086_vm4, %v9803_v53, %v6280_v56 }
 0x5b0   : > { %v6114_v43 = vpop.f32.mrf.mxu3  ;;  %v6077_v59 = vpop.f32.mrf.mxu0  ;;  %v6289_v5 = vsel %vm6286_vm6, %v6288_v58, %v6284_v61  ;;  %v6243_v58 = vld [vmem:[%s15106_s24 + $0x38] sm:$0xff] }
 0x5b1   : > { %9804 = vpow2.f32 %v9101_v4  ;;  %v6115_v40 = vadd.f32 %v6114_v43, %v6101_v44  ;;  %v6307_v63 = vmul.f32 %v6289_v5, %v6248_v60 }
 0x5b2   : > { %v6090_v27 = vpop.f32.mrf.mxu1 }
 0x5b3   : > { %v6234_v38 = vadd.f32 %v6230_v25, %v6115_v40  ;;  %v6242_v25 = vld [vmem:[%s15106_s24 + $0x30] sm:$0xff] }
 0x5b5   : > { %9806 = vtanh.f32 %v6234_v38 }
 0x5b6   : > { %v6103_v19 = vpop.f32.mrf.mxu2 }
 0x5b7   : > { %v9805_v15 = vpop.eup %9804 }
 0x5b8   : > { %v6260_v45 = vadd.f32 1.0, %v9805_v15  ;;  %v6116_v36 = vpop.f32.mrf.mxu3 }
 0x5ba   : > { %9808 = vrcp.f32 %v6260_v45  ;;  %v6302_v51 = vand.u32 2147483648, %v6260_v45  ;;  %vm6296_vm8 = vweird.f32 %v6260_v45  ;;  %v6300_v33 = vand.u32 2147483647, %v6260_v45 }
 0x5bb   : > { %v9807_v55 = vpop.eup %9806 }
 0x5bc   : > { %v6308_v46 = vmul.f32 %v9807_v55, %v6274_v0  ;;  %v6303_v49 = vor.u32 1.1754944e-38, %v6302_v51  ;;  %vm6301_vm11 = vcmp.eq.f32.partialorder %v6300_v33, 8.507059e+37 }
 0x5be   : > { %v6309_v23 = vadd.f32 %v6308_v46, %v6307_v63 }
 0x5c0   : > { %v9809_v7 = vpop.eup %9808  ;;  %6376 = vst [vmem:[#allocation4 + $0x8] sm:$0xff] %v6309_v23  ;;  %9810 = vtanh.f32 %v6309_v23 }
 0x5c1   : > { %v6292_v47 = vmul.f32 %v9809_v7, %v6260_v45  ;;  %vm6297_vm9 = vweird.f32 %v9809_v7 }
 0x5c2   : > { %vm6298_vm10 = vmor %vm6296_vm8, %vm6297_vm9 }
 0x5c3   : > { %v6293_v18 = vsub.f32 1.0, %v6292_v47 }
 0x5c5   : > { %v6294_v34 = vmul.f32 %v9809_v7, %v6293_v18 }
 0x5c6   : > { %v9811_v13 = vpop.eup %9810 }
 0x5c7   : > { %v6295_v37 = vadd.f32 %v9809_v7, %v6294_v34  ;;  %v6312_v34 = vld [vmem:[#allocation4] sm:$0xff] }
 0x5c8   : > { %v6127_v26 = vpop.f32.mrf.mxu0 }
 0x5c9   : > { %v6299_v3 = vsel %vm6298_vm10, %v9809_v7, %v6295_v37 }
 0x5ca   : > { %v6140_v35 = vpop.f32.mrf.mxu1  ;;  %v6304_v16 = vsel %vm6301_vm11, %v6303_v49, %v6299_v3 }
 0x5cb   : > { %v6141_v14 = vadd.f32 %v6140_v35, %v6127_v26  ;;  %v6311_v11 = vmul.f32 %v9811_v13, %v6304_v16 }
 0x5cd   : > { %v6244_v50 = vadd.f32 %v6240_v42, %v6141_v14  ;;  %6378 = vst [vmem:[#allocation3] sm:$0xff] %v6311_v11 }
 0x5ce   : > { %6383 = vst [vmem:[%s6382_s3] sm:$0xff] %v6311_v11  ;;  %v6153_v17 = vpop.f32.mrf.mxu2 }
 0x5cf   : > { %v9102_v48 = vmul.f32 -1.442695, %v6244_v50 }
 0x5d0   : > { %v6166_v31 = vpop.f32.mrf.mxu3  ;;  %v6129_v52 = vpop.f32.mrf.mxu0 }
 0x5d1   : > { %9812 = vpow2.f32 %v9102_v48  ;;  %v6167_v53 = vadd.f32 %v6166_v31, %v6153_v17 }
 0x5d2   : > { %v6142_v30 = vpop.f32.mrf.mxu1 }
 0x5d3   : > { %v6245_v57 = vadd.f32 %v6241_v29, %v6167_v53 }
 0x5d5   : > { %v9103_v2 = vmul.f32 -1.442695, %v6245_v57 }
 0x5d6   : > { %v6155_v8 = vpop.f32.mrf.mxu2 }
 0x5d7   : > { %v9813_v21 = vpop.eup %9812  ;;  %9814 = vpow2.f32 %v9103_v2 }
 0x5d8   : > { %v6322_v1 = vadd.f32 1.0, %v9813_v21  ;;  %v6168_v22 = vpop.f32.mrf.mxu3 }
 0x5da   : > { %9816 = vrcp.f32 %v6322_v1  ;;  %vm6330_vm14 = vweird.f32 %v6322_v1  ;;  %v6336_v19 = vand.u32 2147483648, %v6322_v1  ;;  %v6334_v0 = vand.u32 2147483647, %v6322_v1 }
 0x5dc   : > { %v6337_v47 = vor.u32 1.1754944e-38, %v6336_v19  ;;  %vm6335_vm3 = vcmp.eq.f32.partialorder %v6334_v0, 8.507059e+37 }
 0x5dd   : > { %v9815_v6 = vpop.eup %9814 }
 0x5de   : > { %v6323_v12 = vadd.f32 1.0, %v9815_v6 }
 0x5e0   : > { %9818 = vrcp.f32 %v6323_v12  ;;  %v9817_v4 = vpop.eup %9816  ;;  %vm6345_vm12 = vweird.f32 %v6323_v12  ;;  %v6351_v61 = vand.u32 2147483648, %v6323_v12  ;;  %v6349_v45 = vand.u32 2147483647, %v6323_v12 }
 0x5e1   : > { %v6326_v10 = vmul.f32 %v9817_v4, %v6322_v1  ;;  %vm6331_vm15 = vweird.f32 %v9817_v4 }
 0x5e2   : > { %v6352_v63 = vor.u32 1.1754944e-38, %v6351_v61  ;;  %vm15119_vm1 = vmor %vm6330_vm14, %vm6331_vm15  ;;  %vm6350_vm2 = vcmp.eq.f32.partialorder %v6349_v45, 8.507059e+37 }
 0x5e3   : > { %v6327_v59 = vsub.f32 1.0, %v6326_v10 }
 0x5e5   : > { %v6328_v38 = vmul.f32 %v9817_v4, %v6327_v59 }
 0x5e6   : > { %v9819_v44 = vpop.eup %9818 }
 0x5e7   : > { %v6341_v56 = vmul.f32 %v9819_v44, %v6323_v12  ;;  %vm6346_vm13 = vweird.f32 %v9819_v44  ;;  %v6329_v36 = vadd.f32 %v9817_v4, %v6328_v38 }
 0x5e8   : > { %v6179_v9 = vpop.f32.mrf.mxu0  ;;  %vm15115_vm0 = vmor %vm6345_vm12, %vm6346_vm13 }
 0x5e9   : > { %v6342_v62 = vsub.f32 1.0, %v6341_v56  ;;  %v6333_v18 = vsel %vm15119_vm1, %v9817_v4, %v6329_v36 }
 0x5ea   : > { %v6192_v43 = vpop.f32.mrf.mxu1  ;;  %v6338_v26 = vsel %vm6335_vm3, %v6337_v47, %v6333_v18 }
 0x5eb   : > { %v6193_v39 = vadd.f32 %v6192_v43, %v6179_v9  ;;  %v6343_v32 = vmul.f32 %v9819_v44, %v6342_v62 }
 0x5ed   : > { %v6246_v40 = vadd.f32 %v6242_v25, %v6193_v39  ;;  %v6344_v20 = vadd.f32 %v9819_v44, %v6343_v32 }
 0x5ee   : > { %v6205_v24 = vpop.f32.mrf.mxu2 }
 0x5ef   : > { %v9104_v27 = vmul.f32 -1.442695, %v6246_v40  ;;  %v6348_v23 = vsel %vm15115_vm0, %v9819_v44, %v6344_v20 }
 0x5f0   : > { %v6218_v28 = vpop.f32.mrf.mxu3  ;;  %v6181_v41 = vpop.f32.mrf.mxu0  ;;  %v6353_v49 = vsel %vm6350_vm2, %v6352_v63, %v6348_v23 }
 0x5f1   : > { %9820 = vpow2.f32 %v9104_v27  ;;  %v6219_v54 = vadd.f32 %v6218_v28, %v6205_v24  ;;  %v6371_v35 = vmul.f32 %v6353_v49, %v6312_v34 }
 0x5f2   : > { %v6194_v15 = vpop.f32.mrf.mxu1 }
 0x5f3   : > { %v6247_v5 = vadd.f32 %v6243_v58, %v6219_v54 }
 0x5f5   : > { %9822 = vtanh.f32 %v6247_v5 }
 0x5f6   : > { %v6207_v51 = vpop.f32.mrf.mxu2 }
 0x5f7   : > { %v9821_v46 = vpop.eup %9820 }
 0x5f8   : > { %v6324_v7 = vadd.f32 1.0, %v9821_v46  ;;  %v6220_v33 = vpop.f32.mrf.mxu3 }
 0x5fa   : > { %9824 = vrcp.f32 %v6324_v7  ;;  %v6366_v11 = vand.u32 2147483648, %v6324_v7  ;;  %v6364_v48 = vand.u32 2147483647, %v6324_v7  ;;  %vm6360_vm5 = vweird.f32 %v6324_v7 }
 0x5fb   : > { %v9823_v37 = vpop.eup %9822 }
 0x5fc   : > { %v6372_v42 = vmul.f32 %v9823_v37, %v6338_v26  ;;  %v6367_v31 = vor.u32 1.1754944e-38, %v6366_v11  ;;  %vm6365_vm7 = vcmp.eq.f32.partialorder %v6364_v48, 8.507059e+37 }
 0x5fe   : > { %v6373_v3 = vadd.f32 %v6372_v42, %v6371_v35 }
 0x600   : > { %v9825_v14 = vpop.eup %9824  ;;  %6377 = vst [vmem:[#allocation4] sm:$0xff] %v6373_v3  ;;  %9826 = vtanh.f32 %v6373_v3 }
 0x601   : > { %v6356_v13 = vmul.f32 %v9825_v14, %v6324_v7  ;;  %vm6361_vm4 = vweird.f32 %v9825_v14 }
 0x602   : > { %vm6362_vm6 = vmor %vm6360_vm5, %vm6361_vm4 }
 0x603   : > { %v6357_v16 = vsub.f32 1.0, %v6356_v13 }
 0x605   : > { %v6358_v50 = vmul.f32 %v9825_v14, %v6357_v16 }
 0x606   : > { %v9827_v52 = vpop.eup %9826 }
 0x607   : > { %v6359_v17 = vadd.f32 %v9825_v14, %v6358_v50 }
 0x609   : > { %v6363_v29 = vsel %vm6362_vm6, %v9825_v14, %v6359_v17 }
 0x60a   : > { %v6368_v53 = vsel %vm6365_vm7, %v6367_v31, %v6363_v29  ;;  %5237 = sbr.rel (!%p5235_p0) target bundleno = 1256 (0x4e8), region = 55 }
 0x60b   : > { %v6375_v30 = vmul.f32 %v9827_v52, %v6368_v53 }
 0x60d   : > { %6379 = vst [vmem:[#allocation3 + $0x8] sm:$0xff] %v6375_v30 }
 0x60e   : > { %6387 = vst [vmem:[%s6386_s29 + $0x8] sm:$0xff] %v6375_v30 }

</bundles_post_ra>
